<compile_context>
chip_gen: v7x
topology: tpu7x:2x2x1
jax: 0.10.0
libtpu: 0.0.40
codegen_flags: <defaults>
</compile_context>

<pallas_src>
import jax
import jax.numpy as jnp
from jax.experimental import pallas as pl
from jax.experimental.pallas import tpu as pltpu

MAX_OBJ = 30            # max_num_objects
IMG_DIM = 1536          # img / point feature width (concat -> 3072 = fc1 in)
FUSED_DIM = 2 * IMG_DIM
HID1, HID2 = 512, 128   # fc1 / fc2-fc3 widths
REG_HID = 64            # regression head hidden
OUT_PAD = 128           # regression output padded 7 -> 128 (lane-dense stores)
TK = 512                # K tile for the fc1 reduction grid (1536 / 512 = 3)


def _fused_kernel(img_ref, pts_ref, w1a_ref, w1b_ref, b1_ref,
                  w2_ref, b2_ref, w3_ref, b3_ref,
                  wop_ref, bop_ref, wr1_ref, br1_ref, wr2_ref, br2_ref,
                  out_ref, acc_ref):
    k = pl.program_id(0)

    @pl.when(k == 0)
    def _():
        acc_ref[...] = jnp.zeros_like(acc_ref)

    # fc1 partial product for this K tile (bf16 MXU inputs, f32 accumulation).
    acc_ref[...] += (
        jnp.dot(img_ref[...].astype(jnp.bfloat16), w1a_ref[...],
                preferred_element_type=jnp.float32)
        + jnp.dot(pts_ref[...].astype(jnp.bfloat16), w1b_ref[...],
                  preferred_element_type=jnp.float32))

    @pl.when(k == pl.num_programs(0) - 1)
    def _():
        # fc1 bias + ReLU   (fusion_dropout p=0.4: identity in eval mode)
        h = jnp.maximum(acc_ref[...] + b1_ref[...], 0.0)                  # [B, 512]
        # fc2 + ReLU
        h = jnp.maximum(
            jnp.dot(h.astype(jnp.bfloat16), w2_ref[...],
                    preferred_element_type=jnp.float32) + b2_ref[...], 0.0)
        # fc3 + ReLU
        h = jnp.maximum(
            jnp.dot(h.astype(jnp.bfloat16), w3_ref[...],
                    preferred_element_type=jnp.float32) + b3_ref[...], 0.0)
        # object_proposal: one big MXU matmul -> [B, 128*MAX_OBJ]
        obj = (jnp.dot(h.astype(jnp.bfloat16), wop_ref[...],
                       preferred_element_type=jnp.float32) + bop_ref[...])

        wr1 = wr1_ref[...]
        br1 = br1_ref[...]
        wr2 = wr2_ref[...]
        br2 = br2_ref[...]
        # Per-object regression head, static unroll with 128-aligned lane slices.
        for o in range(MAX_OBJ):
            obj_o = obj[:, o * HID2:(o + 1) * HID2]                        # [B, 128]
            r = jnp.maximum(
                jnp.dot(obj_o.astype(jnp.bfloat16), wr1,
                        preferred_element_type=jnp.float32) + br1, 0.0)    # [B, 64]
            r = (jnp.dot(r.astype(jnp.bfloat16), wr2,
                         preferred_element_type=jnp.float32) + br2)        # [B, 128] (cols 7.. are 0)
            out_ref[o, :, :] = r
        # TODO(synk): confidence_head (Linear 128->1 + Sigmoid) is computed but
        # never returned by the PyTorch forward; omitted as dead compute.


def sereact_forward(img_feats, point_feats, params):
    # img_feats / point_feats: [B, 1, 1536] -> squeeze(1); concat is avoided by
    # splitting w1 into two 1536-row halves consumed inside the kernel.
    img = jnp.squeeze(img_feats, axis=1)
    pts = jnp.squeeze(point_feats, axis=1)
    B = img.shape[0]
    nk = IMG_DIM // TK

    const = lambda shape: pl.BlockSpec(shape, lambda k: (0,) * len(shape))

    out = pl.pallas_call(
        _fused_kernel,
        out_shape=jax.ShapeDtypeStruct((MAX_OBJ, B, OUT_PAD), jnp.float32),
        grid_spec=pltpu.PrefetchScalarGridSpec(
            num_scalar_prefetch=0,
            grid=(nk,),
            in_specs=[
                pl.BlockSpec((B, TK), lambda k: (0, k)),       # img
                pl.BlockSpec((B, TK), lambda k: (0, k)),       # pts
                pl.BlockSpec((TK, HID1), lambda k: (k, 0)),    # w1a (bf16)
                pl.BlockSpec((TK, HID1), lambda k: (k, 0)),    # w1b (bf16)
                const((1, HID1)),                              # b1
                const((HID1, HID2)),                           # w2
                const((1, HID2)),                              # b2
                const((HID2, HID2)),                           # w3
                const((1, HID2)),                              # b3
                const((HID2, HID2 * MAX_OBJ)),                 # wop
                const((1, HID2 * MAX_OBJ)),                    # bop
                const((HID2, REG_HID)),                        # wr1
                const((1, REG_HID)),                           # br1
                const((REG_HID, OUT_PAD)),                     # wr2 (padded)
                const((1, OUT_PAD)),                           # br2 (padded)
            ],
            out_specs=pl.BlockSpec((MAX_OBJ, B, OUT_PAD), lambda k: (0, 0, 0)),
            scratch_shapes=[pltpu.VMEM((B, HID1), jnp.float32)],
        ),
        compiler_params=pltpu.CompilerParams(
            dimension_semantics=("arbitrary",)),
    )(img, pts,
      params["w1a"], params["w1b"], params["b1"],
      params["w2"], params["b2"],
      params["w3"], params["b3"],
      params["wop"], params["bop"],
      params["wr1"], params["br1"],
      params["wr2p"], params["br2p"])

    # (MAX_OBJ, B, 128) -> (B, MAX_OBJ, 7)
    return jnp.transpose(out[:, :, :7], (1, 0, 2))


def init_params(key):
    """Deterministic PyTorch-style (uniform +-1/sqrt(fan_in)) initialization.

    Weight matrices are stored in bfloat16 (halved HBM traffic); biases in f32.
    wr2/br2 are zero-padded from 7 to 128 output columns for lane-dense stores.
    """
    def lin(k, fan_in, fan_out):
        kw, kb = jax.random.split(k)
        bound = 1.0 / float(fan_in) ** 0.5
        w = jax.random.uniform(kw, (fan_in, fan_out), jnp.float32, -bound, bound)
        b = jax.random.uniform(kb, (1, fan_out), jnp.float32, -bound, bound)
        return w, b

    keys = jax.random.split(key, 6)
    p = {}
    w1, p["b1"] = lin(keys[0], FUSED_DIM, HID1)
    p["w1a"] = w1[:IMG_DIM].astype(jnp.bfloat16)
    p["w1b"] = w1[IMG_DIM:].astype(jnp.bfloat16)
    w2, p["b2"] = lin(keys[1], HID1, HID2)
    p["w2"] = w2.astype(jnp.bfloat16)
    w3, p["b3"] = lin(keys[2], HID2, HID2)
    p["w3"] = w3.astype(jnp.bfloat16)
    wop, p["bop"] = lin(keys[3], HID2, HID2 * MAX_OBJ)
    p["wop"] = wop.astype(jnp.bfloat16)
    wr1, p["br1"] = lin(keys[4], HID2, REG_HID)
    p["wr1"] = wr1.astype(jnp.bfloat16)
    wr2, br2 = lin(keys[5], REG_HID, 7)
    wr2p = jnp.zeros((REG_HID, OUT_PAD), jnp.float32).at[:, :7].set(wr2)
    br2p = jnp.zeros((1, OUT_PAD), jnp.float32).at[:, :7].set(br2)
    p["wr2p"] = wr2p.astype(jnp.bfloat16)
    p["br2p"] = br2p
    return p


if __name__ == "__main__":
    key = jax.random.PRNGKey(0)
    k_img, k_pts, k_par = jax.random.split(key, 3)

    B = 2
    # concat(img, point) along features must equal fc1's 3072 inputs
    img_feats = jax.random.normal(k_img, (B, 1, IMG_DIM), jnp.float32)
    point_feats = jax.random.normal(k_pts, (B, 1, IMG_DIM), jnp.float32)
    params = init_params(k_par)

    bboxes_3d = sereact_forward(img_feats, point_feats, params)
    jax.block_until_ready(bboxes_3d)
    assert bboxes_3d.shape == (B, MAX_OBJ, 7), bboxes_3d.shape
    print("KERNEL_OK")
</pallas_src>

<mosaic_0001>
module attributes {stable_mosaic.version = 11 : i64} {
  func.func @_fused_kernel(%arg0: i32, %arg1: memref<2x512xf32, #tpu.memory_space<vmem>>, %arg2: memref<2x512xf32, #tpu.memory_space<vmem>>, %arg3: memref<512x512xbf16, #tpu.memory_space<vmem>>, %arg4: memref<512x512xbf16, #tpu.memory_space<vmem>>, %arg5: memref<1x512xf32, #tpu.memory_space<vmem>>, %arg6: memref<512x128xbf16, #tpu.memory_space<vmem>>, %arg7: memref<1x128xf32, #tpu.memory_space<vmem>>, %arg8: memref<128x128xbf16, #tpu.memory_space<vmem>>, %arg9: memref<1x128xf32, #tpu.memory_space<vmem>>, %arg10: memref<128x3840xbf16, #tpu.memory_space<vmem>>, %arg11: memref<1x3840xf32, #tpu.memory_space<vmem>>, %arg12: memref<128x64xbf16, #tpu.memory_space<vmem>>, %arg13: memref<1x64xf32, #tpu.memory_space<vmem>>, %arg14: memref<64x128xbf16, #tpu.memory_space<vmem>>, %arg15: memref<1x128xf32, #tpu.memory_space<vmem>>, %arg16: memref<30x2x128xf32, #tpu.memory_space<vmem>>, %arg17: memref<2x512xf32, #tpu.memory_space<vmem>>) attributes {dimension_semantics = [#tpu.dimension_semantics<arbitrary>], iteration_bounds = array<i64: 3>, scalar_prefetch = 0 : i64, scratch_operands = 1 : i64, tpu.core_type = #tpu.core_type<tc>, window_params = [{transform_indices = @transform_0, window_bounds = array<i64: 2, 512>}, {transform_indices = @transform_1, window_bounds = array<i64: 2, 512>}, {transform_indices = @transform_2, window_bounds = array<i64: 512, 512>}, {transform_indices = @transform_3, window_bounds = array<i64: 512, 512>}, {pipeline_mode = #tpu.pipeline_mode<synchronous>, transform_indices = @transform_4, window_bounds = array<i64: 1, 512>}, {pipeline_mode = #tpu.pipeline_mode<synchronous>, transform_indices = @transform_5, window_bounds = array<i64: 512, 128>}, {pipeline_mode = #tpu.pipeline_mode<synchronous>, transform_indices = @transform_6, window_bounds = array<i64: 1, 128>}, {pipeline_mode = #tpu.pipeline_mode<synchronous>, transform_indices = @transform_7, window_bounds = array<i64: 128, 128>}, {pipeline_mode = #tpu.pipeline_mode<synchronous>, transform_indices = @transform_8, window_bounds = array<i64: 1, 128>}, {pipeline_mode = #tpu.pipeline_mode<synchronous>, transform_indices = @transform_9, window_bounds = array<i64: 128, 3840>}, {pipeline_mode = #tpu.pipeline_mode<synchronous>, transform_indices = @transform_10, window_bounds = array<i64: 1, 3840>}, {pipeline_mode = #tpu.pipeline_mode<synchronous>, transform_indices = @transform_11, window_bounds = array<i64: 128, 64>}, {pipeline_mode = #tpu.pipeline_mode<synchronous>, transform_indices = @transform_12, window_bounds = array<i64: 1, 64>}, {pipeline_mode = #tpu.pipeline_mode<synchronous>, transform_indices = @transform_13, window_bounds = array<i64: 64, 128>}, {pipeline_mode = #tpu.pipeline_mode<synchronous>, transform_indices = @transform_14, window_bounds = array<i64: 1, 128>}, {pipeline_mode = #tpu.pipeline_mode<synchronous>, transform_indices = @transform_15, window_bounds = array<i64: 30, 2, 128>}]} {
    %c0_i32 = arith.constant 0 : i32
    %0 = arith.cmpi eq, %arg0, %c0_i32 : i32
    %1 = arith.extui %0 : i1 to i32
    %c0_i32_0 = arith.constant 0 : i32
    %2 = arith.cmpi ne, %1, %c0_i32_0 : i32
    scf.if %2 {
      %cst_14 = arith.constant 0.000000e+00 : f32
      %18 = vector.broadcast %cst_14 : f32 to vector<2x512xf32>
      %c0_15 = arith.constant 0 : index
      %c0_16 = arith.constant 0 : index
      %19 = vector.load %arg17[%c0_15, %c0_16] : memref<2x512xf32, #tpu.memory_space<vmem>>, vector<2x512xf32>
      tpu.vector_store %arg17[%c0_15, %c0_16], %18 {strides = array<i32>} : memref<2x512xf32, #tpu.memory_space<vmem>>, vector<2x512xf32>,
    } else {
    }
    %c0 = arith.constant 0 : index
    %c0_1 = arith.constant 0 : index
    %3 = vector.load %arg17[%c0, %c0_1] : memref<2x512xf32, #tpu.memory_space<vmem>>, vector<2x512xf32>
    %c0_2 = arith.constant 0 : index
    %c0_3 = arith.constant 0 : index
    %4 = vector.load %arg1[%c0_2, %c0_3] : memref<2x512xf32, #tpu.memory_space<vmem>>, vector<2x512xf32>
    %5 = arith.truncf %4 : vector<2x512xf32> to vector<2x512xbf16>
    %c0_4 = arith.constant 0 : index
    %c0_5 = arith.constant 0 : index
    %6 = vector.load %arg3[%c0_4, %c0_5] : memref<512x512xbf16, #tpu.memory_space<vmem>>, vector<512x512xbf16>
    %cst = arith.constant dense<0.000000e+00> : vector<2x512xf32>
    %7 = tpu.matmul %5, %6, %cst {dimension_numbers = #tpu.dot_dimension_numbers<[1], [0], [0], [1], [0, 0, 1, 1], [], []>} : vector<2x512xbf16>, vector<512x512xbf16>, vector<2x512xf32> -> vector<2x512xf32>
    %c0_6 = arith.constant 0 : index
    %c0_7 = arith.constant 0 : index
    %8 = vector.load %arg2[%c0_6, %c0_7] : memref<2x512xf32, #tpu.memory_space<vmem>>, vector<2x512xf32>
    %9 = arith.truncf %8 : vector<2x512xf32> to vector<2x512xbf16>
    %c0_8 = arith.constant 0 : index
    %c0_9 = arith.constant 0 : index
    %10 = vector.load %arg4[%c0_8, %c0_9] : memref<512x512xbf16, #tpu.memory_space<vmem>>, vector<512x512xbf16>
    %cst_10 = arith.constant dense<0.000000e+00> : vector<2x512xf32>
    %11 = tpu.matmul %9, %10, %cst_10 {dimension_numbers = #tpu.dot_dimension_numbers<[1], [0], [0], [1], [0, 0, 1, 1], [], []>} : vector<2x512xbf16>, vector<512x512xbf16>, vector<2x512xf32> -> vector<2x512xf32>
    %12 = arith.addf %7, %11 : vector<2x512xf32>
    %13 = arith.addf %3, %12 : vector<2x512xf32>
    %c0_11 = arith.constant 0 : index
    %c0_12 = arith.constant 0 : index
    %14 = vector.load %arg17[%c0_11, %c0_12] : memref<2x512xf32, #tpu.memory_space<vmem>>, vector<2x512xf32>
    tpu.vector_store %arg17[%c0_11, %c0_12], %13 {strides = array<i32>} : memref<2x512xf32, #tpu.memory_space<vmem>>, vector<2x512xf32>,
    %c2_i32 = arith.constant 2 : i32
    %15 = arith.cmpi eq, %arg0, %c2_i32 : i32
    %16 = arith.extui %15 : i1 to i32
    %c0_i32_13 = arith.constant 0 : i32
    %17 = arith.cmpi ne, %16, %c0_i32_13 : i32
    scf.if %17 {
      %c0_14 = arith.constant 0 : index
      %c0_15 = arith.constant 0 : index
      %18 = vector.load %arg17[%c0_14, %c0_15] : memref<2x512xf32, #tpu.memory_space<vmem>>, vector<2x512xf32>
      %c0_16 = arith.constant 0 : index
      %c0_17 = arith.constant 0 : index
      %19 = vector.load %arg5[%c0_16, %c0_17] : memref<1x512xf32, #tpu.memory_space<vmem>>, vector<1x512xf32>
      %20 = vector.broadcast %19 : vector<1x512xf32> to vector<2x512xf32>
      %21 = arith.addf %18, %20 : vector<2x512xf32>
      %cst_18 = arith.constant 0.000000e+00 : f32
      %22 = vector.broadcast %cst_18 : f32 to vector<2x512xf32>
      %23 = arith.maximumf %21, %22 : vector<2x512xf32>
      %24 = arith.truncf %23 : vector<2x512xf32> to vector<2x512xbf16>
      %c0_19 = arith.constant 0 : index
      %c0_20 = arith.constant 0 : index
      %25 = vector.load %arg6[%c0_19, %c0_20] : memref<512x128xbf16, #tpu.memory_space<vmem>>, vector<512x128xbf16>
      %cst_21 = arith.constant dense<0.000000e+00> : vector<2x128xf32>
      %26 = tpu.matmul %24, %25, %cst_21 {dimension_numbers = #tpu.dot_dimension_numbers<[1], [0], [0], [1], [0, 0, 1, 1], [], []>} : vector<2x512xbf16>, vector<512x128xbf16>, vector<2x128xf32> -> vector<2x128xf32>
      %c0_22 = arith.constant 0 : index
      %c0_23 = arith.constant 0 : index
      %27 = vector.load %arg7[%c0_22, %c0_23] : memref<1x128xf32, #tpu.memory_space<vmem>>, vector<1x128xf32>
      %28 = vector.broadcast %27 : vector<1x128xf32> to vector<2x128xf32>
      %29 = arith.addf %26, %28 : vector<2x128xf32>
      %cst_24 = arith.constant 0.000000e+00 : f32
      %30 = vector.broadcast %cst_24 : f32 to vector<2x128xf32>
      %31 = arith.maximumf %29, %30 : vector<2x128xf32>
      %32 = arith.truncf %31 : vector<2x128xf32> to vector<2x128xbf16>
      %c0_25 = arith.constant 0 : index
      %c0_26 = arith.constant 0 : index
      %33 = vector.load %arg8[%c0_25, %c0_26] : memref<128x128xbf16, #tpu.memory_space<vmem>>, vector<128x128xbf16>
      %cst_27 = arith.constant dense<0.000000e+00> : vector<2x128xf32>
      %34 = tpu.matmul %32, %33, %cst_27 {dimension_numbers = #tpu.dot_dimension_numbers<[1], [0], [0], [1], [0, 0, 1, 1], [], []>} : vector<2x128xbf16>, vector<128x128xbf16>, vector<2x128xf32> -> vector<2x128xf32>
      %c0_28 = arith.constant 0 : index
      %c0_29 = arith.constant 0 : index
      %35 = vector.load %arg9[%c0_28, %c0_29] : memref<1x128xf32, #tpu.memory_space<vmem>>, vector<1x128xf32>
      %36 = vector.broadcast %35 : vector<1x128xf32> to vector<2x128xf32>
      %37 = arith.addf %34, %36 : vector<2x128xf32>
      %cst_30 = arith.constant 0.000000e+00 : f32
      %38 = vector.broadcast %cst_30 : f32 to vector<2x128xf32>
      %39 = arith.maximumf %37, %38 : vector<2x128xf32>
      %40 = arith.truncf %39 : vector<2x128xf32> to vector<2x128xbf16>
      %c0_31 = arith.constant 0 : index
      %c0_32 = arith.constant 0 : index
      %41 = vector.load %arg10[%c0_31, %c0_32] : memref<128x3840xbf16, #tpu.memory_space<vmem>>, vector<128x3840xbf16>
      %cst_33 = arith.constant dense<0.000000e+00> : vector<2x3840xf32>
      %42 = tpu.matmul %40, %41, %cst_33 {dimension_numbers = #tpu.dot_dimension_numbers<[1], [0], [0], [1], [0, 0, 1, 1], [], []>} : vector<2x128xbf16>, vector<128x3840xbf16>, vector<2x3840xf32> -> vector<2x3840xf32>
      %c0_34 = arith.constant 0 : index
      %c0_35 = arith.constant 0 : index
      %43 = vector.load %arg11[%c0_34, %c0_35] : memref<1x3840xf32, #tpu.memory_space<vmem>>, vector<1x3840xf32>
      %44 = vector.broadcast %43 : vector<1x3840xf32> to vector<2x3840xf32>
      %45 = arith.addf %42, %44 : vector<2x3840xf32>
      %c0_36 = arith.constant 0 : index
      %c0_37 = arith.constant 0 : index
      %46 = vector.load %arg12[%c0_36, %c0_37] : memref<128x64xbf16, #tpu.memory_space<vmem>>, vector<128x64xbf16>
      %c0_38 = arith.constant 0 : index
      %c0_39 = arith.constant 0 : index
      %47 = vector.load %arg13[%c0_38, %c0_39] : memref<1x64xf32, #tpu.memory_space<vmem>>, vector<1x64xf32>
      %c0_40 = arith.constant 0 : index
      %c0_41 = arith.constant 0 : index
      %48 = vector.load %arg14[%c0_40, %c0_41] : memref<64x128xbf16, #tpu.memory_space<vmem>>, vector<64x128xbf16>
      %c0_42 = arith.constant 0 : index
      %c0_43 = arith.constant 0 : index
      %49 = vector.load %arg15[%c0_42, %c0_43] : memref<1x128xf32, #tpu.memory_space<vmem>>, vector<1x128xf32>
      %50 = vector.extract_strided_slice %45 {offsets = [0, 0], sizes = [2, 128], strides = [1, 1]} : vector<2x3840xf32> to vector<2x128xf32>
      %51 = arith.truncf %50 : vector<2x128xf32> to vector<2x128xbf16>
      %cst_44 = arith.constant dense<0.000000e+00> : vector<2x64xf32>
      %52 = tpu.matmul %51, %46, %cst_44 {dimension_numbers = #tpu.dot_dimension_numbers<[1], [0], [0], [1], [0, 0, 1, 1], [], []>} : vector<2x128xbf16>, vector<128x64xbf16>, vector<2x64xf32> -> vector<2x64xf32>
      %53 = vector.broadcast %47 : vector<1x64xf32> to vector<2x64xf32>
      %54 = arith.addf %52, %53 : vector<2x64xf32>
      %cst_45 = arith.constant 0.000000e+00 : f32
      %55 = vector.broadcast %cst_45 : f32 to vector<2x64xf32>
      %56 = arith.maximumf %54, %55 : vector<2x64xf32>
      %57 = arith.truncf %56 : vector<2x64xf32> to vector<2x64xbf16>
      %cst_46 = arith.constant dense<0.000000e+00> : vector<2x128xf32>
      %58 = tpu.matmul %57, %48, %cst_46 {dimension_numbers = #tpu.dot_dimension_numbers<[1], [0], [0], [1], [0, 0, 1, 1], [], []>} : vector<2x64xbf16>, vector<64x128xbf16>, vector<2x128xf32> -> vector<2x128xf32>
      %59 = vector.broadcast %49 : vector<1x128xf32> to vector<2x128xf32>
      %60 = arith.addf %58, %59 : vector<2x128xf32>
      %c0_47 = arith.constant 0 : index
      %c0_48 = arith.constant 0 : index
      %c0_49 = arith.constant 0 : index
      %61 = vector.load %arg16[%c0_47, %c0_48, %c0_49] : memref<30x2x128xf32, #tpu.memory_space<vmem>>, vector<1x2x128xf32>
      %62 = vector.shape_cast %61 : vector<1x2x128xf32> to vector<2x128xf32>
      %63 = vector.shape_cast %60 : vector<2x128xf32> to vector<1x2x128xf32>
      tpu.vector_store %arg16[%c0_47, %c0_48, %c0_49], %63 {strides = array<i32>} : memref<30x2x128xf32, #tpu.memory_space<vmem>>, vector<1x2x128xf32>,
      %64 = vector.extract_strided_slice %45 {offsets = [0, 128], sizes = [2, 128], strides = [1, 1]} : vector<2x3840xf32> to vector<2x128xf32>
      %65 = arith.truncf %64 : vector<2x128xf32> to vector<2x128xbf16>
      %cst_50 = arith.constant dense<0.000000e+00> : vector<2x64xf32>
      %66 = tpu.matmul %65, %46, %cst_50 {dimension_numbers = #tpu.dot_dimension_numbers<[1], [0], [0], [1], [0, 0, 1, 1], [], []>} : vector<2x128xbf16>, vector<128x64xbf16>, vector<2x64xf32> -> vector<2x64xf32>
      %67 = vector.broadcast %47 : vector<1x64xf32> to vector<2x64xf32>
      %68 = arith.addf %66, %67 : vector<2x64xf32>
      %cst_51 = arith.constant 0.000000e+00 : f32
      %69 = vector.broadcast %cst_51 : f32 to vector<2x64xf32>
      %70 = arith.maximumf %68, %69 : vector<2x64xf32>
      %71 = arith.truncf %70 : vector<2x64xf32> to vector<2x64xbf16>
      %cst_52 = arith.constant dense<0.000000e+00> : vector<2x128xf32>
      %72 = tpu.matmul %71, %48, %cst_52 {dimension_numbers = #tpu.dot_dimension_numbers<[1], [0], [0], [1], [0, 0, 1, 1], [], []>} : vector<2x64xbf16>, vector<64x128xbf16>, vector<2x128xf32> -> vector<2x128xf32>
      %73 = vector.broadcast %49 : vector<1x128xf32> to vector<2x128xf32>
      %74 = arith.addf %72, %73 : vector<2x128xf32>
      %c1 = arith.constant 1 : index
      %c0_53 = arith.constant 0 : index
      %c0_54 = arith.constant 0 : index
      %75 = vector.load %arg16[%c1, %c0_53, %c0_54] : memref<30x2x128xf32, #tpu.memory_space<vmem>>, vector<1x2x128xf32>
      %76 = vector.shape_cast %75 : vector<1x2x128xf32> to vector<2x128xf32>
      %77 = vector.shape_cast %74 : vector<2x128xf32> to vector<1x2x128xf32>
      tpu.vector_store %arg16[%c1, %c0_53, %c0_54], %77 {strides = array<i32>} : memref<30x2x128xf32, #tpu.memory_space<vmem>>, vector<1x2x128xf32>,
      %78 = vector.extract_strided_slice %45 {offsets = [0, 256], sizes = [2, 128], strides = [1, 1]} : vector<2x3840xf32> to vector<2x128xf32>
      %79 = arith.truncf %78 : vector<2x128xf32> to vector<2x128xbf16>
      %cst_55 = arith.constant dense<0.000000e+00> : vector<2x64xf32>
      %80 = tpu.matmul %79, %46, %cst_55 {dimension_numbers = #tpu.dot_dimension_numbers<[1], [0], [0], [1], [0, 0, 1, 1], [], []>} : vector<2x128xbf16>, vector<128x64xbf16>, vector<2x64xf32> -> vector<2x64xf32>
      %81 = vector.broadcast %47 : vector<1x64xf32> to vector<2x64xf32>
      %82 = arith.addf %80, %81 : vector<2x64xf32>
      %cst_56 = arith.constant 0.000000e+00 : f32
      %83 = vector.broadcast %cst_56 : f32 to vector<2x64xf32>
      %84 = arith.maximumf %82, %83 : vector<2x64xf32>
      %85 = arith.truncf %84 : vector<2x64xf32> to vector<2x64xbf16>
      %cst_57 = arith.constant dense<0.000000e+00> : vector<2x128xf32>
      %86 = tpu.matmul %85, %48, %cst_57 {dimension_numbers = #tpu.dot_dimension_numbers<[1], [0], [0], [1], [0, 0, 1, 1], [], []>} : vector<2x64xbf16>, vector<64x128xbf16>, vector<2x128xf32> -> vector<2x128xf32>
      %87 = vector.broadcast %49 : vector<1x128xf32> to vector<2x128xf32>
      %88 = arith.addf %86, %87 : vector<2x128xf32>
      %c2 = arith.constant 2 : index
      %c0_58 = arith.constant 0 : index
      %c0_59 = arith.constant 0 : index
      %89 = vector.load %arg16[%c2, %c0_58, %c0_59] : memref<30x2x128xf32, #tpu.memory_space<vmem>>, vector<1x2x128xf32>
      %90 = vector.shape_cast %89 : vector<1x2x128xf32> to vector<2x128xf32>
      %91 = vector.shape_cast %88 : vector<2x128xf32> to vector<1x2x128xf32>
      tpu.vector_store %arg16[%c2, %c0_58, %c0_59], %91 {strides = array<i32>} : memref<30x2x128xf32, #tpu.memory_space<vmem>>, vector<1x2x128xf32>,
      %92 = vector.extract_strided_slice %45 {offsets = [0, 384], sizes = [2, 128], strides = [1, 1]} : vector<2x3840xf32> to vector<2x128xf32>
      %93 = arith.truncf %92 : vector<2x128xf32> to vector<2x128xbf16>
      %cst_60 = arith.constant dense<0.000000e+00> : vector<2x64xf32>
      %94 = tpu.matmul %93, %46, %cst_60 {dimension_numbers = #tpu.dot_dimension_numbers<[1], [0], [0], [1], [0, 0, 1, 1], [], []>} : vector<2x128xbf16>, vector<128x64xbf16>, vector<2x64xf32> -> vector<2x64xf32>
      %95 = vector.broadcast %47 : vector<1x64xf32> to vector<2x64xf32>
      %96 = arith.addf %94, %95 : vector<2x64xf32>
      %cst_61 = arith.constant 0.000000e+00 : f32
      %97 = vector.broadcast %cst_61 : f32 to vector<2x64xf32>
      %98 = arith.maximumf %96, %97 : vector<2x64xf32>
      %99 = arith.truncf %98 : vector<2x64xf32> to vector<2x64xbf16>
      %cst_62 = arith.constant dense<0.000000e+00> : vector<2x128xf32>
      %100 = tpu.matmul %99, %48, %cst_62 {dimension_numbers = #tpu.dot_dimension_numbers<[1], [0], [0], [1], [0, 0, 1, 1], [], []>} : vector<2x64xbf16>, vector<64x128xbf16>, vector<2x128xf32> -> vector<2x128xf32>
      %101 = vector.broadcast %49 : vector<1x128xf32> to vector<2x128xf32>
      %102 = arith.addf %100, %101 : vector<2x128xf32>
      %c3 = arith.constant 3 : index
      %c0_63 = arith.constant 0 : index
      %c0_64 = arith.constant 0 : index
      %103 = vector.load %arg16[%c3, %c0_63, %c0_64] : memref<30x2x128xf32, #tpu.memory_space<vmem>>, vector<1x2x128xf32>
      %104 = vector.shape_cast %103 : vector<1x2x128xf32> to vector<2x128xf32>
      %105 = vector.shape_cast %102 : vector<2x128xf32> to vector<1x2x128xf32>
      tpu.vector_store %arg16[%c3, %c0_63, %c0_64], %105 {strides = array<i32>} : memref<30x2x128xf32, #tpu.memory_space<vmem>>, vector<1x2x128xf32>,
      %106 = vector.extract_strided_slice %45 {offsets = [0, 512], sizes = [2, 128], strides = [1, 1]} : vector<2x3840xf32> to vector<2x128xf32>
      %107 = arith.truncf %106 : vector<2x128xf32> to vector<2x128xbf16>
      %cst_65 = arith.constant dense<0.000000e+00> : vector<2x64xf32>
      %108 = tpu.matmul %107, %46, %cst_65 {dimension_numbers = #tpu.dot_dimension_numbers<[1], [0], [0], [1], [0, 0, 1, 1], [], []>} : vector<2x128xbf16>, vector<128x64xbf16>, vector<2x64xf32> -> vector<2x64xf32>
      %109 = vector.broadcast %47 : vector<1x64xf32> to vector<2x64xf32>
      %110 = arith.addf %108, %109 : vector<2x64xf32>
      %cst_66 = arith.constant 0.000000e+00 : f32
      %111 = vector.broadcast %cst_66 : f32 to vector<2x64xf32>
      %112 = arith.maximumf %110, %111 : vector<2x64xf32>
      %113 = arith.truncf %112 : vector<2x64xf32> to vector<2x64xbf16>
      %cst_67 = arith.constant dense<0.000000e+00> : vector<2x128xf32>
      %114 = tpu.matmul %113, %48, %cst_67 {dimension_numbers = #tpu.dot_dimension_numbers<[1], [0], [0], [1], [0, 0, 1, 1], [], []>} : vector<2x64xbf16>, vector<64x128xbf16>, vector<2x128xf32> -> vector<2x128xf32>
      %115 = vector.broadcast %49 : vector<1x128xf32> to vector<2x128xf32>
      %116 = arith.addf %114, %115 : vector<2x128xf32>
      %c4 = arith.constant 4 : index
      %c0_68 = arith.constant 0 : index
      %c0_69 = arith.constant 0 : index
      %117 = vector.load %arg16[%c4, %c0_68, %c0_69] : memref<30x2x128xf32, #tpu.memory_space<vmem>>, vector<1x2x128xf32>
      %118 = vector.shape_cast %117 : vector<1x2x128xf32> to vector<2x128xf32>
      %119 = vector.shape_cast %116 : vector<2x128xf32> to vector<1x2x128xf32>
      tpu.vector_store %arg16[%c4, %c0_68, %c0_69], %119 {strides = array<i32>} : memref<30x2x128xf32, #tpu.memory_space<vmem>>, vector<1x2x128xf32>,
      %120 = vector.extract_strided_slice %45 {offsets = [0, 640], sizes = [2, 128], strides = [1, 1]} : vector<2x3840xf32> to vector<2x128xf32>
      %121 = arith.truncf %120 : vector<2x128xf32> to vector<2x128xbf16>
      %cst_70 = arith.constant dense<0.000000e+00> : vector<2x64xf32>
      %122 = tpu.matmul %121, %46, %cst_70 {dimension_numbers = #tpu.dot_dimension_numbers<[1], [0], [0], [1], [0, 0, 1, 1], [], []>} : vector<2x128xbf16>, vector<128x64xbf16>, vector<2x64xf32> -> vector<2x64xf32>
      %123 = vector.broadcast %47 : vector<1x64xf32> to vector<2x64xf32>
      %124 = arith.addf %122, %123 : vector<2x64xf32>
      %cst_71 = arith.constant 0.000000e+00 : f32
      %125 = vector.broadcast %cst_71 : f32 to vector<2x64xf32>
      %126 = arith.maximumf %124, %125 : vector<2x64xf32>
      %127 = arith.truncf %126 : vector<2x64xf32> to vector<2x64xbf16>
      %cst_72 = arith.constant dense<0.000000e+00> : vector<2x128xf32>
      %128 = tpu.matmul %127, %48, %cst_72 {dimension_numbers = #tpu.dot_dimension_numbers<[1], [0], [0], [1], [0, 0, 1, 1], [], []>} : vector<2x64xbf16>, vector<64x128xbf16>, vector<2x128xf32> -> vector<2x128xf32>
      %129 = vector.broadcast %49 : vector<1x128xf32> to vector<2x128xf32>
      %130 = arith.addf %128, %129 : vector<2x128xf32>
      %c5 = arith.constant 5 : index
      %c0_73 = arith.constant 0 : index
      %c0_74 = arith.constant 0 : index
      %131 = vector.load %arg16[%c5, %c0_73, %c0_74] : memref<30x2x128xf32, #tpu.memory_space<vmem>>, vector<1x2x128xf32>
      %132 = vector.shape_cast %131 : vector<1x2x128xf32> to vector<2x128xf32>
      %133 = vector.shape_cast %130 : vector<2x128xf32> to vector<1x2x128xf32>
      tpu.vector_store %arg16[%c5, %c0_73, %c0_74], %133 {strides = array<i32>} : memref<30x2x128xf32, #tpu.memory_space<vmem>>, vector<1x2x128xf32>,
      %134 = vector.extract_strided_slice %45 {offsets = [0, 768], sizes = [2, 128], strides = [1, 1]} : vector<2x3840xf32> to vector<2x128xf32>
      %135 = arith.truncf %134 : vector<2x128xf32> to vector<2x128xbf16>
      %cst_75 = arith.constant dense<0.000000e+00> : vector<2x64xf32>
      %136 = tpu.matmul %135, %46, %cst_75 {dimension_numbers = #tpu.dot_dimension_numbers<[1], [0], [0], [1], [0, 0, 1, 1], [], []>} : vector<2x128xbf16>, vector<128x64xbf16>, vector<2x64xf32> -> vector<2x64xf32>
      %137 = vector.broadcast %47 : vector<1x64xf32> to vector<2x64xf32>
      %138 = arith.addf %136, %137 : vector<2x64xf32>
      %cst_76 = arith.constant 0.000000e+00 : f32
      %139 = vector.broadcast %cst_76 : f32 to vector<2x64xf32>
      %140 = arith.maximumf %138, %139 : vector<2x64xf32>
      %141 = arith.truncf %140 : vector<2x64xf32> to vector<2x64xbf16>
      %cst_77 = arith.constant dense<0.000000e+00> : vector<2x128xf32>
      %142 = tpu.matmul %141, %48, %cst_77 {dimension_numbers = #tpu.dot_dimension_numbers<[1], [0], [0], [1], [0, 0, 1, 1], [], []>} : vector<2x64xbf16>, vector<64x128xbf16>, vector<2x128xf32> -> vector<2x128xf32>
      %143 = vector.broadcast %49 : vector<1x128xf32> to vector<2x128xf32>
      %144 = arith.addf %142, %143 : vector<2x128xf32>
      %c6 = arith.constant 6 : index
      %c0_78 = arith.constant 0 : index
      %c0_79 = arith.constant 0 : index
      %145 = vector.load %arg16[%c6, %c0_78, %c0_79] : memref<30x2x128xf32, #tpu.memory_space<vmem>>, vector<1x2x128xf32>
      %146 = vector.shape_cast %145 : vector<1x2x128xf32> to vector<2x128xf32>
      %147 = vector.shape_cast %144 : vector<2x128xf32> to vector<1x2x128xf32>
      tpu.vector_store %arg16[%c6, %c0_78, %c0_79], %147 {strides = array<i32>} : memref<30x2x128xf32, #tpu.memory_space<vmem>>, vector<1x2x128xf32>,
      %148 = vector.extract_strided_slice %45 {offsets = [0, 896], sizes = [2, 128], strides = [1, 1]} : vector<2x3840xf32> to vector<2x128xf32>
      %149 = arith.truncf %148 : vector<2x128xf32> to vector<2x128xbf16>
      %cst_80 = arith.constant dense<0.000000e+00> : vector<2x64xf32>
      %150 = tpu.matmul %149, %46, %cst_80 {dimension_numbers = #tpu.dot_dimension_numbers<[1], [0], [0], [1], [0, 0, 1, 1], [], []>} : vector<2x128xbf16>, vector<128x64xbf16>, vector<2x64xf32> -> vector<2x64xf32>
      %151 = vector.broadcast %47 : vector<1x64xf32> to vector<2x64xf32>
      %152 = arith.addf %150, %151 : vector<2x64xf32>
      %cst_81 = arith.constant 0.000000e+00 : f32
      %153 = vector.broadcast %cst_81 : f32 to vector<2x64xf32>
      %154 = arith.maximumf %152, %153 : vector<2x64xf32>
      %155 = arith.truncf %154 : vector<2x64xf32> to vector<2x64xbf16>
      %cst_82 = arith.constant dense<0.000000e+00> : vector<2x128xf32>
      %156 = tpu.matmul %155, %48, %cst_82 {dimension_numbers = #tpu.dot_dimension_numbers<[1], [0], [0], [1], [0, 0, 1, 1], [], []>} : vector<2x64xbf16>, vector<64x128xbf16>, vector<2x128xf32> -> vector<2x128xf32>
      %157 = vector.broadcast %49 : vector<1x128xf32> to vector<2x128xf32>
      %158 = arith.addf %156, %157 : vector<2x128xf32>
      %c7 = arith.constant 7 : index
      %c0_83 = arith.constant 0 : index
      %c0_84 = arith.constant 0 : index
      %159 = vector.load %arg16[%c7, %c0_83, %c0_84] : memref<30x2x128xf32, #tpu.memory_space<vmem>>, vector<1x2x128xf32>
      %160 = vector.shape_cast %159 : vector<1x2x128xf32> to vector<2x128xf32>
      %161 = vector.shape_cast %158 : vector<2x128xf32> to vector<1x2x128xf32>
      tpu.vector_store %arg16[%c7, %c0_83, %c0_84], %161 {strides = array<i32>} : memref<30x2x128xf32, #tpu.memory_space<vmem>>, vector<1x2x128xf32>,
      %162 = vector.extract_strided_slice %45 {offsets = [0, 1024], sizes = [2, 128], strides = [1, 1]} : vector<2x3840xf32> to vector<2x128xf32>
      %163 = arith.truncf %162 : vector<2x128xf32> to vector<2x128xbf16>
      %cst_85 = arith.constant dense<0.000000e+00> : vector<2x64xf32>
      %164 = tpu.matmul %163, %46, %cst_85 {dimension_numbers = #tpu.dot_dimension_numbers<[1], [0], [0], [1], [0, 0, 1, 1], [], []>} : vector<2x128xbf16>, vector<128x64xbf16>, vector<2x64xf32> -> vector<2x64xf32>
      %165 = vector.broadcast %47 : vector<1x64xf32> to vector<2x64xf32>
      %166 = arith.addf %164, %165 : vector<2x64xf32>
      %cst_86 = arith.constant 0.000000e+00 : f32
      %167 = vector.broadcast %cst_86 : f32 to vector<2x64xf32>
      %168 = arith.maximumf %166, %167 : vector<2x64xf32>
      %169 = arith.truncf %168 : vector<2x64xf32> to vector<2x64xbf16>
      %cst_87 = arith.constant dense<0.000000e+00> : vector<2x128xf32>
      %170 = tpu.matmul %169, %48, %cst_87 {dimension_numbers = #tpu.dot_dimension_numbers<[1], [0], [0], [1], [0, 0, 1, 1], [], []>} : vector<2x64xbf16>, vector<64x128xbf16>, vector<2x128xf32> -> vector<2x128xf32>
      %171 = vector.broadcast %49 : vector<1x128xf32> to vector<2x128xf32>
      %172 = arith.addf %170, %171 : vector<2x128xf32>
      %c8 = arith.constant 8 : index
      %c0_88 = arith.constant 0 : index
      %c0_89 = arith.constant 0 : index
      %173 = vector.load %arg16[%c8, %c0_88, %c0_89] : memref<30x2x128xf32, #tpu.memory_space<vmem>>, vector<1x2x128xf32>
      %174 = vector.shape_cast %173 : vector<1x2x128xf32> to vector<2x128xf32>
      %175 = vector.shape_cast %172 : vector<2x128xf32> to vector<1x2x128xf32>
      tpu.vector_store %arg16[%c8, %c0_88, %c0_89], %175 {strides = array<i32>} : memref<30x2x128xf32, #tpu.memory_space<vmem>>, vector<1x2x128xf32>,
      %176 = vector.extract_strided_slice %45 {offsets = [0, 1152], sizes = [2, 128], strides = [1, 1]} : vector<2x3840xf32> to vector<2x128xf32>
      %177 = arith.truncf %176 : vector<2x128xf32> to vector<2x128xbf16>
      %cst_90 = arith.constant dense<0.000000e+00> : vector<2x64xf32>
      %178 = tpu.matmul %177, %46, %cst_90 {dimension_numbers = #tpu.dot_dimension_numbers<[1], [0], [0], [1], [0, 0, 1, 1], [], []>} : vector<2x128xbf16>, vector<128x64xbf16>, vector<2x64xf32> -> vector<2x64xf32>
      %179 = vector.broadcast %47 : vector<1x64xf32> to vector<2x64xf32>
      %180 = arith.addf %178, %179 : vector<2x64xf32>
      %cst_91 = arith.constant 0.000000e+00 : f32
      %181 = vector.broadcast %cst_91 : f32 to vector<2x64xf32>
      %182 = arith.maximumf %180, %181 : vector<2x64xf32>
      %183 = arith.truncf %182 : vector<2x64xf32> to vector<2x64xbf16>
      %cst_92 = arith.constant dense<0.000000e+00> : vector<2x128xf32>
      %184 = tpu.matmul %183, %48, %cst_92 {dimension_numbers = #tpu.dot_dimension_numbers<[1], [0], [0], [1], [0, 0, 1, 1], [], []>} : vector<2x64xbf16>, vector<64x128xbf16>, vector<2x128xf32> -> vector<2x128xf32>
      %185 = vector.broadcast %49 : vector<1x128xf32> to vector<2x128xf32>
      %186 = arith.addf %184, %185 : vector<2x128xf32>
      %c9 = arith.constant 9 : index
      %c0_93 = arith.constant 0 : index
      %c0_94 = arith.constant 0 : index
      %187 = vector.load %arg16[%c9, %c0_93, %c0_94] : memref<30x2x128xf32, #tpu.memory_space<vmem>>, vector<1x2x128xf32>
      %188 = vector.shape_cast %187 : vector<1x2x128xf32> to vector<2x128xf32>
      %189 = vector.shape_cast %186 : vector<2x128xf32> to vector<1x2x128xf32>
      tpu.vector_store %arg16[%c9, %c0_93, %c0_94], %189 {strides = array<i32>} : memref<30x2x128xf32, #tpu.memory_space<vmem>>, vector<1x2x128xf32>,
      %190 = vector.extract_strided_slice %45 {offsets = [0, 1280], sizes = [2, 128], strides = [1, 1]} : vector<2x3840xf32> to vector<2x128xf32>
      %191 = arith.truncf %190 : vector<2x128xf32> to vector<2x128xbf16>
      %cst_95 = arith.constant dense<0.000000e+00> : vector<2x64xf32>
      %192 = tpu.matmul %191, %46, %cst_95 {dimension_numbers = #tpu.dot_dimension_numbers<[1], [0], [0], [1], [0, 0, 1, 1], [], []>} : vector<2x128xbf16>, vector<128x64xbf16>, vector<2x64xf32> -> vector<2x64xf32>
      %193 = vector.broadcast %47 : vector<1x64xf32> to vector<2x64xf32>
      %194 = arith.addf %192, %193 : vector<2x64xf32>
      %cst_96 = arith.constant 0.000000e+00 : f32
      %195 = vector.broadcast %cst_96 : f32 to vector<2x64xf32>
      %196 = arith.maximumf %194, %195 : vector<2x64xf32>
      %197 = arith.truncf %196 : vector<2x64xf32> to vector<2x64xbf16>
      %cst_97 = arith.constant dense<0.000000e+00> : vector<2x128xf32>
      %198 = tpu.matmul %197, %48, %cst_97 {dimension_numbers = #tpu.dot_dimension_numbers<[1], [0], [0], [1], [0, 0, 1, 1], [], []>} : vector<2x64xbf16>, vector<64x128xbf16>, vector<2x128xf32> -> vector<2x128xf32>
      %199 = vector.broadcast %49 : vector<1x128xf32> to vector<2x128xf32>
      %200 = arith.addf %198, %199 : vector<2x128xf32>
      %c10 = arith.constant 10 : index
      %c0_98 = arith.constant 0 : index
      %c0_99 = arith.constant 0 : index
      %201 = vector.load %arg16[%c10, %c0_98, %c0_99] : memref<30x2x128xf32, #tpu.memory_space<vmem>>, vector<1x2x128xf32>
      %202 = vector.shape_cast %201 : vector<1x2x128xf32> to vector<2x128xf32>
      %203 = vector.shape_cast %200 : vector<2x128xf32> to vector<1x2x128xf32>
      tpu.vector_store %arg16[%c10, %c0_98, %c0_99], %203 {strides = array<i32>} : memref<30x2x128xf32, #tpu.memory_space<vmem>>, vector<1x2x128xf32>,
      %204 = vector.extract_strided_slice %45 {offsets = [0, 1408], sizes = [2, 128], strides = [1, 1]} : vector<2x3840xf32> to vector<2x128xf32>
      %205 = arith.truncf %204 : vector<2x128xf32> to vector<2x128xbf16>
      %cst_100 = arith.constant dense<0.000000e+00> : vector<2x64xf32>
      %206 = tpu.matmul %205, %46, %cst_100 {dimension_numbers = #tpu.dot_dimension_numbers<[1], [0], [0], [1], [0, 0, 1, 1], [], []>} : vector<2x128xbf16>, vector<128x64xbf16>, vector<2x64xf32> -> vector<2x64xf32>
      %207 = vector.broadcast %47 : vector<1x64xf32> to vector<2x64xf32>
      %208 = arith.addf %206, %207 : vector<2x64xf32>
      %cst_101 = arith.constant 0.000000e+00 : f32
      %209 = vector.broadcast %cst_101 : f32 to vector<2x64xf32>
      %210 = arith.maximumf %208, %209 : vector<2x64xf32>
      %211 = arith.truncf %210 : vector<2x64xf32> to vector<2x64xbf16>
      %cst_102 = arith.constant dense<0.000000e+00> : vector<2x128xf32>
      %212 = tpu.matmul %211, %48, %cst_102 {dimension_numbers = #tpu.dot_dimension_numbers<[1], [0], [0], [1], [0, 0, 1, 1], [], []>} : vector<2x64xbf16>, vector<64x128xbf16>, vector<2x128xf32> -> vector<2x128xf32>
      %213 = vector.broadcast %49 : vector<1x128xf32> to vector<2x128xf32>
      %214 = arith.addf %212, %213 : vector<2x128xf32>
      %c11 = arith.constant 11 : index
      %c0_103 = arith.constant 0 : index
      %c0_104 = arith.constant 0 : index
      %215 = vector.load %arg16[%c11, %c0_103, %c0_104] : memref<30x2x128xf32, #tpu.memory_space<vmem>>, vector<1x2x128xf32>
      %216 = vector.shape_cast %215 : vector<1x2x128xf32> to vector<2x128xf32>
      %217 = vector.shape_cast %214 : vector<2x128xf32> to vector<1x2x128xf32>
      tpu.vector_store %arg16[%c11, %c0_103, %c0_104], %217 {strides = array<i32>} : memref<30x2x128xf32, #tpu.memory_space<vmem>>, vector<1x2x128xf32>,
      %218 = vector.extract_strided_slice %45 {offsets = [0, 1536], sizes = [2, 128], strides = [1, 1]} : vector<2x3840xf32> to vector<2x128xf32>
      %219 = arith.truncf %218 : vector<2x128xf32> to vector<2x128xbf16>
      %cst_105 = arith.constant dense<0.000000e+00> : vector<2x64xf32>
      %220 = tpu.matmul %219, %46, %cst_105 {dimension_numbers = #tpu.dot_dimension_numbers<[1], [0], [0], [1], [0, 0, 1, 1], [], []>} : vector<2x128xbf16>, vector<128x64xbf16>, vector<2x64xf32> -> vector<2x64xf32>
      %221 = vector.broadcast %47 : vector<1x64xf32> to vector<2x64xf32>
      %222 = arith.addf %220, %221 : vector<2x64xf32>
      %cst_106 = arith.constant 0.000000e+00 : f32
      %223 = vector.broadcast %cst_106 : f32 to vector<2x64xf32>
      %224 = arith.maximumf %222, %223 : vector<2x64xf32>
      %225 = arith.truncf %224 : vector<2x64xf32> to vector<2x64xbf16>
      %cst_107 = arith.constant dense<0.000000e+00> : vector<2x128xf32>
      %226 = tpu.matmul %225, %48, %cst_107 {dimension_numbers = #tpu.dot_dimension_numbers<[1], [0], [0], [1], [0, 0, 1, 1], [], []>} : vector<2x64xbf16>, vector<64x128xbf16>, vector<2x128xf32> -> vector<2x128xf32>
      %227 = vector.broadcast %49 : vector<1x128xf32> to vector<2x128xf32>
      %228 = arith.addf %226, %227 : vector<2x128xf32>
      %c12 = arith.constant 12 : index
      %c0_108 = arith.constant 0 : index
      %c0_109 = arith.constant 0 : index
      %229 = vector.load %arg16[%c12, %c0_108, %c0_109] : memref<30x2x128xf32, #tpu.memory_space<vmem>>, vector<1x2x128xf32>
      %230 = vector.shape_cast %229 : vector<1x2x128xf32> to vector<2x128xf32>
      %231 = vector.shape_cast %228 : vector<2x128xf32> to vector<1x2x128xf32>
      tpu.vector_store %arg16[%c12, %c0_108, %c0_109], %231 {strides = array<i32>} : memref<30x2x128xf32, #tpu.memory_space<vmem>>, vector<1x2x128xf32>,
      %232 = vector.extract_strided_slice %45 {offsets = [0, 1664], sizes = [2, 128], strides = [1, 1]} : vector<2x3840xf32> to vector<2x128xf32>
      %233 = arith.truncf %232 : vector<2x128xf32> to vector<2x128xbf16>
      %cst_110 = arith.constant dense<0.000000e+00> : vector<2x64xf32>
      %234 = tpu.matmul %233, %46, %cst_110 {dimension_numbers = #tpu.dot_dimension_numbers<[1], [0], [0], [1], [0, 0, 1, 1], [], []>} : vector<2x128xbf16>, vector<128x64xbf16>, vector<2x64xf32> -> vector<2x64xf32>
      %235 = vector.broadcast %47 : vector<1x64xf32> to vector<2x64xf32>
      %236 = arith.addf %234, %235 : vector<2x64xf32>
      %cst_111 = arith.constant 0.000000e+00 : f32
      %237 = vector.broadcast %cst_111 : f32 to vector<2x64xf32>
      %238 = arith.maximumf %236, %237 : vector<2x64xf32>
      %239 = arith.truncf %238 : vector<2x64xf32> to vector<2x64xbf16>
      %cst_112 = arith.constant dense<0.000000e+00> : vector<2x128xf32>
      %240 = tpu.matmul %239, %48, %cst_112 {dimension_numbers = #tpu.dot_dimension_numbers<[1], [0], [0], [1], [0, 0, 1, 1], [], []>} : vector<2x64xbf16>, vector<64x128xbf16>, vector<2x128xf32> -> vector<2x128xf32>
      %241 = vector.broadcast %49 : vector<1x128xf32> to vector<2x128xf32>
      %242 = arith.addf %240, %241 : vector<2x128xf32>
      %c13 = arith.constant 13 : index
      %c0_113 = arith.constant 0 : index
      %c0_114 = arith.constant 0 : index
      %243 = vector.load %arg16[%c13, %c0_113, %c0_114] : memref<30x2x128xf32, #tpu.memory_space<vmem>>, vector<1x2x128xf32>
      %244 = vector.shape_cast %243 : vector<1x2x128xf32> to vector<2x128xf32>
      %245 = vector.shape_cast %242 : vector<2x128xf32> to vector<1x2x128xf32>
      tpu.vector_store %arg16[%c13, %c0_113, %c0_114], %245 {strides = array<i32>} : memref<30x2x128xf32, #tpu.memory_space<vmem>>, vector<1x2x128xf32>,
      %246 = vector.extract_strided_slice %45 {offsets = [0, 1792], sizes = [2, 128], strides = [1, 1]} : vector<2x3840xf32> to vector<2x128xf32>
      %247 = arith.truncf %246 : vector<2x128xf32> to vector<2x128xbf16>
      %cst_115 = arith.constant dense<0.000000e+00> : vector<2x64xf32>
      %248 = tpu.matmul %247, %46, %cst_115 {dimension_numbers = #tpu.dot_dimension_numbers<[1], [0], [0], [1], [0, 0, 1, 1], [], []>} : vector<2x128xbf16>, vector<128x64xbf16>, vector<2x64xf32> -> vector<2x64xf32>
      %249 = vector.broadcast %47 : vector<1x64xf32> to vector<2x64xf32>
      %250 = arith.addf %248, %249 : vector<2x64xf32>
      %cst_116 = arith.constant 0.000000e+00 : f32
      %251 = vector.broadcast %cst_116 : f32 to vector<2x64xf32>
      %252 = arith.maximumf %250, %251 : vector<2x64xf32>
      %253 = arith.truncf %252 : vector<2x64xf32> to vector<2x64xbf16>
      %cst_117 = arith.constant dense<0.000000e+00> : vector<2x128xf32>
      %254 = tpu.matmul %253, %48, %cst_117 {dimension_numbers = #tpu.dot_dimension_numbers<[1], [0], [0], [1], [0, 0, 1, 1], [], []>} : vector<2x64xbf16>, vector<64x128xbf16>, vector<2x128xf32> -> vector<2x128xf32>
      %255 = vector.broadcast %49 : vector<1x128xf32> to vector<2x128xf32>
      %256 = arith.addf %254, %255 : vector<2x128xf32>
      %c14 = arith.constant 14 : index
      %c0_118 = arith.constant 0 : index
      %c0_119 = arith.constant 0 : index
      %257 = vector.load %arg16[%c14, %c0_118, %c0_119] : memref<30x2x128xf32, #tpu.memory_space<vmem>>, vector<1x2x128xf32>
      %258 = vector.shape_cast %257 : vector<1x2x128xf32> to vector<2x128xf32>
      %259 = vector.shape_cast %256 : vector<2x128xf32> to vector<1x2x128xf32>
      tpu.vector_store %arg16[%c14, %c0_118, %c0_119], %259 {strides = array<i32>} : memref<30x2x128xf32, #tpu.memory_space<vmem>>, vector<1x2x128xf32>,
      %260 = vector.extract_strided_slice %45 {offsets = [0, 1920], sizes = [2, 128], strides = [1, 1]} : vector<2x3840xf32> to vector<2x128xf32>
      %261 = arith.truncf %260 : vector<2x128xf32> to vector<2x128xbf16>
      %cst_120 = arith.constant dense<0.000000e+00> : vector<2x64xf32>
      %262 = tpu.matmul %261, %46, %cst_120 {dimension_numbers = #tpu.dot_dimension_numbers<[1], [0], [0], [1], [0, 0, 1, 1], [], []>} : vector<2x128xbf16>, vector<128x64xbf16>, vector<2x64xf32> -> vector<2x64xf32>
      %263 = vector.broadcast %47 : vector<1x64xf32> to vector<2x64xf32>
      %264 = arith.addf %262, %263 : vector<2x64xf32>
      %cst_121 = arith.constant 0.000000e+00 : f32
      %265 = vector.broadcast %cst_121 : f32 to vector<2x64xf32>
      %266 = arith.maximumf %264, %265 : vector<2x64xf32>
      %267 = arith.truncf %266 : vector<2x64xf32> to vector<2x64xbf16>
      %cst_122 = arith.constant dense<0.000000e+00> : vector<2x128xf32>
      %268 = tpu.matmul %267, %48, %cst_122 {dimension_numbers = #tpu.dot_dimension_numbers<[1], [0], [0], [1], [0, 0, 1, 1], [], []>} : vector<2x64xbf16>, vector<64x128xbf16>, vector<2x128xf32> -> vector<2x128xf32>
      %269 = vector.broadcast %49 : vector<1x128xf32> to vector<2x128xf32>
      %270 = arith.addf %268, %269 : vector<2x128xf32>
      %c15 = arith.constant 15 : index
      %c0_123 = arith.constant 0 : index
      %c0_124 = arith.constant 0 : index
      %271 = vector.load %arg16[%c15, %c0_123, %c0_124] : memref<30x2x128xf32, #tpu.memory_space<vmem>>, vector<1x2x128xf32>
      %272 = vector.shape_cast %271 : vector<1x2x128xf32> to vector<2x128xf32>
      %273 = vector.shape_cast %270 : vector<2x128xf32> to vector<1x2x128xf32>
      tpu.vector_store %arg16[%c15, %c0_123, %c0_124], %273 {strides = array<i32>} : memref<30x2x128xf32, #tpu.memory_space<vmem>>, vector<1x2x128xf32>,
      %274 = vector.extract_strided_slice %45 {offsets = [0, 2048], sizes = [2, 128], strides = [1, 1]} : vector<2x3840xf32> to vector<2x128xf32>
      %275 = arith.truncf %274 : vector<2x128xf32> to vector<2x128xbf16>
      %cst_125 = arith.constant dense<0.000000e+00> : vector<2x64xf32>
      %276 = tpu.matmul %275, %46, %cst_125 {dimension_numbers = #tpu.dot_dimension_numbers<[1], [0], [0], [1], [0, 0, 1, 1], [], []>} : vector<2x128xbf16>, vector<128x64xbf16>, vector<2x64xf32> -> vector<2x64xf32>
      %277 = vector.broadcast %47 : vector<1x64xf32> to vector<2x64xf32>
      %278 = arith.addf %276, %277 : vector<2x64xf32>
      %cst_126 = arith.constant 0.000000e+00 : f32
      %279 = vector.broadcast %cst_126 : f32 to vector<2x64xf32>
      %280 = arith.maximumf %278, %279 : vector<2x64xf32>
      %281 = arith.truncf %280 : vector<2x64xf32> to vector<2x64xbf16>
      %cst_127 = arith.constant dense<0.000000e+00> : vector<2x128xf32>
      %282 = tpu.matmul %281, %48, %cst_127 {dimension_numbers = #tpu.dot_dimension_numbers<[1], [0], [0], [1], [0, 0, 1, 1], [], []>} : vector<2x64xbf16>, vector<64x128xbf16>, vector<2x128xf32> -> vector<2x128xf32>
      %283 = vector.broadcast %49 : vector<1x128xf32> to vector<2x128xf32>
      %284 = arith.addf %282, %283 : vector<2x128xf32>
      %c16 = arith.constant 16 : index
      %c0_128 = arith.constant 0 : index
      %c0_129 = arith.constant 0 : index
      %285 = vector.load %arg16[%c16, %c0_128, %c0_129] : memref<30x2x128xf32, #tpu.memory_space<vmem>>, vector<1x2x128xf32>
      %286 = vector.shape_cast %285 : vector<1x2x128xf32> to vector<2x128xf32>
      %287 = vector.shape_cast %284 : vector<2x128xf32> to vector<1x2x128xf32>
      tpu.vector_store %arg16[%c16, %c0_128, %c0_129], %287 {strides = array<i32>} : memref<30x2x128xf32, #tpu.memory_space<vmem>>, vector<1x2x128xf32>,
      %288 = vector.extract_strided_slice %45 {offsets = [0, 2176], sizes = [2, 128], strides = [1, 1]} : vector<2x3840xf32> to vector<2x128xf32>
      %289 = arith.truncf %288 : vector<2x128xf32> to vector<2x128xbf16>
      %cst_130 = arith.constant dense<0.000000e+00> : vector<2x64xf32>
      %290 = tpu.matmul %289, %46, %cst_130 {dimension_numbers = #tpu.dot_dimension_numbers<[1], [0], [0], [1], [0, 0, 1, 1], [], []>} : vector<2x128xbf16>, vector<128x64xbf16>, vector<2x64xf32> -> vector<2x64xf32>
      %291 = vector.broadcast %47 : vector<1x64xf32> to vector<2x64xf32>
      %292 = arith.addf %290, %291 : vector<2x64xf32>
      %cst_131 = arith.constant 0.000000e+00 : f32
      %293 = vector.broadcast %cst_131 : f32 to vector<2x64xf32>
      %294 = arith.maximumf %292, %293 : vector<2x64xf32>
      %295 = arith.truncf %294 : vector<2x64xf32> to vector<2x64xbf16>
      %cst_132 = arith.constant dense<0.000000e+00> : vector<2x128xf32>
      %296 = tpu.matmul %295, %48, %cst_132 {dimension_numbers = #tpu.dot_dimension_numbers<[1], [0], [0], [1], [0, 0, 1, 1], [], []>} : vector<2x64xbf16>, vector<64x128xbf16>, vector<2x128xf32> -> vector<2x128xf32>
      %297 = vector.broadcast %49 : vector<1x128xf32> to vector<2x128xf32>
      %298 = arith.addf %296, %297 : vector<2x128xf32>
      %c17 = arith.constant 17 : index
      %c0_133 = arith.constant 0 : index
      %c0_134 = arith.constant 0 : index
      %299 = vector.load %arg16[%c17, %c0_133, %c0_134] : memref<30x2x128xf32, #tpu.memory_space<vmem>>, vector<1x2x128xf32>
      %300 = vector.shape_cast %299 : vector<1x2x128xf32> to vector<2x128xf32>
      %301 = vector.shape_cast %298 : vector<2x128xf32> to vector<1x2x128xf32>
      tpu.vector_store %arg16[%c17, %c0_133, %c0_134], %301 {strides = array<i32>} : memref<30x2x128xf32, #tpu.memory_space<vmem>>, vector<1x2x128xf32>,
      %302 = vector.extract_strided_slice %45 {offsets = [0, 2304], sizes = [2, 128], strides = [1, 1]} : vector<2x3840xf32> to vector<2x128xf32>
      %303 = arith.truncf %302 : vector<2x128xf32> to vector<2x128xbf16>
      %cst_135 = arith.constant dense<0.000000e+00> : vector<2x64xf32>
      %304 = tpu.matmul %303, %46, %cst_135 {dimension_numbers = #tpu.dot_dimension_numbers<[1], [0], [0], [1], [0, 0, 1, 1], [], []>} : vector<2x128xbf16>, vector<128x64xbf16>, vector<2x64xf32> -> vector<2x64xf32>
      %305 = vector.broadcast %47 : vector<1x64xf32> to vector<2x64xf32>
      %306 = arith.addf %304, %305 : vector<2x64xf32>
      %cst_136 = arith.constant 0.000000e+00 : f32
      %307 = vector.broadcast %cst_136 : f32 to vector<2x64xf32>
      %308 = arith.maximumf %306, %307 : vector<2x64xf32>
      %309 = arith.truncf %308 : vector<2x64xf32> to vector<2x64xbf16>
      %cst_137 = arith.constant dense<0.000000e+00> : vector<2x128xf32>
      %310 = tpu.matmul %309, %48, %cst_137 {dimension_numbers = #tpu.dot_dimension_numbers<[1], [0], [0], [1], [0, 0, 1, 1], [], []>} : vector<2x64xbf16>, vector<64x128xbf16>, vector<2x128xf32> -> vector<2x128xf32>
      %311 = vector.broadcast %49 : vector<1x128xf32> to vector<2x128xf32>
      %312 = arith.addf %310, %311 : vector<2x128xf32>
      %c18 = arith.constant 18 : index
      %c0_138 = arith.constant 0 : index
      %c0_139 = arith.constant 0 : index
      %313 = vector.load %arg16[%c18, %c0_138, %c0_139] : memref<30x2x128xf32, #tpu.memory_space<vmem>>, vector<1x2x128xf32>
      %314 = vector.shape_cast %313 : vector<1x2x128xf32> to vector<2x128xf32>
      %315 = vector.shape_cast %312 : vector<2x128xf32> to vector<1x2x128xf32>
      tpu.vector_store %arg16[%c18, %c0_138, %c0_139], %315 {strides = array<i32>} : memref<30x2x128xf32, #tpu.memory_space<vmem>>, vector<1x2x128xf32>,
      %316 = vector.extract_strided_slice %45 {offsets = [0, 2432], sizes = [2, 128], strides = [1, 1]} : vector<2x3840xf32> to vector<2x128xf32>
      %317 = arith.truncf %316 : vector<2x128xf32> to vector<2x128xbf16>
      %cst_140 = arith.constant dense<0.000000e+00> : vector<2x64xf32>
      %318 = tpu.matmul %317, %46, %cst_140 {dimension_numbers = #tpu.dot_dimension_numbers<[1], [0], [0], [1], [0, 0, 1, 1], [], []>} : vector<2x128xbf16>, vector<128x64xbf16>, vector<2x64xf32> -> vector<2x64xf32>
      %319 = vector.broadcast %47 : vector<1x64xf32> to vector<2x64xf32>
      %320 = arith.addf %318, %319 : vector<2x64xf32>
      %cst_141 = arith.constant 0.000000e+00 : f32
      %321 = vector.broadcast %cst_141 : f32 to vector<2x64xf32>
      %322 = arith.maximumf %320, %321 : vector<2x64xf32>
      %323 = arith.truncf %322 : vector<2x64xf32> to vector<2x64xbf16>
      %cst_142 = arith.constant dense<0.000000e+00> : vector<2x128xf32>
      %324 = tpu.matmul %323, %48, %cst_142 {dimension_numbers = #tpu.dot_dimension_numbers<[1], [0], [0], [1], [0, 0, 1, 1], [], []>} : vector<2x64xbf16>, vector<64x128xbf16>, vector<2x128xf32> -> vector<2x128xf32>
      %325 = vector.broadcast %49 : vector<1x128xf32> to vector<2x128xf32>
      %326 = arith.addf %324, %325 : vector<2x128xf32>
      %c19 = arith.constant 19 : index
      %c0_143 = arith.constant 0 : index
      %c0_144 = arith.constant 0 : index
      %327 = vector.load %arg16[%c19, %c0_143, %c0_144] : memref<30x2x128xf32, #tpu.memory_space<vmem>>, vector<1x2x128xf32>
      %328 = vector.shape_cast %327 : vector<1x2x128xf32> to vector<2x128xf32>
      %329 = vector.shape_cast %326 : vector<2x128xf32> to vector<1x2x128xf32>
      tpu.vector_store %arg16[%c19, %c0_143, %c0_144], %329 {strides = array<i32>} : memref<30x2x128xf32, #tpu.memory_space<vmem>>, vector<1x2x128xf32>,
      %330 = vector.extract_strided_slice %45 {offsets = [0, 2560], sizes = [2, 128], strides = [1, 1]} : vector<2x3840xf32> to vector<2x128xf32>
      %331 = arith.truncf %330 : vector<2x128xf32> to vector<2x128xbf16>
      %cst_145 = arith.constant dense<0.000000e+00> : vector<2x64xf32>
      %332 = tpu.matmul %331, %46, %cst_145 {dimension_numbers = #tpu.dot_dimension_numbers<[1], [0], [0], [1], [0, 0, 1, 1], [], []>} : vector<2x128xbf16>, vector<128x64xbf16>, vector<2x64xf32> -> vector<2x64xf32>
      %333 = vector.broadcast %47 : vector<1x64xf32> to vector<2x64xf32>
      %334 = arith.addf %332, %333 : vector<2x64xf32>
      %cst_146 = arith.constant 0.000000e+00 : f32
      %335 = vector.broadcast %cst_146 : f32 to vector<2x64xf32>
      %336 = arith.maximumf %334, %335 : vector<2x64xf32>
      %337 = arith.truncf %336 : vector<2x64xf32> to vector<2x64xbf16>
      %cst_147 = arith.constant dense<0.000000e+00> : vector<2x128xf32>
      %338 = tpu.matmul %337, %48, %cst_147 {dimension_numbers = #tpu.dot_dimension_numbers<[1], [0], [0], [1], [0, 0, 1, 1], [], []>} : vector<2x64xbf16>, vector<64x128xbf16>, vector<2x128xf32> -> vector<2x128xf32>
      %339 = vector.broadcast %49 : vector<1x128xf32> to vector<2x128xf32>
      %340 = arith.addf %338, %339 : vector<2x128xf32>
      %c20 = arith.constant 20 : index
      %c0_148 = arith.constant 0 : index
      %c0_149 = arith.constant 0 : index
      %341 = vector.load %arg16[%c20, %c0_148, %c0_149] : memref<30x2x128xf32, #tpu.memory_space<vmem>>, vector<1x2x128xf32>
      %342 = vector.shape_cast %341 : vector<1x2x128xf32> to vector<2x128xf32>
      %343 = vector.shape_cast %340 : vector<2x128xf32> to vector<1x2x128xf32>
      tpu.vector_store %arg16[%c20, %c0_148, %c0_149], %343 {strides = array<i32>} : memref<30x2x128xf32, #tpu.memory_space<vmem>>, vector<1x2x128xf32>,
      %344 = vector.extract_strided_slice %45 {offsets = [0, 2688], sizes = [2, 128], strides = [1, 1]} : vector<2x3840xf32> to vector<2x128xf32>
      %345 = arith.truncf %344 : vector<2x128xf32> to vector<2x128xbf16>
      %cst_150 = arith.constant dense<0.000000e+00> : vector<2x64xf32>
      %346 = tpu.matmul %345, %46, %cst_150 {dimension_numbers = #tpu.dot_dimension_numbers<[1], [0], [0], [1], [0, 0, 1, 1], [], []>} : vector<2x128xbf16>, vector<128x64xbf16>, vector<2x64xf32> -> vector<2x64xf32>
      %347 = vector.broadcast %47 : vector<1x64xf32> to vector<2x64xf32>
      %348 = arith.addf %346, %347 : vector<2x64xf32>
      %cst_151 = arith.constant 0.000000e+00 : f32
      %349 = vector.broadcast %cst_151 : f32 to vector<2x64xf32>
      %350 = arith.maximumf %348, %349 : vector<2x64xf32>
      %351 = arith.truncf %350 : vector<2x64xf32> to vector<2x64xbf16>
      %cst_152 = arith.constant dense<0.000000e+00> : vector<2x128xf32>
      %352 = tpu.matmul %351, %48, %cst_152 {dimension_numbers = #tpu.dot_dimension_numbers<[1], [0], [0], [1], [0, 0, 1, 1], [], []>} : vector<2x64xbf16>, vector<64x128xbf16>, vector<2x128xf32> -> vector<2x128xf32>
      %353 = vector.broadcast %49 : vector<1x128xf32> to vector<2x128xf32>
      %354 = arith.addf %352, %353 : vector<2x128xf32>
      %c21 = arith.constant 21 : index
      %c0_153 = arith.constant 0 : index
      %c0_154 = arith.constant 0 : index
      %355 = vector.load %arg16[%c21, %c0_153, %c0_154] : memref<30x2x128xf32, #tpu.memory_space<vmem>>, vector<1x2x128xf32>
      %356 = vector.shape_cast %355 : vector<1x2x128xf32> to vector<2x128xf32>
      %357 = vector.shape_cast %354 : vector<2x128xf32> to vector<1x2x128xf32>
      tpu.vector_store %arg16[%c21, %c0_153, %c0_154], %357 {strides = array<i32>} : memref<30x2x128xf32, #tpu.memory_space<vmem>>, vector<1x2x128xf32>,
      %358 = vector.extract_strided_slice %45 {offsets = [0, 2816], sizes = [2, 128], strides = [1, 1]} : vector<2x3840xf32> to vector<2x128xf32>
      %359 = arith.truncf %358 : vector<2x128xf32> to vector<2x128xbf16>
      %cst_155 = arith.constant dense<0.000000e+00> : vector<2x64xf32>
      %360 = tpu.matmul %359, %46, %cst_155 {dimension_numbers = #tpu.dot_dimension_numbers<[1], [0], [0], [1], [0, 0, 1, 1], [], []>} : vector<2x128xbf16>, vector<128x64xbf16>, vector<2x64xf32> -> vector<2x64xf32>
      %361 = vector.broadcast %47 : vector<1x64xf32> to vector<2x64xf32>
      %362 = arith.addf %360, %361 : vector<2x64xf32>
      %cst_156 = arith.constant 0.000000e+00 : f32
      %363 = vector.broadcast %cst_156 : f32 to vector<2x64xf32>
      %364 = arith.maximumf %362, %363 : vector<2x64xf32>
      %365 = arith.truncf %364 : vector<2x64xf32> to vector<2x64xbf16>
      %cst_157 = arith.constant dense<0.000000e+00> : vector<2x128xf32>
      %366 = tpu.matmul %365, %48, %cst_157 {dimension_numbers = #tpu.dot_dimension_numbers<[1], [0], [0], [1], [0, 0, 1, 1], [], []>} : vector<2x64xbf16>, vector<64x128xbf16>, vector<2x128xf32> -> vector<2x128xf32>
      %367 = vector.broadcast %49 : vector<1x128xf32> to vector<2x128xf32>
      %368 = arith.addf %366, %367 : vector<2x128xf32>
      %c22 = arith.constant 22 : index
      %c0_158 = arith.constant 0 : index
      %c0_159 = arith.constant 0 : index
      %369 = vector.load %arg16[%c22, %c0_158, %c0_159] : memref<30x2x128xf32, #tpu.memory_space<vmem>>, vector<1x2x128xf32>
      %370 = vector.shape_cast %369 : vector<1x2x128xf32> to vector<2x128xf32>
      %371 = vector.shape_cast %368 : vector<2x128xf32> to vector<1x2x128xf32>
      tpu.vector_store %arg16[%c22, %c0_158, %c0_159], %371 {strides = array<i32>} : memref<30x2x128xf32, #tpu.memory_space<vmem>>, vector<1x2x128xf32>,
      %372 = vector.extract_strided_slice %45 {offsets = [0, 2944], sizes = [2, 128], strides = [1, 1]} : vector<2x3840xf32> to vector<2x128xf32>
      %373 = arith.truncf %372 : vector<2x128xf32> to vector<2x128xbf16>
      %cst_160 = arith.constant dense<0.000000e+00> : vector<2x64xf32>
      %374 = tpu.matmul %373, %46, %cst_160 {dimension_numbers = #tpu.dot_dimension_numbers<[1], [0], [0], [1], [0, 0, 1, 1], [], []>} : vector<2x128xbf16>, vector<128x64xbf16>, vector<2x64xf32> -> vector<2x64xf32>
      %375 = vector.broadcast %47 : vector<1x64xf32> to vector<2x64xf32>
      %376 = arith.addf %374, %375 : vector<2x64xf32>
      %cst_161 = arith.constant 0.000000e+00 : f32
      %377 = vector.broadcast %cst_161 : f32 to vector<2x64xf32>
      %378 = arith.maximumf %376, %377 : vector<2x64xf32>
      %379 = arith.truncf %378 : vector<2x64xf32> to vector<2x64xbf16>
      %cst_162 = arith.constant dense<0.000000e+00> : vector<2x128xf32>
      %380 = tpu.matmul %379, %48, %cst_162 {dimension_numbers = #tpu.dot_dimension_numbers<[1], [0], [0], [1], [0, 0, 1, 1], [], []>} : vector<2x64xbf16>, vector<64x128xbf16>, vector<2x128xf32> -> vector<2x128xf32>
      %381 = vector.broadcast %49 : vector<1x128xf32> to vector<2x128xf32>
      %382 = arith.addf %380, %381 : vector<2x128xf32>
      %c23 = arith.constant 23 : index
      %c0_163 = arith.constant 0 : index
      %c0_164 = arith.constant 0 : index
      %383 = vector.load %arg16[%c23, %c0_163, %c0_164] : memref<30x2x128xf32, #tpu.memory_space<vmem>>, vector<1x2x128xf32>
      %384 = vector.shape_cast %383 : vector<1x2x128xf32> to vector<2x128xf32>
      %385 = vector.shape_cast %382 : vector<2x128xf32> to vector<1x2x128xf32>
      tpu.vector_store %arg16[%c23, %c0_163, %c0_164], %385 {strides = array<i32>} : memref<30x2x128xf32, #tpu.memory_space<vmem>>, vector<1x2x128xf32>,
      %386 = vector.extract_strided_slice %45 {offsets = [0, 3072], sizes = [2, 128], strides = [1, 1]} : vector<2x3840xf32> to vector<2x128xf32>
      %387 = arith.truncf %386 : vector<2x128xf32> to vector<2x128xbf16>
      %cst_165 = arith.constant dense<0.000000e+00> : vector<2x64xf32>
      %388 = tpu.matmul %387, %46, %cst_165 {dimension_numbers = #tpu.dot_dimension_numbers<[1], [0], [0], [1], [0, 0, 1, 1], [], []>} : vector<2x128xbf16>, vector<128x64xbf16>, vector<2x64xf32> -> vector<2x64xf32>
      %389 = vector.broadcast %47 : vector<1x64xf32> to vector<2x64xf32>
      %390 = arith.addf %388, %389 : vector<2x64xf32>
      %cst_166 = arith.constant 0.000000e+00 : f32
      %391 = vector.broadcast %cst_166 : f32 to vector<2x64xf32>
      %392 = arith.maximumf %390, %391 : vector<2x64xf32>
      %393 = arith.truncf %392 : vector<2x64xf32> to vector<2x64xbf16>
      %cst_167 = arith.constant dense<0.000000e+00> : vector<2x128xf32>
      %394 = tpu.matmul %393, %48, %cst_167 {dimension_numbers = #tpu.dot_dimension_numbers<[1], [0], [0], [1], [0, 0, 1, 1], [], []>} : vector<2x64xbf16>, vector<64x128xbf16>, vector<2x128xf32> -> vector<2x128xf32>
      %395 = vector.broadcast %49 : vector<1x128xf32> to vector<2x128xf32>
      %396 = arith.addf %394, %395 : vector<2x128xf32>
      %c24 = arith.constant 24 : index
      %c0_168 = arith.constant 0 : index
      %c0_169 = arith.constant 0 : index
      %397 = vector.load %arg16[%c24, %c0_168, %c0_169] : memref<30x2x128xf32, #tpu.memory_space<vmem>>, vector<1x2x128xf32>
      %398 = vector.shape_cast %397 : vector<1x2x128xf32> to vector<2x128xf32>
      %399 = vector.shape_cast %396 : vector<2x128xf32> to vector<1x2x128xf32>
      tpu.vector_store %arg16[%c24, %c0_168, %c0_169], %399 {strides = array<i32>} : memref<30x2x128xf32, #tpu.memory_space<vmem>>, vector<1x2x128xf32>,
      %400 = vector.extract_strided_slice %45 {offsets = [0, 3200], sizes = [2, 128], strides = [1, 1]} : vector<2x3840xf32> to vector<2x128xf32>
      %401 = arith.truncf %400 : vector<2x128xf32> to vector<2x128xbf16>
      %cst_170 = arith.constant dense<0.000000e+00> : vector<2x64xf32>
      %402 = tpu.matmul %401, %46, %cst_170 {dimension_numbers = #tpu.dot_dimension_numbers<[1], [0], [0], [1], [0, 0, 1, 1], [], []>} : vector<2x128xbf16>, vector<128x64xbf16>, vector<2x64xf32> -> vector<2x64xf32>
      %403 = vector.broadcast %47 : vector<1x64xf32> to vector<2x64xf32>
      %404 = arith.addf %402, %403 : vector<2x64xf32>
      %cst_171 = arith.constant 0.000000e+00 : f32
      %405 = vector.broadcast %cst_171 : f32 to vector<2x64xf32>
      %406 = arith.maximumf %404, %405 : vector<2x64xf32>
      %407 = arith.truncf %406 : vector<2x64xf32> to vector<2x64xbf16>
      %cst_172 = arith.constant dense<0.000000e+00> : vector<2x128xf32>
      %408 = tpu.matmul %407, %48, %cst_172 {dimension_numbers = #tpu.dot_dimension_numbers<[1], [0], [0], [1], [0, 0, 1, 1], [], []>} : vector<2x64xbf16>, vector<64x128xbf16>, vector<2x128xf32> -> vector<2x128xf32>
      %409 = vector.broadcast %49 : vector<1x128xf32> to vector<2x128xf32>
      %410 = arith.addf %408, %409 : vector<2x128xf32>
      %c25 = arith.constant 25 : index
      %c0_173 = arith.constant 0 : index
      %c0_174 = arith.constant 0 : index
      %411 = vector.load %arg16[%c25, %c0_173, %c0_174] : memref<30x2x128xf32, #tpu.memory_space<vmem>>, vector<1x2x128xf32>
      %412 = vector.shape_cast %411 : vector<1x2x128xf32> to vector<2x128xf32>
      %413 = vector.shape_cast %410 : vector<2x128xf32> to vector<1x2x128xf32>
      tpu.vector_store %arg16[%c25, %c0_173, %c0_174], %413 {strides = array<i32>} : memref<30x2x128xf32, #tpu.memory_space<vmem>>, vector<1x2x128xf32>,
      %414 = vector.extract_strided_slice %45 {offsets = [0, 3328], sizes = [2, 128], strides = [1, 1]} : vector<2x3840xf32> to vector<2x128xf32>
      %415 = arith.truncf %414 : vector<2x128xf32> to vector<2x128xbf16>
      %cst_175 = arith.constant dense<0.000000e+00> : vector<2x64xf32>
      %416 = tpu.matmul %415, %46, %cst_175 {dimension_numbers = #tpu.dot_dimension_numbers<[1], [0], [0], [1], [0, 0, 1, 1], [], []>} : vector<2x128xbf16>, vector<128x64xbf16>, vector<2x64xf32> -> vector<2x64xf32>
      %417 = vector.broadcast %47 : vector<1x64xf32> to vector<2x64xf32>
      %418 = arith.addf %416, %417 : vector<2x64xf32>
      %cst_176 = arith.constant 0.000000e+00 : f32
      %419 = vector.broadcast %cst_176 : f32 to vector<2x64xf32>
      %420 = arith.maximumf %418, %419 : vector<2x64xf32>
      %421 = arith.truncf %420 : vector<2x64xf32> to vector<2x64xbf16>
      %cst_177 = arith.constant dense<0.000000e+00> : vector<2x128xf32>
      %422 = tpu.matmul %421, %48, %cst_177 {dimension_numbers = #tpu.dot_dimension_numbers<[1], [0], [0], [1], [0, 0, 1, 1], [], []>} : vector<2x64xbf16>, vector<64x128xbf16>, vector<2x128xf32> -> vector<2x128xf32>
      %423 = vector.broadcast %49 : vector<1x128xf32> to vector<2x128xf32>
      %424 = arith.addf %422, %423 : vector<2x128xf32>
      %c26 = arith.constant 26 : index
      %c0_178 = arith.constant 0 : index
      %c0_179 = arith.constant 0 : index
      %425 = vector.load %arg16[%c26, %c0_178, %c0_179] : memref<30x2x128xf32, #tpu.memory_space<vmem>>, vector<1x2x128xf32>
      %426 = vector.shape_cast %425 : vector<1x2x128xf32> to vector<2x128xf32>
      %427 = vector.shape_cast %424 : vector<2x128xf32> to vector<1x2x128xf32>
      tpu.vector_store %arg16[%c26, %c0_178, %c0_179], %427 {strides = array<i32>} : memref<30x2x128xf32, #tpu.memory_space<vmem>>, vector<1x2x128xf32>,
      %428 = vector.extract_strided_slice %45 {offsets = [0, 3456], sizes = [2, 128], strides = [1, 1]} : vector<2x3840xf32> to vector<2x128xf32>
      %429 = arith.truncf %428 : vector<2x128xf32> to vector<2x128xbf16>
      %cst_180 = arith.constant dense<0.000000e+00> : vector<2x64xf32>
      %430 = tpu.matmul %429, %46, %cst_180 {dimension_numbers = #tpu.dot_dimension_numbers<[1], [0], [0], [1], [0, 0, 1, 1], [], []>} : vector<2x128xbf16>, vector<128x64xbf16>, vector<2x64xf32> -> vector<2x64xf32>
      %431 = vector.broadcast %47 : vector<1x64xf32> to vector<2x64xf32>
      %432 = arith.addf %430, %431 : vector<2x64xf32>
      %cst_181 = arith.constant 0.000000e+00 : f32
      %433 = vector.broadcast %cst_181 : f32 to vector<2x64xf32>
      %434 = arith.maximumf %432, %433 : vector<2x64xf32>
      %435 = arith.truncf %434 : vector<2x64xf32> to vector<2x64xbf16>
      %cst_182 = arith.constant dense<0.000000e+00> : vector<2x128xf32>
      %436 = tpu.matmul %435, %48, %cst_182 {dimension_numbers = #tpu.dot_dimension_numbers<[1], [0], [0], [1], [0, 0, 1, 1], [], []>} : vector<2x64xbf16>, vector<64x128xbf16>, vector<2x128xf32> -> vector<2x128xf32>
      %437 = vector.broadcast %49 : vector<1x128xf32> to vector<2x128xf32>
      %438 = arith.addf %436, %437 : vector<2x128xf32>
      %c27 = arith.constant 27 : index
      %c0_183 = arith.constant 0 : index
      %c0_184 = arith.constant 0 : index
      %439 = vector.load %arg16[%c27, %c0_183, %c0_184] : memref<30x2x128xf32, #tpu.memory_space<vmem>>, vector<1x2x128xf32>
      %440 = vector.shape_cast %439 : vector<1x2x128xf32> to vector<2x128xf32>
      %441 = vector.shape_cast %438 : vector<2x128xf32> to vector<1x2x128xf32>
      tpu.vector_store %arg16[%c27, %c0_183, %c0_184], %441 {strides = array<i32>} : memref<30x2x128xf32, #tpu.memory_space<vmem>>, vector<1x2x128xf32>,
      %442 = vector.extract_strided_slice %45 {offsets = [0, 3584], sizes = [2, 128], strides = [1, 1]} : vector<2x3840xf32> to vector<2x128xf32>
      %443 = arith.truncf %442 : vector<2x128xf32> to vector<2x128xbf16>
      %cst_185 = arith.constant dense<0.000000e+00> : vector<2x64xf32>
      %444 = tpu.matmul %443, %46, %cst_185 {dimension_numbers = #tpu.dot_dimension_numbers<[1], [0], [0], [1], [0, 0, 1, 1], [], []>} : vector<2x128xbf16>, vector<128x64xbf16>, vector<2x64xf32> -> vector<2x64xf32>
      %445 = vector.broadcast %47 : vector<1x64xf32> to vector<2x64xf32>
      %446 = arith.addf %444, %445 : vector<2x64xf32>
      %cst_186 = arith.constant 0.000000e+00 : f32
      %447 = vector.broadcast %cst_186 : f32 to vector<2x64xf32>
      %448 = arith.maximumf %446, %447 : vector<2x64xf32>
      %449 = arith.truncf %448 : vector<2x64xf32> to vector<2x64xbf16>
      %cst_187 = arith.constant dense<0.000000e+00> : vector<2x128xf32>
      %450 = tpu.matmul %449, %48, %cst_187 {dimension_numbers = #tpu.dot_dimension_numbers<[1], [0], [0], [1], [0, 0, 1, 1], [], []>} : vector<2x64xbf16>, vector<64x128xbf16>, vector<2x128xf32> -> vector<2x128xf32>
      %451 = vector.broadcast %49 : vector<1x128xf32> to vector<2x128xf32>
      %452 = arith.addf %450, %451 : vector<2x128xf32>
      %c28 = arith.constant 28 : index
      %c0_188 = arith.constant 0 : index
      %c0_189 = arith.constant 0 : index
      %453 = vector.load %arg16[%c28, %c0_188, %c0_189] : memref<30x2x128xf32, #tpu.memory_space<vmem>>, vector<1x2x128xf32>
      %454 = vector.shape_cast %453 : vector<1x2x128xf32> to vector<2x128xf32>
      %455 = vector.shape_cast %452 : vector<2x128xf32> to vector<1x2x128xf32>
      tpu.vector_store %arg16[%c28, %c0_188, %c0_189], %455 {strides = array<i32>} : memref<30x2x128xf32, #tpu.memory_space<vmem>>, vector<1x2x128xf32>,
      %456 = vector.extract_strided_slice %45 {offsets = [0, 3712], sizes = [2, 128], strides = [1, 1]} : vector<2x3840xf32> to vector<2x128xf32>
      %457 = arith.truncf %456 : vector<2x128xf32> to vector<2x128xbf16>
      %cst_190 = arith.constant dense<0.000000e+00> : vector<2x64xf32>
      %458 = tpu.matmul %457, %46, %cst_190 {dimension_numbers = #tpu.dot_dimension_numbers<[1], [0], [0], [1], [0, 0, 1, 1], [], []>} : vector<2x128xbf16>, vector<128x64xbf16>, vector<2x64xf32> -> vector<2x64xf32>
      %459 = vector.broadcast %47 : vector<1x64xf32> to vector<2x64xf32>
      %460 = arith.addf %458, %459 : vector<2x64xf32>
      %cst_191 = arith.constant 0.000000e+00 : f32
      %461 = vector.broadcast %cst_191 : f32 to vector<2x64xf32>
      %462 = arith.maximumf %460, %461 : vector<2x64xf32>
      %463 = arith.truncf %462 : vector<2x64xf32> to vector<2x64xbf16>
      %cst_192 = arith.constant dense<0.000000e+00> : vector<2x128xf32>
      %464 = tpu.matmul %463, %48, %cst_192 {dimension_numbers = #tpu.dot_dimension_numbers<[1], [0], [0], [1], [0, 0, 1, 1], [], []>} : vector<2x64xbf16>, vector<64x128xbf16>, vector<2x128xf32> -> vector<2x128xf32>
      %465 = vector.broadcast %49 : vector<1x128xf32> to vector<2x128xf32>
      %466 = arith.addf %464, %465 : vector<2x128xf32>
      %c29 = arith.constant 29 : index
      %c0_193 = arith.constant 0 : index
      %c0_194 = arith.constant 0 : index
      %467 = vector.load %arg16[%c29, %c0_193, %c0_194] : memref<30x2x128xf32, #tpu.memory_space<vmem>>, vector<1x2x128xf32>
      %468 = vector.shape_cast %467 : vector<1x2x128xf32> to vector<2x128xf32>
      %469 = vector.shape_cast %466 : vector<2x128xf32> to vector<1x2x128xf32>
      tpu.vector_store %arg16[%c29, %c0_193, %c0_194], %469 {strides = array<i32>} : memref<30x2x128xf32, #tpu.memory_space<vmem>>, vector<1x2x128xf32>,
    } else {
    }
    return
  }
  func.func @transform_0(%arg0: i32) -> (i32, i32) {
    %c0_i32 = arith.constant 0 : i32
    %c0_i32_0 = arith.constant 0 : i32
    return %c0_i32, %arg0 : i32, i32
  }
  func.func @transform_1(%arg0: i32) -> (i32, i32) {
    %c0_i32 = arith.constant 0 : i32
    %c0_i32_0 = arith.constant 0 : i32
    return %c0_i32, %arg0 : i32, i32
  }
  func.func @transform_2(%arg0: i32) -> (i32, i32) {
    %c0_i32 = arith.constant 0 : i32
    %c0_i32_0 = arith.constant 0 : i32
    return %arg0, %c0_i32 : i32, i32
  }
  func.func @transform_3(%arg0: i32) -> (i32, i32) {
    %c0_i32 = arith.constant 0 : i32
    %c0_i32_0 = arith.constant 0 : i32
    return %arg0, %c0_i32 : i32, i32
  }
  func.func @transform_4(%arg0: i32) -> (i32, i32) {
    %c0_i32 = arith.constant 0 : i32
    %c0_i32_0 = arith.constant 0 : i32
    %c0_i32_1 = arith.constant 0 : i32
    return %c0_i32, %c0_i32_0 : i32, i32
  }
  func.func @transform_5(%arg0: i32) -> (i32, i32) {
    %c0_i32 = arith.constant 0 : i32
    %c0_i32_0 = arith.constant 0 : i32
    %c0_i32_1 = arith.constant 0 : i32
    return %c0_i32, %c0_i32_0 : i32, i32
  }
  func.func @transform_6(%arg0: i32) -> (i32, i32) {
    %c0_i32 = arith.constant 0 : i32
    %c0_i32_0 = arith.constant 0 : i32
    %c0_i32_1 = arith.constant 0 : i32
    return %c0_i32, %c0_i32_0 : i32, i32
  }
  func.func @transform_7(%arg0: i32) -> (i32, i32) {
    %c0_i32 = arith.constant 0 : i32
    %c0_i32_0 = arith.constant 0 : i32
    %c0_i32_1 = arith.constant 0 : i32
    return %c0_i32, %c0_i32_0 : i32, i32
  }
  func.func @transform_8(%arg0: i32) -> (i32, i32) {
    %c0_i32 = arith.constant 0 : i32
    %c0_i32_0 = arith.constant 0 : i32
    %c0_i32_1 = arith.constant 0 : i32
    return %c0_i32, %c0_i32_0 : i32, i32
  }
  func.func @transform_9(%arg0: i32) -> (i32, i32) {
    %c0_i32 = arith.constant 0 : i32
    %c0_i32_0 = arith.constant 0 : i32
    %c0_i32_1 = arith.constant 0 : i32
    return %c0_i32, %c0_i32_0 : i32, i32
  }
  func.func @transform_10(%arg0: i32) -> (i32, i32) {
    %c0_i32 = arith.constant 0 : i32
    %c0_i32_0 = arith.constant 0 : i32
    %c0_i32_1 = arith.constant 0 : i32
    return %c0_i32, %c0_i32_0 : i32, i32
  }
  func.func @transform_11(%arg0: i32) -> (i32, i32) {
    %c0_i32 = arith.constant 0 : i32
    %c0_i32_0 = arith.constant 0 : i32
    %c0_i32_1 = arith.constant 0 : i32
    return %c0_i32, %c0_i32_0 : i32, i32
  }
  func.func @transform_12(%arg0: i32) -> (i32, i32) {
    %c0_i32 = arith.constant 0 : i32
    %c0_i32_0 = arith.constant 0 : i32
    %c0_i32_1 = arith.constant 0 : i32
    return %c0_i32, %c0_i32_0 : i32, i32
  }
  func.func @transform_13(%arg0: i32) -> (i32, i32) {
    %c0_i32 = arith.constant 0 : i32
    %c0_i32_0 = arith.constant 0 : i32
    %c0_i32_1 = arith.constant 0 : i32
    return %c0_i32, %c0_i32_0 : i32, i32
  }
  func.func @transform_14(%arg0: i32) -> (i32, i32) {
    %c0_i32 = arith.constant 0 : i32
    %c0_i32_0 = arith.constant 0 : i32
    %c0_i32_1 = arith.constant 0 : i32
    return %c0_i32, %c0_i32_0 : i32, i32
  }
  func.func @transform_15(%arg0: i32) -> (i32, i32, i32) {
    %c0_i32 = arith.constant 0 : i32
    %c0_i32_0 = arith.constant 0 : i32
    %c0_i32_1 = arith.constant 0 : i32
    %c0_i32_2 = arith.constant 0 : i32
    return %c0_i32, %c0_i32_0, %c0_i32_1 : i32, i32, i32
  }
}

</mosaic_0001>

<bundles_post_ra>
// kernel: tpu_custom_call.1
= control target key start
LH: loop header
LB: loop body
LE: loop exit
PB: predicated region body
PF: predicated region fallthrough
CT: control target
= control target key end

     0   :  { %s14269_s0 = inlined_call_operand.hbm [shape: f32[2,1536], index: 0, kind: input, shape index: {}]   ;;  %s14270_s1 = inlined_call_operand.hbm [shape: f32[2,1536], index: 1, kind: input, shape index: {}]   ;;  %s14271_s2 = inlined_call_operand.hbm [shape: bf16[1536,512], index: 2, kind: input, shape index: {}]   ;;  %s14272_s3 = inlined_call_operand.hbm [shape: bf16[1536,512], index: 3, kind: input, shape index: {}]   ;;  %s14273_s4 = inlined_call_operand.hbm [shape: f32[1,512], index: 4, kind: input, shape index: {}]   ;;  %s14274_s5 = inlined_call_operand.hbm [shape: bf16[512,128], index: 5, kind: input, shape index: {}]   ;;  %s14275_s6 = inlined_call_operand.hbm [shape: f32[1,128], index: 6, kind: input, shape index: {}]   ;;  %s14276_s7 = inlined_call_operand.hbm [shape: bf16[128,128], index: 7, kind: input, shape index: {}]   ;;  %s14277_s8 = inlined_call_operand.hbm [shape: f32[1,128], index: 8, kind: input, shape index: {}]   ;;  %s14278_s9 = inlined_call_operand.hbm [shape: bf16[128,3840], index: 9, kind: input, shape index: {}]   ;;  %s14279_s10 = inlined_call_operand.hbm [shape: f32[1,3840], index: 10, kind: input, shape index: {}]   ;;  %s14280_s11 = inlined_call_operand.vmem [shape: bf16[128,64], index: 11, kind: input, shape index: {}]   ;;  %s14281_s12 = inlined_call_operand.hbm [shape: f32[1,64], index: 12, kind: input, shape index: {}]   ;;  %s14282_s13 = inlined_call_operand.hbm [shape: bf16[64,128], index: 13, kind: input, shape index: {}]   ;;  %s14283_s14 = inlined_call_operand.hbm [shape: f32[1,128], index: 14, kind: input, shape index: {}]   ;;  %s14284_s15 = inlined_call_operand.hbm [shape: f32[30,2,128], index: 15, kind: output, shape index: {}]  }
   0x1   :  { %14309 = sst [smem:[#allocation41_spill]] %s14270_s1 }
   0x2   :  { %14310 = sst [smem:[#allocation42_spill]] %s14271_s2 }
   0x3   :  { %14311 = sst [smem:[#allocation43_spill]] %s14272_s3 }
   0x4   :  { %14312 = sst [smem:[#allocation44_spill]] %s14273_s4 }
   0x5   :  { %14313 = sst [smem:[#allocation45_spill]] %s14274_s5 }
   0x6   :  { %14314 = sst [smem:[#allocation46_spill]] %s14276_s7 }
   0x7   :  { %14315 = sst [smem:[#allocation47_spill]] %s14278_s9 }
   0x8   :  { %14316 = sst [smem:[#allocation48_spill]] %s14280_s11 }
   0x9   :  { %14317 = sst [smem:[#allocation49_spill]] %s14281_s12 }
   0xa   :  { %14318 = sst [smem:[#allocation50_spill]] %s14284_s15 }
   0xb   :  { %20 = vsyncpa [#allocation4], 0 }
   0xc   :  { %22 = vsyncpa [#allocation4 + $0x1], 0 }
   0xd   :  { %23 = vsyncpa [#allocation7], 0 }
   0xe   :  { %25 = vsyncpa [#allocation7 + $0x1], 0 }
   0xf   :  { %26 = vsyncpa [#allocation10], 0 }
  0x10   :  { %28 = vsyncpa [#allocation10 + $0x1], 0 }
  0x11   :  { %29 = vsyncpa [#allocation13], 0 }
  0x12   :  { %30 = vsyncpa [#allocation16], 0 }
  0x13   :  { %31 = vsyncpa [#allocation19], 0 }
  0x14   :  { %32 = vsyncpa [#allocation22], 0 }
  0x15   :  { %33 = vsyncpa [#allocation25], 0 }
  0x16   :  { %34 = vsyncpa [#allocation5], 0  ;;  %s12134_s18 = smov 0   ;;  %s12136_s19 = smov 0  }
  0x17   :  { %s12138_s20 = smov 0   ;;  %s12140_s21 = smov 0  }
  0x18 LB: > { %14319 = sst [smem:[#allocation37_spill]] %s12020_s20  ;;  %s12026_s22 = smov [#allocation11]   ;;  %s12024_s21 = sphi %s12140_s21, %s14367_s21   ;;  %s12020_s20 = sphi %s12138_s20, %s14369_s20   ;;  %s12016_s19 = sphi %s12136_s19, %s14371_s19   ;;  %s12012_s18 = sphi %s12134_s18, %s14370_s18  }
  0x19   : > { %s414_s23 = sshll.u32 %s12026_s22, 4  ;;  %s12155_s24 = sadd.s32 4294967295, %s12024_s21   ;;  %s415_s23 = int_to_ptr.vmem [resolvable:$true] %s414_s23 }
  0x1a   : > { %p8413_p0 = scmp.ge.s32.totalorder %s12024_s21, 1  ;;  %p14288_p1 = scmp.eq.s32.totalorder %s12155_s24, 0 }
  0x1b   : > { %p401_p2 = scmp.lt.s32.totalorder %s12024_s21, 4  ;;  %s12027_s26 = smov [#allocation12]  }
  0x1c   : > { %s424_s27 = sshll.u32 %s12027_s26, 4  ;;  %s12028_s29 = smov [#allocation15]   ;;  %s12167_s27 = int_to_ptr.vmem [resolvable:$true] %s424_s27 }
  0x1d   : > { %p12161_p4 = pnand %p8413_p0, %p401_p2  ;;  %s448_s30 = sshll.u32 %s12028_s29, 4  ;;  %s12175_s30 = int_to_ptr.vmem [resolvable:$true] %s448_s30 }
  0x1e   : > { %s14323_s4 = sld [smem:[#allocation44_spill]] }
  0x1f   : > { %s14320_s25 = scalar_select %p12161_p4, 1, 0 }
  0x20   : > { %p10577_p5 = pneg %p12161_p4 }
  0x21   : > { %14321 = sst [smem:[#allocation38_spill]] %s14320_s25 }
  0x22   : > { %p12171_p6 = pnand %p10577_p5, %p14288_p1 }
  0x24   : > { %s14322_s28 = scalar_select %p12171_p6, 1, 0 }
  0x25   : > { %s11528_s22 = scalar_lea.hbm %s14323_s4, 64  ;;  %p12185_p8 = pneg %p12171_p6 }
  0x26   : > { %p11529_p7 = scmp.ne.s32.totalorder %s14323_s4, %s11528_s22  ;;  %p11535_p11 = scmp.lt.u32.totalorder %s11528_s22, %s14323_s4 }
  0x27   : > { %s14324_s26 = scalar_select %p12185_p8, 1, 0 }
  0x28   : > { %p11531_p9 = pnand %p12185_p8, %p11529_p7 }
  0x2a   : > { %p11532_p10 = pneg %p11531_p9 }
  0x2c   : > { %p11537_p12 = pnand %p11535_p11, %p11532_p10 }
  0x2e   : > { %11540 = shalt.err (!%p11537_p12)
}
  0x2f   : > { %s11541_s16 = scalar_lea.vmem %s415_s23, 64  ;;  %p11549_p5 = scmp.lt.s32.totalorder %s415_s23, %s415_s23 }
  0x30   : > { %p11542_p13 = scmp.ne.s32.totalorder %s415_s23, %s11541_s16  ;;  %p11550_p3 = scmp.lt.s32.totalorder %s11541_s16, %s11541_s16 }
  0x32   : > { %p11544_p0 = pnand %p11542_p13, %p12185_p8  ;;  %p11551_p1 = por %p11550_p3, %p11549_p5 }
  0x34   : > { %p11545_p2 = pneg %p11544_p0 }
  0x36   : > { %p11552_p4 = pnand %p11551_p1, %p11545_p2 }
  0x38   : > { %11555 = shalt.err (!%p11552_p4)
}
  0x39   : > { %10580 = dma.hbm_to_vmem [thread:$0]  (!%p12171_p6), %s14323_s4, 64, %s415_s23, [#allocation10]  }
  0x3a   : > { %s14325_s5 = sld [smem:[#allocation45_spill]] }
  0x40   : > { %s11556_s22 = scalar_lea.hbm %s14325_s5, 4096 }
  0x41   : > { %p11557_p7 = scmp.ne.s32.totalorder %s14325_s5, %s11556_s22  ;;  %p11563_p1 = scmp.lt.u32.totalorder %s11556_s22, %s14325_s5 }
  0x43   : > { %p11559_p9 = pnand %p11557_p7, %p12185_p8 }
  0x45   : > { %p11560_p3 = pneg %p11559_p9 }
  0x47   : > { %p11565_p4 = pnand %p11563_p1, %p11560_p3 }
  0x49   : > { %11568 = shalt.err (!%p11565_p4)
}
  0x4a   : > { %s11569_s23 = scalar_lea.vmem %s12167_s27, 4096  ;;  %p11577_p13 = scmp.lt.s32.totalorder %s12167_s27, %s12167_s27 }
  0x4b   : > { %p11570_p10 = scmp.ne.s32.totalorder %s12167_s27, %s11569_s23  ;;  %p11578_p0 = scmp.lt.s32.totalorder %s11569_s23, %s11569_s23 }
  0x4d   : > { %p11572_p11 = pnand %p11570_p10, %p12185_p8  ;;  %p11579_p2 = por %p11578_p0, %p11577_p13 }
  0x4f   : > { %p11573_p12 = pneg %p11572_p11 }
  0x51   : > { %p11580_p5 = pnand %p11579_p2, %p11573_p12 }
  0x53   : > { %11583 = shalt.err (!%p11580_p5)
}
  0x54   : > { %s14292_s3 = smov 64   ;;  %s14293_s2 = smov 4  }
  0x55   : > { %10583 = dma.hbm_to_vmem [thread:$0]  (!%p12171_p6), %s14325_s5, 4096, %s12167_s27, [#allocation13], %s14292_s3, %s14292_s3, %s14293_s2  }
  0x56   : > { %s14326_s7 = sld [smem:[#allocation46_spill]] }
  0x5c   : > { %s11584_s22 = scalar_lea.hbm %s14326_s7, 1024 }
  0x5d   : > { %p11585_p7 = scmp.ne.s32.totalorder %s14326_s7, %s11584_s22  ;;  %p11591_p1 = scmp.lt.u32.totalorder %s11584_s22, %s14326_s7 }
  0x5f   : > { %p11587_p9 = pnand %p11585_p7, %p12185_p8 }
  0x61   : > { %p11588_p3 = pneg %p11587_p9 }
  0x63   : > { %p11593_p4 = pnand %p11591_p1, %p11588_p3 }
  0x65   : > { %11596 = shalt.err (!%p11593_p4)
}
  0x66   : > { %s11597_s27 = scalar_lea.vmem %s12175_s30, 1024  ;;  %p11605_p13 = scmp.lt.s32.totalorder %s12175_s30, %s12175_s30 }
  0x67   : > { %p11598_p10 = scmp.ne.s32.totalorder %s12175_s30, %s11597_s27  ;;  %p11606_p0 = scmp.lt.s32.totalorder %s11597_s27, %s11597_s27 }
  0x69   : > { %p11600_p11 = pnand %p11598_p10, %p12185_p8  ;;  %p11607_p2 = por %p11606_p0, %p11605_p13 }
  0x6b   : > { %p11601_p12 = pneg %p11600_p11 }
  0x6d   : > { %p11608_p5 = pnand %p11607_p2, %p11601_p12 }
  0x6f   : > { %11611 = shalt.err (!%p11608_p5)
}
  0x70   : > { %10589 = dma.hbm_to_vmem [thread:$0]  (!%p12171_p6), %s14326_s7, 1024, %s12175_s30, [#allocation16], %s14292_s3, %s14292_s3, %s14293_s2  }
  0x71   : > { %s12031_s15 = smov [#allocation18]   ;;  %s14327_s9 = sld [smem:[#allocation47_spill]] }
  0x72   : > { %s472_s25 = sshll.u32 %s12031_s15, 4  ;;  %s473_s25 = int_to_ptr.vmem [resolvable:$true] %s472_s25 }
  0x77   : > { %s11612_s29 = scalar_lea.hbm %s14327_s9, 30720 }
  0x78   : > { %p11613_p7 = scmp.ne.s32.totalorder %s14327_s9, %s11612_s29  ;;  %p11619_p1 = scmp.lt.u32.totalorder %s11612_s29, %s14327_s9 }
  0x7a   : > { %p11615_p9 = pnand %p11613_p7, %p12185_p8 }
  0x7c   : > { %p11616_p3 = pneg %p11615_p9 }
  0x7e   : > { %p11621_p4 = pnand %p11619_p1, %p11616_p3 }
  0x80   : > { %11624 = shalt.err (!%p11621_p4)
}
  0x81   : > { %s11625_s30 = scalar_lea.vmem %s473_s25, 30720  ;;  %p11633_p13 = scmp.lt.s32.totalorder %s473_s25, %s473_s25 }
  0x82   : > { %p11626_p10 = scmp.ne.s32.totalorder %s473_s25, %s11625_s30  ;;  %p11634_p0 = scmp.lt.s32.totalorder %s11625_s30, %s11625_s30 }
  0x84   : > { %p11628_p11 = pnand %p11626_p10, %p12185_p8  ;;  %p11635_p2 = por %p11634_p0, %p11633_p13 }
  0x86   : > { %p11629_p12 = pneg %p11628_p11 }
  0x88   : > { %p11636_p5 = pnand %p11635_p2, %p11629_p12 }
  0x8a   : > { %11639 = shalt.err (!%p11636_p5)
}
  0x8b   : > { %s12032_s4 = smov 1920   ;;  %s12033_s11 = smov 120  }
  0x8c   : > { %10595 = dma.hbm_to_vmem [thread:$0]  (!%p12171_p6), %s14327_s9, 30720, %s473_s25, [#allocation19], %s12032_s4, %s12032_s4, %s12033_s11  }
  0x8d   : > { %s12034_s17 = smov [#allocation21]   ;;  %s14328_s12 = sld [smem:[#allocation49_spill]] }
  0x8e   : > { %s500_s22 = sshll.u32 %s12034_s17, 4  ;;  %s501_s22 = int_to_ptr.vmem [resolvable:$true] %s500_s22 }
  0x93   : > { %s11640_s23 = scalar_lea.hbm %s14328_s12, 16 }
  0x94   : > { %p11641_p7 = scmp.ne.s32.totalorder %s14328_s12, %s11640_s23  ;;  %p11647_p1 = scmp.lt.u32.totalorder %s11640_s23, %s14328_s12 }
  0x96   : > { %p11643_p9 = pnand %p11641_p7, %p12185_p8 }
  0x98   : > { %p11644_p3 = pneg %p11643_p9 }
  0x9a   : > { %p11649_p4 = pnand %p11647_p1, %p11644_p3 }
  0x9c   : > { %11652 = shalt.err (!%p11649_p4)
}
  0x9d   : > { %s11653_s25 = scalar_lea.vmem %s501_s22, 16  ;;  %s11660_s4 = scalar_lea.vmem %s501_s22, 32 }
  0x9e   : > { %p11654_p10 = scmp.ne.s32.totalorder %s501_s22, %s11653_s25  ;;  %p11661_p13 = scmp.lt.s32.totalorder %s501_s22, %s501_s22 }
  0x9f   : > { %p11662_p0 = scmp.lt.s32.totalorder %s11660_s4, %s11653_s25 }
  0xa0   : > { %p11656_p11 = pnand %p11654_p10, %p12185_p8 }
  0xa1   : > { %p11663_p2 = por %p11662_p0, %p11661_p13 }
  0xa2   : > { %p11657_p12 = pneg %p11656_p11 }
  0xa4   : > { %p11664_p5 = pnand %p11663_p2, %p11657_p12 }
  0xa6   : > { %11667 = shalt.err (!%p11664_p5)
}
  0xa7   : > { %10601 = dma.hbm_to_vmem [thread:$0]  (!%p12171_p6), %s14328_s12, 16, %s501_s22, [#allocation22]  }
  0xa8   : > { %s12290_s3 = sadd.s32 1, %s12024_s21   ;;  %s47_s15 = sadd.s32 1, %s12020_s20 }
  0xa9   : > { %14329 = sst [smem:[#allocation39_spill]] %s12290_s3  ;;  %s44_s2 = ssub.s32 %s12024_s21, %s12290_s3 }
  0xaa   : > { %p45_p7 = scmp.eq.s32.totalorder %s44_s2, 0  ;;  %p54_p9 = scmp.ne.s32.totalorder %s12020_s20, %s12016_s19 }
  0xab   : > { %p55_p3 = scmp.eq.s32.totalorder %s12024_s21, 0  ;;  %p60_p1 = scmp.ne.s32.totalorder %s12016_s19, %s12012_s18 }
  0xac   : > { %s12301_s17 = scalar_select %p45_p7, %s12020_s20, %s47_s15  }
  0xad   : > { %p56_p4 = por %p55_p3, %p54_p9  ;;  %p14331_p10 = scmp.eq.s32.totalorder %s12155_s24, 0 }
  0xae   : > { %14330 = sst [smem:[#allocation40_spill]] %s12301_s17  ;;  %p10631_p12 = scmp.lt.s32.totalorder %s12024_s21, 3 }
  0xaf   : > { %p12305_p11 = por %p14331_p10, %p60_p1  ;;  %s12311_s22 = sand.u32 1, %s12020_s20  }
  0xb0   : > { %s14294_s16 = sshll.u32 %s12311_s22, 3  ;;  %s14295_s23 = sshll.u32 %s12024_s21, 7 }
  0xb1   : > { %s14332_s29 = scalar_select %p12305_p11, 1, 0 }
  0xb2   : > { %p12315_p13 = pnand %p10631_p12, %p56_p4  ;;  %s14296_s18 = sand.u32 1, %s12024_s21  }
  0xb3   : > { %s14334_s1 = sld [smem:[#allocation41_spill]]  ;;  %s558_s11 = scalar_lea.vmem [#allocation6], %s14294_s16 }
  0xb4   : > { %s14333_s27 = scalar_select %p12315_p13, 1, 0 }
  0xb5   : > { %s566_s5 = sshll.u32 %s558_s11, 4  ;;  %s12334_s15 = scalar_lea.sflag [#allocation7], %s14296_s18  ;;  %s12330_s5 = int_to_ptr.vmem [resolvable:$true] %s566_s5 }
  0xb6   : > { %p12340_p2 = pneg %p12315_p13 }
  0xb8   : > { %s14335_s30 = scalar_select %p12340_p2, 1, 0 }
  0xb9   : > { %s12325_s4 = scalar_lea.hbm %s14334_s1, %s14295_s23  ;;  %s11673_s11 = scalar_lea.hbm %s14334_s1, 384 }
  0xba   : > { %s11668_s7 = scalar_lea.hbm %s12325_s4, 128  ;;  %p11674_p9 = scmp.lt.u32.totalorder %s12325_s4, %s14334_s1 }
  0xbb   : > { %p11669_p0 = scmp.ne.s32.totalorder %s12325_s4, %s11668_s7  ;;  %p11675_p3 = scmp.lt.u32.totalorder %s11673_s11, %s11668_s7 }
  0xbc   : > { %p11677_p4 = scmp.lt.u32.totalorder %s11668_s7, %s12325_s4 }
  0xbd   : > { %p11671_p5 = pnand %p12340_p2, %p11669_p0  ;;  %p11676_p1 = por %p11675_p3, %p11674_p9 }
  0xbf   : > { %p11672_p7 = pneg %p11671_p5  ;;  %p11678_p10 = por %p11677_p4, %p11676_p1 }
  0xc1   : > { %p11679_p12 = pnand %p11678_p10, %p11672_p7 }
  0xc3   : > { %11682 = shalt.err (!%p11679_p12)
}
  0xc4   : > { %s11683_s18 = scalar_lea.vmem %s12330_s5, 128  ;;  %s12035_s16 = smov [#allocation6]  }
  0xc5   : > { %p11684_p0 = scmp.ne.s32.totalorder %s12330_s5, %s11683_s18  ;;  %s11688_s25 = sshll.u32 %s12035_s16, 4  ;;  %s11689_s25 = int_to_ptr.vmem [resolvable:$false] %s11688_s25 }
  0xc6   : > { %s11690_s23 = scalar_lea.vmem %s11689_s25, 256  ;;  %p11691_p6 = scmp.lt.s32.totalorder %s12330_s5, %s11689_s25 }
  0xc7   : > { %p11686_p5 = pnand %p11684_p0, %p12340_p2  ;;  %p11692_p8 = scmp.lt.s32.totalorder %s11690_s23, %s11683_s18 }
  0xc9   : > { %p11687_p11 = pneg %p11686_p5  ;;  %p11693_p9 = por %p11692_p8, %p11691_p6 }
  0xcb   : > { %p11694_p3 = pnand %p11693_p9, %p11687_p11 }
  0xcd   : > { %11697 = shalt.err (!%p11694_p3)
}
  0xce   : > { %10614 = dma.hbm_to_vmem [thread:$0]  (!%p12315_p13), %s12325_s4, 128, %s12330_s5, %s12334_s15  }
  0xcf   : > { %s14336_s7 = sshll.u32 %s12311_s22, 10  ;;  %s12036_s23 = smov [#allocation14]  }
  0xd0   : > { %s577_s2 = scalar_lea.vmem [#allocation8], %s14336_s7  ;;  %s14337_s16 = smov %s14336_s7 }
  0xd1   : > { %s585_s11 = sshll.u32 %s577_s2, 4  ;;  %s599_s25 = scalar_lea.vmem [#allocation9], %s14337_s16  ;;  %s12366_s11 = int_to_ptr.vmem [resolvable:$true] %s585_s11 }
  0xd2   : > { %s607_s18 = sshll.u32 %s599_s25, 4  ;;  %s438_s1 = sshll.u32 %s12036_s23, 4  ;;  %s12370_s18 = int_to_ptr.vmem [resolvable:$true] %s607_s18  ;;  %s439_s1 = int_to_ptr.vmem [resolvable:$true] %s438_s1 }
  0xd3   : > { %s11698_s17 = scalar_lea.hbm %s14275_s6, 16  ;;  %p14338_p8 = scmp.ne.s32.totalorder %s14324_s26, 0 }
  0xd4   : > { %p11699_p6 = scmp.ne.s32.totalorder %s14275_s6, %s11698_s17  ;;  %p11705_p1 = scmp.lt.u32.totalorder %s11698_s17, %s14275_s6 }
  0xd6   : > { %p11701_p11 = pnand %p11699_p6, %p14338_p8 }
  0xd8   : > { %p11702_p7 = pneg %p11701_p11 }
  0xda   : > { %p11707_p4 = pnand %p11705_p1, %p11702_p7 }
  0xdc   : > { %11710 = shalt.err (!%p11707_p4)
}
  0xdd   : > { %s11711_s7 = scalar_lea.vmem %s439_s1, 16  ;;  %s11718_s9 = scalar_lea.vmem %s439_s1, 32 }
  0xde   : > { %p11712_p10 = scmp.ne.s32.totalorder %s439_s1, %s11711_s7  ;;  %p11719_p5 = scmp.lt.s32.totalorder %s439_s1, %s439_s1 }
  0xdf   : > { %p11720_p9 = scmp.lt.s32.totalorder %s11718_s9, %s11711_s7 }
  0xe0   : > { %p11714_p12 = pnand %p11712_p10, %p14338_p8 }
  0xe1   : > { %p11721_p3 = por %p11720_p9, %p11719_p5 }
  0xe2   : > { %p11715_p0 = pneg %p11714_p12 }
  0xe4   : > { %p11722_p13 = pnand %p11721_p3, %p11715_p0 }
  0xe6   : > { %11725 = shalt.err (!%p11722_p13)
}
  0xe7   : > { %p14339_p6 = scmp.ne.s32.totalorder %s14322_s28, 0  ;;  %s12037_s3 = smov [#allocation17]  }
  0xe8   : > { %s462_s17 = sshll.u32 %s12037_s3, 4  ;;  %s12038_s2 = smov [#allocation20]   ;;  %s463_s17 = int_to_ptr.vmem [resolvable:$true] %s462_s17 }
  0xe9   : > { %10586 = dma.hbm_to_vmem [thread:$0]  (!%p14339_p6), %s14275_s6, 16, %s439_s1, [#allocation13]  }
  0xea   : > { %s486_s16 = sshll.u32 %s12038_s2, 4  ;;  %s11726_s4 = scalar_lea.hbm %s14277_s8, 16  ;;  %s487_s16 = int_to_ptr.vmem [resolvable:$true] %s486_s16 }
  0xeb   : > { %p11727_p13 = scmp.ne.s32.totalorder %s14277_s8, %s11726_s4  ;;  %p11733_p1 = scmp.lt.u32.totalorder %s11726_s4, %s14277_s8 }
  0xed   : > { %p11729_p11 = pnand %p11727_p13, %p14338_p8 }
  0xef   : > { %p11730_p7 = pneg %p11729_p11 }
  0xf1   : > { %p11735_p4 = pnand %p11733_p1, %p11730_p7 }
  0xf3   : > { %11738 = shalt.err (!%p11735_p4)
}
  0xf4   : > { %s11739_s1 = scalar_lea.vmem %s463_s17, 16  ;;  %s11746_s20 = scalar_lea.vmem %s463_s17, 32 }
  0xf5   : > { %p11740_p10 = scmp.ne.s32.totalorder %s463_s17, %s11739_s1  ;;  %p11747_p5 = scmp.lt.s32.totalorder %s463_s17, %s463_s17 }
  0xf6   : > { %p11748_p9 = scmp.lt.s32.totalorder %s11746_s20, %s11739_s1 }
  0xf7   : > { %p11742_p12 = pnand %p11740_p10, %p14338_p8 }
  0xf8   : > { %p11749_p3 = por %p11748_p9, %p11747_p5 }
  0xf9   : > { %p11743_p0 = pneg %p11742_p12 }
  0xfb   : > { %p11750_p2 = pnand %p11749_p3, %p11743_p0 }
  0xfd   : > { %11753 = shalt.err (!%p11750_p2)
}
  0xfe   : > { %10592 = dma.hbm_to_vmem [thread:$0]  (!%p14339_p6), %s14277_s8, 16, %s463_s17, [#allocation16]  }
  0xff   : > { %s11754_s4 = scalar_lea.hbm %s14279_s10, 480 }
 0x100   : > { %p11755_p13 = scmp.ne.s32.totalorder %s14279_s10, %s11754_s4  ;;  %p11761_p2 = scmp.lt.u32.totalorder %s11754_s4, %s14279_s10 }
 0x102   : > { %p11757_p11 = pnand %p11755_p13, %p14338_p8 }
 0x104   : > { %p11758_p7 = pneg %p11757_p11 }
 0x106   : > { %p11763_p1 = pnand %p11761_p2, %p11758_p7 }
 0x108   : > { %11766 = shalt.err (!%p11763_p1)
}
 0x109   : > { %s11767_s1 = scalar_lea.vmem %s487_s16, 480  ;;  %p11775_p0 = scmp.lt.s32.totalorder %s487_s16, %s487_s16 }
 0x10a   : > { %p11768_p4 = scmp.ne.s32.totalorder %s487_s16, %s11767_s1  ;;  %p11776_p5 = scmp.lt.s32.totalorder %s11767_s1, %s11767_s1 }
 0x10c   : > { %p11770_p10 = pnand %p11768_p4, %p14338_p8  ;;  %p11777_p9 = por %p11776_p5, %p11775_p0 }
 0x10e   : > { %p11771_p12 = pneg %p11770_p10 }
 0x110   : > { %p11778_p3 = pnand %p11777_p9, %p11771_p12 }
 0x112   : > { %11781 = shalt.err (!%p11778_p3)
}
 0x113   : > { %10598 = dma.hbm_to_vmem [thread:$0]  (!%p14339_p6), %s14279_s10, 480, %s487_s16, [#allocation19]  }
 0x114   : > { %s12039_s3 = smov [#allocation23]   ;;  %s12040_s25 = smov [#allocation24]  }
 0x115   : > { %s510_s2 = sshll.u32 %s12039_s3, 4  ;;  %s524_s23 = sshll.u32 %s12040_s25, 4  ;;  %s511_s2 = int_to_ptr.vmem [resolvable:$true] %s510_s2  ;;  %s525_s23 = int_to_ptr.vmem [resolvable:$true] %s524_s23 }
 0x116   : > { %s11782_s7 = scalar_lea.hbm %s14282_s13, 512 }
 0x117   : > { %p11783_p13 = scmp.ne.s32.totalorder %s14282_s13, %s11782_s7  ;;  %p11789_p2 = scmp.lt.u32.totalorder %s11782_s7, %s14282_s13 }
 0x119   : > { %p11785_p11 = pnand %p11783_p13, %p14338_p8 }
 0x11b   : > { %p11786_p7 = pneg %p11785_p11 }
 0x11d   : > { %p11791_p1 = pnand %p11789_p2, %p11786_p7 }
 0x11f   : > { %11794 = shalt.err (!%p11791_p1)
}
 0x120   : > { %s11795_s16 = scalar_lea.vmem %s511_s2, 512  ;;  %p11803_p0 = scmp.lt.s32.totalorder %s511_s2, %s511_s2 }
 0x121   : > { %p11796_p4 = scmp.ne.s32.totalorder %s511_s2, %s11795_s16  ;;  %p11804_p5 = scmp.lt.s32.totalorder %s11795_s16, %s11795_s16 }
 0x123   : > { %p11798_p10 = pnand %p11796_p4, %p14338_p8  ;;  %p11805_p9 = por %p11804_p5, %p11803_p0 }
 0x125   : > { %p11799_p12 = pneg %p11798_p10 }
 0x127   : > { %p11806_p3 = pnand %p11805_p9, %p11799_p12 }
 0x129   : > { %11809 = shalt.err (!%p11806_p3)
}
 0x12a   : > { %s14340_s20 = smov 4   ;;  %s14341_s3 = smov 64  }
 0x12b   : > { %10604 = dma.hbm_to_vmem [thread:$0]  (!%p14339_p6), %s14282_s13, 512, %s511_s2, [#allocation22], %s14341_s3, %s14341_s3, %s14340_s20  }
 0x12c   : > { %s11810_s9 = scalar_lea.hbm %s14283_s14, 16 }
 0x12d   : > { %p11811_p13 = scmp.ne.s32.totalorder %s14283_s14, %s11810_s9  ;;  %p11817_p2 = scmp.lt.u32.totalorder %s11810_s9, %s14283_s14 }
 0x12f   : > { %p11813_p11 = pnand %p11811_p13, %p14338_p8 }
 0x131   : > { %p11814_p7 = pneg %p11813_p11 }
 0x133   : > { %p11819_p1 = pnand %p11817_p2, %p11814_p7 }
 0x135   : > { %11822 = shalt.err (!%p11819_p1)
}
 0x136   : > { %s11823_s25 = scalar_lea.vmem %s525_s23, 16  ;;  %s11830_s2 = scalar_lea.vmem %s525_s23, 32 }
 0x137   : > { %p11824_p4 = scmp.ne.s32.totalorder %s525_s23, %s11823_s25  ;;  %p11831_p0 = scmp.lt.s32.totalorder %s525_s23, %s525_s23 }
 0x138   : > { %p11832_p5 = scmp.lt.s32.totalorder %s11830_s2, %s11823_s25 }
 0x139   : > { %p11826_p10 = pnand %p11824_p4, %p14338_p8 }
 0x13a   : > { %p11833_p9 = por %p11832_p5, %p11831_p0 }
 0x13b   : > { %p11827_p12 = pneg %p11826_p10 }
 0x13d   : > { %p11834_p3 = pnand %p11833_p9, %p11827_p12 }
 0x13f   : > { %11837 = shalt.err (!%p11834_p3)
}
 0x140   : > { %10607 = dma.hbm_to_vmem [thread:$0]  (!%p14339_p6), %s14283_s14, 16, %s525_s23, [#allocation25]  }
 0x141   : > { %s14342_s26 = sshll.u32 %s12024_s21, 7  ;;  %s14343_s9 = sshll.u32 %s12311_s22, 3 }
 0x142   : > { %s12470_s7 = scalar_lea.hbm %s14269_s0, %s14342_s26  ;;  %s539_s28 = scalar_lea.vmem [#allocation3], %s14343_s9 }
 0x143   : > { %s547_s12 = sshll.u32 %s539_s28, 4  ;;  %s9045_s1 = sshll.u32 %s12024_s21, 14  ;;  %s12475_s12 = int_to_ptr.vmem [resolvable:$true] %s547_s12 }
 0x144   : > { %s14344_s23 = sld [smem:[#allocation42_spill]]  ;;  %s536_s2 = scalar_lea.sflag [#allocation4], %s12311_s22 }
 0x145   : > { %s11838_s20 = scalar_lea.hbm %s12470_s7, 128  ;;  %p14345_p6 = scmp.ne.s32.totalorder %s14335_s30, 0 }
 0x146   : > { %p11839_p8 = scmp.ne.s32.totalorder %s12470_s7, %s11838_s20  ;;  %s11843_s4 = scalar_lea.hbm %s14269_s0, 384 }
 0x147   : > { %p11844_p7 = scmp.lt.u32.totalorder %s12470_s7, %s14269_s0  ;;  %p11845_p2 = scmp.lt.u32.totalorder %s11843_s4, %s11838_s20 }
 0x148   : > { %p11841_p13 = pnand %p11839_p8, %p14345_p6  ;;  %p11847_p4 = scmp.lt.u32.totalorder %s11838_s20, %s12470_s7 }
 0x149   : > { %p11846_p1 = por %p11845_p2, %p11844_p7 }
 0x14a   : > { %s12482_s25 = scalar_lea.hbm %s14344_s23, %s9045_s1  ;;  %p11842_p11 = pneg %p11841_p13 }
 0x14b   : > { %p11848_p10 = por %p11847_p4, %p11846_p1 }
 0x14d   : > { %p11849_p12 = pnand %p11848_p10, %p11842_p11 }
 0x14f   : > { %11852 = shalt.err (!%p11849_p12)
}
 0x150   : > { %s11853_s22 = scalar_lea.vmem %s12475_s12, 128  ;;  %s12041_s28 = smov [#allocation3]  }
 0x151   : > { %p11854_p0 = scmp.ne.s32.totalorder %s12475_s12, %s11853_s22  ;;  %s11858_s17 = sshll.u32 %s12041_s28, 4  ;;  %s11859_s17 = int_to_ptr.vmem [resolvable:$false] %s11858_s17 }
 0x152   : > { %s11860_s16 = scalar_lea.vmem %s11859_s17, 256  ;;  %p11861_p3 = scmp.lt.s32.totalorder %s12475_s12, %s11859_s17 }
 0x153   : > { %p11856_p5 = pnand %p11854_p0, %p14345_p6  ;;  %p11862_p8 = scmp.lt.s32.totalorder %s11860_s16, %s11853_s22 }
 0x155   : > { %p11857_p9 = pneg %p11856_p5  ;;  %p11863_p13 = por %p11862_p8, %p11861_p3 }
 0x157   : > { %p11864_p7 = pnand %p11863_p13, %p11857_p9 }
 0x159   : > { %11867 = shalt.err (!%p11864_p7)
}
 0x15a   : > { %p14346_p11 = scmp.ne.s32.totalorder %s14333_s27, 0  ;;  %s11868_s20 = scalar_lea.hbm %s12482_s25, 16384 }
 0x15b   : > { %p11869_p2 = scmp.ne.s32.totalorder %s12482_s25, %s11868_s20  ;;  %s11873_s4 = scalar_lea.hbm %s14344_s23, 49152 }
 0x15c   : > { %10611 = dma.hbm_to_vmem [thread:$0]  (!%p14346_p11), %s12470_s7, 128, %s12475_s12, %s536_s2  }
 0x15d   : > { %p11871_p1 = pnand %p11869_p2, %p14345_p6  ;;  %p11874_p10 = scmp.lt.u32.totalorder %s12482_s25, %s14344_s23 }
 0x15e   : > { %p11875_p12 = scmp.lt.u32.totalorder %s11873_s4, %s11868_s20  ;;  %p11877_p5 = scmp.lt.u32.totalorder %s11868_s20, %s12482_s25 }
 0x15f   : > { %p11872_p4 = pneg %p11871_p1 }
 0x160   : > { %p11876_p0 = por %p11875_p12, %p11874_p10 }
 0x162   : > { %p11878_p9 = por %p11877_p5, %p11876_p0 }
 0x164   : > { %p11879_p3 = pnand %p11878_p9, %p11872_p4 }
 0x166   : > { %11882 = shalt.err (!%p11879_p3)
}
 0x167   : > { %s11883_s7 = scalar_lea.vmem %s12366_s11, 16384  ;;  %s12042_s12 = smov [#allocation8]  }
 0x168   : > { %p11884_p8 = scmp.ne.s32.totalorder %s12366_s11, %s11883_s7  ;;  %s11888_s2 = sshll.u32 %s12042_s12, 4  ;;  %s11889_s2 = int_to_ptr.vmem [resolvable:$false] %s11888_s2 }
 0x169   : > { %s11890_s22 = scalar_lea.vmem %s11889_s2, 32768  ;;  %p11891_p2 = scmp.lt.s32.totalorder %s12366_s11, %s11889_s2 }
 0x16a   : > { %p11886_p13 = pnand %p11884_p8, %p14345_p6  ;;  %p11892_p1 = scmp.lt.s32.totalorder %s11890_s22, %s11883_s7 }
 0x16c   : > { %p11887_p7 = pneg %p11886_p13  ;;  %p11893_p10 = por %p11892_p1, %p11891_p2 }
 0x16e   : > { %p11894_p12 = pnand %p11893_p10, %p11887_p7 }
 0x170   : > { %11897 = shalt.err (!%p11894_p12)
}
 0x171   : > { %s12043_s28 = smov 256   ;;  %s12044_s17 = smov 16  }
 0x172   : > { %10617 = dma.hbm_to_vmem [thread:$0]  (!%p14346_p11), %s12482_s25, 16384, %s12366_s11, %s12334_s15, %s12043_s28, %s12043_s28, %s12044_s17  }
 0x173   : > { %s14347_s3 = sld [smem:[#allocation43_spill]]  ;;  %s14348_s4 = sand.u32 1, %s12024_s21  }
 0x174   : > { %s12540_s5 = scalar_lea.sflag [#allocation10], %s14348_s4 }
 0x179   : > { %s12536_s26 = scalar_lea.hbm %s14347_s3, %s9045_s1  ;;  %s11903_s11 = scalar_lea.hbm %s14347_s3, 49152 }
 0x17a   : > { %s11898_s9 = scalar_lea.hbm %s12536_s26, 16384  ;;  %p11904_p9 = scmp.lt.u32.totalorder %s12536_s26, %s14347_s3 }
 0x17b   : > { %p11899_p4 = scmp.ne.s32.totalorder %s12536_s26, %s11898_s9  ;;  %p11905_p3 = scmp.lt.u32.totalorder %s11903_s11, %s11898_s9 }
 0x17c   : > { %p11907_p13 = scmp.lt.u32.totalorder %s11898_s9, %s12536_s26 }
 0x17d   : > { %p11901_p0 = pnand %p11899_p4, %p14345_p6  ;;  %p11906_p8 = por %p11905_p3, %p11904_p9 }
 0x17f   : > { %p11902_p5 = pneg %p11901_p0  ;;  %p11908_p7 = por %p11907_p13, %p11906_p8 }
 0x181   : > { %p11909_p2 = pnand %p11908_p7, %p11902_p5 }
 0x183   : > { %11912 = shalt.err (!%p11909_p2)
}
 0x184   : > { %s11913_s21 = scalar_lea.vmem %s12370_s18, 16384  ;;  %s12045_s1 = smov [#allocation9]  }
 0x185   : > { %p11914_p1 = scmp.ne.s32.totalorder %s12370_s18, %s11913_s21  ;;  %s11918_s2 = sshll.u32 %s12045_s1, 4  ;;  %s11919_s2 = int_to_ptr.vmem [resolvable:$false] %s11918_s2 }
 0x186   : > { %s11920_s22 = scalar_lea.vmem %s11919_s2, 32768  ;;  %p11921_p4 = scmp.lt.s32.totalorder %s12370_s18, %s11919_s2 }
 0x187   : > { %p11916_p10 = pnand %p11914_p1, %p14345_p6  ;;  %p11922_p0 = scmp.lt.s32.totalorder %s11920_s22, %s11913_s21 }
 0x189   : > { %p11917_p12 = pneg %p11916_p10  ;;  %p11923_p9 = por %p11922_p0, %p11921_p4 }
 0x18b   : > { %p11924_p3 = pnand %p11923_p9, %p11917_p12 }
 0x18d   : > { %11927 = shalt.err (!%p11924_p3)
}
 0x18e   : > { %10620 = dma.hbm_to_vmem [thread:$0]  (!%p14346_p11), %s12536_s26, 16384, %s12370_s18, %s12540_s5, %s12043_s28, %s12043_s28, %s12044_s17  }
 0x18f   : > { %s14349_s30 = sld [smem:[#allocation38_spill]] }
 0x195   : > { %p14350_p6 = scmp.ne.s32.totalorder %s14349_s30, 0 }
 0x196   : > { %s621_s16 = sand.u32 (!%p14350_p6), 1, %s12016_s19   ;;  %p14351_p5 = scmp.ne.s32.totalorder (!%p14350_p6), %s14332_s29, 0 }
 0x197   : > { %619 = sbr.rel (%p14350_p6) target bundleno = 9327 (0x246f), region = 80  ;;  %s8440_s20 = sshll.u32 (!%p14350_p6), %s621_s16, 3 }
 0x198   : > { %s622_s4 = scalar_lea.sflag (!%p14350_p6), [#allocation4], %s621_s16  ;;  %s12570_s9 = scalar_lea.vmem (!%p14350_p6), [#allocation3], %s8440_s20 }
 0x19e   : > { %11971 = dma.done.wait (%p14351_p5), %s622_s4, 128  }
 0x19f   : > { %11973 = vsyncadd (%p14351_p5), %s622_s4, 4294967168  ;;  %s630_s27 = sand.u32 1, %s12155_s24   ;;  %s12577_s18 = scalar_lea.vmem [#allocation6], %s8440_s20 }
 0x1a0   : > { %s631_s7 = scalar_lea.sflag [#allocation7], %s630_s27 }
 0x1a1   : > { %11975 = dma.done.wait (%p14351_p5), %s631_s7, 16512  }
 0x1a2   : > { %11977 = vsyncadd (%p14351_p5), %s631_s7, 4294950784  ;;  %s8442_s28 = sshll.u32 %s621_s16, 10  ;;  %s649_s26 = scalar_lea.sflag [#allocation10], %s630_s27 }
 0x1a3   : > { %s12583_s17 = scalar_lea.vmem [#allocation8], %s8442_s28  ;;  %s12585_s5 = scalar_lea.vmem [#allocation9], %s8442_s28 }
 0x1a4   : > { %11979 = dma.done.wait (%p14351_p5), %s649_s26, 16384  }
 0x1a5   : > { %11981 = vsyncadd (%p14351_p5), %s649_s26, 4294950912  ;;  %p14352_p11 = scmp.eq.s32.totalorder %s12155_s24, 0 }
 0x1a7   : > { %11983 = dma.done.wait (%p14352_p11), [#allocation10], 64   ;;  %p14353_p8 = pmov %p14352_p11 }
 0x1a9   : > { %11985 = vsyncadd (%p14353_p8), [#allocation10], 4294967232  ;;  %p14354_p13 = pmov %p14353_p8 }
 0x1aa   : > { %p14355_p7 = pmov %p14353_p8 }
 0x1ab   : > { %11987 = dma.done.wait (%p14354_p13), [#allocation13], 4112  }
 0x1ac   : > { %11989 = vsyncadd (%p14355_p7), [#allocation13], 4294963184  ;;  %p14356_p2 = pmov %p14355_p7 }
 0x1ae   : > { %11991 = dma.done.wait (%p14356_p2), [#allocation16], 1040   ;;  %p14357_p1 = pmov %p14356_p2 }
 0x1b0   : > { %11993 = vsyncadd (%p14357_p1), [#allocation16], 4294966256  ;;  %p14358_p10 = pmov %p14357_p1 }
 0x1b1   : > { %p14359_p12 = pmov %p14357_p1 }
 0x1b2   : > { %11995 = dma.done.wait (%p14358_p10), [#allocation19], 31200  }
 0x1b3   : > { %11997 = vsyncadd (%p14359_p12), [#allocation19], 4294936096  ;;  %p14360_p4 = pmov %p14357_p1 }
 0x1b4   : > { %p14361_p0 = pmov %p14357_p1 }
 0x1b5   : > { %11999 = dma.done.wait (%p14360_p4), [#allocation22], 528  }
 0x1b6   : > { %12001 = vsyncadd (%p14361_p0), [#allocation22], 4294966768  ;;  %p14362_p9 = pmov %p14361_p0 }
 0x1b7   : > { %p14363_p3 = pmov %p14361_p0 }
 0x1b8   : > { %12003 = dma.done.wait (%p14362_p9), [#allocation25], 16  }
 0x1b9   : > { %12005 = vsyncadd (%p14363_p3), [#allocation25], 4294967280  ;;  %p14364_p6 = scmp.ne.s32.totalorder %s12155_s24, 0 }
 0x1ba   : > { %v12046_v0 = vmov (!%p14364_p6), 0.0  }
 0x1bb   : > { %757 = sbr.rel (%p14364_p6) target bundleno = 450 (0x1c2), region = 140  ;;  %758 = vst [vmem:[#allocation2] sm:$0xff] (!%p14364_p6), %v12046_v0 }
 0x1c2 PF: > { %v10700_v1 = vld [vmem:[%s12585_s5 + $0x4] ss:$16 sps:$4 sm:$0xff]   ;;  %v10702_v2 = vld [vmem:[%s12585_s5 + $0xc] ss:$16 sps:$4 sm:$0xff]   ;;  %v10704_v3 = vld [vmem:[%s12585_s5] ss:$16 sps:$4 sm:$0xff]   ;;  %v766_v39 = vlaneseq }
 0x1c3   : > { %1710 = vmatprep.subr.bf16.mxu0 %v10700_v1  ;;  %v10705_v4 = vld [vmem:[%s12585_s5 + $0x8] ss:$16 sps:$4 sm:$0xff]   ;;  %1792 = vmatprep.subr.bf16.mxu1 %v10702_v2  ;;  %v10706_v5 = vld [vmem:[%s12585_s5 + $0x24] ss:$16 sps:$4 sm:$0xff]   ;;  %v10708_v6 = vld [vmem:[%s12585_s5 + $0x2c] ss:$16 sps:$4 sm:$0xff]  }
 0x1c4   : > { %1711 = vmatpush1.bf16.msra.mxu0 %v10704_v3  ;;  %1793 = vmatpush1.bf16.msra.mxu1 %v10705_v4  ;;  %v10710_v7 = vld [vmem:[%s12585_s5 + $0x20] ss:$16 sps:$4 sm:$0xff]   ;;  %v10711_v8 = vld [vmem:[%s12585_s5 + $0x28] ss:$16 sps:$4 sm:$0xff]   ;;  %v10712_v9 = vld [vmem:[%s12585_s5 + $0x44] ss:$16 sps:$4 sm:$0xff]  }
 0x1c5   : > { %1712 = vmatprep.subr.bf16.mxu0 %v10706_v5  ;;  %1794 = vmatprep.subr.bf16.mxu1 %v10708_v6  ;;  %v10714_v10 = vld [vmem:[%s12585_s5 + $0x4c] ss:$16 sps:$4 sm:$0xff]   ;;  %v10716_v11 = vld [vmem:[%s12585_s5 + $0x40] ss:$16 sps:$4 sm:$0xff]   ;;  %v10717_v12 = vld [vmem:[%s12585_s5 + $0x48] ss:$16 sps:$4 sm:$0xff]  }
 0x1c6   : > { %v10718_v13 = vld [vmem:[%s12585_s5 + $0x64] ss:$16 sps:$4 sm:$0xff]   ;;  %v10720_v14 = vld [vmem:[%s12585_s5 + $0x6c] ss:$16 sps:$4 sm:$0xff]   ;;  %v10722_v15 = vld [vmem:[%s12585_s5 + $0x60] ss:$16 sps:$4 sm:$0xff]  }
 0x1c7   : > { %v10723_v16 = vld [vmem:[%s12585_s5 + $0x68] ss:$16 sps:$4 sm:$0xff]   ;;  %v10724_v17 = vld [vmem:[%s12585_s5 + $0x84] ss:$16 sps:$4 sm:$0xff]   ;;  %v10726_v18 = vld [vmem:[%s12585_s5 + $0x8c] ss:$16 sps:$4 sm:$0xff]  }
 0x1c8   : > { %1713 = vmatpush1.bf16.msra.mxu0 %v10710_v7  ;;  %1795 = vmatpush1.bf16.msra.mxu1 %v10711_v8  ;;  %v10728_v19 = vld [vmem:[%s12585_s5 + $0x80] ss:$16 sps:$4 sm:$0xff]   ;;  %v10729_v20 = vld [vmem:[%s12585_s5 + $0x88] ss:$16 sps:$4 sm:$0xff]   ;;  %v10730_v21 = vld [vmem:[%s12585_s5 + $0xa4] ss:$16 sps:$4 sm:$0xff]  }
 0x1c9   : > { %1714 = vmatprep.subr.bf16.mxu0 %v10712_v9  ;;  %1796 = vmatprep.subr.bf16.mxu1 %v10714_v10  ;;  %v10732_v22 = vld [vmem:[%s12585_s5 + $0xac] ss:$16 sps:$4 sm:$0xff]   ;;  %v10734_v23 = vld [vmem:[%s12585_s5 + $0xa0] ss:$16 sps:$4 sm:$0xff]   ;;  %v10735_v24 = vld [vmem:[%s12585_s5 + $0xa8] ss:$16 sps:$4 sm:$0xff]  }
 0x1ca   : > { %v10736_v25 = vld [vmem:[%s12585_s5 + $0xc4] ss:$16 sps:$4 sm:$0xff]   ;;  %v10738_v26 = vld [vmem:[%s12585_s5 + $0xcc] ss:$16 sps:$4 sm:$0xff]   ;;  %v10740_v27 = vld [vmem:[%s12585_s5 + $0xc0] ss:$16 sps:$4 sm:$0xff]  }
 0x1cb   : > { %v10741_v28 = vld [vmem:[%s12585_s5 + $0xc8] ss:$16 sps:$4 sm:$0xff]   ;;  %v10742_v29 = vld [vmem:[%s12585_s5 + $0xe4] ss:$16 sps:$4 sm:$0xff]   ;;  %v10744_v30 = vld [vmem:[%s12585_s5 + $0xec] ss:$16 sps:$4 sm:$0xff]  }
 0x1cc   : > { %1715 = vmatpush1.bf16.msra.mxu0 %v10716_v11  ;;  %1797 = vmatpush1.bf16.msra.mxu1 %v10717_v12  ;;  %v10746_v31 = vld [vmem:[%s12585_s5 + $0xe0] ss:$16 sps:$4 sm:$0xff]   ;;  %v10747_v32 = vld [vmem:[%s12585_s5 + $0xe8] ss:$16 sps:$4 sm:$0xff]   ;;  %v10748_v33 = vld [vmem:[%s12585_s5 + $0x104] ss:$16 sps:$4 sm:$0xff]  }
 0x1cd   : > { %1716 = vmatprep.subr.bf16.mxu0 %v10718_v13  ;;  %1798 = vmatprep.subr.bf16.mxu1 %v10720_v14  ;;  %v10750_v34 = vld [vmem:[%s12585_s5 + $0x10c] ss:$16 sps:$4 sm:$0xff]   ;;  %v10752_v35 = vld [vmem:[%s12585_s5 + $0x100] ss:$16 sps:$4 sm:$0xff]   ;;  %v10753_v36 = vld [vmem:[%s12585_s5 + $0x108] ss:$16 sps:$4 sm:$0xff]  }
 0x1ce   : > { %v12047_v37 = vmov 1983009808   ;;  %v10754_v40 = vld [vmem:[%s12585_s5 + $0x124] ss:$16 sps:$4 sm:$0xff]   ;;  %v10756_v41 = vld [vmem:[%s12585_s5 + $0x12c] ss:$16 sps:$4 sm:$0xff]  }
 0x1cf   : > { %v764_v38 = vunpack.c.l.s4 %v12047_v37  ;;  %v10758_v42 = vld [vmem:[%s12585_s5 + $0x120] ss:$16 sps:$4 sm:$0xff]   ;;  %v12656_v44 = vshrl.u32 %v766_v39, 7  ;;  %v10759_v45 = vld [vmem:[%s12585_s5 + $0x128] ss:$16 sps:$4 sm:$0xff]   ;;  %p8711_p5 = scmp.ne.s32.totalorder %s12155_s24, 2 }
 0x1d0   : > { %1717 = vmatpush1.bf16.msra.mxu0 %v10722_v15  ;;  %1799 = vmatpush1.bf16.msra.mxu1 %v10723_v16  ;;  %v10760_v46 = vld [vmem:[%s12585_s5 + $0x144] ss:$16 sps:$4 sm:$0xff]   ;;  %v10762_v47 = vld [vmem:[%s12585_s5 + $0x14c] ss:$16 sps:$4 sm:$0xff]   ;;  %v10764_v48 = vld [vmem:[%s12585_s5 + $0x140] ss:$16 sps:$4 sm:$0xff]  }
 0x1d1   : > { %1718 = vmatprep.subr.bf16.mxu0 %v10724_v17  ;;  %1800 = vmatprep.subr.bf16.mxu1 %v10726_v18  ;;  %v765_v43 = vunpack.c.0.s8 %v764_v38  ;;  %v10765_v49 = vld [vmem:[%s12585_s5 + $0x148] ss:$16 sps:$4 sm:$0xff]   ;;  %v10766_v51 = vld [vmem:[%s12585_s5 + $0x164] ss:$16 sps:$4 sm:$0xff]   ;;  %v10768_v52 = vld [vmem:[%s12585_s5 + $0x16c] ss:$16 sps:$4 sm:$0xff]  }
 0x1d2   : > { %v915_v53 = vld [vmem:[%s12577_s18] sm:$0xff]  ;;  %vm12049_vm0 = vmmov (!%p8711_p5), 0   ;;  %s14365_s11 = sld [smem:[#allocation48_spill]] (!%p8711_p5)  ;;  %vm5595_vm1 = vcmask (!%p8711_p5), 523264  }
 0x1d3   : > { %v12664_v50 = vsub.s32 %v765_v43, %v12656_v44  ;;  %v10770_v54 = vld [vmem:[%s12585_s5 + $0x160] ss:$16 sps:$4 sm:$0xff]   ;;  %v10771_v56 = vld [vmem:[%s12585_s5 + $0x168] ss:$16 sps:$4 sm:$0xff]   ;;  %v10772_v57 = vld [vmem:[%s12585_s5 + $0x184] ss:$16 sps:$4 sm:$0xff]   ;;  %v917_v5 = vcombine.high %v915_v53, %v915_v53 }
 0x1d4   : > { %1719 = vmatpush1.bf16.msra.mxu0 %v10728_v19  ;;  %1801 = vmatpush1.bf16.msra.mxu1 %v10729_v20  ;;  %v10774_v58 = vld [vmem:[%s12585_s5 + $0x18c] ss:$16 sps:$4 sm:$0xff]   ;;  %v10776_v60 = vld [vmem:[%s12585_s5 + $0x180] ss:$16 sps:$4 sm:$0xff]   ;;  %v10777_v62 = vld [vmem:[%s12585_s5 + $0x188] ss:$16 sps:$4 sm:$0xff]  }
 0x1d5   : > { %1720 = vmatprep.subr.bf16.mxu0 %v10730_v21  ;;  %1802 = vmatprep.subr.bf16.mxu1 %v10732_v22  ;;  %v924_v55 = vrot.slane %v915_v53, %v12664_v50  ;;  %v10778_v63 = vld [vmem:[%s12585_s5 + $0x1a4] ss:$16 sps:$4 sm:$0xff]   ;;  %v10780_v0 = vld [vmem:[%s12585_s5 + $0x1ac] ss:$16 sps:$4 sm:$0xff]   ;;  %v10782_v1 = vld [vmem:[%s12585_s5 + $0x1a0] ss:$16 sps:$4 sm:$0xff]   ;;  %v12687_v10 = vrot.slane %v917_v5, %v12664_v50 }
 0x1d6   : > { %v10783_v2 = vld [vmem:[%s12585_s5 + $0x1a8] ss:$16 sps:$4 sm:$0xff]   ;;  %v10784_v3 = vld [vmem:[%s12585_s5 + $0x1c4] ss:$16 sps:$4 sm:$0xff]   ;;  %v10786_v4 = vld [vmem:[%s12585_s5 + $0x1cc] ss:$16 sps:$4 sm:$0xff]  }
 0x1d7   : > { %v932_v59 = vcombine.high %v924_v55, %v924_v55  ;;  %v10788_v6 = vld [vmem:[%s12585_s5 + $0x1c0] ss:$16 sps:$4 sm:$0xff]   ;;  %v10789_v7 = vld [vmem:[%s12585_s5 + $0x1c8] ss:$16 sps:$4 sm:$0xff]   ;;  %v10790_v8 = vld [vmem:[%s12585_s5 + $0x1e4] ss:$16 sps:$4 sm:$0xff]   ;;  %v933_v15 = vcombine.high %v12687_v10, %v12687_v10  ;;  %v938_v17 = vpack.c.bf16 %v924_v55, %v924_v55 }
 0x1d8   : > { %1721 = vmatpush1.bf16.msra.mxu0 %v10734_v23  ;;  %1803 = vmatpush1.bf16.msra.mxu1 %v10735_v24  ;;  %v10792_v9 = vld [vmem:[%s12585_s5 + $0x1ec] ss:$16 sps:$4 sm:$0xff]   ;;  %v10794_v11 = vld [vmem:[%s12585_s5 + $0x1e0] ss:$16 sps:$4 sm:$0xff]   ;;  %v10795_v12 = vld [vmem:[%s12585_s5 + $0x1e8] ss:$16 sps:$4 sm:$0xff]  }
 0x1d9   : > { %1722 = vmatprep.subr.bf16.mxu0 %v10736_v25  ;;  %1804 = vmatprep.subr.bf16.mxu1 %v10738_v26  ;;  %v939_v61 = vpack.c.bf16 %v932_v59, %v932_v59  ;;  %v10799_v13 = vld [vmem:[%s12585_s5 + $0x204] ss:$16 sps:$4 sm:$0xff]   ;;  %v10802_v14 = vld [vmem:[%s12585_s5 + $0x20c] ss:$16 sps:$4 sm:$0xff]   ;;  %v10797_v16 = vld [vmem:[%s12585_s5 + $0x200] ss:$16 sps:$4 sm:$0xff]   ;;  %v941_v21 = vpack.c.bf16 %v933_v15, %v933_v15 }
 0x1da   : > { %v10800_v18 = vld [vmem:[%s12585_s5 + $0x208] ss:$16 sps:$4 sm:$0xff]   ;;  %v10805_v19 = vld [vmem:[%s12585_s5 + $0x224] ss:$16 sps:$4 sm:$0xff]   ;;  %v10808_v20 = vld [vmem:[%s12585_s5 + $0x22c] ss:$16 sps:$4 sm:$0xff]  }
 0x1db   : > { %1742 = vmatprep.mubr.bf16.mxu0 %v939_v61  ;;  %1824 = vmatprep.mubr.bf16.mxu1 %v939_v61  ;;  %v10803_v22 = vld [vmem:[%s12585_s5 + $0x220] ss:$16 sps:$4 sm:$0xff]   ;;  %v10806_v23 = vld [vmem:[%s12585_s5 + $0x228] ss:$16 sps:$4 sm:$0xff]   ;;  %v10811_v24 = vld [vmem:[%s12585_s5 + $0x244] ss:$16 sps:$4 sm:$0xff]  }
 0x1dc   : > { %1723 = vmatpush1.bf16.msra.mxu0 %v10740_v27  ;;  %1805 = vmatpush1.bf16.msra.mxu1 %v10741_v28  ;;  %v10814_v25 = vld [vmem:[%s12585_s5 + $0x24c] ss:$16 sps:$4 sm:$0xff]   ;;  %v10809_v26 = vld [vmem:[%s12585_s5 + $0x240] ss:$16 sps:$4 sm:$0xff]   ;;  %v10812_v27 = vld [vmem:[%s12585_s5 + $0x248] ss:$16 sps:$4 sm:$0xff]  }
 0x1dd   : > { %1724 = vmatprep.subr.bf16.mxu0 %v10742_v29  ;;  %1806 = vmatprep.subr.bf16.mxu1 %v10744_v30  ;;  %v10817_v28 = vld [vmem:[%s12585_s5 + $0x264] ss:$16 sps:$4 sm:$0xff]   ;;  %v10820_v29 = vld [vmem:[%s12585_s5 + $0x26c] ss:$16 sps:$4 sm:$0xff]   ;;  %v10815_v30 = vld [vmem:[%s12585_s5 + $0x260] ss:$16 sps:$4 sm:$0xff]  }
 0x1de   : > { %v10832_v37 = vld [vmem:[%s12585_s5 + $0x2ac] ss:$16 sps:$4 sm:$0xff]   ;;  %v10827_v38 = vld [vmem:[%s12585_s5 + $0x2a0] ss:$16 sps:$4 sm:$0xff]   ;;  %v10830_v39 = vld [vmem:[%s12585_s5 + $0x2a8] ss:$16 sps:$4 sm:$0xff]  }
 0x1df   : > { %v10836_v43 = vld [vmem:[%s12585_s5 + $0x2c8] ss:$16 sps:$4 sm:$0xff]   ;;  %v10856_v55 = vld [vmem:[%s12585_s5 + $0x32c] ss:$16 sps:$4 sm:$0xff]   ;;  %v10889_v15 = vld [vmem:[%s12585_s5 + $0x3e4] ss:$16 sps:$4 sm:$0xff]  }
 0x1e0   : > { %1725 = vmatpush1.bf16.msra.mxu0 %v10746_v31  ;;  %1807 = vmatpush1.bf16.msra.mxu1 %v10747_v32  ;;  %v10818_v31 = vld [vmem:[%s12585_s5 + $0x268] ss:$16 sps:$4 sm:$0xff]   ;;  %v10823_v32 = vld [vmem:[%s12585_s5 + $0x284] ss:$16 sps:$4 sm:$0xff]   ;;  %v10862_v59 = vld [vmem:[%s12585_s5 + $0x34c] ss:$16 sps:$4 sm:$0xff]  }
 0x1e1   : > { %1726 = vmatprep.subr.bf16.mxu0 %v10748_v33  ;;  %1808 = vmatprep.subr.bf16.mxu1 %v10750_v34  ;;  %v10826_v33 = vld [vmem:[%s12585_s5 + $0x28c] ss:$16 sps:$4 sm:$0xff]   ;;  %v10821_v34 = vld [vmem:[%s12585_s5 + $0x280] ss:$16 sps:$4 sm:$0xff]   ;;  %v10848_v53 = vld [vmem:[%s12585_s5 + $0x308] ss:$16 sps:$4 sm:$0xff]  }
 0x1e2   : > { %v10860_v61 = vld [vmem:[%s12585_s5 + $0x348] ss:$16 sps:$4 sm:$0xff]  }
 0x1e3   : > { %v10872_v5 = vld [vmem:[%s12585_s5 + $0x388] ss:$16 sps:$4 sm:$0xff]  }
 0x1e4   : > { %1727 = vmatpush1.bf16.msra.mxu0 %v10752_v35  ;;  %1809 = vmatpush1.bf16.msra.mxu1 %v10753_v36  ;;  %v10824_v35 = vld [vmem:[%s12585_s5 + $0x288] ss:$16 sps:$4 sm:$0xff]   ;;  %v10829_v36 = vld [vmem:[%s12585_s5 + $0x2a4] ss:$16 sps:$4 sm:$0xff]  }
 0x1e5   : > { %1728 = vmatprep.subr.bf16.mxu0 %v10754_v40  ;;  %1810 = vmatprep.subr.bf16.mxu1 %v10756_v41  ;;  %v10835_v40 = vld [vmem:[%s12585_s5 + $0x2c4] ss:$16 sps:$4 sm:$0xff]   ;;  %v10838_v41 = vld [vmem:[%s12585_s5 + $0x2cc] ss:$16 sps:$4 sm:$0xff]  }
 0x1e8   : > { %1729 = vmatpush1.bf16.msra.mxu0 %v10758_v42  ;;  %1811 = vmatpush1.bf16.msra.mxu1 %v10759_v45  ;;  %v10833_v42 = vld [vmem:[%s12585_s5 + $0x2c0] ss:$16 sps:$4 sm:$0xff]   ;;  %v10841_v45 = vld [vmem:[%s12585_s5 + $0x2e4] ss:$16 sps:$4 sm:$0xff]  }
 0x1e9   : > { %1730 = vmatprep.subr.bf16.mxu0 %v10760_v46  ;;  %1812 = vmatprep.subr.bf16.mxu1 %v10762_v47  ;;  %v10844_v46 = vld [vmem:[%s12585_s5 + $0x2ec] ss:$16 sps:$4 sm:$0xff]   ;;  %v10839_v47 = vld [vmem:[%s12585_s5 + $0x2e0] ss:$16 sps:$4 sm:$0xff]  }
 0x1ec   : > { %1731 = vmatpush1.bf16.msra.mxu0 %v10764_v48  ;;  %1813 = vmatpush1.bf16.msra.mxu1 %v10765_v49  ;;  %v10842_v48 = vld [vmem:[%s12585_s5 + $0x2e8] ss:$16 sps:$4 sm:$0xff]   ;;  %v10847_v49 = vld [vmem:[%s12585_s5 + $0x304] ss:$16 sps:$4 sm:$0xff]  }
 0x1ed   : > { %1732 = vmatprep.subr.bf16.mxu0 %v10766_v51  ;;  %1814 = vmatprep.subr.bf16.mxu1 %v10768_v52  ;;  %v10850_v51 = vld [vmem:[%s12585_s5 + $0x30c] ss:$16 sps:$4 sm:$0xff]   ;;  %v10845_v52 = vld [vmem:[%s12585_s5 + $0x300] ss:$16 sps:$4 sm:$0xff]  }
 0x1f0   : > { %1733 = vmatpush1.bf16.msra.mxu0 %v10770_v54  ;;  %1815 = vmatpush1.bf16.msra.mxu1 %v10771_v56  ;;  %v10853_v54 = vld [vmem:[%s12585_s5 + $0x324] ss:$16 sps:$4 sm:$0xff]   ;;  %v10851_v56 = vld [vmem:[%s12585_s5 + $0x320] ss:$16 sps:$4 sm:$0xff]  }
 0x1f1   : > { %1734 = vmatprep.subr.bf16.mxu0 %v10772_v57  ;;  %1816 = vmatprep.subr.bf16.mxu1 %v10774_v58  ;;  %v10854_v57 = vld [vmem:[%s12585_s5 + $0x328] ss:$16 sps:$4 sm:$0xff]   ;;  %v10859_v58 = vld [vmem:[%s12585_s5 + $0x344] ss:$16 sps:$4 sm:$0xff]  }
 0x1f4   : > { %1735 = vmatpush1.bf16.msra.mxu0 %v10776_v60  ;;  %1817 = vmatpush1.bf16.msra.mxu1 %v10777_v62  ;;  %v10857_v60 = vld [vmem:[%s12585_s5 + $0x340] ss:$16 sps:$4 sm:$0xff]   ;;  %v10865_v62 = vld [vmem:[%s12585_s5 + $0x364] ss:$16 sps:$4 sm:$0xff]  }
 0x1f5   : > { %1736 = vmatprep.subr.bf16.mxu0 %v10778_v63  ;;  %1818 = vmatprep.subr.bf16.mxu1 %v10780_v0  ;;  %v10868_v63 = vld [vmem:[%s12585_s5 + $0x36c] ss:$16 sps:$4 sm:$0xff]   ;;  %v10863_v0 = vld [vmem:[%s12585_s5 + $0x360] ss:$16 sps:$4 sm:$0xff]  }
 0x1f8   : > { %1737 = vmatpush1.bf16.msra.mxu0 %v10782_v1  ;;  %1819 = vmatpush1.bf16.msra.mxu1 %v10783_v2  ;;  %v10866_v1 = vld [vmem:[%s12585_s5 + $0x368] ss:$16 sps:$4 sm:$0xff]   ;;  %v10871_v2 = vld [vmem:[%s12585_s5 + $0x384] ss:$16 sps:$4 sm:$0xff]  }
 0x1f9   : > { %1738 = vmatprep.subr.bf16.mxu0 %v10784_v3  ;;  %1820 = vmatprep.subr.bf16.mxu1 %v10786_v4  ;;  %v10874_v3 = vld [vmem:[%s12585_s5 + $0x38c] ss:$16 sps:$4 sm:$0xff]   ;;  %v10869_v4 = vld [vmem:[%s12585_s5 + $0x380] ss:$16 sps:$4 sm:$0xff]  }
 0x1fc   : > { %1739 = vmatpush1.bf16.msra.mxu0 %v10788_v6  ;;  %1821 = vmatpush1.bf16.msra.mxu1 %v10789_v7  ;;  %v10877_v6 = vld [vmem:[%s12585_s5 + $0x3a4] ss:$16 sps:$4 sm:$0xff]   ;;  %v10880_v7 = vld [vmem:[%s12585_s5 + $0x3ac] ss:$16 sps:$4 sm:$0xff]  }
 0x1fd   : > { %1740 = vmatprep.subr.bf16.mxu0 %v10790_v8  ;;  %1822 = vmatprep.subr.bf16.mxu1 %v10792_v9  ;;  %v10875_v8 = vld [vmem:[%s12585_s5 + $0x3a0] ss:$16 sps:$4 sm:$0xff]   ;;  %v10878_v9 = vld [vmem:[%s12585_s5 + $0x3a8] ss:$16 sps:$4 sm:$0xff]  }
 0x200   : > { %1741 = vmatpush1.bf16.msra.mxu0 %v10794_v11  ;;  %1823 = vmatpush1.bf16.msra.mxu1 %v10795_v12  ;;  %v10883_v11 = vld [vmem:[%s12585_s5 + $0x3c4] ss:$16 sps:$4 sm:$0xff]   ;;  %v10886_v12 = vld [vmem:[%s12585_s5 + $0x3cc] ss:$16 sps:$4 sm:$0xff]  }
 0x201   : > { %1751 = vmatprep.subr.bf16.mxu0 %v10799_v13  ;;  %1833 = vmatprep.subr.bf16.mxu1 %v10802_v14  ;;  %v10881_v13 = vld [vmem:[%s12585_s5 + $0x3c0] ss:$16 sps:$4 sm:$0xff]   ;;  %v10884_v14 = vld [vmem:[%s12585_s5 + $0x3c8] ss:$16 sps:$4 sm:$0xff]  }
 0x203   : > { %1743 = vmatmul.mubr.bf16.vlgmr.msra.gmra.mrb[0].mxu0 %v938_v17  ;;  %1825 = vmatmul.mubr.bf16.vlgmr.msra.gmra.mrb[0].mxu1 %v938_v17  ;;  %v10887_v17 = vld [vmem:[%s12585_s5 + $0x3e0] ss:$16 sps:$4 sm:$0xff]  }
 0x204   : > { %1752 = vmatpush1.bf16.msra.mxu0 %v10797_v16  ;;  %1834 = vmatpush1.bf16.msra.mxu1 %v10800_v18  ;;  %v10892_v16 = vld [vmem:[%s12585_s5 + $0x3ec] ss:$16 sps:$4 sm:$0xff]   ;;  %v10890_v18 = vld [vmem:[%s12585_s5 + $0x3e8] ss:$16 sps:$4 sm:$0xff]  }
 0x205   : > { %1753 = vmatprep.subr.bf16.mxu0 %v10805_v19  ;;  %1835 = vmatprep.subr.bf16.mxu1 %v10808_v20  ;;  %v10895_v19 = vld [vmem:[%s12583_s17 + $0x4] ss:$16 sps:$4 sm:$0xff]   ;;  %v10898_v20 = vld [vmem:[%s12583_s17 + $0xc] ss:$16 sps:$4 sm:$0xff]  }
 0x206   : > { %1783 = vmatprep.mubr.bf16.mxu0 %v941_v21  ;;  %1865 = vmatprep.mubr.bf16.mxu1 %v941_v21  ;;  %v10893_v21 = vld [vmem:[%s12583_s17] ss:$16 sps:$4 sm:$0xff]  }
 0x208   : > { %1754 = vmatpush1.bf16.msra.mxu0 %v10803_v22  ;;  %1836 = vmatpush1.bf16.msra.mxu1 %v10806_v23  ;;  %v940_v22 = vpack.c.bf16 %v12687_v10, %v12687_v10  ;;  %v10896_v23 = vld [vmem:[%s12583_s17 + $0x8] ss:$16 sps:$4 sm:$0xff]  }
 0x209   : > { %1755 = vmatprep.subr.bf16.mxu0 %v10811_v24  ;;  %1837 = vmatprep.subr.bf16.mxu1 %v10814_v25  ;;  %v12764_v24 = vld [vmem:[%s12570_s9] sm:$0xff] }
 0x20a   : > { %v10901_v25 = vld [vmem:[%s12583_s17 + $0x24] ss:$16 sps:$4 sm:$0xff]  }
 0x20c   : > { %1756 = vmatpush1.bf16.msra.mxu0 %v10809_v26  ;;  %1838 = vmatpush1.bf16.msra.mxu1 %v10812_v27  ;;  %v10904_v26 = vld [vmem:[%s12583_s17 + $0x2c] ss:$16 sps:$4 sm:$0xff]   ;;  %v12770_v27 = vrot.slane %v12764_v24, %v12664_v50 }
 0x20d   : > { %1757 = vmatprep.subr.bf16.mxu0 %v10817_v28  ;;  %1839 = vmatprep.subr.bf16.mxu1 %v10820_v29  ;;  %v10899_v28 = vld [vmem:[%s12583_s17 + $0x20] ss:$16 sps:$4 sm:$0xff]   ;;  %v10902_v29 = vld [vmem:[%s12583_s17 + $0x28] ss:$16 sps:$4 sm:$0xff]  }
 0x20e   : > { %v777_v10 = vcombine.high %v12770_v27, %v12770_v27 }
 0x210   : > { %1758 = vmatpush1.bf16.msra.mxu0 %v10815_v30  ;;  %1840 = vmatpush1.bf16.msra.mxu1 %v10818_v31  ;;  %v10907_v30 = vld [vmem:[%s12583_s17 + $0x44] ss:$16 sps:$4 sm:$0xff]   ;;  %v10910_v31 = vld [vmem:[%s12583_s17 + $0x4c] ss:$16 sps:$4 sm:$0xff]  }
 0x211   : > { %1759 = vmatprep.subr.bf16.mxu0 %v10823_v32  ;;  %1841 = vmatprep.subr.bf16.mxu1 %v10826_v33  ;;  %v784_v32 = vpack.c.bf16 %v777_v10, %v777_v10  ;;  %v10905_v33 = vld [vmem:[%s12583_s17 + $0x40] ss:$16 sps:$4 sm:$0xff]   ;;  %v10986_v10 = vld [vmem:[%s12583_s17 + $0x1e8] ss:$16 sps:$4 sm:$0xff]  }
 0x214   : > { %1760 = vmatpush1.bf16.msra.mxu0 %v10821_v34  ;;  %1842 = vmatpush1.bf16.msra.mxu1 %v10824_v35  ;;  %v10908_v34 = vld [vmem:[%s12583_s17 + $0x48] ss:$16 sps:$4 sm:$0xff]   ;;  %v10913_v35 = vld [vmem:[%s12583_s17 + $0x64] ss:$16 sps:$4 sm:$0xff]  }
 0x215   : > { %1761 = vmatprep.subr.bf16.mxu0 %v10829_v36  ;;  %1843 = vmatprep.subr.bf16.mxu1 %v10832_v37  ;;  %v10916_v36 = vld [vmem:[%s12583_s17 + $0x6c] ss:$16 sps:$4 sm:$0xff]   ;;  %v10911_v37 = vld [vmem:[%s12583_s17 + $0x60] ss:$16 sps:$4 sm:$0xff]  }
 0x218   : > { %1762 = vmatpush1.bf16.msra.mxu0 %v10827_v38  ;;  %1844 = vmatpush1.bf16.msra.mxu1 %v10830_v39  ;;  %v10914_v38 = vld [vmem:[%s12583_s17 + $0x68] ss:$16 sps:$4 sm:$0xff]   ;;  %v10919_v39 = vld [vmem:[%s12583_s17 + $0x84] ss:$16 sps:$4 sm:$0xff]  }
 0x219   : > { %1763 = vmatprep.subr.bf16.mxu0 %v10835_v40  ;;  %1845 = vmatprep.subr.bf16.mxu1 %v10838_v41  ;;  %v10922_v40 = vld [vmem:[%s12583_s17 + $0x8c] ss:$16 sps:$4 sm:$0xff]   ;;  %v10917_v41 = vld [vmem:[%s12583_s17 + $0x80] ss:$16 sps:$4 sm:$0xff]  }
 0x21c   : > { %1764 = vmatpush1.bf16.msra.mxu0 %v10833_v42  ;;  %1846 = vmatpush1.bf16.msra.mxu1 %v10836_v43  ;;  %v10920_v42 = vld [vmem:[%s12583_s17 + $0x88] ss:$16 sps:$4 sm:$0xff]   ;;  %v10925_v43 = vld [vmem:[%s12583_s17 + $0xa4] ss:$16 sps:$4 sm:$0xff]  }
 0x21d   : > { %1765 = vmatprep.subr.bf16.mxu0 %v10841_v45  ;;  %1847 = vmatprep.subr.bf16.mxu1 %v10844_v46  ;;  %v10928_v45 = vld [vmem:[%s12583_s17 + $0xac] ss:$16 sps:$4 sm:$0xff]   ;;  %v10923_v46 = vld [vmem:[%s12583_s17 + $0xa0] ss:$16 sps:$4 sm:$0xff]  }
 0x220   : > { %1766 = vmatpush1.bf16.msra.mxu0 %v10839_v47  ;;  %1848 = vmatpush1.bf16.msra.mxu1 %v10842_v48  ;;  %v10926_v47 = vld [vmem:[%s12583_s17 + $0xa8] ss:$16 sps:$4 sm:$0xff]   ;;  %v10931_v48 = vld [vmem:[%s12583_s17 + $0xc4] ss:$16 sps:$4 sm:$0xff]  }
 0x221   : > { %1767 = vmatprep.subr.bf16.mxu0 %v10847_v49  ;;  %1849 = vmatprep.subr.bf16.mxu1 %v10850_v51  ;;  %v10934_v49 = vld [vmem:[%s12583_s17 + $0xcc] ss:$16 sps:$4 sm:$0xff]   ;;  %v10929_v51 = vld [vmem:[%s12583_s17 + $0xc0] ss:$16 sps:$4 sm:$0xff]  }
 0x224   : > { %1768 = vmatpush1.bf16.msra.mxu0 %v10845_v52  ;;  %1850 = vmatpush1.bf16.msra.mxu1 %v10848_v53  ;;  %v10932_v52 = vld [vmem:[%s12583_s17 + $0xc8] ss:$16 sps:$4 sm:$0xff]   ;;  %v10937_v53 = vld [vmem:[%s12583_s17 + $0xe4] ss:$16 sps:$4 sm:$0xff]  }
 0x225   : > { %1769 = vmatprep.subr.bf16.mxu0 %v10853_v54  ;;  %1851 = vmatprep.subr.bf16.mxu1 %v10856_v55  ;;  %v10940_v54 = vld [vmem:[%s12583_s17 + $0xec] ss:$16 sps:$4 sm:$0xff]   ;;  %v10935_v55 = vld [vmem:[%s12583_s17 + $0xe0] ss:$16 sps:$4 sm:$0xff]  }
 0x228   : > { %1770 = vmatpush1.bf16.msra.mxu0 %v10851_v56  ;;  %1852 = vmatpush1.bf16.msra.mxu1 %v10854_v57  ;;  %v10938_v56 = vld [vmem:[%s12583_s17 + $0xe8] ss:$16 sps:$4 sm:$0xff]   ;;  %v10943_v57 = vld [vmem:[%s12583_s17 + $0x104] ss:$16 sps:$4 sm:$0xff]  }
 0x229   : > { %1771 = vmatprep.subr.bf16.mxu0 %v10859_v58  ;;  %1853 = vmatprep.subr.bf16.mxu1 %v10862_v59  ;;  %v10946_v58 = vld [vmem:[%s12583_s17 + $0x10c] ss:$16 sps:$4 sm:$0xff]   ;;  %v10941_v59 = vld [vmem:[%s12583_s17 + $0x100] ss:$16 sps:$4 sm:$0xff]  }
 0x22c   : > { %1772 = vmatpush1.bf16.msra.mxu0 %v10857_v60  ;;  %1854 = vmatpush1.bf16.msra.mxu1 %v10860_v61  ;;  %v10944_v60 = vld [vmem:[%s12583_s17 + $0x108] ss:$16 sps:$4 sm:$0xff]   ;;  %v10949_v61 = vld [vmem:[%s12583_s17 + $0x124] ss:$16 sps:$4 sm:$0xff]  }
 0x22d   : > { %1773 = vmatprep.subr.bf16.mxu0 %v10865_v62  ;;  %1855 = vmatprep.subr.bf16.mxu1 %v10868_v63  ;;  %v10952_v62 = vld [vmem:[%s12583_s17 + $0x12c] ss:$16 sps:$4 sm:$0xff]   ;;  %v10947_v63 = vld [vmem:[%s12583_s17 + $0x120] ss:$16 sps:$4 sm:$0xff]  }
 0x230   : > { %1774 = vmatpush1.bf16.msra.mxu0 %v10863_v0  ;;  %1856 = vmatpush1.bf16.msra.mxu1 %v10866_v1  ;;  %v10950_v0 = vld [vmem:[%s12583_s17 + $0x128] ss:$16 sps:$4 sm:$0xff]   ;;  %v10955_v1 = vld [vmem:[%s12583_s17 + $0x144] ss:$16 sps:$4 sm:$0xff]  }
 0x231   : > { %1775 = vmatprep.subr.bf16.mxu0 %v10871_v2  ;;  %1857 = vmatprep.subr.bf16.mxu1 %v10874_v3  ;;  %v10958_v2 = vld [vmem:[%s12583_s17 + $0x14c] ss:$16 sps:$4 sm:$0xff]   ;;  %v10953_v3 = vld [vmem:[%s12583_s17 + $0x140] ss:$16 sps:$4 sm:$0xff]  }
 0x234   : > { %1776 = vmatpush1.bf16.msra.mxu0 %v10869_v4  ;;  %1858 = vmatpush1.bf16.msra.mxu1 %v10872_v5  ;;  %v10956_v4 = vld [vmem:[%s12583_s17 + $0x148] ss:$16 sps:$4 sm:$0xff]   ;;  %v10961_v5 = vld [vmem:[%s12583_s17 + $0x164] ss:$16 sps:$4 sm:$0xff]  }
 0x235   : > { %1777 = vmatprep.subr.bf16.mxu0 %v10877_v6  ;;  %1859 = vmatprep.subr.bf16.mxu1 %v10880_v7  ;;  %v10964_v6 = vld [vmem:[%s12583_s17 + $0x16c] ss:$16 sps:$4 sm:$0xff]   ;;  %v10959_v7 = vld [vmem:[%s12583_s17 + $0x160] ss:$16 sps:$4 sm:$0xff]  }
 0x238   : > { %1778 = vmatpush1.bf16.msra.mxu0 %v10875_v8  ;;  %1860 = vmatpush1.bf16.msra.mxu1 %v10878_v9  ;;  %v10962_v8 = vld [vmem:[%s12583_s17 + $0x168] ss:$16 sps:$4 sm:$0xff]   ;;  %v10967_v9 = vld [vmem:[%s12583_s17 + $0x184] ss:$16 sps:$4 sm:$0xff]  }
 0x239   : > { %1779 = vmatprep.subr.bf16.mxu0 %v10883_v11  ;;  %1861 = vmatprep.subr.bf16.mxu1 %v10886_v12  ;;  %v10970_v11 = vld [vmem:[%s12583_s17 + $0x18c] ss:$16 sps:$4 sm:$0xff]   ;;  %v10965_v12 = vld [vmem:[%s12583_s17 + $0x180] ss:$16 sps:$4 sm:$0xff]  }
 0x23c   : > { %1780 = vmatpush1.bf16.msra.mxu0 %v10881_v13  ;;  %1862 = vmatpush1.bf16.msra.mxu1 %v10884_v14  ;;  %v10968_v13 = vld [vmem:[%s12583_s17 + $0x188] ss:$16 sps:$4 sm:$0xff]   ;;  %v10973_v14 = vld [vmem:[%s12583_s17 + $0x1a4] ss:$16 sps:$4 sm:$0xff]  }
 0x23d   : > { %1781 = vmatprep.subr.bf16.mxu0 %v10889_v15  ;;  %1863 = vmatprep.subr.bf16.mxu1 %v10892_v16  ;;  %v10976_v15 = vld [vmem:[%s12583_s17 + $0x1ac] ss:$16 sps:$4 sm:$0xff]   ;;  %v10971_v16 = vld [vmem:[%s12583_s17 + $0x1a0] ss:$16 sps:$4 sm:$0xff]  }
 0x240   : > { %1782 = vmatpush1.bf16.msra.mxu0 %v10887_v17  ;;  %1864 = vmatpush1.bf16.msra.mxu1 %v10890_v18  ;;  %v10974_v17 = vld [vmem:[%s12583_s17 + $0x1a8] ss:$16 sps:$4 sm:$0xff]   ;;  %v10979_v18 = vld [vmem:[%s12583_s17 + $0x1c4] ss:$16 sps:$4 sm:$0xff]  }
 0x241   : > { %2514 = vmatprep.subr.bf16.mxu0 %v10895_v19  ;;  %2596 = vmatprep.subr.bf16.mxu1 %v10898_v20  ;;  %v10982_v19 = vld [vmem:[%s12583_s17 + $0x1cc] ss:$16 sps:$4 sm:$0xff]   ;;  %v762_v20 = vcombine.high %v12764_v24, %v12764_v24  ;;  %v10983_v24 = vld [vmem:[%s12583_s17 + $0x1e0] ss:$16 sps:$4 sm:$0xff]  }
 0x243   : > { %1784 = vmatmul.mubr.bf16.vlgmr.msra.gmra.mrb[0].mxu0 %v940_v22  ;;  %1866 = vmatmul.mubr.bf16.vlgmr.msra.gmra.mrb[0].mxu1 %v940_v22  ;;  %v10980_v22 = vld [vmem:[%s12583_s17 + $0x1c8] ss:$16 sps:$4 sm:$0xff]  }
 0x244   : > { %2515 = vmatpush1.bf16.msra.mxu0 %v10893_v21  ;;  %2597 = vmatpush1.bf16.msra.mxu1 %v10896_v23  ;;  %v10977_v21 = vld [vmem:[%s12583_s17 + $0x1c0] ss:$16 sps:$4 sm:$0xff]   ;;  %v10985_v23 = vld [vmem:[%s12583_s17 + $0x1e4] ss:$16 sps:$4 sm:$0xff]  }
 0x245   : > { %2516 = vmatprep.subr.bf16.mxu0 %v10901_v25  ;;  %2598 = vmatprep.subr.bf16.mxu1 %v10904_v26  ;;  %v10988_v25 = vld [vmem:[%s12583_s17 + $0x1ec] ss:$16 sps:$4 sm:$0xff]   ;;  %v12833_v26 = vrot.slane %v762_v20, %v12664_v50  ;;  %v11064_v20 = vld [vmem:[%s12583_s17 + $0x388] ss:$16 sps:$4 sm:$0xff]  }
 0x246   : > { %2546 = vmatprep.mubr.bf16.mxu0 %v784_v32  ;;  %2628 = vmatprep.mubr.bf16.mxu1 %v784_v32  ;;  %v10989_v32 = vld [vmem:[%s12583_s17 + $0x200] ss:$16 sps:$4 sm:$0xff]  }
 0x248   : > { %2517 = vmatpush1.bf16.msra.mxu0 %v10899_v28  ;;  %2599 = vmatpush1.bf16.msra.mxu1 %v10902_v29  ;;  %v10991_v28 = vld [vmem:[%s12583_s17 + $0x204] ss:$16 sps:$4 sm:$0xff]   ;;  %v10994_v29 = vld [vmem:[%s12583_s17 + $0x20c] ss:$16 sps:$4 sm:$0xff]  }
 0x249   : > { %2518 = vmatprep.subr.bf16.mxu0 %v10907_v30  ;;  %2600 = vmatprep.subr.bf16.mxu1 %v10910_v31  ;;  %v778_v30 = vcombine.high %v12833_v26, %v12833_v26  ;;  %v783_v31 = vpack.c.bf16 %v12770_v27, %v12770_v27  ;;  %v10995_v27 = vld [vmem:[%s12583_s17 + $0x220] ss:$16 sps:$4 sm:$0xff]  }
 0x24c   : > { %2519 = vmatpush1.bf16.msra.mxu0 %v10905_v33  ;;  %2601 = vmatpush1.bf16.msra.mxu1 %v10908_v34  ;;  %v10992_v33 = vld [vmem:[%s12583_s17 + $0x208] ss:$16 sps:$4 sm:$0xff]   ;;  %v10997_v34 = vld [vmem:[%s12583_s17 + $0x224] ss:$16 sps:$4 sm:$0xff]  }
 0x24d   : > { %2520 = vmatprep.subr.bf16.mxu0 %v10913_v35  ;;  %2602 = vmatprep.subr.bf16.mxu1 %v10916_v36  ;;  %v11000_v35 = vld [vmem:[%s12583_s17 + $0x22c] ss:$16 sps:$4 sm:$0xff]   ;;  %v786_v36 = vpack.c.bf16 %v778_v30, %v778_v30  ;;  %v11081_v30 = vld [vmem:[%s12583_s17 + $0x3e4] ss:$16 sps:$4 sm:$0xff]  }
 0x250   : > { %2521 = vmatpush1.bf16.msra.mxu0 %v10911_v37  ;;  %2603 = vmatpush1.bf16.msra.mxu1 %v10914_v38  ;;  %v10998_v37 = vld [vmem:[%s12583_s17 + $0x228] ss:$16 sps:$4 sm:$0xff]   ;;  %v11003_v38 = vld [vmem:[%s12583_s17 + $0x244] ss:$16 sps:$4 sm:$0xff]  }
 0x251   : > { %2522 = vmatprep.subr.bf16.mxu0 %v10919_v39  ;;  %2604 = vmatprep.subr.bf16.mxu1 %v10922_v40  ;;  %v11006_v39 = vld [vmem:[%s12583_s17 + $0x24c] ss:$16 sps:$4 sm:$0xff]   ;;  %v11001_v40 = vld [vmem:[%s12583_s17 + $0x240] ss:$16 sps:$4 sm:$0xff]  }
 0x254   : > { %2523 = vmatpush1.bf16.msra.mxu0 %v10917_v41  ;;  %2605 = vmatpush1.bf16.msra.mxu1 %v10920_v42  ;;  %v11004_v41 = vld [vmem:[%s12583_s17 + $0x248] ss:$16 sps:$4 sm:$0xff]   ;;  %v11009_v42 = vld [vmem:[%s12583_s17 + $0x264] ss:$16 sps:$4 sm:$0xff]  }
 0x255   : > { %2524 = vmatprep.subr.bf16.mxu0 %v10925_v43  ;;  %2606 = vmatprep.subr.bf16.mxu1 %v10928_v45  ;;  %v11012_v43 = vld [vmem:[%s12583_s17 + $0x26c] ss:$16 sps:$4 sm:$0xff]   ;;  %v11007_v45 = vld [vmem:[%s12583_s17 + $0x260] ss:$16 sps:$4 sm:$0xff]  }
 0x258   : > { %2525 = vmatpush1.bf16.msra.mxu0 %v10923_v46  ;;  %2607 = vmatpush1.bf16.msra.mxu1 %v10926_v47  ;;  %v11010_v46 = vld [vmem:[%s12583_s17 + $0x268] ss:$16 sps:$4 sm:$0xff]   ;;  %v11015_v47 = vld [vmem:[%s12583_s17 + $0x284] ss:$16 sps:$4 sm:$0xff]  }
 0x259   : > { %2526 = vmatprep.subr.bf16.mxu0 %v10931_v48  ;;  %2608 = vmatprep.subr.bf16.mxu1 %v10934_v49  ;;  %v11018_v48 = vld [vmem:[%s12583_s17 + $0x28c] ss:$16 sps:$4 sm:$0xff]   ;;  %v11013_v49 = vld [vmem:[%s12583_s17 + $0x280] ss:$16 sps:$4 sm:$0xff]  }
 0x25c   : > { %2527 = vmatpush1.bf16.msra.mxu0 %v10929_v51  ;;  %2609 = vmatpush1.bf16.msra.mxu1 %v10932_v52  ;;  %v11016_v51 = vld [vmem:[%s12583_s17 + $0x288] ss:$16 sps:$4 sm:$0xff]   ;;  %v11021_v52 = vld [vmem:[%s12583_s17 + $0x2a4] ss:$16 sps:$4 sm:$0xff]  }
 0x25d   : > { %2528 = vmatprep.subr.bf16.mxu0 %v10937_v53  ;;  %2610 = vmatprep.subr.bf16.mxu1 %v10940_v54  ;;  %v11024_v53 = vld [vmem:[%s12583_s17 + $0x2ac] ss:$16 sps:$4 sm:$0xff]   ;;  %v11019_v54 = vld [vmem:[%s12583_s17 + $0x2a0] ss:$16 sps:$4 sm:$0xff]  }
 0x260   : > { %2529 = vmatpush1.bf16.msra.mxu0 %v10935_v55  ;;  %2611 = vmatpush1.bf16.msra.mxu1 %v10938_v56  ;;  %v11022_v55 = vld [vmem:[%s12583_s17 + $0x2a8] ss:$16 sps:$4 sm:$0xff]   ;;  %v11027_v56 = vld [vmem:[%s12583_s17 + $0x2c4] ss:$16 sps:$4 sm:$0xff]  }
 0x261   : > { %2530 = vmatprep.subr.bf16.mxu0 %v10943_v57  ;;  %2612 = vmatprep.subr.bf16.mxu1 %v10946_v58  ;;  %v11030_v57 = vld [vmem:[%s12583_s17 + $0x2cc] ss:$16 sps:$4 sm:$0xff]   ;;  %v11025_v58 = vld [vmem:[%s12583_s17 + $0x2c0] ss:$16 sps:$4 sm:$0xff]  }
 0x264   : > { %2531 = vmatpush1.bf16.msra.mxu0 %v10941_v59  ;;  %2613 = vmatpush1.bf16.msra.mxu1 %v10944_v60  ;;  %v11028_v59 = vld [vmem:[%s12583_s17 + $0x2c8] ss:$16 sps:$4 sm:$0xff]   ;;  %v11033_v60 = vld [vmem:[%s12583_s17 + $0x2e4] ss:$16 sps:$4 sm:$0xff]  }
 0x265   : > { %2532 = vmatprep.subr.bf16.mxu0 %v10949_v61  ;;  %2614 = vmatprep.subr.bf16.mxu1 %v10952_v62  ;;  %v11036_v61 = vld [vmem:[%s12583_s17 + $0x2ec] ss:$16 sps:$4 sm:$0xff]   ;;  %v11031_v62 = vld [vmem:[%s12583_s17 + $0x2e0] ss:$16 sps:$4 sm:$0xff]  }
 0x268   : > { %2533 = vmatpush1.bf16.msra.mxu0 %v10947_v63  ;;  %2615 = vmatpush1.bf16.msra.mxu1 %v10950_v0  ;;  %v11034_v63 = vld [vmem:[%s12583_s17 + $0x2e8] ss:$16 sps:$4 sm:$0xff]   ;;  %v11039_v0 = vld [vmem:[%s12583_s17 + $0x304] ss:$16 sps:$4 sm:$0xff]  }
 0x269   : > { %2534 = vmatprep.subr.bf16.mxu0 %v10955_v1  ;;  %2616 = vmatprep.subr.bf16.mxu1 %v10958_v2  ;;  %v11042_v1 = vld [vmem:[%s12583_s17 + $0x30c] ss:$16 sps:$4 sm:$0xff]   ;;  %v11037_v2 = vld [vmem:[%s12583_s17 + $0x300] ss:$16 sps:$4 sm:$0xff]  }
 0x26c   : > { %2535 = vmatpush1.bf16.msra.mxu0 %v10953_v3  ;;  %2617 = vmatpush1.bf16.msra.mxu1 %v10956_v4  ;;  %v11040_v3 = vld [vmem:[%s12583_s17 + $0x308] ss:$16 sps:$4 sm:$0xff]   ;;  %v11045_v4 = vld [vmem:[%s12583_s17 + $0x324] ss:$16 sps:$4 sm:$0xff]  }
 0x26d   : > { %2536 = vmatprep.subr.bf16.mxu0 %v10961_v5  ;;  %2618 = vmatprep.subr.bf16.mxu1 %v10964_v6  ;;  %v11048_v5 = vld [vmem:[%s12583_s17 + $0x32c] ss:$16 sps:$4 sm:$0xff]   ;;  %v11043_v6 = vld [vmem:[%s12583_s17 + $0x320] ss:$16 sps:$4 sm:$0xff]  }
 0x270   : > { %2537 = vmatpush1.bf16.msra.mxu0 %v10959_v7  ;;  %2619 = vmatpush1.bf16.msra.mxu1 %v10962_v8  ;;  %v11046_v7 = vld [vmem:[%s12583_s17 + $0x328] ss:$16 sps:$4 sm:$0xff]   ;;  %v11051_v8 = vld [vmem:[%s12583_s17 + $0x344] ss:$16 sps:$4 sm:$0xff]  }
 0x271   : > { %2538 = vmatprep.subr.bf16.mxu0 %v10967_v9  ;;  %2620 = vmatprep.subr.bf16.mxu1 %v10970_v11  ;;  %v11054_v9 = vld [vmem:[%s12583_s17 + $0x34c] ss:$16 sps:$4 sm:$0xff]   ;;  %v11049_v11 = vld [vmem:[%s12583_s17 + $0x340] ss:$16 sps:$4 sm:$0xff]  }
 0x274   : > { %2539 = vmatpush1.bf16.msra.mxu0 %v10965_v12  ;;  %2621 = vmatpush1.bf16.msra.mxu1 %v10968_v13  ;;  %v11052_v12 = vld [vmem:[%s12583_s17 + $0x348] ss:$16 sps:$4 sm:$0xff]   ;;  %v11057_v13 = vld [vmem:[%s12583_s17 + $0x364] ss:$16 sps:$4 sm:$0xff]  }
 0x275   : > { %2540 = vmatprep.subr.bf16.mxu0 %v10973_v14  ;;  %2622 = vmatprep.subr.bf16.mxu1 %v10976_v15  ;;  %v11060_v14 = vld [vmem:[%s12583_s17 + $0x36c] ss:$16 sps:$4 sm:$0xff]   ;;  %v11055_v15 = vld [vmem:[%s12583_s17 + $0x360] ss:$16 sps:$4 sm:$0xff]  }
 0x278   : > { %2541 = vmatpush1.bf16.msra.mxu0 %v10971_v16  ;;  %2623 = vmatpush1.bf16.msra.mxu1 %v10974_v17  ;;  %v11058_v16 = vld [vmem:[%s12583_s17 + $0x368] ss:$16 sps:$4 sm:$0xff]   ;;  %v11063_v17 = vld [vmem:[%s12583_s17 + $0x384] ss:$16 sps:$4 sm:$0xff]  }
 0x279   : > { %2542 = vmatprep.subr.bf16.mxu0 %v10979_v18  ;;  %2624 = vmatprep.subr.bf16.mxu1 %v10982_v19  ;;  %v11066_v18 = vld [vmem:[%s12583_s17 + $0x38c] ss:$16 sps:$4 sm:$0xff]   ;;  %v11061_v19 = vld [vmem:[%s12583_s17 + $0x380] ss:$16 sps:$4 sm:$0xff]  }
 0x27c   : > { %2543 = vmatpush1.bf16.msra.mxu0 %v10977_v21  ;;  %2625 = vmatpush1.bf16.msra.mxu1 %v10980_v22  ;;  %v11069_v21 = vld [vmem:[%s12583_s17 + $0x3a4] ss:$16 sps:$4 sm:$0xff]   ;;  %v11072_v22 = vld [vmem:[%s12583_s17 + $0x3ac] ss:$16 sps:$4 sm:$0xff]  }
 0x27d   : > { %2544 = vmatprep.subr.bf16.mxu0 %v10985_v23  ;;  %2626 = vmatprep.subr.bf16.mxu1 %v10988_v25  ;;  %v11067_v23 = vld [vmem:[%s12583_s17 + $0x3a0] ss:$16 sps:$4 sm:$0xff]   ;;  %v11070_v25 = vld [vmem:[%s12583_s17 + $0x3a8] ss:$16 sps:$4 sm:$0xff]  }
 0x280   : > { %2545 = vmatpush1.bf16.msra.mxu0 %v10983_v24  ;;  %2627 = vmatpush1.bf16.msra.mxu1 %v10986_v10  ;;  %v11075_v24 = vld [vmem:[%s12583_s17 + $0x3c4] ss:$16 sps:$4 sm:$0xff]   ;;  %v11078_v10 = vld [vmem:[%s12583_s17 + $0x3cc] ss:$16 sps:$4 sm:$0xff]  }
 0x281   : > { %2555 = vmatprep.subr.bf16.mxu0 %v10991_v28  ;;  %2637 = vmatprep.subr.bf16.mxu1 %v10994_v29  ;;  %v11073_v28 = vld [vmem:[%s12583_s17 + $0x3c0] ss:$16 sps:$4 sm:$0xff]   ;;  %v11076_v29 = vld [vmem:[%s12583_s17 + $0x3c8] ss:$16 sps:$4 sm:$0xff]  }
 0x283   : > { %2547 = vmatmul.mubr.bf16.vlgmr.msra.gmra.mrb[0].mxu0 %v783_v31  ;;  %2629 = vmatmul.mubr.bf16.vlgmr.msra.gmra.mrb[0].mxu1 %v783_v31  ;;  %v11084_v31 = vld [vmem:[%s12583_s17 + $0x3ec] ss:$16 sps:$4 sm:$0xff]  }
 0x284   : > { %2556 = vmatpush1.bf16.msra.mxu0 %v10989_v32  ;;  %2638 = vmatpush1.bf16.msra.mxu1 %v10992_v33  ;;  %v11079_v32 = vld [vmem:[%s12583_s17 + $0x3e0] ss:$16 sps:$4 sm:$0xff]   ;;  %v11082_v33 = vld [vmem:[%s12583_s17 + $0x3e8] ss:$16 sps:$4 sm:$0xff]  }
 0x285   : > { %2557 = vmatprep.subr.bf16.mxu0 %v10997_v34  ;;  %2639 = vmatprep.subr.bf16.mxu1 %v11000_v35  ;;  %v785_v34 = vpack.c.bf16 %v12833_v26, %v12833_v26 }
 0x286   : > { %2587 = vmatprep.mubr.bf16.mxu0 %v786_v36  ;;  %2669 = vmatprep.mubr.bf16.mxu1 %v786_v36 }
 0x288   : > { %2558 = vmatpush1.bf16.msra.mxu0 %v10995_v27  ;;  %2640 = vmatpush1.bf16.msra.mxu1 %v10998_v37 }
 0x289   : > { %2559 = vmatprep.subr.bf16.mxu0 %v11003_v38  ;;  %2641 = vmatprep.subr.bf16.mxu1 %v11006_v39 }
 0x28c   : > { %2560 = vmatpush1.bf16.msra.mxu0 %v11001_v40  ;;  %2642 = vmatpush1.bf16.msra.mxu1 %v11004_v41 }
 0x28d   : > { %2561 = vmatprep.subr.bf16.mxu0 %v11009_v42  ;;  %2643 = vmatprep.subr.bf16.mxu1 %v11012_v43 }
 0x290   : > { %2562 = vmatpush1.bf16.msra.mxu0 %v11007_v45  ;;  %2644 = vmatpush1.bf16.msra.mxu1 %v11010_v46 }
 0x291   : > { %2563 = vmatprep.subr.bf16.mxu0 %v11015_v47  ;;  %2645 = vmatprep.subr.bf16.mxu1 %v11018_v48  ;;  %v759_v47 = vld [vmem:[#allocation2] sm:$0xff] }
 0x294   : > { %2564 = vmatpush1.bf16.msra.mxu0 %v11013_v49  ;;  %2646 = vmatpush1.bf16.msra.mxu1 %v11016_v51  ;;  %v11086_v49 = vld [vmem:[#allocation12 + $0x40] sm:$0xff] (!%p8711_p5)  }
 0x295   : > { %2565 = vmatprep.subr.bf16.mxu0 %v11021_v52  ;;  %2647 = vmatprep.subr.bf16.mxu1 %v11024_v53  ;;  %v11087_v51 = vld [vmem:[#allocation12 + $0xc0] sm:$0xff] (!%p8711_p5)  }
 0x296   : > { %v11088_v52 = vld [vmem:[#allocation12] sm:$0xff] (!%p8711_p5)  }
 0x297   : > { %v11089_v53 = vld [vmem:[#allocation12 + $0x80] sm:$0xff] (!%p8711_p5)  }
 0x298   : > { %2566 = vmatpush1.bf16.msra.mxu0 %v11019_v54  ;;  %2648 = vmatpush1.bf16.msra.mxu1 %v11022_v55  ;;  %v11090_v54 = vld [vmem:[#allocation12 + $0x48] sm:$0xff] (!%p8711_p5)  }
 0x299   : > { %2567 = vmatprep.subr.bf16.mxu0 %v11027_v56  ;;  %2649 = vmatprep.subr.bf16.mxu1 %v11030_v57  ;;  %v11091_v55 = vld [vmem:[#allocation12 + $0xc8] sm:$0xff] (!%p8711_p5)  }
 0x29a   : > { %v11092_v56 = vld [vmem:[#allocation12 + $0x8] sm:$0xff] (!%p8711_p5)  }
 0x29b   : > { %v11093_v57 = vld [vmem:[#allocation12 + $0x88] sm:$0xff] (!%p8711_p5)  }
 0x29c   : > { %2568 = vmatpush1.bf16.msra.mxu0 %v11025_v58  ;;  %2650 = vmatpush1.bf16.msra.mxu1 %v11028_v59  ;;  %v11094_v58 = vld [vmem:[#allocation12 + $0x50] sm:$0xff] (!%p8711_p5)  }
 0x29d   : > { %2569 = vmatprep.subr.bf16.mxu0 %v11033_v60  ;;  %2651 = vmatprep.subr.bf16.mxu1 %v11036_v61  ;;  %v11095_v59 = vld [vmem:[#allocation12 + $0xd0] sm:$0xff] (!%p8711_p5)  }
 0x29e   : > { %v11096_v60 = vld [vmem:[#allocation12 + $0x10] sm:$0xff] (!%p8711_p5)  }
 0x29f   : > { %v11097_v61 = vld [vmem:[#allocation12 + $0x90] sm:$0xff] (!%p8711_p5)  }
 0x2a0   : > { %2570 = vmatpush1.bf16.msra.mxu0 %v11031_v62  ;;  %2652 = vmatpush1.bf16.msra.mxu1 %v11034_v63  ;;  %v11098_v62 = vld [vmem:[#allocation12 + $0x58] sm:$0xff] (!%p8711_p5)  }
 0x2a1   : > { %2571 = vmatprep.subr.bf16.mxu0 %v11039_v0  ;;  %2653 = vmatprep.subr.bf16.mxu1 %v11042_v1  ;;  %v11099_v63 = vld [vmem:[#allocation12 + $0xd8] sm:$0xff] (!%p8711_p5)  }
 0x2a2   : > { %v11100_v0 = vld [vmem:[#allocation12 + $0x18] sm:$0xff] (!%p8711_p5)  }
 0x2a3   : > { %v11101_v1 = vld [vmem:[#allocation12 + $0x98] sm:$0xff] (!%p8711_p5)  }
 0x2a4   : > { %2572 = vmatpush1.bf16.msra.mxu0 %v11037_v2  ;;  %2654 = vmatpush1.bf16.msra.mxu1 %v11040_v3  ;;  %v11102_v2 = vld [vmem:[#allocation12 + $0x60] sm:$0xff] (!%p8711_p5)  }
 0x2a5   : > { %2573 = vmatprep.subr.bf16.mxu0 %v11045_v4  ;;  %2655 = vmatprep.subr.bf16.mxu1 %v11048_v5  ;;  %v11103_v3 = vld [vmem:[#allocation12 + $0xe0] sm:$0xff] (!%p8711_p5)  }
 0x2a6   : > { %v11104_v4 = vld [vmem:[#allocation12 + $0x20] sm:$0xff] (!%p8711_p5)  }
 0x2a7   : > { %v11105_v5 = vld [vmem:[#allocation12 + $0xa0] sm:$0xff] (!%p8711_p5)  }
 0x2a8   : > { %2574 = vmatpush1.bf16.msra.mxu0 %v11043_v6  ;;  %2656 = vmatpush1.bf16.msra.mxu1 %v11046_v7  ;;  %v11106_v6 = vld [vmem:[#allocation12 + $0x68] sm:$0xff] (!%p8711_p5)  }
 0x2a9   : > { %2575 = vmatprep.subr.bf16.mxu0 %v11051_v8  ;;  %2657 = vmatprep.subr.bf16.mxu1 %v11054_v9  ;;  %v11107_v7 = vld [vmem:[#allocation12 + $0xe8] sm:$0xff] (!%p8711_p5)  }
 0x2aa   : > { %v11108_v8 = vld [vmem:[#allocation12 + $0x28] sm:$0xff] (!%p8711_p5)  }
 0x2ab   : > { %v11109_v9 = vld [vmem:[#allocation12 + $0xa8] sm:$0xff] (!%p8711_p5)  }
 0x2ac   : > { %2576 = vmatpush1.bf16.msra.mxu0 %v11049_v11  ;;  %2658 = vmatpush1.bf16.msra.mxu1 %v11052_v12  ;;  %v11110_v11 = vld [vmem:[#allocation12 + $0x70] sm:$0xff] (!%p8711_p5)  }
 0x2ad   : > { %2577 = vmatprep.subr.bf16.mxu0 %v11057_v13  ;;  %2659 = vmatprep.subr.bf16.mxu1 %v11060_v14  ;;  %v11111_v12 = vld [vmem:[#allocation12 + $0xf0] sm:$0xff] (!%p8711_p5)   ;;  %v12911_v14 = vsub.s32 (!%p8711_p5), 0, %v12656_v44 }
 0x2ae   : > { %v11112_v13 = vld [vmem:[#allocation12 + $0x30] sm:$0xff] (!%p8711_p5)  }
 0x2b0   : > { %2578 = vmatpush1.bf16.msra.mxu0 %v11055_v15  ;;  %2660 = vmatpush1.bf16.msra.mxu1 %v11058_v16  ;;  %v11113_v15 = vld [vmem:[#allocation12 + $0xb0] sm:$0xff] (!%p8711_p5)   ;;  %v12914_v16 = vsub.s32 (!%p8711_p5), 1, %v12656_v44 }
 0x2b1   : > { %2579 = vmatprep.subr.bf16.mxu0 %v11063_v17  ;;  %2661 = vmatprep.subr.bf16.mxu1 %v11066_v18  ;;  %v11114_v17 = vld [vmem:[#allocation12 + $0x78] sm:$0xff] (!%p8711_p5)   ;;  %v12917_v18 = vsub.s32 (!%p8711_p5), 2, %v12656_v44 }
 0x2b4   : > { %2580 = vmatpush1.bf16.msra.mxu0 %v11061_v19  ;;  %2662 = vmatpush1.bf16.msra.mxu1 %v11064_v20  ;;  %v11115_v19 = vld [vmem:[#allocation12 + $0xf8] sm:$0xff] (!%p8711_p5)   ;;  %v12920_v20 = vsub.s32 (!%p8711_p5), 3, %v12656_v44 }
 0x2b5   : > { %2581 = vmatprep.subr.bf16.mxu0 %v11069_v21  ;;  %2663 = vmatprep.subr.bf16.mxu1 %v11072_v22  ;;  %v11116_v21 = vld [vmem:[#allocation12 + $0x38] sm:$0xff] (!%p8711_p5)  }
 0x2b6   : > { %v11117_v22 = vld [vmem:[#allocation12 + $0xb8] sm:$0xff] (!%p8711_p5)  }
 0x2b8   : > { %2582 = vmatpush1.bf16.msra.mxu0 %v11067_v23  ;;  %2664 = vmatpush1.bf16.msra.mxu1 %v11070_v25  ;;  %v2707_v23 = vld [vmem:[#allocation11] sm:$0xf] (!%p8711_p5) }
 0x2b9   : > { %2583 = vmatprep.subr.bf16.mxu0 %v11075_v24  ;;  %2665 = vmatprep.subr.bf16.mxu1 %v11078_v10  ;;  %v2712_v25 = vrot.slane (!%p8711_p5), %v2707_v23, %v12911_v14  ;;  %v2716_v24 = vrot.slane (!%p8711_p5), %v2707_v23, %v12914_v16  ;;  %v2720_v10 = vrot.slane (!%p8711_p5), %v2707_v23, %v12917_v18 }
 0x2bc   : > { %2584 = vmatpush1.bf16.msra.mxu0 %v11073_v28  ;;  %2666 = vmatpush1.bf16.msra.mxu1 %v11076_v29  ;;  %v2724_v28 = vrot.slane (!%p8711_p5), %v2707_v23, %v12920_v20  ;;  %v12048_v29 = vmov (!%p8711_p5), 0.0  }
 0x2bd   : > { %2585 = vmatprep.subr.bf16.mxu0 %v11081_v30  ;;  %2667 = vmatprep.subr.bf16.mxu1 %v11084_v31  ;;  %v2725_v30 = vcombine.low (!%p8711_p5), %v2712_v25, %v2716_v24  ;;  %v11129_v25 = vld [vmem:[#allocation18 + $0x8] ss:$120 sps:$4 sm:$0xff] (!%p8711_p5)  }
 0x2be   : > { %v2726_v31 = vcombine.low (!%p8711_p5), %v2720_v10, %v2724_v28  ;;  %v11137_v10 = vld [vmem:[#allocation18 + $0xfc] ss:$120 sps:$4 sm:$0xff] (!%p8711_p5)   ;;  %v11135_v28 = vld [vmem:[#allocation18 + $0xf8] ss:$120 sps:$4 sm:$0xff] (!%p8711_p5)  }
 0x2c0   : > { %2586 = vmatpush1.bf16.msra.mxu0 %v11079_v32  ;;  %2668 = vmatpush1.bf16.msra.mxu1 %v11082_v33  ;;  %v2733_v33 = vrot.slane (!%p8711_p5), %v2725_v30, %v12664_v50  ;;  %v11143_v30 = vld [vmem:[#allocation18 + $0x1ec] ss:$120 sps:$4 sm:$0xff] (!%p8711_p5)  }
 0x2c1   : > { %9048 = vmatprep.subr.bf16.mxu0 (!%p8711_p5), %v11086_v49  ;;  %9070 = vmatprep.subr.bf16.mxu1 (!%p8711_p5), %v11087_v51  ;;  %v11121_v49 = vld [vmem:[#allocation15 + $0x18] sm:$0xff] (!%p8711_p5)   ;;  %v11123_v51 = vld [vmem:[#allocation15 + $0x28] sm:$0xff] (!%p8711_p5)  }
 0x2c3   : > { %2588 = vmatmul.mubr.bf16.vlgmr.msra.gmra.mrb[0].mxu0 %v785_v34  ;;  %2670 = vmatmul.mubr.bf16.vlgmr.msra.gmra.mrb[0].mxu1 %v785_v34  ;;  %v2740_v34 = vrot.slane (!%p8711_p5), %v2726_v31, %v12664_v50  ;;  %v11141_v31 = vld [vmem:[#allocation18 + $0x1e8] ss:$120 sps:$4 sm:$0xff] (!%p8711_p5)  }
 0x2c4   : > { %9049 = vmatpush3.bf16.msra.mxu0 (!%p8711_p5), %v11088_v52  ;;  %9071 = vmatpush3.bf16.msra.mxu1 (!%p8711_p5), %v11089_v53  ;;  %v11124_v52 = vld [vmem:[#allocation15 + $0x30] sm:$0xff] (!%p8711_p5)   ;;  %v11125_v53 = vld [vmem:[#allocation15 + $0x38] sm:$0xff] (!%p8711_p5)  }
 0x2c5   : > { %9050 = vmatprep.subr.bf16.mxu0 (!%p8711_p5), %v11090_v54  ;;  %9072 = vmatprep.subr.bf16.mxu1 (!%p8711_p5), %v11091_v55  ;;  %v11126_v54 = vld [vmem:[#allocation18] ss:$120 sps:$4 sm:$0xff] (!%p8711_p5)   ;;  %v11128_v55 = vld [vmem:[#allocation18 + $0x4] ss:$120 sps:$4 sm:$0xff] (!%p8711_p5)  }
 0x2c8   : > { %9051 = vmatpush3.bf16.msra.mxu0 (!%p8711_p5), %v11092_v56  ;;  %9073 = vmatpush3.bf16.msra.mxu1 (!%p8711_p5), %v11093_v57  ;;  %v11131_v56 = vld [vmem:[#allocation18 + $0xc] ss:$120 sps:$4 sm:$0xff] (!%p8711_p5)  }
 0x2c9   : > { %9052 = vmatprep.subr.bf16.mxu0 (!%p8711_p5), %v11094_v58  ;;  %9074 = vmatprep.subr.bf16.mxu1 (!%p8711_p5), %v11095_v59  ;;  %v11134_v57 = vld [vmem:[#allocation18 + $0xf4] ss:$120 sps:$4 sm:$0xff] (!%p8711_p5)   ;;  %v11132_v58 = vld [vmem:[#allocation18 + $0xf0] ss:$120 sps:$4 sm:$0xff] (!%p8711_p5)   ;;  %v11140_v59 = vld [vmem:[#allocation18 + $0x1e4] ss:$120 sps:$4 sm:$0xff] (!%p8711_p5)  }
 0x2cc   : > { %9053 = vmatpush3.bf16.msra.mxu0 (!%p8711_p5), %v11096_v60  ;;  %9075 = vmatpush3.bf16.msra.mxu1 (!%p8711_p5), %v11097_v61  ;;  %v11138_v60 = vld [vmem:[#allocation18 + $0x1e0] ss:$120 sps:$4 sm:$0xff] (!%p8711_p5)   ;;  %v11146_v61 = vld [vmem:[#allocation18 + $0x2d4] ss:$120 sps:$4 sm:$0xff] (!%p8711_p5)  }
 0x2cd   : > { %9054 = vmatprep.subr.bf16.mxu0 (!%p8711_p5), %v11098_v62  ;;  %9076 = vmatprep.subr.bf16.mxu1 (!%p8711_p5), %v11099_v63  ;;  %v11144_v62 = vld [vmem:[#allocation18 + $0x2d0] ss:$120 sps:$4 sm:$0xff] (!%p8711_p5)   ;;  %v11152_v63 = vld [vmem:[#allocation18 + $0x3c4] ss:$120 sps:$4 sm:$0xff] (!%p8711_p5)  }
 0x2d0   : > { %9055 = vmatpush3.bf16.msra.mxu0 (!%p8711_p5), %v11100_v0  ;;  %9077 = vmatpush3.bf16.msra.mxu1 (!%p8711_p5), %v11101_v1  ;;  %v11150_v0 = vld [vmem:[#allocation18 + $0x3c0] ss:$120 sps:$4 sm:$0xff] (!%p8711_p5)   ;;  %v11158_v1 = vld [vmem:[#allocation18 + $0x4b4] ss:$120 sps:$4 sm:$0xff] (!%p8711_p5)  }
 0x2d1   : > { %9056 = vmatprep.subr.bf16.mxu0 (!%p8711_p5), %v11102_v2  ;;  %9078 = vmatprep.subr.bf16.mxu1 (!%p8711_p5), %v11103_v3  ;;  %v11156_v2 = vld [vmem:[#allocation18 + $0x4b0] ss:$120 sps:$4 sm:$0xff] (!%p8711_p5)   ;;  %v11164_v3 = vld [vmem:[#allocation18 + $0x5a4] ss:$120 sps:$4 sm:$0xff] (!%p8711_p5)  }
 0x2d4   : > { %9057 = vmatpush3.bf16.msra.mxu0 (!%p8711_p5), %v11104_v4  ;;  %9079 = vmatpush3.bf16.msra.mxu1 (!%p8711_p5), %v11105_v5  ;;  %v11162_v4 = vld [vmem:[#allocation18 + $0x5a0] ss:$120 sps:$4 sm:$0xff] (!%p8711_p5)  }
 0x2d5   : > { %9058 = vmatprep.subr.bf16.mxu0 (!%p8711_p5), %v11106_v6  ;;  %9080 = vmatprep.subr.bf16.mxu1 (!%p8711_p5), %v11107_v7  ;;  %v8712_v6 = vld [vmem:[#allocation14] ss:$0 sm:$0xff] (!%p8711_p5) }
 0x2d8   : > { %9059 = vmatpush3.bf16.msra.mxu0 (!%p8711_p5), %v11108_v8  ;;  %9081 = vmatpush3.bf16.msra.mxu1 (!%p8711_p5), %v11109_v9 }
 0x2d9   : > { %9060 = vmatprep.subr.bf16.mxu0 (!%p8711_p5), %v11110_v11  ;;  %9082 = vmatprep.subr.bf16.mxu1 (!%p8711_p5), %v11111_v12 }
 0x2dc   : > { %9061 = vmatpush3.bf16.msra.mxu0 (!%p8711_p5), %v11112_v13  ;;  %9083 = vmatpush3.bf16.msra.mxu1 (!%p8711_p5), %v11113_v15 }
 0x2dd   : > { %9062 = vmatprep.subr.bf16.mxu0 (!%p8711_p5), %v11114_v17  ;;  %9084 = vmatprep.subr.bf16.mxu1 (!%p8711_p5), %v11115_v19 }
 0x2e0   : > { %9063 = vmatpush3.bf16.msra.mxu0 (!%p8711_p5), %v11116_v21  ;;  %9085 = vmatpush3.bf16.msra.mxu1 (!%p8711_p5), %v11117_v22 }
 0x2e1   : > { %9521 = vmatprep.subr.bf16.mxu0 (!%p8711_p5), %v12048_v29  ;;  %4827 = vmatprep.subr.bf16.mxu1 (!%p8711_p5), %v11128_v55 }
 0x396   : > { %v2589_v35 = vpop.f32.mrb[0].mxu0  ;;  %v2671_v36 = vpop.f32.mrb[0].mxu1 }
 0x397   : > { %v2591_v27 = vpop.f32.mrb[1].mxu0  ;;  %v2673_v37 = vpop.f32.mrb[1].mxu1 }
 0x398   : > { %v2682_v38 = vcombine.low %v2589_v35, %v2591_v27  ;;  %v2683_v39 = vcombine.low %v2671_v36, %v2673_v37  ;;  %v2593_v40 = vpop.f32.mrb[2].mxu0  ;;  %v2675_v41 = vpop.f32.mrb[2].mxu1  ;;  %v2741_v35 = vcombine.low (!%p8711_p5), %v2733_v33, %v2740_v34  ;;  %v11147_v33 = vld [vmem:[#allocation18 + $0x2d8] ss:$120 sps:$4 sm:$0xff] (!%p8711_p5)   ;;  %v11155_v34 = vld [vmem:[#allocation18 + $0x3cc] ss:$120 sps:$4 sm:$0xff] (!%p8711_p5)  }
 0x399   : > { %v2594_v42 = vpop.f32.mrb[3].mxu0  ;;  %v2676_v43 = vpop.f32.mrb[3].mxu1  ;;  %v11118_v41 = vld [vmem:[#allocation15] sm:$0xff] (!%p8711_p5)  }
 0x39a   : > { %v2690_v45 = vrot.slane %v2682_v38, %v12664_v50  ;;  %v2697_v46 = vrot.slane %v2683_v39, %v12664_v50  ;;  %2705 = sbr.rel (%p8711_p5) target bundleno = 9295 (0x244f), region = 144 }
 0x39c   : > { %v2698_v26 = vcombine.low %v2690_v45, %v2697_v46 }
 0x39e   : > { %v2700_v48 = vadd.f32 %v2698_v26, %v759_v47  ;;  %v11119_v26 = vld [vmem:[#allocation15 + $0x8] sm:$0xff] (!%p8711_p5)  }
 0x3a0   : > { %2701 = vst [vmem:[#allocation2] sm:$0xff] %v2700_v48  ;;  %v11120_v48 = vld [vmem:[#allocation15 + $0x10] sm:$0xff] (!%p8711_p5)  }
 0x3a7   : > { %v2706_v32 = vld [vmem:[#allocation2] sm:$0xff] }
 0x3a8   : > { %v2743_v36 = vadd.f32 %v2741_v35, %v2706_v32  ;;  %v11149_v32 = vld [vmem:[#allocation18 + $0x2dc] ss:$120 sps:$4 sm:$0xff]   ;;  %v11153_v35 = vld [vmem:[#allocation18 + $0x3c8] ss:$120 sps:$4 sm:$0xff]  }
 0x3aa   : > { %v2744_v27 = vmax.f32 %v2743_v36, 0.0  ;;  %v11161_v36 = vld [vmem:[#allocation18 + $0x4bc] ss:$120 sps:$4 sm:$0xff]  }
 0x3ac   : > { %v2753_v37 = vrot.slane %v2744_v27, %v12664_v50  ;;  %v2746_v38 = vcombine.high %v2744_v27, %v2744_v27  ;;  %v11159_v27 = vld [vmem:[#allocation18 + $0x4b8] ss:$120 sps:$4 sm:$0xff]  }
 0x3ae   : > { %v2761_v39 = vcombine.high %v2753_v37, %v2753_v37  ;;  %v2760_v40 = vrot.slane %v2746_v38, %v12664_v50  ;;  %v2767_v42 = vpack.c.bf16 %v2753_v37, %v2753_v37  ;;  %v11122_v50 = vld [vmem:[#allocation15 + $0x20] sm:$0xff]  }
 0x3af   : > { %v11167_v37 = vld [vmem:[#allocation18 + $0x5ac] ss:$120 sps:$4 sm:$0xff]   ;;  %v11165_v38 = vld [vmem:[#allocation18 + $0x5a8] ss:$120 sps:$4 sm:$0xff]  }
 0x3b0   : > { %v2768_v43 = vpack.c.bf16 %v2761_v39, %v2761_v39  ;;  %v2762_v45 = vcombine.high %v2760_v40, %v2760_v40  ;;  %v2769_v46 = vpack.c.bf16 %v2760_v40, %v2760_v40  ;;  %v11170_v39 = vld [vmem:[#allocation18 + $0x694] ss:$120 sps:$4 sm:$0xff]  }
 0x3b1   : > { %v11173_v40 = vld [vmem:[#allocation18 + $0x69c] ss:$120 sps:$4 sm:$0xff]  }
 0x3b2   : > { %3066 = vmatprep.mubr.bf16.mxu0 %v2768_v43  ;;  %v2770_v47 = vpack.c.bf16 %v2762_v45, %v2762_v45  ;;  %v11176_v43 = vld [vmem:[#allocation18 + $0x14] ss:$120 sps:$4 sm:$0xff]   ;;  %v12050_v45 = vmov 0  }
 0x3b3   : > { %3067 = vmatmul.mubr.bf16.vlgmr.msra.gmra.mrb[0].mxu0 %v2767_v42  ;;  %v11171_v42 = vld [vmem:[#allocation18 + $0x698] ss:$120 sps:$4 sm:$0xff]  }
 0x3b4   : > { %3106 = vmatprep.mubr.bf16.mxu1 %v2770_v47  ;;  %9522 = vmatpush3.bf16.msra.mxu0 %v11118_v41  ;;  %v11168_v41 = vld [vmem:[#allocation18 + $0x690] ss:$120 sps:$4 sm:$0xff]   ;;  %v8745_v47 = vld [vmem:[#allocation17] ss:$0 sm:$0xff] }
 0x3b5   : > { %3107 = vmatmul.mubr.bf16.vlgmr.msra.gmra.mrb[0].mxu1 %v2769_v46  ;;  %9523 = vmatprep.subr.bf16.mxu0 %v12048_v29  ;;  %v11179_v46 = vld [vmem:[#allocation18 + $0x1c] ss:$120 sps:$4 sm:$0xff]  }
 0x3b6   : > { %9537 = vmatprep.mubr.msk.bf16.mxu0 %vm12049_vm0, %v12048_v29  ;;  %4828 = vmatpush1.bf16.msra.mxu1 %v11126_v54  ;;  %v11177_v54 = vld [vmem:[#allocation18 + $0x18] ss:$120 sps:$4 sm:$0xff]  }
 0x3b7   : > { %4829 = vmatprep.subr.bf16.mxu1 %v11134_v57  ;;  %4859 = vmatprep.mubr.bf16.mxu1 %v12050_v45  ;;  %v11185_v57 = vld [vmem:[#allocation18 + $0x10c] ss:$120 sps:$4 sm:$0xff]  }
 0x3b8   : > { %9524 = vmatpush3.bf16.msra.mxu0 %v11119_v26 }
 0x3b9   : > { %9525 = vmatprep.subr.bf16.mxu0 %v12048_v29 }
 0x3ba   : > { %4830 = vmatpush1.bf16.msra.mxu1 %v11132_v58  ;;  %v11180_v58 = vld [vmem:[#allocation18 + $0x100] ss:$120 sps:$4 sm:$0xff]  }
 0x3bb   : > { %4831 = vmatprep.subr.bf16.mxu1 %v11140_v59  ;;  %v11183_v59 = vld [vmem:[#allocation18 + $0x108] ss:$120 sps:$4 sm:$0xff]  }
 0x3bc   : > { %9526 = vmatpush3.bf16.msra.mxu0 %v11120_v48 }
 0x3bd   : > { %9527 = vmatprep.subr.bf16.mxu0 %v12048_v29 }
 0x3be   : > { %4832 = vmatpush1.bf16.msra.mxu1 %v11138_v60  ;;  %v11188_v60 = vld [vmem:[#allocation18 + $0x1f4] ss:$120 sps:$4 sm:$0xff]  }
 0x3bf   : > { %4833 = vmatprep.subr.bf16.mxu1 %v11146_v61  ;;  %v11191_v61 = vld [vmem:[#allocation18 + $0x1fc] ss:$120 sps:$4 sm:$0xff]  }
 0x3c0   : > { %9528 = vmatpush3.bf16.msra.mxu0 %v11121_v49 }
 0x3c1   : > { %9529 = vmatprep.subr.bf16.mxu0 %v12048_v29 }
 0x3c2   : > { %4834 = vmatpush1.bf16.msra.mxu1 %v11144_v62  ;;  %v11186_v62 = vld [vmem:[#allocation18 + $0x1f0] ss:$120 sps:$4 sm:$0xff]  }
 0x3c3   : > { %4835 = vmatprep.subr.bf16.mxu1 %v11152_v63  ;;  %v11189_v63 = vld [vmem:[#allocation18 + $0x1f8] ss:$120 sps:$4 sm:$0xff]  }
 0x3c4   : > { %9530 = vmatpush3.bf16.msra.mxu0 %v11122_v50 }
 0x3c5   : > { %9531 = vmatprep.subr.bf16.mxu0 %v12048_v29 }
 0x3c6   : > { %4836 = vmatpush1.bf16.msra.mxu1 %v11150_v0  ;;  %v11194_v0 = vld [vmem:[#allocation18 + $0x2e4] ss:$120 sps:$4 sm:$0xff]  }
 0x3c7   : > { %4837 = vmatprep.subr.bf16.mxu1 %v11158_v1  ;;  %v11197_v1 = vld [vmem:[#allocation18 + $0x2ec] ss:$120 sps:$4 sm:$0xff]  }
 0x3c8   : > { %9532 = vmatpush3.bf16.msra.mxu0 %v11123_v51 }
 0x3c9   : > { %9533 = vmatprep.subr.bf16.mxu0 %v12048_v29 }
 0x3ca   : > { %4838 = vmatpush1.bf16.msra.mxu1 %v11156_v2  ;;  %v11192_v2 = vld [vmem:[#allocation18 + $0x2e0] ss:$120 sps:$4 sm:$0xff]  }
 0x3cb   : > { %4839 = vmatprep.subr.bf16.mxu1 %v11164_v3  ;;  %v11195_v3 = vld [vmem:[#allocation18 + $0x2e8] ss:$120 sps:$4 sm:$0xff]  }
 0x3cc   : > { %9534 = vmatpush3.bf16.msra.mxu0 %v11124_v52 }
 0x3cd   : > { %9535 = vmatprep.subr.bf16.mxu0 %v12048_v29 }
 0x3ce   : > { %4840 = vmatpush1.bf16.msra.mxu1 %v11162_v4  ;;  %v11200_v4 = vld [vmem:[#allocation18 + $0x3d4] ss:$120 sps:$4 sm:$0xff]  }
 0x3cf   : > { %4841 = vmatprep.subr.bf16.mxu1 %v11170_v39  ;;  %v11245_v39 = vld [vmem:[#allocation18 + $0x2fc] ss:$120 sps:$4 sm:$0xff]  }
 0x3d0   : > { %9536 = vmatpush3.bf16.msra.mxu0 %v11125_v53  ;;  %v11174_v53 = vld [vmem:[#allocation18 + $0x10] ss:$120 sps:$4 sm:$0xff]  }
 0x3d1   : > { %4868 = vmatprep.subr.bf16.mxu0 %v11131_v56  ;;  %v11182_v56 = vld [vmem:[#allocation18 + $0x104] ss:$120 sps:$4 sm:$0xff]  }
 0x3d2   : > { %4842 = vmatpush1.bf16.msra.mxu1 %v11168_v41  ;;  %v11243_v41 = vld [vmem:[#allocation18 + $0x2f8] ss:$120 sps:$4 sm:$0xff]  }
 0x3d3   : > { %4909 = vmatprep.subr.bf16.mxu1 %v11176_v43  ;;  %v11251_v43 = vld [vmem:[#allocation18 + $0x3ec] ss:$120 sps:$4 sm:$0xff]  }
 0x486   : > { %v9064_v5 = vpop.f32.mrb[0].mxu0 }
 0x487   : > { %v9065_v7 = vpop.f32.mrb[1].mxu0 }
 0x488   : > { %v9086_v8 = vpop.f32.mrb[0].mxu1  ;;  %v9066_v9 = vadd.f32 %v9065_v7, %v9064_v5  ;;  %v9067_v11 = vpop.f32.mrb[2].mxu0  ;;  %v11203_v5 = vld [vmem:[#allocation18 + $0x3dc] ss:$120 sps:$4 sm:$0xff]   ;;  %v11201_v7 = vld [vmem:[#allocation18 + $0x3d8] ss:$120 sps:$4 sm:$0xff]  }
 0x489   : > { %v9087_v12 = vpop.f32.mrb[1].mxu1  ;;  %v9068_v13 = vpop.f32.mrb[3].mxu0  ;;  %v11204_v11 = vld [vmem:[#allocation18 + $0x4c0] ss:$120 sps:$4 sm:$0xff]  }
 0x48a   : > { %v3069_v15 = vadd.f32 %v9066_v9, %v8712_v6  ;;  %v9088_v17 = vadd.f32 %v9087_v12, %v9086_v8  ;;  %v9089_v19 = vpop.f32.mrb[2].mxu1  ;;  %v11198_v6 = vld [vmem:[#allocation18 + $0x3d0] ss:$120 sps:$4 sm:$0xff]   ;;  %v11206_v8 = vld [vmem:[#allocation18 + $0x4c4] ss:$120 sps:$4 sm:$0xff]  }
 0x48b   : > { %v9090_v21 = vpop.f32.mrb[3].mxu1  ;;  %v11209_v9 = vld [vmem:[#allocation18 + $0x4cc] ss:$120 sps:$4 sm:$0xff]   ;;  %v11207_v12 = vld [vmem:[#allocation18 + $0x4c8] ss:$120 sps:$4 sm:$0xff]  }
 0x48c   : > { %v3109_v22 = vadd.f32 %v9088_v17, %v3069_v15  ;;  %v11212_v13 = vld [vmem:[#allocation18 + $0x5b4] ss:$120 sps:$4 sm:$0xff]   ;;  %v11210_v17 = vld [vmem:[#allocation18 + $0x5b0] ss:$120 sps:$4 sm:$0xff]   ;;  %v11218_v21 = vld [vmem:[#allocation18 + $0x6a4] ss:$120 sps:$4 sm:$0xff]  }
 0x48d   : > { %v11215_v15 = vld [vmem:[#allocation18 + $0x5bc] ss:$120 sps:$4 sm:$0xff]   ;;  %v11213_v19 = vld [vmem:[#allocation18 + $0x5b8] ss:$120 sps:$4 sm:$0xff]  }
 0x48e   : > { %v3114_v23 = vmax.f32 %v3109_v22, 0.0  ;;  %v11221_v22 = vld [vmem:[#allocation18 + $0x6ac] ss:$120 sps:$4 sm:$0xff]  }
 0x490   : > { %v3115_v24 = vpack.c.bf16 %v3114_v23, %v3114_v23  ;;  %v11216_v23 = vld [vmem:[#allocation18 + $0x6a0] ss:$120 sps:$4 sm:$0xff]  }
 0x492   : > { %9538 = vmatmul.mubr.bf16.vlgmr.msra.gmra.mrb[4].mxu0 %v3115_v24  ;;  %v11224_v24 = vld [vmem:[#allocation18 + $0x24] ss:$120 sps:$4 sm:$0xff]  }
 0x493   : > { %4869 = vmatpush1.bf16.msra.mxu0 %v11129_v25  ;;  %4900 = vmatprep.mubr.bf16.mxu0 %v12050_v45  ;;  %v11219_v25 = vld [vmem:[#allocation18 + $0x6a8] ss:$120 sps:$4 sm:$0xff]  }
 0x494   : > { %4870 = vmatprep.subr.bf16.mxu0 %v11137_v10  ;;  %v11227_v10 = vld [vmem:[#allocation18 + $0x2c] ss:$120 sps:$4 sm:$0xff]  }
 0x497   : > { %4871 = vmatpush1.bf16.msra.mxu0 %v11135_v28  ;;  %v11222_v28 = vld [vmem:[#allocation18 + $0x20] ss:$120 sps:$4 sm:$0xff]  }
 0x498   : > { %4872 = vmatprep.subr.bf16.mxu0 %v11143_v30  ;;  %v11225_v30 = vld [vmem:[#allocation18 + $0x28] ss:$120 sps:$4 sm:$0xff]  }
 0x49b   : > { %4873 = vmatpush1.bf16.msra.mxu0 %v11141_v31  ;;  %v11230_v31 = vld [vmem:[#allocation18 + $0x114] ss:$120 sps:$4 sm:$0xff]  }
 0x49c   : > { %4874 = vmatprep.subr.bf16.mxu0 %v11149_v32  ;;  %v11233_v32 = vld [vmem:[#allocation18 + $0x11c] ss:$120 sps:$4 sm:$0xff]  }
 0x49f   : > { %4875 = vmatpush1.bf16.msra.mxu0 %v11147_v33  ;;  %v11228_v33 = vld [vmem:[#allocation18 + $0x110] ss:$120 sps:$4 sm:$0xff]  }
 0x4a0   : > { %4876 = vmatprep.subr.bf16.mxu0 %v11155_v34  ;;  %v11231_v34 = vld [vmem:[#allocation18 + $0x118] ss:$120 sps:$4 sm:$0xff]  }
 0x4a3   : > { %4877 = vmatpush1.bf16.msra.mxu0 %v11153_v35  ;;  %v11236_v35 = vld [vmem:[#allocation18 + $0x204] ss:$120 sps:$4 sm:$0xff]  }
 0x4a4   : > { %4878 = vmatprep.subr.bf16.mxu0 %v11161_v36  ;;  %v11239_v36 = vld [vmem:[#allocation18 + $0x20c] ss:$120 sps:$4 sm:$0xff]  }
 0x4a7   : > { %4879 = vmatpush1.bf16.msra.mxu0 %v11159_v27  ;;  %v11234_v27 = vld [vmem:[#allocation18 + $0x200] ss:$120 sps:$4 sm:$0xff]  }
 0x4a8   : > { %4880 = vmatprep.subr.bf16.mxu0 %v11167_v37  ;;  %v11237_v37 = vld [vmem:[#allocation18 + $0x208] ss:$120 sps:$4 sm:$0xff]  }
 0x4ab   : > { %4881 = vmatpush1.bf16.msra.mxu0 %v11165_v38  ;;  %v11242_v38 = vld [vmem:[#allocation18 + $0x2f4] ss:$120 sps:$4 sm:$0xff]  }
 0x4ac   : > { %4882 = vmatprep.subr.bf16.mxu0 %v11173_v40  ;;  %v11240_v40 = vld [vmem:[#allocation18 + $0x2f0] ss:$120 sps:$4 sm:$0xff]  }
 0x4af   : > { %4883 = vmatpush1.bf16.msra.mxu0 %v11171_v42  ;;  %v11248_v42 = vld [vmem:[#allocation18 + $0x3e4] ss:$120 sps:$4 sm:$0xff]  }
 0x4b0   : > { %4950 = vmatprep.subr.bf16.mxu0 %v11179_v46  ;;  %v11246_v46 = vld [vmem:[#allocation18 + $0x3e0] ss:$120 sps:$4 sm:$0xff]  }
 0x565   : > { %v3221_v26 = vpop.f32.mrb[4].mxu0 }
 0x566   : > { %v3222_v48 = vadd.f32 %v8745_v47, %v3221_v26  ;;  %v9539_v49 = vpop.f32.mrb[5].mxu0  ;;  %v11249_v47 = vld [vmem:[#allocation18 + $0x3e8] ss:$120 sps:$4 sm:$0xff]   ;;  %v11254_v26 = vld [vmem:[#allocation18 + $0x4d4] ss:$120 sps:$4 sm:$0xff]  }
 0x567   : > { %v3224_v50 = vpop.f32.mrb[6].mxu0  ;;  %v11252_v49 = vld [vmem:[#allocation18 + $0x4d0] ss:$120 sps:$4 sm:$0xff]  }
 0x568   : > { %v3227_v51 = vmax.f32 %v3222_v48, 0.0  ;;  %v9540_v52 = vpop.f32.mrb[7].mxu0  ;;  %v11257_v48 = vld [vmem:[#allocation18 + $0x4dc] ss:$120 sps:$4 sm:$0xff]   ;;  %v11255_v50 = vld [vmem:[#allocation18 + $0x4d8] ss:$120 sps:$4 sm:$0xff]  }
 0x569   : > { %v11263_v52 = vld [vmem:[#allocation18 + $0x5cc] ss:$120 sps:$4 sm:$0xff]  }
 0x56a   : > { %v12942_v55 = vpack.c.bf16 %v3227_v51, %v3227_v51  ;;  %v11260_v51 = vld [vmem:[#allocation18 + $0x5c4] ss:$120 sps:$4 sm:$0xff]  }
 0x56c   : > { %4860 = vmatmul.mubr.bf16.vlgmr.msra.gmra.mrb[4].mxu1 %v12942_v55  ;;  %4901 = vmatmul.mubr.bf16.vlgmr.msra.gmra.mrb[8].mxu0 %v12942_v55 }
 0x56d   : > { %4910 = vmatpush1.bf16.msra.mxu1 %v11174_v53  ;;  %4951 = vmatpush1.bf16.msra.mxu0 %v11177_v54  ;;  %v11258_v53 = vld [vmem:[#allocation18 + $0x5c0] ss:$120 sps:$4 sm:$0xff]  }
 0x56e   : > { %4911 = vmatprep.subr.bf16.mxu1 %v11182_v56  ;;  %4952 = vmatprep.subr.bf16.mxu0 %v11185_v57  ;;  %v11261_v54 = vld [vmem:[#allocation18 + $0x5c8] ss:$120 sps:$4 sm:$0xff]   ;;  %v11266_v56 = vld [vmem:[#allocation18 + $0x6b4] ss:$120 sps:$4 sm:$0xff]  }
 0x56f   : > { %4941 = vmatprep.mubr.bf16.mxu1 %v12050_v45  ;;  %4982 = vmatprep.mubr.bf16.mxu0 %v12050_v45  ;;  %v11269_v57 = vld [vmem:[#allocation18 + $0x6bc] ss:$120 sps:$4 sm:$0xff]  }
 0x571   : > { %4912 = vmatpush1.bf16.msra.mxu1 %v11180_v58  ;;  %4953 = vmatpush1.bf16.msra.mxu0 %v11183_v59  ;;  %v11264_v58 = vld [vmem:[#allocation18 + $0x6b0] ss:$120 sps:$4 sm:$0xff]  }
 0x572   : > { %4913 = vmatprep.subr.bf16.mxu1 %v11188_v60  ;;  %4954 = vmatprep.subr.bf16.mxu0 %v11191_v61  ;;  %v11267_v59 = vld [vmem:[#allocation18 + $0x6b8] ss:$120 sps:$4 sm:$0xff]   ;;  %v11272_v60 = vld [vmem:[#allocation18 + $0x34] ss:$120 sps:$4 sm:$0xff]  }
 0x573   : > { %v11275_v61 = vld [vmem:[#allocation18 + $0x3c] ss:$120 sps:$4 sm:$0xff]  }
 0x575   : > { %4914 = vmatpush1.bf16.msra.mxu1 %v11186_v62  ;;  %4955 = vmatpush1.bf16.msra.mxu0 %v11189_v63  ;;  %v11270_v62 = vld [vmem:[#allocation18 + $0x30] ss:$120 sps:$4 sm:$0xff]  }
 0x576   : > { %4915 = vmatprep.subr.bf16.mxu1 %v11194_v0  ;;  %4956 = vmatprep.subr.bf16.mxu0 %v11197_v1  ;;  %v11273_v63 = vld [vmem:[#allocation18 + $0x38] ss:$120 sps:$4 sm:$0xff]   ;;  %v11278_v0 = vld [vmem:[#allocation18 + $0x124] ss:$120 sps:$4 sm:$0xff]  }
 0x577   : > { %v11281_v1 = vld [vmem:[#allocation18 + $0x12c] ss:$120 sps:$4 sm:$0xff]  }
 0x579   : > { %4916 = vmatpush1.bf16.msra.mxu1 %v11192_v2  ;;  %4957 = vmatpush1.bf16.msra.mxu0 %v11195_v3  ;;  %v11276_v2 = vld [vmem:[#allocation18 + $0x120] ss:$120 sps:$4 sm:$0xff]  }
 0x57a   : > { %4917 = vmatprep.subr.bf16.mxu1 %v11200_v4  ;;  %4958 = vmatprep.subr.bf16.mxu0 %v11203_v5  ;;  %v11279_v3 = vld [vmem:[#allocation18 + $0x128] ss:$120 sps:$4 sm:$0xff]   ;;  %v11284_v4 = vld [vmem:[#allocation18 + $0x214] ss:$120 sps:$4 sm:$0xff]  }
 0x57b   : > { %v11287_v5 = vld [vmem:[#allocation18 + $0x21c] ss:$120 sps:$4 sm:$0xff]  }
 0x57d   : > { %4918 = vmatpush1.bf16.msra.mxu1 %v11198_v6  ;;  %4959 = vmatpush1.bf16.msra.mxu0 %v11201_v7  ;;  %v11282_v6 = vld [vmem:[#allocation18 + $0x210] ss:$120 sps:$4 sm:$0xff]  }
 0x57e   : > { %4919 = vmatprep.subr.bf16.mxu1 %v11206_v8  ;;  %4960 = vmatprep.subr.bf16.mxu0 %v11209_v9  ;;  %v11285_v7 = vld [vmem:[#allocation18 + $0x218] ss:$120 sps:$4 sm:$0xff]   ;;  %v11290_v8 = vld [vmem:[#allocation18 + $0x304] ss:$120 sps:$4 sm:$0xff]  }
 0x57f   : > { %v11293_v9 = vld [vmem:[#allocation18 + $0x30c] ss:$120 sps:$4 sm:$0xff]  }
 0x581   : > { %4920 = vmatpush1.bf16.msra.mxu1 %v11204_v11  ;;  %4961 = vmatpush1.bf16.msra.mxu0 %v11207_v12  ;;  %v11288_v11 = vld [vmem:[#allocation18 + $0x300] ss:$120 sps:$4 sm:$0xff]  }
 0x582   : > { %4921 = vmatprep.subr.bf16.mxu1 %v11212_v13  ;;  %4962 = vmatprep.subr.bf16.mxu0 %v11215_v15  ;;  %v11291_v12 = vld [vmem:[#allocation18 + $0x308] ss:$120 sps:$4 sm:$0xff]   ;;  %v11296_v13 = vld [vmem:[#allocation18 + $0x3f4] ss:$120 sps:$4 sm:$0xff]  }
 0x583   : > { %v11299_v15 = vld [vmem:[#allocation18 + $0x3fc] ss:$120 sps:$4 sm:$0xff]  }
 0x585   : > { %4922 = vmatpush1.bf16.msra.mxu1 %v11210_v17  ;;  %4963 = vmatpush1.bf16.msra.mxu0 %v11213_v19  ;;  %v11294_v17 = vld [vmem:[#allocation18 + $0x3f0] ss:$120 sps:$4 sm:$0xff]  }
 0x586   : > { %4923 = vmatprep.subr.bf16.mxu1 %v11218_v21  ;;  %4964 = vmatprep.subr.bf16.mxu0 %v11221_v22  ;;  %v11297_v19 = vld [vmem:[#allocation18 + $0x3f8] ss:$120 sps:$4 sm:$0xff]   ;;  %v11302_v21 = vld [vmem:[#allocation18 + $0x4e4] ss:$120 sps:$4 sm:$0xff]  }
 0x587   : > { %v11305_v22 = vld [vmem:[#allocation18 + $0x4ec] ss:$120 sps:$4 sm:$0xff]  }
 0x589   : > { %4924 = vmatpush1.bf16.msra.mxu1 %v11216_v23  ;;  %4965 = vmatpush1.bf16.msra.mxu0 %v11219_v25  ;;  %v11300_v23 = vld [vmem:[#allocation18 + $0x4e0] ss:$120 sps:$4 sm:$0xff]  }
 0x58a   : > { %4991 = vmatprep.subr.bf16.mxu1 %v11224_v24  ;;  %5032 = vmatprep.subr.bf16.mxu0 %v11227_v10  ;;  %v11303_v25 = vld [vmem:[#allocation18 + $0x4e8] ss:$120 sps:$4 sm:$0xff]   ;;  %v11308_v24 = vld [vmem:[#allocation18 + $0x5d4] ss:$120 sps:$4 sm:$0xff]  }
 0x58b   : > { %v11311_v10 = vld [vmem:[#allocation18 + $0x5dc] ss:$120 sps:$4 sm:$0xff]  }
 0x58c   : > { %4942 = vmatmul.mubr.bf16.vlgmr.msra.gmra.mrb[8].mxu1 %v12942_v55  ;;  %4983 = vmatmul.mubr.bf16.vlgmr.msra.gmra.mrb[12].mxu0 %v12942_v55 }
 0x58d   : > { %4992 = vmatpush1.bf16.msra.mxu1 %v11222_v28  ;;  %5033 = vmatpush1.bf16.msra.mxu0 %v11225_v30  ;;  %v11306_v28 = vld [vmem:[#allocation18 + $0x5d0] ss:$120 sps:$4 sm:$0xff]  }
 0x58e   : > { %4993 = vmatprep.subr.bf16.mxu1 %v11230_v31  ;;  %5034 = vmatprep.subr.bf16.mxu0 %v11233_v32  ;;  %v11309_v30 = vld [vmem:[#allocation18 + $0x5d8] ss:$120 sps:$4 sm:$0xff]   ;;  %v11314_v31 = vld [vmem:[#allocation18 + $0x6c4] ss:$120 sps:$4 sm:$0xff]  }
 0x58f   : > { %5023 = vmatprep.mubr.bf16.mxu1 %v12050_v45  ;;  %5064 = vmatprep.mubr.bf16.mxu0 %v12050_v45  ;;  %v11317_v32 = vld [vmem:[#allocation18 + $0x6cc] ss:$120 sps:$4 sm:$0xff]  }
 0x591   : > { %4994 = vmatpush1.bf16.msra.mxu1 %v11228_v33  ;;  %5035 = vmatpush1.bf16.msra.mxu0 %v11231_v34  ;;  %v11312_v33 = vld [vmem:[#allocation18 + $0x6c0] ss:$120 sps:$4 sm:$0xff]  }
 0x592   : > { %4995 = vmatprep.subr.bf16.mxu1 %v11236_v35  ;;  %5036 = vmatprep.subr.bf16.mxu0 %v11239_v36  ;;  %v11315_v34 = vld [vmem:[#allocation18 + $0x6c8] ss:$120 sps:$4 sm:$0xff]   ;;  %v11320_v35 = vld [vmem:[#allocation18 + $0x44] ss:$120 sps:$4 sm:$0xff]  }
 0x593   : > { %v11323_v36 = vld [vmem:[#allocation18 + $0x4c] ss:$120 sps:$4 sm:$0xff]  }
 0x595   : > { %4996 = vmatpush1.bf16.msra.mxu1 %v11234_v27  ;;  %5037 = vmatpush1.bf16.msra.mxu0 %v11237_v37  ;;  %v11318_v27 = vld [vmem:[#allocation18 + $0x40] ss:$120 sps:$4 sm:$0xff]  }
 0x596   : > { %4997 = vmatprep.subr.bf16.mxu1 %v11242_v38  ;;  %5038 = vmatprep.subr.bf16.mxu0 %v11245_v39  ;;  %v11321_v37 = vld [vmem:[#allocation18 + $0x48] ss:$120 sps:$4 sm:$0xff]   ;;  %v11326_v38 = vld [vmem:[#allocation18 + $0x134] ss:$120 sps:$4 sm:$0xff]  }
 0x597   : > { %v11329_v39 = vld [vmem:[#allocation18 + $0x13c] ss:$120 sps:$4 sm:$0xff]  }
 0x599   : > { %4998 = vmatpush1.bf16.msra.mxu1 %v11240_v40  ;;  %5039 = vmatpush1.bf16.msra.mxu0 %v11243_v41  ;;  %v11324_v40 = vld [vmem:[#allocation18 + $0x130] ss:$120 sps:$4 sm:$0xff]  }
 0x59a   : > { %4999 = vmatprep.subr.bf16.mxu1 %v11248_v42  ;;  %5040 = vmatprep.subr.bf16.mxu0 %v11251_v43  ;;  %v11327_v41 = vld [vmem:[#allocation18 + $0x138] ss:$120 sps:$4 sm:$0xff]   ;;  %v11332_v42 = vld [vmem:[#allocation18 + $0x224] ss:$120 sps:$4 sm:$0xff]  }
 0x59b   : > { %v11335_v43 = vld [vmem:[#allocation18 + $0x22c] ss:$120 sps:$4 sm:$0xff]  }
 0x59d   : > { %5000 = vmatpush1.bf16.msra.mxu1 %v11246_v46  ;;  %5041 = vmatpush1.bf16.msra.mxu0 %v11249_v47  ;;  %v11330_v46 = vld [vmem:[#allocation18 + $0x220] ss:$120 sps:$4 sm:$0xff]  }
 0x59e   : > { %5001 = vmatprep.subr.bf16.mxu1 %v11254_v26  ;;  %5042 = vmatprep.subr.bf16.mxu0 %v11257_v48  ;;  %v11333_v47 = vld [vmem:[#allocation18 + $0x228] ss:$120 sps:$4 sm:$0xff]   ;;  %v11338_v26 = vld [vmem:[#allocation18 + $0x314] ss:$120 sps:$4 sm:$0xff]  }
 0x59f   : > { %v11341_v48 = vld [vmem:[#allocation18 + $0x31c] ss:$120 sps:$4 sm:$0xff]  }
 0x5a1   : > { %5002 = vmatpush1.bf16.msra.mxu1 %v11252_v49  ;;  %5043 = vmatpush1.bf16.msra.mxu0 %v11255_v50  ;;  %v11336_v49 = vld [vmem:[#allocation18 + $0x310] ss:$120 sps:$4 sm:$0xff]  }
 0x5a2   : > { %5003 = vmatprep.subr.bf16.mxu1 %v11260_v51  ;;  %5044 = vmatprep.subr.bf16.mxu0 %v11263_v52  ;;  %v11339_v50 = vld [vmem:[#allocation18 + $0x318] ss:$120 sps:$4 sm:$0xff]   ;;  %v11344_v51 = vld [vmem:[#allocation18 + $0x404] ss:$120 sps:$4 sm:$0xff]  }
 0x5a3   : > { %v11347_v52 = vld [vmem:[#allocation18 + $0x40c] ss:$120 sps:$4 sm:$0xff]  }
 0x5a5   : > { %5004 = vmatpush1.bf16.msra.mxu1 %v11258_v53  ;;  %5045 = vmatpush1.bf16.msra.mxu0 %v11261_v54  ;;  %v11342_v53 = vld [vmem:[#allocation18 + $0x400] ss:$120 sps:$4 sm:$0xff]  }
 0x5a6   : > { %5005 = vmatprep.subr.bf16.mxu1 %v11266_v56  ;;  %5046 = vmatprep.subr.bf16.mxu0 %v11269_v57  ;;  %v11345_v54 = vld [vmem:[#allocation18 + $0x408] ss:$120 sps:$4 sm:$0xff]   ;;  %v11350_v56 = vld [vmem:[#allocation18 + $0x4f4] ss:$120 sps:$4 sm:$0xff]  }
 0x5a7   : > { %v11353_v57 = vld [vmem:[#allocation18 + $0x4fc] ss:$120 sps:$4 sm:$0xff]  }
 0x5a9   : > { %5006 = vmatpush1.bf16.msra.mxu1 %v11264_v58  ;;  %5047 = vmatpush1.bf16.msra.mxu0 %v11267_v59  ;;  %v11348_v58 = vld [vmem:[#allocation18 + $0x4f0] ss:$120 sps:$4 sm:$0xff]  }
 0x5aa   : > { %5073 = vmatprep.subr.bf16.mxu1 %v11272_v60  ;;  %5114 = vmatprep.subr.bf16.mxu0 %v11275_v61  ;;  %v11351_v59 = vld [vmem:[#allocation18 + $0x4f8] ss:$120 sps:$4 sm:$0xff]   ;;  %v11356_v60 = vld [vmem:[#allocation18 + $0x5e4] ss:$120 sps:$4 sm:$0xff]  }
 0x5ab   : > { %v11359_v61 = vld [vmem:[#allocation18 + $0x5ec] ss:$120 sps:$4 sm:$0xff]  }
 0x5ac   : > { %5024 = vmatmul.mubr.bf16.vlgmr.msra.gmra.mrb[12].mxu1 %v12942_v55  ;;  %5065 = vmatmul.mubr.bf16.vlgmr.msra.gmra.mrb[16].mxu0 %v12942_v55 }
 0x5ad   : > { %5074 = vmatpush1.bf16.msra.mxu1 %v11270_v62  ;;  %5115 = vmatpush1.bf16.msra.mxu0 %v11273_v63  ;;  %v11354_v62 = vld [vmem:[#allocation18 + $0x5e0] ss:$120 sps:$4 sm:$0xff]  }
 0x5ae   : > { %5075 = vmatprep.subr.bf16.mxu1 %v11278_v0  ;;  %5116 = vmatprep.subr.bf16.mxu0 %v11281_v1  ;;  %v11357_v63 = vld [vmem:[#allocation18 + $0x5e8] ss:$120 sps:$4 sm:$0xff]   ;;  %v11362_v0 = vld [vmem:[#allocation18 + $0x6d4] ss:$120 sps:$4 sm:$0xff]  }
 0x5af   : > { %5105 = vmatprep.mubr.bf16.mxu1 %v12050_v45  ;;  %5146 = vmatprep.mubr.bf16.mxu0 %v12050_v45  ;;  %v11365_v1 = vld [vmem:[#allocation18 + $0x6dc] ss:$120 sps:$4 sm:$0xff]  }
 0x5b1   : > { %5076 = vmatpush1.bf16.msra.mxu1 %v11276_v2  ;;  %5117 = vmatpush1.bf16.msra.mxu0 %v11279_v3  ;;  %v11360_v2 = vld [vmem:[#allocation18 + $0x6d0] ss:$120 sps:$4 sm:$0xff]  }
 0x5b2   : > { %5077 = vmatprep.subr.bf16.mxu1 %v11284_v4  ;;  %5118 = vmatprep.subr.bf16.mxu0 %v11287_v5  ;;  %v11363_v3 = vld [vmem:[#allocation18 + $0x6d8] ss:$120 sps:$4 sm:$0xff]   ;;  %v11368_v4 = vld [vmem:[#allocation18 + $0x54] ss:$120 sps:$4 sm:$0xff]  }
 0x5b3   : > { %v11371_v5 = vld [vmem:[#allocation18 + $0x5c] ss:$120 sps:$4 sm:$0xff]  }
 0x5b5   : > { %5078 = vmatpush1.bf16.msra.mxu1 %v11282_v6  ;;  %5119 = vmatpush1.bf16.msra.mxu0 %v11285_v7  ;;  %v11366_v6 = vld [vmem:[#allocation18 + $0x50] ss:$120 sps:$4 sm:$0xff]  }
 0x5b6   : > { %5079 = vmatprep.subr.bf16.mxu1 %v11290_v8  ;;  %5120 = vmatprep.subr.bf16.mxu0 %v11293_v9  ;;  %v11369_v7 = vld [vmem:[#allocation18 + $0x58] ss:$120 sps:$4 sm:$0xff]   ;;  %v11374_v8 = vld [vmem:[#allocation18 + $0x144] ss:$120 sps:$4 sm:$0xff]  }
 0x5b7   : > { %v11377_v9 = vld [vmem:[#allocation18 + $0x14c] ss:$120 sps:$4 sm:$0xff]  }
 0x5b9   : > { %5080 = vmatpush1.bf16.msra.mxu1 %v11288_v11  ;;  %5121 = vmatpush1.bf16.msra.mxu0 %v11291_v12  ;;  %v11372_v11 = vld [vmem:[#allocation18 + $0x140] ss:$120 sps:$4 sm:$0xff]  }
 0x5ba   : > { %5081 = vmatprep.subr.bf16.mxu1 %v11296_v13  ;;  %5122 = vmatprep.subr.bf16.mxu0 %v11299_v15  ;;  %v11375_v12 = vld [vmem:[#allocation18 + $0x148] ss:$120 sps:$4 sm:$0xff]   ;;  %v11380_v13 = vld [vmem:[#allocation18 + $0x234] ss:$120 sps:$4 sm:$0xff]  }
 0x5bb   : > { %v11383_v15 = vld [vmem:[#allocation18 + $0x23c] ss:$120 sps:$4 sm:$0xff]  }
 0x5bd   : > { %5082 = vmatpush1.bf16.msra.mxu1 %v11294_v17  ;;  %5123 = vmatpush1.bf16.msra.mxu0 %v11297_v19  ;;  %v11378_v17 = vld [vmem:[#allocation18 + $0x230] ss:$120 sps:$4 sm:$0xff]  }
 0x5be   : > { %5083 = vmatprep.subr.bf16.mxu1 %v11302_v21  ;;  %5124 = vmatprep.subr.bf16.mxu0 %v11305_v22  ;;  %v11381_v19 = vld [vmem:[#allocation18 + $0x238] ss:$120 sps:$4 sm:$0xff]   ;;  %v11386_v21 = vld [vmem:[#allocation18 + $0x324] ss:$120 sps:$4 sm:$0xff]  }
 0x5bf   : > { %v11389_v22 = vld [vmem:[#allocation18 + $0x32c] ss:$120 sps:$4 sm:$0xff]  }
 0x5c1   : > { %5084 = vmatpush1.bf16.msra.mxu1 %v11300_v23  ;;  %5125 = vmatpush1.bf16.msra.mxu0 %v11303_v25  ;;  %v11384_v23 = vld [vmem:[#allocation18 + $0x320] ss:$120 sps:$4 sm:$0xff]  }
 0x5c2   : > { %5085 = vmatprep.subr.bf16.mxu1 %v11308_v24  ;;  %5126 = vmatprep.subr.bf16.mxu0 %v11311_v10  ;;  %v11387_v25 = vld [vmem:[#allocation18 + $0x328] ss:$120 sps:$4 sm:$0xff]   ;;  %v11392_v24 = vld [vmem:[#allocation18 + $0x414] ss:$120 sps:$4 sm:$0xff]  }
 0x5c3   : > { %v11395_v10 = vld [vmem:[#allocation18 + $0x41c] ss:$120 sps:$4 sm:$0xff]  }
 0x5c5   : > { %5086 = vmatpush1.bf16.msra.mxu1 %v11306_v28  ;;  %5127 = vmatpush1.bf16.msra.mxu0 %v11309_v30  ;;  %v11390_v28 = vld [vmem:[#allocation18 + $0x410] ss:$120 sps:$4 sm:$0xff]  }
 0x5c6   : > { %5087 = vmatprep.subr.bf16.mxu1 %v11314_v31  ;;  %5128 = vmatprep.subr.bf16.mxu0 %v11317_v32  ;;  %v11393_v30 = vld [vmem:[#allocation18 + $0x418] ss:$120 sps:$4 sm:$0xff]   ;;  %v11398_v31 = vld [vmem:[#allocation18 + $0x504] ss:$120 sps:$4 sm:$0xff]  }
 0x5c7   : > { %v11401_v32 = vld [vmem:[#allocation18 + $0x50c] ss:$120 sps:$4 sm:$0xff]  }
 0x5c9   : > { %5088 = vmatpush1.bf16.msra.mxu1 %v11312_v33  ;;  %5129 = vmatpush1.bf16.msra.mxu0 %v11315_v34  ;;  %v11396_v33 = vld [vmem:[#allocation18 + $0x500] ss:$120 sps:$4 sm:$0xff]  }
 0x5ca   : > { %5155 = vmatprep.subr.bf16.mxu1 %v11320_v35  ;;  %5196 = vmatprep.subr.bf16.mxu0 %v11323_v36  ;;  %v11399_v34 = vld [vmem:[#allocation18 + $0x508] ss:$120 sps:$4 sm:$0xff]   ;;  %v11404_v35 = vld [vmem:[#allocation18 + $0x5f4] ss:$120 sps:$4 sm:$0xff]  }
 0x5cb   : > { %v11407_v36 = vld [vmem:[#allocation18 + $0x5fc] ss:$120 sps:$4 sm:$0xff]  }
 0x5cc   : > { %5106 = vmatmul.mubr.bf16.vlgmr.msra.gmra.mrb[16].mxu1 %v12942_v55  ;;  %5147 = vmatmul.mubr.bf16.vlgmr.msra.gmra.mrb[20].mxu0 %v12942_v55 }
 0x5cd   : > { %5156 = vmatpush1.bf16.msra.mxu1 %v11318_v27  ;;  %5197 = vmatpush1.bf16.msra.mxu0 %v11321_v37  ;;  %v11402_v27 = vld [vmem:[#allocation18 + $0x5f0] ss:$120 sps:$4 sm:$0xff]  }
 0x5ce   : > { %5157 = vmatprep.subr.bf16.mxu1 %v11326_v38  ;;  %5198 = vmatprep.subr.bf16.mxu0 %v11329_v39  ;;  %v11405_v37 = vld [vmem:[#allocation18 + $0x5f8] ss:$120 sps:$4 sm:$0xff]   ;;  %v11410_v38 = vld [vmem:[#allocation18 + $0x6e4] ss:$120 sps:$4 sm:$0xff]  }
 0x5cf   : > { %5187 = vmatprep.mubr.bf16.mxu1 %v12050_v45  ;;  %5228 = vmatprep.mubr.bf16.mxu0 %v12050_v45  ;;  %v11413_v39 = vld [vmem:[#allocation18 + $0x6ec] ss:$120 sps:$4 sm:$0xff]  }
 0x5d1   : > { %5158 = vmatpush1.bf16.msra.mxu1 %v11324_v40  ;;  %5199 = vmatpush1.bf16.msra.mxu0 %v11327_v41  ;;  %v11408_v40 = vld [vmem:[#allocation18 + $0x6e0] ss:$120 sps:$4 sm:$0xff]  }
 0x5d2   : > { %5159 = vmatprep.subr.bf16.mxu1 %v11332_v42  ;;  %5200 = vmatprep.subr.bf16.mxu0 %v11335_v43  ;;  %v11411_v41 = vld [vmem:[#allocation18 + $0x6e8] ss:$120 sps:$4 sm:$0xff]   ;;  %v11416_v42 = vld [vmem:[#allocation18 + $0x64] ss:$120 sps:$4 sm:$0xff]  }
 0x5d3   : > { %v11419_v43 = vld [vmem:[#allocation18 + $0x6c] ss:$120 sps:$4 sm:$0xff]  }
 0x5d5   : > { %5160 = vmatpush1.bf16.msra.mxu1 %v11330_v46  ;;  %5201 = vmatpush1.bf16.msra.mxu0 %v11333_v47  ;;  %v11414_v46 = vld [vmem:[#allocation18 + $0x60] ss:$120 sps:$4 sm:$0xff]  }
 0x5d6   : > { %5161 = vmatprep.subr.bf16.mxu1 %v11338_v26  ;;  %5202 = vmatprep.subr.bf16.mxu0 %v11341_v48  ;;  %v11417_v47 = vld [vmem:[#allocation18 + $0x68] ss:$120 sps:$4 sm:$0xff]   ;;  %v11422_v26 = vld [vmem:[#allocation18 + $0x154] ss:$120 sps:$4 sm:$0xff]  }
 0x5d7   : > { %v11425_v48 = vld [vmem:[#allocation18 + $0x15c] ss:$120 sps:$4 sm:$0xff]  }
 0x5d9   : > { %5162 = vmatpush1.bf16.msra.mxu1 %v11336_v49  ;;  %5203 = vmatpush1.bf16.msra.mxu0 %v11339_v50  ;;  %v11420_v49 = vld [vmem:[#allocation18 + $0x150] ss:$120 sps:$4 sm:$0xff]  }
 0x5da   : > { %5163 = vmatprep.subr.bf16.mxu1 %v11344_v51  ;;  %5204 = vmatprep.subr.bf16.mxu0 %v11347_v52  ;;  %v11423_v50 = vld [vmem:[#allocation18 + $0x158] ss:$120 sps:$4 sm:$0xff]   ;;  %v11428_v51 = vld [vmem:[#allocation18 + $0x244] ss:$120 sps:$4 sm:$0xff]  }
 0x5db   : > { %v11431_v52 = vld [vmem:[#allocation18 + $0x24c] ss:$120 sps:$4 sm:$0xff]  }
 0x5dd   : > { %5164 = vmatpush1.bf16.msra.mxu1 %v11342_v53  ;;  %5205 = vmatpush1.bf16.msra.mxu0 %v11345_v54  ;;  %v11426_v53 = vld [vmem:[#allocation18 + $0x240] ss:$120 sps:$4 sm:$0xff]  }
 0x5de   : > { %5165 = vmatprep.subr.bf16.mxu1 %v11350_v56  ;;  %5206 = vmatprep.subr.bf16.mxu0 %v11353_v57  ;;  %v11429_v54 = vld [vmem:[#allocation18 + $0x248] ss:$120 sps:$4 sm:$0xff]   ;;  %v11434_v56 = vld [vmem:[#allocation18 + $0x334] ss:$120 sps:$4 sm:$0xff]  }
 0x5df   : > { %v11437_v57 = vld [vmem:[#allocation18 + $0x33c] ss:$120 sps:$4 sm:$0xff]  }
 0x5e1   : > { %5166 = vmatpush1.bf16.msra.mxu1 %v11348_v58  ;;  %5207 = vmatpush1.bf16.msra.mxu0 %v11351_v59  ;;  %v11432_v58 = vld [vmem:[#allocation18 + $0x330] ss:$120 sps:$4 sm:$0xff]  }
 0x5e2   : > { %5167 = vmatprep.subr.bf16.mxu1 %v11356_v60  ;;  %5208 = vmatprep.subr.bf16.mxu0 %v11359_v61  ;;  %v11435_v59 = vld [vmem:[#allocation18 + $0x338] ss:$120 sps:$4 sm:$0xff]   ;;  %v11440_v60 = vld [vmem:[#allocation18 + $0x424] ss:$120 sps:$4 sm:$0xff]  }
 0x5e3   : > { %v11443_v61 = vld [vmem:[#allocation18 + $0x42c] ss:$120 sps:$4 sm:$0xff]  }
 0x5e5   : > { %5168 = vmatpush1.bf16.msra.mxu1 %v11354_v62  ;;  %5209 = vmatpush1.bf16.msra.mxu0 %v11357_v63  ;;  %v11438_v62 = vld [vmem:[#allocation18 + $0x420] ss:$120 sps:$4 sm:$0xff]  }
 0x5e6   : > { %5169 = vmatprep.subr.bf16.mxu1 %v11362_v0  ;;  %5210 = vmatprep.subr.bf16.mxu0 %v11365_v1  ;;  %v11441_v63 = vld [vmem:[#allocation18 + $0x428] ss:$120 sps:$4 sm:$0xff]   ;;  %v11446_v0 = vld [vmem:[#allocation18 + $0x514] ss:$120 sps:$4 sm:$0xff]  }
 0x5e7   : > { %v11449_v1 = vld [vmem:[#allocation18 + $0x51c] ss:$120 sps:$4 sm:$0xff]  }
 0x5e9   : > { %5170 = vmatpush1.bf16.msra.mxu1 %v11360_v2  ;;  %5211 = vmatpush1.bf16.msra.mxu0 %v11363_v3  ;;  %v11444_v2 = vld [vmem:[#allocation18 + $0x510] ss:$120 sps:$4 sm:$0xff]  }
 0x5ea   : > { %5237 = vmatprep.subr.bf16.mxu1 %v11368_v4  ;;  %5278 = vmatprep.subr.bf16.mxu0 %v11371_v5  ;;  %v11447_v3 = vld [vmem:[#allocation18 + $0x518] ss:$120 sps:$4 sm:$0xff]   ;;  %v11452_v4 = vld [vmem:[#allocation18 + $0x604] ss:$120 sps:$4 sm:$0xff]  }
 0x5eb   : > { %v11455_v5 = vld [vmem:[#allocation18 + $0x60c] ss:$120 sps:$4 sm:$0xff]  }
 0x5ec   : > { %5188 = vmatmul.mubr.bf16.vlgmr.msra.gmra.mrb[20].mxu1 %v12942_v55  ;;  %5229 = vmatmul.mubr.bf16.vlgmr.msra.gmra.mrb[24].mxu0 %v12942_v55 }
 0x5ed   : > { %5238 = vmatpush1.bf16.msra.mxu1 %v11366_v6  ;;  %5279 = vmatpush1.bf16.msra.mxu0 %v11369_v7  ;;  %v11450_v6 = vld [vmem:[#allocation18 + $0x600] ss:$120 sps:$4 sm:$0xff]  }
 0x5ee   : > { %5239 = vmatprep.subr.bf16.mxu1 %v11374_v8  ;;  %5280 = vmatprep.subr.bf16.mxu0 %v11377_v9  ;;  %v11453_v7 = vld [vmem:[#allocation18 + $0x608] ss:$120 sps:$4 sm:$0xff]   ;;  %v11458_v8 = vld [vmem:[#allocation18 + $0x6f4] ss:$120 sps:$4 sm:$0xff]  }
 0x5ef   : > { %5269 = vmatprep.mubr.bf16.mxu1 %v12050_v45  ;;  %5310 = vmatprep.mubr.bf16.mxu0 %v12050_v45  ;;  %v11461_v9 = vld [vmem:[#allocation18 + $0x6fc] ss:$120 sps:$4 sm:$0xff]  }
 0x5f1   : > { %5240 = vmatpush1.bf16.msra.mxu1 %v11372_v11  ;;  %5281 = vmatpush1.bf16.msra.mxu0 %v11375_v12  ;;  %v11456_v11 = vld [vmem:[#allocation18 + $0x6f0] ss:$120 sps:$4 sm:$0xff]  }
 0x5f2   : > { %5241 = vmatprep.subr.bf16.mxu1 %v11380_v13  ;;  %5282 = vmatprep.subr.bf16.mxu0 %v11383_v15  ;;  %v11459_v12 = vld [vmem:[#allocation18 + $0x6f8] ss:$120 sps:$4 sm:$0xff]   ;;  %v11464_v13 = vld [vmem:[#allocation18 + $0x74] ss:$120 sps:$4 sm:$0xff]  }
 0x5f3   : > { %v11462_v15 = vld [vmem:[#allocation18 + $0x70] ss:$120 sps:$4 sm:$0xff]  }
 0x5f5   : > { %5242 = vmatpush1.bf16.msra.mxu1 %v11378_v17  ;;  %5283 = vmatpush1.bf16.msra.mxu0 %v11381_v19  ;;  %v12971_v17 = vld [vmem:[%s14365_s11] sm:$0xff]   ;;  %v11468_v19 = vld [vmem:[#allocation18 + $0x164] ss:$120 sps:$4 sm:$0xff]  }
 0x5f6   : > { %5243 = vmatprep.subr.bf16.mxu1 %v11386_v21  ;;  %5284 = vmatprep.subr.bf16.mxu0 %v11389_v22  ;;  %v11466_v21 = vld [vmem:[#allocation18 + $0x160] ss:$120 sps:$4 sm:$0xff]  }
 0x5f7   : > { %v12980_v22 = vld [vmem:[%s14365_s11 + $0x8] sm:$0xff]  }
 0x5f9   : > { %5244 = vmatpush1.bf16.msra.mxu1 %v11384_v23  ;;  %5285 = vmatpush1.bf16.msra.mxu0 %v11387_v25  ;;  %v11472_v23 = vld [vmem:[#allocation18 + $0x254] ss:$120 sps:$4 sm:$0xff]   ;;  %v11470_v25 = vld [vmem:[#allocation18 + $0x250] ss:$120 sps:$4 sm:$0xff]  }
 0x5fa   : > { %5245 = vmatprep.subr.bf16.mxu1 %v11392_v24  ;;  %5286 = vmatprep.subr.bf16.mxu0 %v11395_v10  ;;  %v12990_v24 = vld [vmem:[%s14365_s11 + $0x10] sm:$0xff]  }
 0x5fb   : > { %v11476_v10 = vld [vmem:[#allocation18 + $0x344] ss:$120 sps:$4 sm:$0xff]  }
 0x5fd   : > { %5246 = vmatpush1.bf16.msra.mxu1 %v11390_v28  ;;  %5287 = vmatpush1.bf16.msra.mxu0 %v11393_v30  ;;  %v12997_v28 = vld [vmem:[%s14365_s11 + $0x18] sm:$0xff]  }
 0x5fe   : > { %5247 = vmatprep.subr.bf16.mxu1 %v11398_v31  ;;  %5288 = vmatprep.subr.bf16.mxu0 %v11401_v32  ;;  %v11480_v30 = vld [vmem:[#allocation18 + $0x434] ss:$120 sps:$4 sm:$0xff]   ;;  %v11478_v31 = vld [vmem:[#allocation18 + $0x430] ss:$120 sps:$4 sm:$0xff]  }
 0x5ff   : > { %v13004_v32 = vld [vmem:[%s14365_s11 + $0x20] sm:$0xff]  }
 0x601   : > { %5248 = vmatpush1.bf16.msra.mxu1 %v11396_v33  ;;  %5289 = vmatpush1.bf16.msra.mxu0 %v11399_v34  ;;  %v13006_v33 = vld [vmem:[#allocation20] sm:$0xff] }
 0x602   : > { %5249 = vmatprep.subr.bf16.mxu1 %v11404_v35  ;;  %5290 = vmatprep.subr.bf16.mxu0 %v11407_v36  ;;  %v11484_v34 = vld [vmem:[#allocation18 + $0x524] ss:$120 sps:$4 sm:$0xff]   ;;  %v3488_v35 = vrot.slane %v13006_v33, %v12917_v18  ;;  %v11482_v36 = vld [vmem:[#allocation18 + $0x520] ss:$120 sps:$4 sm:$0xff]  }
 0x605   : > { %5250 = vmatpush1.bf16.msra.mxu1 %v11402_v27  ;;  %5291 = vmatpush1.bf16.msra.mxu0 %v11405_v37  ;;  %v3484_v27 = vrot.slane %v13006_v33, %v12914_v16  ;;  %v3492_v37 = vrot.slane %v13006_v33, %v12920_v20 }
 0x606   : > { %5251 = vmatprep.subr.bf16.mxu1 %v11410_v38  ;;  %5292 = vmatprep.subr.bf16.mxu0 %v11413_v39  ;;  %v13019_v38 = vld [vmem:[%s14365_s11 + $0x28] sm:$0xff]   ;;  %v11488_v39 = vld [vmem:[#allocation18 + $0x614] ss:$120 sps:$4 sm:$0xff]  }
 0x609   : > { %5252 = vmatpush1.bf16.msra.mxu1 %v11408_v40  ;;  %5293 = vmatpush1.bf16.msra.mxu0 %v11411_v41 }
 0x60a   : > { %5319 = vmatprep.subr.bf16.mxu1 %v11416_v42  ;;  %5360 = vmatprep.subr.bf16.mxu0 %v11419_v43 }
 0x60c   : > { %5270 = vmatmul.mubr.bf16.vlgmr.msra.gmra.mrb[24].mxu1 %v12942_v55  ;;  %5311 = vmatmul.mubr.bf16.vlgmr.msra.gmra.mrb[28].mxu0 %v12942_v55 }
 0x60d   : > { %5320 = vmatpush1.bf16.msra.mxu1 %v11414_v46  ;;  %5361 = vmatpush1.bf16.msra.mxu0 %v11417_v47 }
 0x60e   : > { %5321 = vmatprep.subr.bf16.mxu1 %v11422_v26  ;;  %5362 = vmatprep.subr.bf16.mxu0 %v11425_v48 }
 0x60f   : > { %5351 = vmatprep.mubr.bf16.mxu1 %v12050_v45  ;;  %5392 = vmatprep.mubr.bf16.mxu0 %v12050_v45 }
 0x611   : > { %5322 = vmatpush1.bf16.msra.mxu1 %v11420_v49  ;;  %5363 = vmatpush1.bf16.msra.mxu0 %v11423_v50  ;;  %v11486_v50 = vld [vmem:[#allocation18 + $0x610] ss:$120 sps:$4 sm:$0xff]  }
 0x612   : > { %5323 = vmatprep.subr.bf16.mxu1 %v11428_v51  ;;  %5364 = vmatprep.subr.bf16.mxu0 %v11431_v52  ;;  %v13032_v51 = vld [vmem:[%s14365_s11 + $0x30] sm:$0xff]   ;;  %v3480_v52 = vrot.slane %v13006_v33, %v12911_v14 }
 0x615   : > { %5324 = vmatpush1.bf16.msra.mxu1 %v11426_v53  ;;  %5365 = vmatpush1.bf16.msra.mxu0 %v11429_v54 }
 0x616   : > { %5325 = vmatprep.subr.bf16.mxu1 %v11434_v56  ;;  %5366 = vmatprep.subr.bf16.mxu0 %v11437_v57  ;;  %v11492_v56 = vld [vmem:[#allocation18 + $0x704] ss:$120 sps:$4 sm:$0xff]   ;;  %v11490_v57 = vld [vmem:[#allocation18 + $0x700] ss:$120 sps:$4 sm:$0xff]  }
 0x619   : > { %5326 = vmatpush1.bf16.msra.mxu1 %v11432_v58  ;;  %5367 = vmatpush1.bf16.msra.mxu0 %v11435_v59  ;;  %v13041_v58 = vld [vmem:[%s14365_s11 + $0x38] sm:$0xff]  }
 0x61a   : > { %5327 = vmatprep.subr.bf16.mxu1 %v11440_v60  ;;  %5368 = vmatprep.subr.bf16.mxu0 %v11443_v61  ;;  %v13053_v61 = vsub.s32 4, %v12656_v44 }
 0x61d   : > { %5328 = vmatpush1.bf16.msra.mxu1 %v11438_v62  ;;  %5369 = vmatpush1.bf16.msra.mxu0 %v11441_v63  ;;  %v13056_v62 = vsub.s32 6, %v12656_v44  ;;  %v13059_v63 = vsub.s32 5, %v12656_v44 }
 0x61e   : > { %5329 = vmatprep.subr.bf16.mxu1 %v11446_v0  ;;  %5370 = vmatprep.subr.bf16.mxu0 %v11449_v1  ;;  %v13062_v0 = vsub.s32 7, %v12656_v44 }
 0x61f   : > { %v3504_v1 = vrot.slane %v13006_v33, %v13056_v62 }
 0x621   : > { %5330 = vmatpush1.bf16.msra.mxu1 %v11444_v2  ;;  %5371 = vmatpush1.bf16.msra.mxu0 %v11447_v3  ;;  %v3500_v2 = vrot.slane %v13006_v33, %v13059_v63  ;;  %v3508_v3 = vrot.slane %v13006_v33, %v13062_v0 }
 0x622   : > { %5331 = vmatprep.subr.bf16.mxu1 %v11452_v4  ;;  %5372 = vmatprep.subr.bf16.mxu0 %v11455_v5 }
 0x625   : > { %5332 = vmatpush1.bf16.msra.mxu1 %v11450_v6  ;;  %5373 = vmatpush1.bf16.msra.mxu0 %v11453_v7 }
 0x626   : > { %5333 = vmatprep.subr.bf16.mxu1 %v11458_v8  ;;  %5374 = vmatprep.subr.bf16.mxu0 %v11461_v9 }
 0x629   : > { %5334 = vmatpush1.bf16.msra.mxu1 %v11456_v11  ;;  %5375 = vmatpush1.bf16.msra.mxu0 %v11459_v12 }
 0x62a   : > { %5401 = vmatprep.subr.bf16.mxu1 %v11464_v13  ;;  %9541 = vmatprep.subr.bf16.mxu0 %v12048_v29 }
 0x62c   : > { %5352 = vmatmul.mubr.bf16.vlgmr.msra.gmra.mrb[28].mxu1 %v12942_v55  ;;  %5393 = vmatmul.mubr.bf16.vlgmr.msra.gmra.mrb[32].mxu0 %v12942_v55 }
 0x62d   : > { %5402 = vmatpush1.bf16.msra.mxu1 %v11462_v15  ;;  %9542 = vmatpush3.bf16.msra.mxu0 %v12971_v17 }
 0x62e   : > { %5403 = vmatprep.subr.bf16.mxu1 %v11468_v19  ;;  %9543 = vmatprep.subr.bf16.mxu0 %v12048_v29 }
 0x62f   : > { %5433 = vmatprep.mubr.bf16.mxu1 %v12050_v45  ;;  %9557 = vmatprep.mubr.msk.bf16.mxu0 %vm12049_vm0, %v12048_v29  ;;  %v11474_v45 = vld [vmem:[#allocation18 + $0x340] ss:$120 sps:$4 sm:$0xff]  }
 0x631   : > { %5404 = vmatpush1.bf16.msra.mxu1 %v11466_v21  ;;  %9544 = vmatpush3.bf16.msra.mxu0 %v12980_v22  ;;  %v13080_v21 = vld [vmem:[#allocation20 + $0x8] sm:$0xff] }
 0x632   : > { %5405 = vmatprep.subr.bf16.mxu1 %v11472_v23  ;;  %9545 = vmatprep.subr.bf16.mxu0 %v12048_v29  ;;  %v3520_v23 = vrot.slane %v13080_v21, %v12917_v18 }
 0x635   : > { %5406 = vmatpush1.bf16.msra.mxu1 %v11470_v25  ;;  %9546 = vmatpush3.bf16.msra.mxu0 %v12990_v24  ;;  %v3516_v25 = vrot.slane %v13080_v21, %v12914_v16 }
 0x636   : > { %5407 = vmatprep.subr.bf16.mxu1 %v11476_v10  ;;  %9547 = vmatprep.subr.bf16.mxu0 %v12048_v29  ;;  %v3524_v10 = vrot.slane %v13080_v21, %v12920_v20 }
 0x639   : > { %5408 = vmatpush1.bf16.msra.mxu1 %v11474_v45  ;;  %9548 = vmatpush3.bf16.msra.mxu0 %v12997_v28 }
 0x63a   : > { %5409 = vmatprep.subr.bf16.mxu1 %v11480_v30  ;;  %9549 = vmatprep.subr.bf16.mxu0 %v12048_v29 }
 0x63d   : > { %5410 = vmatpush1.bf16.msra.mxu1 %v11478_v31  ;;  %9550 = vmatpush3.bf16.msra.mxu0 %v13004_v32 }
 0x63e   : > { %5411 = vmatprep.subr.bf16.mxu1 %v11484_v34  ;;  %9551 = vmatprep.subr.bf16.mxu0 %v12048_v29 }
 0x63f   : > { %v4861_v40 = vpop.f32.mrb[4].mxu1  ;;  %v4902_v41 = vpop.f32.mrb[8].mxu0 }
 0x640   : > { %v13022_v42 = vadd.f32 %v4902_v41, %v3488_v35  ;;  %v4863_v43 = vpop.f32.mrb[5].mxu1  ;;  %v4904_v46 = vpop.f32.mrb[9].mxu0  ;;  %v4862_v59 = vadd.f32 %v4861_v40, %v3480_v52  ;;  %v13096_v41 = vld [vmem:[#allocation23] sm:$0xff]   ;;  %v3540_v52 = vrot.slane %v13080_v21, %v13062_v0 }
 0x641   : > { %v13024_v47 = vadd.f32 %v4863_v43, %v3484_v27  ;;  %v13026_v26 = vadd.f32 %v4904_v46, %v3492_v37  ;;  %5412 = vmatpush1.bf16.msra.mxu1 %v11482_v36  ;;  %9552 = vmatpush3.bf16.msra.mxu0 %v13019_v38  ;;  %v4865_v48 = vpop.f32.mrb[6].mxu1  ;;  %v4906_v49 = vpop.f32.mrb[10].mxu0  ;;  %v13099_v43 = vld [vmem:[#allocation23 + $0x8] sm:$0xff]   ;;  %v13105_v46 = vld [vmem:[#allocation23 + $0x10] sm:$0xff]  }
 0x642   : > { %v4866_v53 = vpop.f32.mrb[7].mxu1  ;;  %v4907_v54 = vpop.f32.mrb[11].mxu0  ;;  %5413 = vmatprep.subr.bf16.mxu1 %v11488_v39  ;;  %9553 = vmatprep.subr.bf16.mxu0 %v12048_v29  ;;  %v5468_v60 = vpack.c.bf16 %v4862_v59, %v4862_v59  ;;  %v3528_v48 = vrot.slane %v13080_v21, %v13053_v61  ;;  %v3536_v49 = vrot.slane %v13080_v21, %v13056_v62 }
 0x645   : > { %5414 = vmatpush1.bf16.msra.mxu1 %v11486_v50  ;;  %9554 = vmatpush3.bf16.msra.mxu0 %v13032_v51  ;;  %v3532_v50 = vrot.slane %v13080_v21, %v13059_v63 }
 0x646   : > { %5415 = vmatprep.subr.bf16.mxu1 %v11492_v56  ;;  %9555 = vmatprep.subr.bf16.mxu0 %v12048_v29 }
 0x649   : > { %5416 = vmatpush1.bf16.msra.mxu1 %v11490_v57  ;;  %9556 = vmatpush3.bf16.msra.mxu0 %v13041_v58 }
 0x64a   : > { %9561 = vmatprep.subr.bf16.mxu1 %v12048_v29  ;;  %9593 = vmatprep.subr.bf16.mxu0 %v12048_v29 }
 0x64c   : > { %5434 = vmatmul.mubr.bf16.vlgmr.msra.gmra.mrb[32].mxu1 %v12942_v55  ;;  %9558 = vmatmul.mubr.bf16.vlgmr.msra.gmra.mrb[36].mxu0 %v5468_v60  ;;  %v3496_v55 = vrot.slane %v13006_v33, %v13053_v61 }
 0x64d   : > { %9569 = vmatprep.mubr.msk.bf16.mxu1 %vm12049_vm0, %v12048_v29  ;;  %9601 = vmatprep.mubr.msk.bf16.mxu0 %vm12049_vm0, %v12048_v29 }
 0x64e   : > { %9562 = vmatpush3.bf16.msra.mxu1 %v13096_v41  ;;  %9594 = vmatpush3.bf16.msra.mxu0 %v13096_v41 }
 0x64f   : > { %9563 = vmatprep.subr.bf16.mxu1 %v12048_v29  ;;  %9595 = vmatprep.subr.bf16.mxu0 %v12048_v29 }
 0x652   : > { %9564 = vmatpush3.bf16.msra.mxu1 %v13099_v43  ;;  %9596 = vmatpush3.bf16.msra.mxu0 %v13099_v43 }
 0x653   : > { %9565 = vmatprep.subr.bf16.mxu1 %v12048_v29  ;;  %9597 = vmatprep.subr.bf16.mxu0 %v12048_v29 }
 0x656   : > { %9566 = vmatpush3.bf16.msra.mxu1 %v13105_v46  ;;  %9598 = vmatpush3.bf16.msra.mxu0 %v13105_v46 }
 0x657   : > { %9567 = vmatprep.subr.bf16.mxu1 %v12048_v29  ;;  %9599 = vmatprep.subr.bf16.mxu0 %v12048_v29 }
 0x65f   : > { %v4943_v4 = vpop.f32.mrb[8].mxu1  ;;  %v4984_v5 = vpop.f32.mrb[12].mxu0 }
 0x660   : > { %v13072_v6 = vadd.f32 %v4943_v4, %v3496_v55  ;;  %v13074_v7 = vadd.f32 %v4984_v5, %v3504_v1  ;;  %v4945_v44 = vpop.f32.mrb[9].mxu1  ;;  %v4986_v8 = vpop.f32.mrb[13].mxu0  ;;  %v13130_v4 = vld [vmem:[#allocation23 + $0x18] sm:$0xff]  }
 0x661   : > { %v13076_v9 = vadd.f32 %v4945_v44, %v3500_v2  ;;  %v13078_v11 = vadd.f32 %v4986_v8, %v3508_v3  ;;  %v4947_v12 = vpop.f32.mrb[10].mxu1  ;;  %v4988_v13 = vpop.f32.mrb[14].mxu0  ;;  %9568 = vmatpush3.bf16.msra.mxu1 %v13130_v4  ;;  %9600 = vmatpush3.bf16.msra.mxu0 %v13130_v4  ;;  %v3471_v8 = vld [vmem:[#allocation20 + $0x10] sm:$0xff] }
 0x662   : > { %v4948_v15 = vpop.f32.mrb[11].mxu1  ;;  %v4989_v19 = vpop.f32.mrb[15].mxu0  ;;  %9573 = vmatprep.subr.bf16.mxu1 %v12048_v29  ;;  %9605 = vmatprep.subr.bf16.mxu0 %v12048_v29  ;;  %v3552_v12 = vrot.slane %v3471_v8, %v12917_v18  ;;  %v3548_v13 = vrot.slane %v3471_v8, %v12914_v16 }
 0x663   : > { %v3556_v15 = vrot.slane %v3471_v8, %v12920_v20 }
 0x67f   : > { %v13088_v45 = vpop.f32.mrb[12].mxu1  ;;  %v5066_v30 = vpop.f32.mrb[16].mxu0 }
 0x680   : > { %v13090_v31 = vadd.f32 %v5066_v30, %v3520_v23  ;;  %v5027_v33 = vpop.f32.mrb[13].mxu1  ;;  %v5068_v34 = vpop.f32.mrb[17].mxu0 }
 0x681   : > { %v13092_v35 = vadd.f32 %v5027_v33, %v3516_v25  ;;  %v13094_v36 = vadd.f32 %v5068_v34, %v3524_v10  ;;  %v5029_v27 = vpop.f32.mrb[14].mxu1  ;;  %v5070_v37 = vpop.f32.mrb[18].mxu0 }
 0x682   : > { %v5030_v39 = vpop.f32.mrb[15].mxu1  ;;  %v5071_v40 = vpop.f32.mrb[19].mxu0 }
 0x69f   : > { %v5107_v53 = vpop.f32.mrb[16].mxu1  ;;  %v5148_v54 = vpop.f32.mrb[20].mxu0 }
 0x6a0   : > { %v13122_v56 = vadd.f32 %v5107_v53, %v3528_v48  ;;  %v13124_v57 = vadd.f32 %v5148_v54, %v3536_v49  ;;  %v5109_v59 = vpop.f32.mrb[17].mxu1  ;;  %v5150_v60 = vpop.f32.mrb[21].mxu0  ;;  %v3560_v48 = vrot.slane %v3471_v8, %v13053_v61  ;;  %v3568_v49 = vrot.slane %v3471_v8, %v13056_v62 }
 0x6a1   : > { %v13126_v55 = vadd.f32 %v5109_v59, %v3532_v50  ;;  %v13128_v1 = vadd.f32 %v5150_v60, %v3540_v52  ;;  %v5111_v2 = vpop.f32.mrb[18].mxu1  ;;  %v5152_v3 = vpop.f32.mrb[22].mxu0  ;;  %v3564_v50 = vrot.slane %v3471_v8, %v13059_v63  ;;  %v3572_v52 = vrot.slane %v3471_v8, %v13062_v0 }
 0x6a2   : > { %v5112_v5 = vpop.f32.mrb[19].mxu1  ;;  %v5153_v44 = vpop.f32.mrb[23].mxu0 }
 0x6bf   : > { %v13139_v19 = vpop.f32.mrb[20].mxu1  ;;  %v5230_v23 = vpop.f32.mrb[24].mxu0 }
 0x6c0   : > { %v13141_v25 = vadd.f32 %v5230_v23, %v3552_v12  ;;  %v5191_v10 = vpop.f32.mrb[21].mxu1  ;;  %v5232_v30 = vpop.f32.mrb[25].mxu0  ;;  %v3472_v23 = vld [vmem:[#allocation20 + $0x18] sm:$0x3f] }
 0x6c1   : > { %v13143_v33 = vadd.f32 %v5191_v10, %v3548_v13  ;;  %v13145_v34 = vadd.f32 %v5232_v30, %v3556_v15  ;;  %v5193_v27 = vpop.f32.mrb[22].mxu1  ;;  %v5234_v37 = vpop.f32.mrb[26].mxu0  ;;  %v3584_v10 = vrot.slane %v3472_v23, %v12917_v18  ;;  %v3580_v0 = vrot.slane %v3472_v23, %v12914_v16  ;;  %v13171_v16 = vld [vmem:[#allocation21] ss:$0 sm:$0xff] }
 0x6c2   : > { %v5194_v39 = vpop.f32.mrb[23].mxu1  ;;  %v5235_v40 = vpop.f32.mrb[27].mxu0  ;;  %v3588_v8 = vrot.slane %v3472_v23, %v12920_v20  ;;  %v3592_v18 = vrot.slane %v3472_v23, %v13053_v61  ;;  %v3596_v20 = vrot.slane %v3472_v23, %v13059_v63  ;;  %v5640_v63 = vpack.c.bf16 %v13024_v47, %v13024_v47  ;;  %v13210_v47 = vld [vmem:[#allocation24] ss:$0 sm:$0xff] }
 0x6df   : > { %v5271_v53 = vpop.f32.mrb[24].mxu1  ;;  %v5312_v54 = vpop.f32.mrb[28].mxu0 }
 0x6e0   : > { %v13151_v59 = vadd.f32 %v5271_v53, %v3560_v48  ;;  %v13153_v60 = vadd.f32 %v5312_v54, %v3568_v49  ;;  %v5273_v2 = vpop.f32.mrb[25].mxu1  ;;  %v5314_v3 = vpop.f32.mrb[29].mxu0 }
 0x6e1   : > { %v13155_v5 = vadd.f32 %v5273_v2, %v3564_v50  ;;  %v13157_v44 = vadd.f32 %v5314_v3, %v3572_v52  ;;  %v5275_v12 = vpop.f32.mrb[26].mxu1  ;;  %v5316_v13 = vpop.f32.mrb[30].mxu0 }
 0x6e2   : > { %v5276_v15 = vpop.f32.mrb[27].mxu1  ;;  %v5317_v62 = vpop.f32.mrb[31].mxu0 }
 0x6ff   : > { %v13162_v30 = vpop.f32.mrb[28].mxu1  ;;  %v5394_v27 = vpop.f32.mrb[32].mxu0 }
 0x700   : > { %v13164_v37 = vadd.f32 %v5394_v27, %v3584_v10  ;;  %v5355_v39 = vpop.f32.mrb[29].mxu1  ;;  %v5396_v40 = vpop.f32.mrb[33].mxu0 }
 0x701   : > { %v13166_v48 = vadd.f32 %v5355_v39, %v3580_v0  ;;  %v13168_v49 = vadd.f32 %v5396_v40, %v3588_v8  ;;  %v5357_v50 = vpop.f32.mrb[30].mxu1  ;;  %v5398_v52 = vpop.f32.mrb[34].mxu0 }
 0x702   : > { %v5358_v53 = vpop.f32.mrb[31].mxu1  ;;  %v5399_v54 = vpop.f32.mrb[35].mxu0 }
 0x71f   : > { %v5435_v2 = vpop.f32.mrb[32].mxu1  ;;  %v5557_v3 = vpop.f32.mrb[36].mxu0 }
 0x720   : > { %v13174_v12 = vadd.f32 %v5435_v2, %v3592_v18  ;;  %v5558_v13 = vadd.f32 %v13171_v16, %v5557_v3  ;;  %v5437_v15 = vpop.f32.mrb[33].mxu1  ;;  %v9559_v62 = vpop.f32.mrb[37].mxu0 }
 0x721   : > { %v13177_v10 = vadd.f32 %v5437_v15, %v3596_v20  ;;  %v5439_v0 = vpop.f32.mrb[34].mxu1  ;;  %v5560_v8 = vpop.f32.mrb[38].mxu0 }
 0x722   : > { %v5563_v27 = vmax.f32 %v5558_v13, 0.0  ;;  %v5440_v39 = vpop.f32.mrb[35].mxu1  ;;  %v9560_v40 = vpop.f32.mrb[39].mxu0  ;;  %v5728_v0 = vpack.c.bf16 %v13022_v42, %v13022_v42 }
 0x724   : > { %v5564_v61 = vpack.c.bf16 %v5563_v27, %v5563_v27 }
 0x726   : > { %9570 = vmatmul.mubr.msk.bf16.vlgmr.msra.gmra.mrb[36].mxu1 %vm5595_vm1, %v5564_v61 }
 0x727   : > { %9574 = vmatpush3.bf16.msra.mxu1 %v12971_v17  ;;  %9589 = vmatprep.mubr.msk.bf16.mxu1 %vm12049_vm0, %v12048_v29 }
 0x728   : > { %9575 = vmatprep.subr.bf16.mxu1 %v12048_v29 }
 0x72b   : > { %9576 = vmatpush3.bf16.msra.mxu1 %v12980_v22 }
 0x72c   : > { %9577 = vmatprep.subr.bf16.mxu1 %v12048_v29 }
 0x72f   : > { %9578 = vmatpush3.bf16.msra.mxu1 %v12990_v24 }
 0x730   : > { %9579 = vmatprep.subr.bf16.mxu1 %v12048_v29 }
 0x733   : > { %9580 = vmatpush3.bf16.msra.mxu1 %v12997_v28 }
 0x734   : > { %9581 = vmatprep.subr.bf16.mxu1 %v12048_v29 }
 0x737   : > { %9582 = vmatpush3.bf16.msra.mxu1 %v13004_v32 }
 0x738   : > { %9583 = vmatprep.subr.bf16.mxu1 %v12048_v29 }
 0x73b   : > { %9584 = vmatpush3.bf16.msra.mxu1 %v13019_v38 }
 0x73c   : > { %9585 = vmatprep.subr.bf16.mxu1 %v12048_v29 }
 0x73f   : > { %9586 = vmatpush3.bf16.msra.mxu1 %v13032_v51 }
 0x740   : > { %9587 = vmatprep.subr.bf16.mxu1 %v12048_v29 }
 0x743   : > { %9588 = vmatpush3.bf16.msra.mxu1 %v13041_v58 }
 0x744   : > { %9625 = vmatprep.subr.bf16.mxu1 %v12048_v29 }
 0x746   : > { %9590 = vmatmul.mubr.bf16.vlgmr.msra.gmra.mrb[40].mxu1 %v5640_v63 }
 0x747   : > { %9626 = vmatpush3.bf16.msra.mxu1 %v13096_v41  ;;  %9633 = vmatprep.mubr.msk.bf16.mxu1 %vm12049_vm0, %v12048_v29 }
 0x748   : > { %9627 = vmatprep.subr.bf16.mxu1 %v12048_v29 }
 0x74b   : > { %9628 = vmatpush3.bf16.msra.mxu1 %v13099_v43 }
 0x74c   : > { %9629 = vmatprep.subr.bf16.mxu1 %v12048_v29 }
 0x74f   : > { %9630 = vmatpush3.bf16.msra.mxu1 %v13105_v46 }
 0x750   : > { %9631 = vmatprep.subr.bf16.mxu1 %v12048_v29 }
 0x753   : > { %9632 = vmatpush3.bf16.msra.mxu1 %v13130_v4 }
 0x754   : > { %9637 = vmatprep.subr.bf16.mxu1 %v12048_v29 }
 0x7f9   : > { %v5633_v23 = vpop.f32.mrb[36].mxu1 }
 0x7fa   : > { %v5634_v50 = vadd.f32 %v13210_v47, %v5633_v23  ;;  %v9571_v52 = vpop.f32.mrb[37].mxu1 }
 0x7fb   : > { %v5636_v53 = vpop.f32.mrb[38].mxu1 }
 0x7fc   : > { %5639 = vst [vmem:[#allocation26] sm:$0x3] %v5634_v50  ;;  %v9572_v54 = vpop.f32.mrb[39].mxu1 }
 0x819   : > { %v5675_v18 = vpop.f32.mrb[40].mxu1 }
 0x81a   : > { %v5676_v20 = vadd.f32 %v13171_v16, %v5675_v18  ;;  %v9591_v2 = vpop.f32.mrb[41].mxu1  ;;  %v5816_v18 = vpack.c.bf16 %v13026_v26, %v13026_v26 }
 0x81b   : > { %v5678_v3 = vpop.f32.mrb[42].mxu1 }
 0x81c   : > { %v5681_v13 = vmax.f32 %v5676_v20, 0.0  ;;  %v9592_v15 = vpop.f32.mrb[43].mxu1 }
 0x81e   : > { %v5682_v62 = vpack.c.bf16 %v5681_v13, %v5681_v13 }
 0x820   : > { %9602 = vmatmul.mubr.msk.bf16.vlgmr.msra.gmra.mrb[40].mxu0 %vm5595_vm1, %v5682_v62 }
 0x821   : > { %9606 = vmatpush3.bf16.msra.mxu0 %v12971_v17  ;;  %9621 = vmatprep.mubr.msk.bf16.mxu0 %vm12049_vm0, %v12048_v29 }
 0x822   : > { %9607 = vmatprep.subr.bf16.mxu0 %v12048_v29 }
 0x825   : > { %9608 = vmatpush3.bf16.msra.mxu0 %v12980_v22 }
 0x826   : > { %9609 = vmatprep.subr.bf16.mxu0 %v12048_v29 }
 0x829   : > { %9610 = vmatpush3.bf16.msra.mxu0 %v12990_v24 }
 0x82a   : > { %9611 = vmatprep.subr.bf16.mxu0 %v12048_v29 }
 0x82d   : > { %9612 = vmatpush3.bf16.msra.mxu0 %v12997_v28 }
 0x82e   : > { %9613 = vmatprep.subr.bf16.mxu0 %v12048_v29 }
 0x831   : > { %9614 = vmatpush3.bf16.msra.mxu0 %v13004_v32 }
 0x832   : > { %9615 = vmatprep.subr.bf16.mxu0 %v12048_v29 }
 0x835   : > { %9616 = vmatpush3.bf16.msra.mxu0 %v13019_v38 }
 0x836   : > { %9617 = vmatprep.subr.bf16.mxu0 %v12048_v29 }
 0x839   : > { %9618 = vmatpush3.bf16.msra.mxu0 %v13032_v51 }
 0x83a   : > { %9619 = vmatprep.subr.bf16.mxu0 %v12048_v29 }
 0x83d   : > { %9620 = vmatpush3.bf16.msra.mxu0 %v13041_v58 }
 0x83e   : > { %9657 = vmatprep.subr.bf16.mxu0 %v12048_v29 }
 0x840   : > { %9622 = vmatmul.mubr.bf16.vlgmr.msra.gmra.mrb[44].mxu0 %v5728_v0 }
 0x841   : > { %9658 = vmatpush3.bf16.msra.mxu0 %v13096_v41  ;;  %9665 = vmatprep.mubr.msk.bf16.mxu0 %vm12049_vm0, %v12048_v29 }
 0x842   : > { %9659 = vmatprep.subr.bf16.mxu0 %v12048_v29 }
 0x845   : > { %9660 = vmatpush3.bf16.msra.mxu0 %v13099_v43 }
 0x846   : > { %9661 = vmatprep.subr.bf16.mxu0 %v12048_v29 }
 0x849   : > { %9662 = vmatpush3.bf16.msra.mxu0 %v13105_v46 }
 0x84a   : > { %9663 = vmatprep.subr.bf16.mxu0 %v12048_v29 }
 0x84d   : > { %9664 = vmatpush3.bf16.msra.mxu0 %v13130_v4 }
 0x84e   : > { %9669 = vmatprep.subr.bf16.mxu0 %v12048_v29 }
 0x8f3   : > { %v5720_v42 = vpop.f32.mrb[40].mxu0 }
 0x8f4   : > { %v5721_v8 = vadd.f32 %v13210_v47, %v5720_v42  ;;  %v9603_v27 = vpop.f32.mrb[41].mxu0 }
 0x8f5   : > { %v5723_v39 = vpop.f32.mrb[42].mxu0 }
 0x8f6   : > { %5727 = vst [vmem:[#allocation26 + $0x2] sm:$0x3] %v5721_v8  ;;  %v9604_v40 = vpop.f32.mrb[43].mxu0 }
 0x8f7   : > { %v5904_v40 = vpack.c.bf16 %v13072_v6, %v13072_v6 }
 0x913   : > { %v5763_v61 = vpop.f32.mrb[44].mxu0 }
 0x914   : > { %v5764_v63 = vadd.f32 %v13171_v16, %v5763_v61  ;;  %v9623_v23 = vpop.f32.mrb[45].mxu0 }
 0x915   : > { %v5766_v50 = vpop.f32.mrb[46].mxu0 }
 0x916   : > { %v5769_v52 = vmax.f32 %v5764_v63, 0.0  ;;  %v9624_v53 = vpop.f32.mrb[47].mxu0 }
 0x918   : > { %v5770_v54 = vpack.c.bf16 %v5769_v52, %v5769_v52 }
 0x91a   : > { %9634 = vmatmul.mubr.msk.bf16.vlgmr.msra.gmra.mrb[44].mxu1 %vm5595_vm1, %v5770_v54 }
 0x91b   : > { %9638 = vmatpush3.bf16.msra.mxu1 %v12971_v17  ;;  %9653 = vmatprep.mubr.msk.bf16.mxu1 %vm12049_vm0, %v12048_v29 }
 0x91c   : > { %9639 = vmatprep.subr.bf16.mxu1 %v12048_v29 }
 0x91f   : > { %9640 = vmatpush3.bf16.msra.mxu1 %v12980_v22 }
 0x920   : > { %9641 = vmatprep.subr.bf16.mxu1 %v12048_v29 }
 0x923   : > { %9642 = vmatpush3.bf16.msra.mxu1 %v12990_v24 }
 0x924   : > { %9643 = vmatprep.subr.bf16.mxu1 %v12048_v29 }
 0x927   : > { %9644 = vmatpush3.bf16.msra.mxu1 %v12997_v28 }
 0x928   : > { %9645 = vmatprep.subr.bf16.mxu1 %v12048_v29 }
 0x92b   : > { %9646 = vmatpush3.bf16.msra.mxu1 %v13004_v32 }
 0x92c   : > { %9647 = vmatprep.subr.bf16.mxu1 %v12048_v29 }
 0x92f   : > { %9648 = vmatpush3.bf16.msra.mxu1 %v13019_v38 }
 0x930   : > { %9649 = vmatprep.subr.bf16.mxu1 %v12048_v29 }
 0x933   : > { %9650 = vmatpush3.bf16.msra.mxu1 %v13032_v51 }
 0x934   : > { %9651 = vmatprep.subr.bf16.mxu1 %v12048_v29 }
 0x937   : > { %9652 = vmatpush3.bf16.msra.mxu1 %v13041_v58 }
 0x938   : > { %9689 = vmatprep.subr.bf16.mxu1 %v12048_v29 }
 0x93a   : > { %9654 = vmatmul.mubr.bf16.vlgmr.msra.gmra.mrb[48].mxu1 %v5816_v18 }
 0x93b   : > { %9690 = vmatpush3.bf16.msra.mxu1 %v13096_v41  ;;  %9697 = vmatprep.mubr.msk.bf16.mxu1 %vm12049_vm0, %v12048_v29 }
 0x93c   : > { %9691 = vmatprep.subr.bf16.mxu1 %v12048_v29 }
 0x93f   : > { %9692 = vmatpush3.bf16.msra.mxu1 %v13099_v43 }
 0x940   : > { %9693 = vmatprep.subr.bf16.mxu1 %v12048_v29 }
 0x943   : > { %9694 = vmatpush3.bf16.msra.mxu1 %v13105_v46 }
 0x944   : > { %9695 = vmatprep.subr.bf16.mxu1 %v12048_v29 }
 0x947   : > { %9696 = vmatpush3.bf16.msra.mxu1 %v13130_v4 }
 0x948   : > { %9701 = vmatprep.subr.bf16.mxu1 %v12048_v29 }
 0x9ed   : > { %v5808_v26 = vpop.f32.mrb[44].mxu1 }
 0x9ee   : > { %v5809_v20 = vadd.f32 %v13210_v47, %v5808_v26  ;;  %v9635_v2 = vpop.f32.mrb[45].mxu1 }
 0x9ef   : > { %v5811_v3 = vpop.f32.mrb[46].mxu1 }
 0x9f0   : > { %5815 = vst [vmem:[#allocation26 + $0x4] sm:$0x3] %v5809_v20  ;;  %v9636_v13 = vpop.f32.mrb[47].mxu1  ;;  %v5992_v3 = vpack.c.bf16 %v13076_v9, %v13076_v9 }
 0xa0d   : > { %v5851_v15 = vpop.f32.mrb[48].mxu1 }
 0xa0e   : > { %v5852_v62 = vadd.f32 %v13171_v16, %v5851_v15  ;;  %v9655_v0 = vpop.f32.mrb[49].mxu1 }
 0xa0f   : > { %v5854_v42 = vpop.f32.mrb[50].mxu1 }
 0xa10   : > { %v5857_v8 = vmax.f32 %v5852_v62, 0.0  ;;  %v9656_v27 = vpop.f32.mrb[51].mxu1 }
 0xa12   : > { %v5858_v39 = vpack.c.bf16 %v5857_v8, %v5857_v8 }
 0xa14   : > { %9666 = vmatmul.mubr.msk.bf16.vlgmr.msra.gmra.mrb[48].mxu0 %vm5595_vm1, %v5858_v39 }
 0xa15   : > { %9670 = vmatpush3.bf16.msra.mxu0 %v12971_v17  ;;  %9685 = vmatprep.mubr.msk.bf16.mxu0 %vm12049_vm0, %v12048_v29 }
 0xa16   : > { %9671 = vmatprep.subr.bf16.mxu0 %v12048_v29 }
 0xa19   : > { %9672 = vmatpush3.bf16.msra.mxu0 %v12980_v22 }
 0xa1a   : > { %9673 = vmatprep.subr.bf16.mxu0 %v12048_v29 }
 0xa1d   : > { %9674 = vmatpush3.bf16.msra.mxu0 %v12990_v24 }
 0xa1e   : > { %9675 = vmatprep.subr.bf16.mxu0 %v12048_v29 }
 0xa21   : > { %9676 = vmatpush3.bf16.msra.mxu0 %v12997_v28 }
 0xa22   : > { %9677 = vmatprep.subr.bf16.mxu0 %v12048_v29 }
 0xa25   : > { %9678 = vmatpush3.bf16.msra.mxu0 %v13004_v32 }
 0xa26   : > { %9679 = vmatprep.subr.bf16.mxu0 %v12048_v29 }
 0xa29   : > { %9680 = vmatpush3.bf16.msra.mxu0 %v13019_v38 }
 0xa2a   : > { %9681 = vmatprep.subr.bf16.mxu0 %v12048_v29 }
 0xa2d   : > { %9682 = vmatpush3.bf16.msra.mxu0 %v13032_v51 }
 0xa2e   : > { %9683 = vmatprep.subr.bf16.mxu0 %v12048_v29 }
 0xa31   : > { %9684 = vmatpush3.bf16.msra.mxu0 %v13041_v58 }
 0xa32   : > { %9721 = vmatprep.subr.bf16.mxu0 %v12048_v29 }
 0xa34   : > { %9686 = vmatmul.mubr.bf16.vlgmr.msra.gmra.mrb[52].mxu0 %v5904_v40 }
 0xa35   : > { %9722 = vmatpush3.bf16.msra.mxu0 %v13096_v41  ;;  %9729 = vmatprep.mubr.msk.bf16.mxu0 %vm12049_vm0, %v12048_v29 }
 0xa36   : > { %9723 = vmatprep.subr.bf16.mxu0 %v12048_v29 }
 0xa39   : > { %9724 = vmatpush3.bf16.msra.mxu0 %v13099_v43 }
 0xa3a   : > { %9725 = vmatprep.subr.bf16.mxu0 %v12048_v29 }
 0xa3d   : > { %9726 = vmatpush3.bf16.msra.mxu0 %v13105_v46 }
 0xa3e   : > { %9727 = vmatprep.subr.bf16.mxu0 %v12048_v29 }
 0xa41   : > { %9728 = vmatpush3.bf16.msra.mxu0 %v13130_v4 }
 0xa42   : > { %9733 = vmatprep.subr.bf16.mxu0 %v12048_v29 }
 0xae7   : > { %v5896_v6 = vpop.f32.mrb[48].mxu0 }
 0xae8   : > { %v5897_v61 = vadd.f32 %v13210_v47, %v5896_v6  ;;  %v9667_v63 = vpop.f32.mrb[49].mxu0 }
 0xae9   : > { %v5899_v23 = vpop.f32.mrb[50].mxu0  ;;  %v6080_v63 = vpack.c.bf16 %v13074_v7, %v13074_v7 }
 0xaea   : > { %5903 = vst [vmem:[#allocation26 + $0x6] sm:$0x3] %v5897_v61  ;;  %v9668_v50 = vpop.f32.mrb[51].mxu0 }
 0xb07   : > { %v5939_v52 = vpop.f32.mrb[52].mxu0 }
 0xb08   : > { %v5940_v53 = vadd.f32 %v13171_v16, %v5939_v52  ;;  %v9687_v54 = vpop.f32.mrb[53].mxu0 }
 0xb09   : > { %v5942_v18 = vpop.f32.mrb[54].mxu0 }
 0xb0a   : > { %v5945_v26 = vmax.f32 %v5940_v53, 0.0  ;;  %v9688_v20 = vpop.f32.mrb[55].mxu0 }
 0xb0c   : > { %v5946_v2 = vpack.c.bf16 %v5945_v26, %v5945_v26 }
 0xb0e   : > { %9698 = vmatmul.mubr.msk.bf16.vlgmr.msra.gmra.mrb[52].mxu1 %vm5595_vm1, %v5946_v2 }
 0xb0f   : > { %9702 = vmatpush3.bf16.msra.mxu1 %v12971_v17  ;;  %9717 = vmatprep.mubr.msk.bf16.mxu1 %vm12049_vm0, %v12048_v29 }
 0xb10   : > { %9703 = vmatprep.subr.bf16.mxu1 %v12048_v29 }
 0xb13   : > { %9704 = vmatpush3.bf16.msra.mxu1 %v12980_v22 }
 0xb14   : > { %9705 = vmatprep.subr.bf16.mxu1 %v12048_v29 }
 0xb17   : > { %9706 = vmatpush3.bf16.msra.mxu1 %v12990_v24 }
 0xb18   : > { %9707 = vmatprep.subr.bf16.mxu1 %v12048_v29 }
 0xb1b   : > { %9708 = vmatpush3.bf16.msra.mxu1 %v12997_v28 }
 0xb1c   : > { %9709 = vmatprep.subr.bf16.mxu1 %v12048_v29 }
 0xb1f   : > { %9710 = vmatpush3.bf16.msra.mxu1 %v13004_v32 }
 0xb20   : > { %9711 = vmatprep.subr.bf16.mxu1 %v12048_v29 }
 0xb23   : > { %9712 = vmatpush3.bf16.msra.mxu1 %v13019_v38 }
 0xb24   : > { %9713 = vmatprep.subr.bf16.mxu1 %v12048_v29 }
 0xb27   : > { %9714 = vmatpush3.bf16.msra.mxu1 %v13032_v51 }
 0xb28   : > { %9715 = vmatprep.subr.bf16.mxu1 %v12048_v29 }
 0xb2b   : > { %9716 = vmatpush3.bf16.msra.mxu1 %v13041_v58 }
 0xb2c   : > { %9753 = vmatprep.subr.bf16.mxu1 %v12048_v29 }
 0xb2e   : > { %9718 = vmatmul.mubr.bf16.vlgmr.msra.gmra.mrb[56].mxu1 %v5992_v3 }
 0xb2f   : > { %9754 = vmatpush3.bf16.msra.mxu1 %v13096_v41  ;;  %9761 = vmatprep.mubr.msk.bf16.mxu1 %vm12049_vm0, %v12048_v29 }
 0xb30   : > { %9755 = vmatprep.subr.bf16.mxu1 %v12048_v29 }
 0xb33   : > { %9756 = vmatpush3.bf16.msra.mxu1 %v13099_v43 }
 0xb34   : > { %9757 = vmatprep.subr.bf16.mxu1 %v12048_v29 }
 0xb37   : > { %9758 = vmatpush3.bf16.msra.mxu1 %v13105_v46 }
 0xb38   : > { %9759 = vmatprep.subr.bf16.mxu1 %v12048_v29 }
 0xb3b   : > { %9760 = vmatpush3.bf16.msra.mxu1 %v13130_v4 }
 0xb3c   : > { %9765 = vmatprep.subr.bf16.mxu1 %v12048_v29 }
 0xbe1   : > { %v5984_v9 = vpop.f32.mrb[52].mxu1 }
 0xbe2   : > { %v5985_v13 = vadd.f32 %v13210_v47, %v5984_v9  ;;  %v9699_v15 = vpop.f32.mrb[53].mxu1 }
 0xbe3   : > { %v5987_v62 = vpop.f32.mrb[54].mxu1 }
 0xbe4   : > { %5991 = vst [vmem:[#allocation26 + $0x8] sm:$0x3] %v5985_v13  ;;  %v9700_v0 = vpop.f32.mrb[55].mxu1 }
 0xc01   : > { %v6027_v42 = vpop.f32.mrb[56].mxu1 }
 0xc02   : > { %v6028_v8 = vadd.f32 %v13171_v16, %v6027_v42  ;;  %v9719_v27 = vpop.f32.mrb[57].mxu1 }
 0xc03   : > { %v6030_v39 = vpop.f32.mrb[58].mxu1 }
 0xc04   : > { %v6033_v40 = vmax.f32 %v6028_v8, 0.0  ;;  %v9720_v6 = vpop.f32.mrb[59].mxu1 }
 0xc06   : > { %v6034_v61 = vpack.c.bf16 %v6033_v40, %v6033_v40 }
 0xc08   : > { %9730 = vmatmul.mubr.msk.bf16.vlgmr.msra.gmra.mrb[56].mxu0 %vm5595_vm1, %v6034_v61 }
 0xc09   : > { %9734 = vmatpush3.bf16.msra.mxu0 %v12971_v17  ;;  %9749 = vmatprep.mubr.msk.bf16.mxu0 %vm12049_vm0, %v12048_v29 }
 0xc0a   : > { %9735 = vmatprep.subr.bf16.mxu0 %v12048_v29 }
 0xc0d   : > { %9736 = vmatpush3.bf16.msra.mxu0 %v12980_v22 }
 0xc0e   : > { %9737 = vmatprep.subr.bf16.mxu0 %v12048_v29 }
 0xc11   : > { %9738 = vmatpush3.bf16.msra.mxu0 %v12990_v24 }
 0xc12   : > { %9739 = vmatprep.subr.bf16.mxu0 %v12048_v29 }
 0xc15   : > { %9740 = vmatpush3.bf16.msra.mxu0 %v12997_v28 }
 0xc16   : > { %9741 = vmatprep.subr.bf16.mxu0 %v12048_v29 }
 0xc19   : > { %9742 = vmatpush3.bf16.msra.mxu0 %v13004_v32 }
 0xc1a   : > { %9743 = vmatprep.subr.bf16.mxu0 %v12048_v29 }
 0xc1d   : > { %9744 = vmatpush3.bf16.msra.mxu0 %v13019_v38 }
 0xc1e   : > { %9745 = vmatprep.subr.bf16.mxu0 %v12048_v29 }
 0xc21   : > { %9746 = vmatpush3.bf16.msra.mxu0 %v13032_v51 }
 0xc22   : > { %9747 = vmatprep.subr.bf16.mxu0 %v12048_v29 }
 0xc25   : > { %9748 = vmatpush3.bf16.msra.mxu0 %v13041_v58 }
 0xc26   : > { %9785 = vmatprep.subr.bf16.mxu0 %v12048_v29 }
 0xc28   : > { %9750 = vmatmul.mubr.bf16.vlgmr.msra.gmra.mrb[60].mxu0 %v6080_v63  ;;  %v13416_v63 = vld [vmem:[%s14365_s11] sm:$0xff]  }
 0xc29   : > { %9786 = vmatpush3.bf16.msra.mxu0 %v13096_v41  ;;  %9793 = vmatprep.mubr.msk.bf16.mxu0 %vm12049_vm0, %v12048_v29 }
 0xc2a   : > { %9787 = vmatprep.subr.bf16.mxu0 %v12048_v29 }
 0xc2d   : > { %9788 = vmatpush3.bf16.msra.mxu0 %v13099_v43 }
 0xc2e   : > { %9789 = vmatprep.subr.bf16.mxu0 %v12048_v29 }
 0xc31   : > { %9790 = vmatpush3.bf16.msra.mxu0 %v13105_v46 }
 0xc32   : > { %9791 = vmatprep.subr.bf16.mxu0 %v12048_v29 }
 0xc35   : > { %9792 = vmatpush3.bf16.msra.mxu0 %v13130_v4 }
 0xc36   : > { %9797 = vmatprep.subr.bf16.mxu0 %v12048_v29 }
 0xcdb   : > { %v6072_v7 = vpop.f32.mrb[56].mxu0 }
 0xcdc   : > { %v6073_v23 = vadd.f32 %v13210_v47, %v6072_v7  ;;  %v9731_v50 = vpop.f32.mrb[57].mxu0  ;;  %v3512_v7 = vrot.slane %v13080_v21, %v12911_v14 }
 0xcdd   : > { %v6075_v52 = vpop.f32.mrb[58].mxu0 }
 0xcde   : > { %6079 = vst [vmem:[#allocation26 + $0xa] sm:$0x3] %v6073_v23  ;;  %v9732_v53 = vpop.f32.mrb[59].mxu0 }
 0xcfb   : > { %v6115_v54 = vpop.f32.mrb[60].mxu0 }
 0xcfc   : > { %v6116_v18 = vadd.f32 %v13171_v16, %v6115_v54  ;;  %v9751_v26 = vpop.f32.mrb[61].mxu0 }
 0xcfd   : > { %v6118_v20 = vpop.f32.mrb[62].mxu0 }
 0xcfe   : > { %v6121_v2 = vmax.f32 %v6116_v18, 0.0  ;;  %v9752_v3 = vpop.f32.mrb[63].mxu0  ;;  %v13459_v20 = vld [vmem:[%s14365_s11 + $0x8] sm:$0xff]  }
 0xcff   : > { %v13473_v3 = vld [vmem:[%s14365_s11 + $0x18] sm:$0xff]  }
 0xd00   : > { %v6122_v9 = vpack.c.bf16 %v6121_v2, %v6121_v2  ;;  %v13466_v2 = vld [vmem:[%s14365_s11 + $0x10] sm:$0xff]  }
 0xd02   : > { %9762 = vmatmul.mubr.msk.bf16.vlgmr.msra.gmra.mrb[60].mxu1 %vm5595_vm1, %v6122_v9  ;;  %v13480_v9 = vld [vmem:[%s14365_s11 + $0x20] sm:$0xff]  }
 0xd03   : > { %9766 = vmatpush3.bf16.msra.mxu1 %v12971_v17  ;;  %9781 = vmatprep.mubr.msk.bf16.mxu1 %vm12049_vm0, %v12048_v29  ;;  %v6168_v17 = vpack.c.bf16 %v13078_v11, %v13078_v11 }
 0xd04   : > { %9767 = vmatprep.subr.bf16.mxu1 %v12048_v29 }
 0xd07   : > { %9768 = vmatpush3.bf16.msra.mxu1 %v12980_v22 }
 0xd08   : > { %9769 = vmatprep.subr.bf16.mxu1 %v12048_v29 }
 0xd0b   : > { %9770 = vmatpush3.bf16.msra.mxu1 %v12990_v24 }
 0xd0c   : > { %9771 = vmatprep.subr.bf16.mxu1 %v12048_v29 }
 0xd0f   : > { %9772 = vmatpush3.bf16.msra.mxu1 %v12997_v28 }
 0xd10   : > { %9773 = vmatprep.subr.bf16.mxu1 %v12048_v29 }
 0xd13   : > { %9774 = vmatpush3.bf16.msra.mxu1 %v13004_v32 }
 0xd14   : > { %9775 = vmatprep.subr.bf16.mxu1 %v12048_v29 }
 0xd17   : > { %9776 = vmatpush3.bf16.msra.mxu1 %v13019_v38 }
 0xd18   : > { %9777 = vmatprep.subr.bf16.mxu1 %v12048_v29 }
 0xd1b   : > { %9778 = vmatpush3.bf16.msra.mxu1 %v13032_v51 }
 0xd1c   : > { %9779 = vmatprep.subr.bf16.mxu1 %v12048_v29 }
 0xd1f   : > { %9780 = vmatpush3.bf16.msra.mxu1 %v13041_v58 }
 0xd20   : > { %9817 = vmatprep.subr.bf16.mxu1 %v12048_v29 }
 0xd22   : > { %9782 = vmatmul.mubr.bf16.vlgmr.msra.gmra.mrb[64].mxu1 %v6168_v17  ;;  %v13487_v17 = vld [vmem:[%s14365_s11 + $0x28] sm:$0xff]  }
 0xd23   : > { %9818 = vmatpush3.bf16.msra.mxu1 %v13096_v41  ;;  %9825 = vmatprep.mubr.msk.bf16.mxu1 %vm12049_vm0, %v12048_v29 }
 0xd24   : > { %9819 = vmatprep.subr.bf16.mxu1 %v12048_v29 }
 0xd27   : > { %9820 = vmatpush3.bf16.msra.mxu1 %v13099_v43 }
 0xd28   : > { %9821 = vmatprep.subr.bf16.mxu1 %v12048_v29 }
 0xd2b   : > { %9822 = vmatpush3.bf16.msra.mxu1 %v13105_v46 }
 0xd2c   : > { %9823 = vmatprep.subr.bf16.mxu1 %v12048_v29 }
 0xd2f   : > { %9824 = vmatpush3.bf16.msra.mxu1 %v13130_v4 }
 0xd30   : > { %9829 = vmatprep.subr.bf16.mxu1 %v12048_v29 }
 0xdd5   : > { %v6160_v11 = vpop.f32.mrb[60].mxu1 }
 0xdd6   : > { %v6161_v13 = vadd.f32 %v13210_v47, %v6160_v11  ;;  %v9763_v15 = vpop.f32.mrb[61].mxu1  ;;  %v6344_v11 = vpack.c.bf16 %v13092_v35, %v13092_v35 }
 0xdd7   : > { %v6163_v62 = vpop.f32.mrb[62].mxu1 }
 0xdd8   : > { %6167 = vst [vmem:[#allocation26 + $0xc] sm:$0x3] %v6161_v13  ;;  %v9764_v0 = vpop.f32.mrb[63].mxu1 }
 0xdf5   : > { %v6203_v42 = vpop.f32.mrb[64].mxu1 }
 0xdf6   : > { %v6204_v8 = vadd.f32 %v13171_v16, %v6203_v42  ;;  %v9783_v27 = vpop.f32.mrb[65].mxu1 }
 0xdf7   : > { %v6206_v39 = vpop.f32.mrb[66].mxu1 }
 0xdf8   : > { %v6209_v40 = vmax.f32 %v6204_v8, 0.0  ;;  %v9784_v6 = vpop.f32.mrb[67].mxu1 }
 0xdf9   : > { %v13527_v6 = vld [vmem:[%s14365_s11 + $0x30] sm:$0xff]  }
 0xdfa   : > { %v6210_v61 = vpack.c.bf16 %v6209_v40, %v6209_v40 }
 0xdfc   : > { %9794 = vmatmul.mubr.msk.bf16.vlgmr.msra.gmra.mrb[64].mxu0 %vm5595_vm1, %v6210_v61  ;;  %v13534_v61 = vld [vmem:[%s14365_s11 + $0x38] sm:$0xff]  }
 0xdfd   : > { %9798 = vmatpush3.bf16.msra.mxu0 %v13416_v63  ;;  %9813 = vmatprep.mubr.msk.bf16.mxu0 %vm12049_vm0, %v12048_v29 }
 0xdfe   : > { %9799 = vmatprep.subr.bf16.mxu0 %v12048_v29 }
 0xe01   : > { %9800 = vmatpush3.bf16.msra.mxu0 %v12980_v22  ;;  %v5026_v22 = vadd.f32 %v13088_v45, %v3512_v7  ;;  %v6432_v7 = vpack.c.bf16 %v13090_v31, %v13090_v31 }
 0xe02   : > { %9801 = vmatprep.subr.bf16.mxu0 %v12048_v29 }
 0xe05   : > { %9802 = vmatpush3.bf16.msra.mxu0 %v12990_v24  ;;  %v6256_v24 = vpack.c.bf16 %v5026_v22, %v5026_v22 }
 0xe06   : > { %9803 = vmatprep.subr.bf16.mxu0 %v12048_v29 }
 0xe09   : > { %9804 = vmatpush3.bf16.msra.mxu0 %v12997_v28 }
 0xe0a   : > { %9805 = vmatprep.subr.bf16.mxu0 %v12048_v29 }
 0xe0d   : > { %9806 = vmatpush3.bf16.msra.mxu0 %v13004_v32 }
 0xe0e   : > { %9807 = vmatprep.subr.bf16.mxu0 %v12048_v29 }
 0xe11   : > { %9808 = vmatpush3.bf16.msra.mxu0 %v13019_v38 }
 0xe12   : > { %9809 = vmatprep.subr.bf16.mxu0 %v12048_v29 }
 0xe15   : > { %9810 = vmatpush3.bf16.msra.mxu0 %v13032_v51 }
 0xe16   : > { %9811 = vmatprep.subr.bf16.mxu0 %v12048_v29 }
 0xe19   : > { %9812 = vmatpush3.bf16.msra.mxu0 %v13041_v58 }
 0xe1a   : > { %9849 = vmatprep.subr.bf16.mxu0 %v12048_v29 }
 0xe1c   : > { %9814 = vmatmul.mubr.bf16.vlgmr.msra.gmra.mrb[68].mxu0 %v6256_v24 }
 0xe1d   : > { %9850 = vmatpush3.bf16.msra.mxu0 %v13096_v41  ;;  %9857 = vmatprep.mubr.msk.bf16.mxu0 %vm12049_vm0, %v12048_v29 }
 0xe1e   : > { %9851 = vmatprep.subr.bf16.mxu0 %v12048_v29 }
 0xe21   : > { %9852 = vmatpush3.bf16.msra.mxu0 %v13099_v43 }
 0xe22   : > { %9853 = vmatprep.subr.bf16.mxu0 %v12048_v29 }
 0xe25   : > { %9854 = vmatpush3.bf16.msra.mxu0 %v13105_v46 }
 0xe26   : > { %9855 = vmatprep.subr.bf16.mxu0 %v12048_v29 }
 0xe29   : > { %9856 = vmatpush3.bf16.msra.mxu0 %v13130_v4 }
 0xe2a   : > { %9861 = vmatprep.subr.bf16.mxu0 %v12048_v29 }
 0xecf   : > { %v6248_v28 = vpop.f32.mrb[64].mxu0 }
 0xed0   : > { %v6249_v32 = vadd.f32 %v13210_v47, %v6248_v28  ;;  %v9795_v38 = vpop.f32.mrb[65].mxu0 }
 0xed1   : > { %v6251_v21 = vpop.f32.mrb[66].mxu0 }
 0xed2   : > { %6255 = vst [vmem:[#allocation26 + $0xe] sm:$0x3] %v6249_v32  ;;  %v9796_v45 = vpop.f32.mrb[67].mxu0 }
 0xeef   : > { %v6291_v23 = vpop.f32.mrb[68].mxu0 }
 0xef0   : > { %v6292_v50 = vadd.f32 %v13171_v16, %v6291_v23  ;;  %v9815_v52 = vpop.f32.mrb[69].mxu0 }
 0xef1   : > { %v6294_v53 = vpop.f32.mrb[70].mxu0  ;;  %v13579_v52 = vld [vmem:[#allocation23 + $0x8] sm:$0xff]  }
 0xef2   : > { %v6297_v54 = vmax.f32 %v6292_v50, 0.0  ;;  %v9816_v18 = vpop.f32.mrb[71].mxu0  ;;  %v13573_v50 = vld [vmem:[#allocation23] sm:$0xff]   ;;  %v13583_v53 = vld [vmem:[#allocation23 + $0x10] sm:$0xff]  }
 0xef4   : > { %v6298_v26 = vpack.c.bf16 %v6297_v54, %v6297_v54 }
 0xef6   : > { %9826 = vmatmul.mubr.msk.bf16.vlgmr.msra.gmra.mrb[68].mxu1 %vm5595_vm1, %v6298_v26 }
 0xef7   : > { %9830 = vmatpush3.bf16.msra.mxu1 %v13416_v63  ;;  %9845 = vmatprep.mubr.msk.bf16.mxu1 %vm12049_vm0, %v12048_v29 }
 0xef8   : > { %9831 = vmatprep.subr.bf16.mxu1 %v12048_v29 }
 0xefb   : > { %9832 = vmatpush3.bf16.msra.mxu1 %v13459_v20 }
 0xefc   : > { %9833 = vmatprep.subr.bf16.mxu1 %v12048_v29 }
 0xeff   : > { %9834 = vmatpush3.bf16.msra.mxu1 %v13466_v2 }
 0xf00   : > { %9835 = vmatprep.subr.bf16.mxu1 %v12048_v29 }
 0xf03   : > { %9836 = vmatpush3.bf16.msra.mxu1 %v13473_v3 }
 0xf04   : > { %9837 = vmatprep.subr.bf16.mxu1 %v12048_v29 }
 0xf07   : > { %9838 = vmatpush3.bf16.msra.mxu1 %v13480_v9 }
 0xf08   : > { %9839 = vmatprep.subr.bf16.mxu1 %v12048_v29 }
 0xf0b   : > { %9840 = vmatpush3.bf16.msra.mxu1 %v13487_v17 }
 0xf0c   : > { %9841 = vmatprep.subr.bf16.mxu1 %v12048_v29 }
 0xf0f   : > { %9842 = vmatpush3.bf16.msra.mxu1 %v13032_v51 }
 0xf10   : > { %9843 = vmatprep.subr.bf16.mxu1 %v12048_v29 }
 0xf13   : > { %9844 = vmatpush3.bf16.msra.mxu1 %v13041_v58 }
 0xf14   : > { %9881 = vmatprep.subr.bf16.mxu1 %v12048_v29 }
 0xf16   : > { %9846 = vmatmul.mubr.bf16.vlgmr.msra.gmra.mrb[72].mxu1 %v6344_v11 }
 0xf17   : > { %9882 = vmatpush3.bf16.msra.mxu1 %v13096_v41  ;;  %9889 = vmatprep.mubr.msk.bf16.mxu1 %vm12049_vm0, %v12048_v29 }
 0xf18   : > { %9883 = vmatprep.subr.bf16.mxu1 %v12048_v29 }
 0xf1b   : > { %9884 = vmatpush3.bf16.msra.mxu1 %v13099_v43 }
 0xf1c   : > { %9885 = vmatprep.subr.bf16.mxu1 %v12048_v29 }
 0xf1f   : > { %9886 = vmatpush3.bf16.msra.mxu1 %v13105_v46 }
 0xf20   : > { %9887 = vmatprep.subr.bf16.mxu1 %v12048_v29 }
 0xf23   : > { %9888 = vmatpush3.bf16.msra.mxu1 %v13130_v4 }
 0xf24   : > { %9893 = vmatprep.subr.bf16.mxu1 %v12048_v29 }
 0xfc9   : > { %v6336_v51 = vpop.f32.mrb[68].mxu1 }
 0xfca   : > { %v6337_v58 = vadd.f32 %v13210_v47, %v6336_v51  ;;  %v9827_v35 = vpop.f32.mrb[69].mxu1 }
 0xfcb   : > { %v6339_v13 = vpop.f32.mrb[70].mxu1 }
 0xfcc   : > { %6343 = vst [vmem:[#allocation26 + $0x10] sm:$0x3] %v6337_v58  ;;  %v9828_v15 = vpop.f32.mrb[71].mxu1 }
 0xfe9   : > { %v6379_v62 = vpop.f32.mrb[72].mxu1 }
 0xfea   : > { %v6380_v0 = vadd.f32 %v13171_v16, %v6379_v62  ;;  %v9847_v42 = vpop.f32.mrb[73].mxu1 }
 0xfeb   : > { %v6382_v8 = vpop.f32.mrb[74].mxu1 }
 0xfec   : > { %v6385_v27 = vmax.f32 %v6380_v0, 0.0  ;;  %v9848_v39 = vpop.f32.mrb[75].mxu1 }
 0xfee   : > { %v6386_v40 = vpack.c.bf16 %v6385_v27, %v6385_v27 }
 0xff0   : > { %9858 = vmatmul.mubr.msk.bf16.vlgmr.msra.gmra.mrb[72].mxu0 %vm5595_vm1, %v6386_v40 }
 0xff1   : > { %9862 = vmatpush3.bf16.msra.mxu0 %v13416_v63  ;;  %9877 = vmatprep.mubr.msk.bf16.mxu0 %vm12049_vm0, %v12048_v29 }
 0xff2   : > { %9863 = vmatprep.subr.bf16.mxu0 %v12048_v29 }
 0xff5   : > { %9864 = vmatpush3.bf16.msra.mxu0 %v13459_v20 }
 0xff6   : > { %9865 = vmatprep.subr.bf16.mxu0 %v12048_v29 }
 0xff9   : > { %9866 = vmatpush3.bf16.msra.mxu0 %v13466_v2 }
 0xffa   : > { %9867 = vmatprep.subr.bf16.mxu0 %v12048_v29 }
 0xffd   : > { %9868 = vmatpush3.bf16.msra.mxu0 %v13473_v3 }
 0xffe   : > { %9869 = vmatprep.subr.bf16.mxu0 %v12048_v29 }
0x1001   : > { %9870 = vmatpush3.bf16.msra.mxu0 %v13480_v9 }
0x1002   : > { %9871 = vmatprep.subr.bf16.mxu0 %v12048_v29 }
0x1005   : > { %9872 = vmatpush3.bf16.msra.mxu0 %v13487_v17 }
0x1006   : > { %9873 = vmatprep.subr.bf16.mxu0 %v12048_v29 }
0x1009   : > { %9874 = vmatpush3.bf16.msra.mxu0 %v13527_v6 }
0x100a   : > { %9875 = vmatprep.subr.bf16.mxu0 %v12048_v29 }
0x100d   : > { %9876 = vmatpush3.bf16.msra.mxu0 %v13534_v61 }
0x100e   : > { %9913 = vmatprep.subr.bf16.mxu0 %v12048_v29 }
0x1010   : > { %9878 = vmatmul.mubr.bf16.vlgmr.msra.gmra.mrb[76].mxu0 %v6432_v7 }
0x1011   : > { %9914 = vmatpush3.bf16.msra.mxu0 %v13096_v41  ;;  %9921 = vmatprep.mubr.msk.bf16.mxu0 %vm12049_vm0, %v12048_v29 }
0x1012   : > { %9915 = vmatprep.subr.bf16.mxu0 %v12048_v29 }
0x1015   : > { %9916 = vmatpush3.bf16.msra.mxu0 %v13099_v43 }
0x1016   : > { %9917 = vmatprep.subr.bf16.mxu0 %v12048_v29 }
0x1019   : > { %9918 = vmatpush3.bf16.msra.mxu0 %v13105_v46 }
0x101a   : > { %9919 = vmatprep.subr.bf16.mxu0 %v12048_v29 }
0x101d   : > { %9920 = vmatpush3.bf16.msra.mxu0 %v13130_v4  ;;  %v6520_v4 = vpack.c.bf16 %v13094_v36, %v13094_v36  ;;  %v13587_v36 = vld [vmem:[#allocation23 + $0x18] sm:$0xff]  }
0x101e   : > { %9925 = vmatprep.subr.bf16.mxu0 %v12048_v29 }
0x10c3   : > { %v6424_v31 = vpop.f32.mrb[72].mxu0 }
0x10c4   : > { %v6425_v41 = vadd.f32 %v13210_v47, %v6424_v31  ;;  %v9859_v22 = vpop.f32.mrb[73].mxu0  ;;  %v13625_v31 = vld [vmem:[#allocation21] ss:$0 sm:$0xff] }
0x10c5   : > { %v6427_v24 = vpop.f32.mrb[74].mxu0 }
0x10c6   : > { %6431 = vst [vmem:[#allocation26 + $0x12] sm:$0x3] %v6425_v41  ;;  %v9860_v28 = vpop.f32.mrb[75].mxu0 }
0x10e3   : > { %v6467_v32 = vpop.f32.mrb[76].mxu0 }
0x10e4   : > { %v6468_v43 = vadd.f32 %v13171_v16, %v6467_v32  ;;  %v9879_v38 = vpop.f32.mrb[77].mxu0 }
0x10e5   : > { %v6470_v21 = vpop.f32.mrb[78].mxu0  ;;  %v6696_v38 = vpack.c.bf16 %v13126_v55, %v13126_v55 }
0x10e6   : > { %v6473_v45 = vmax.f32 %v6468_v43, 0.0  ;;  %v9880_v46 = vpop.f32.mrb[79].mxu0 }
0x10e8   : > { %v6474_v23 = vpack.c.bf16 %v6473_v45, %v6473_v45 }
0x10ea   : > { %9890 = vmatmul.mubr.msk.bf16.vlgmr.msra.gmra.mrb[76].mxu1 %vm5595_vm1, %v6474_v23 }
0x10eb   : > { %9894 = vmatpush3.bf16.msra.mxu1 %v13416_v63  ;;  %9909 = vmatprep.mubr.msk.bf16.mxu1 %vm12049_vm0, %v12048_v29 }
0x10ec   : > { %9895 = vmatprep.subr.bf16.mxu1 %v12048_v29 }
0x10ef   : > { %9896 = vmatpush3.bf16.msra.mxu1 %v13459_v20 }
0x10f0   : > { %9897 = vmatprep.subr.bf16.mxu1 %v12048_v29 }
0x10f3   : > { %9898 = vmatpush3.bf16.msra.mxu1 %v13466_v2 }
0x10f4   : > { %9899 = vmatprep.subr.bf16.mxu1 %v12048_v29 }
0x10f7   : > { %9900 = vmatpush3.bf16.msra.mxu1 %v13473_v3 }
0x10f8   : > { %9901 = vmatprep.subr.bf16.mxu1 %v12048_v29 }
0x10fb   : > { %9902 = vmatpush3.bf16.msra.mxu1 %v13480_v9 }
0x10fc   : > { %9903 = vmatprep.subr.bf16.mxu1 %v12048_v29 }
0x10ff   : > { %9904 = vmatpush3.bf16.msra.mxu1 %v13487_v17 }
0x1100   : > { %9905 = vmatprep.subr.bf16.mxu1 %v12048_v29 }
0x1103   : > { %9906 = vmatpush3.bf16.msra.mxu1 %v13527_v6 }
0x1104   : > { %9907 = vmatprep.subr.bf16.mxu1 %v12048_v29 }
0x1107   : > { %9908 = vmatpush3.bf16.msra.mxu1 %v13534_v61 }
0x1108   : > { %9945 = vmatprep.subr.bf16.mxu1 %v12048_v29 }
0x110a   : > { %9910 = vmatmul.mubr.bf16.vlgmr.msra.gmra.mrb[80].mxu1 %v6520_v4 }
0x110b   : > { %9946 = vmatpush3.bf16.msra.mxu1 %v13573_v50  ;;  %9953 = vmatprep.mubr.msk.bf16.mxu1 %vm12049_vm0, %v12048_v29 }
0x110c   : > { %9947 = vmatprep.subr.bf16.mxu1 %v12048_v29 }
0x110f   : > { %9948 = vmatpush3.bf16.msra.mxu1 %v13579_v52 }
0x1110   : > { %9949 = vmatprep.subr.bf16.mxu1 %v12048_v29 }
0x1113   : > { %9950 = vmatpush3.bf16.msra.mxu1 %v13583_v53 }
0x1114   : > { %9951 = vmatprep.subr.bf16.mxu1 %v12048_v29 }
0x1117   : > { %9952 = vmatpush3.bf16.msra.mxu1 %v13587_v36 }
0x1118   : > { %9957 = vmatprep.subr.bf16.mxu1 %v12048_v29 }
0x11bd   : > { %v6512_v54 = vpop.f32.mrb[76].mxu1 }
0x11be   : > { %v6513_v18 = vadd.f32 %v13210_v47, %v6512_v54  ;;  %v9891_v26 = vpop.f32.mrb[77].mxu1 }
0x11bf   : > { %v6515_v11 = vpop.f32.mrb[78].mxu1 }
0x11c0   : > { %6519 = vst [vmem:[#allocation26 + $0x14] sm:$0x3] %v6513_v18  ;;  %v9892_v51 = vpop.f32.mrb[79].mxu1 }
0x11dd   : > { %v6555_v58 = vpop.f32.mrb[80].mxu1 }
0x11de   : > { %v6556_v35 = vadd.f32 %v13171_v16, %v6555_v58  ;;  %v9911_v13 = vpop.f32.mrb[81].mxu1  ;;  %v6608_v16 = vpack.c.bf16 %v13122_v56, %v13122_v56 }
0x11df   : > { %v6558_v15 = vpop.f32.mrb[82].mxu1 }
0x11e0   : > { %v6561_v62 = vmax.f32 %v6556_v35, 0.0  ;;  %v9912_v0 = vpop.f32.mrb[83].mxu1  ;;  %v13692_v35 = vld [vmem:[#allocation24] ss:$0 sm:$0xff] }
0x11e2   : > { %v6562_v42 = vpack.c.bf16 %v6561_v62, %v6561_v62 }
0x11e4   : > { %9922 = vmatmul.mubr.msk.bf16.vlgmr.msra.gmra.mrb[80].mxu0 %vm5595_vm1, %v6562_v42 }
0x11e5   : > { %9926 = vmatpush3.bf16.msra.mxu0 %v13416_v63  ;;  %9941 = vmatprep.mubr.msk.bf16.mxu0 %vm12049_vm0, %v12048_v29 }
0x11e6   : > { %9927 = vmatprep.subr.bf16.mxu0 %v12048_v29 }
0x11e9   : > { %9928 = vmatpush3.bf16.msra.mxu0 %v13459_v20 }
0x11ea   : > { %9929 = vmatprep.subr.bf16.mxu0 %v12048_v29 }
0x11ed   : > { %9930 = vmatpush3.bf16.msra.mxu0 %v13466_v2 }
0x11ee   : > { %9931 = vmatprep.subr.bf16.mxu0 %v12048_v29 }
0x11f1   : > { %9932 = vmatpush3.bf16.msra.mxu0 %v13473_v3 }
0x11f2   : > { %9933 = vmatprep.subr.bf16.mxu0 %v12048_v29 }
0x11f5   : > { %9934 = vmatpush3.bf16.msra.mxu0 %v13480_v9 }
0x11f6   : > { %9935 = vmatprep.subr.bf16.mxu0 %v12048_v29 }
0x11f9   : > { %9936 = vmatpush3.bf16.msra.mxu0 %v13487_v17 }
0x11fa   : > { %9937 = vmatprep.subr.bf16.mxu0 %v12048_v29 }
0x11fd   : > { %9938 = vmatpush3.bf16.msra.mxu0 %v13527_v6 }
0x11fe   : > { %9939 = vmatprep.subr.bf16.mxu0 %v12048_v29 }
0x1201   : > { %9940 = vmatpush3.bf16.msra.mxu0 %v13534_v61 }
0x1202   : > { %9977 = vmatprep.subr.bf16.mxu0 %v12048_v29 }
0x1204   : > { %9942 = vmatmul.mubr.bf16.vlgmr.msra.gmra.mrb[84].mxu0 %v6608_v16 }
0x1205   : > { %9978 = vmatpush3.bf16.msra.mxu0 %v13573_v50  ;;  %9985 = vmatprep.mubr.msk.bf16.mxu0 %vm12049_vm0, %v12048_v29 }
0x1206   : > { %9979 = vmatprep.subr.bf16.mxu0 %v12048_v29 }
0x1209   : > { %9980 = vmatpush3.bf16.msra.mxu0 %v13579_v52 }
0x120a   : > { %9981 = vmatprep.subr.bf16.mxu0 %v12048_v29 }
0x120d   : > { %9982 = vmatpush3.bf16.msra.mxu0 %v13583_v53 }
0x120e   : > { %9983 = vmatprep.subr.bf16.mxu0 %v12048_v29 }
0x1211   : > { %9984 = vmatpush3.bf16.msra.mxu0 %v13587_v36 }
0x1212   : > { %9989 = vmatprep.subr.bf16.mxu0 %v12048_v29 }
0x12b7   : > { %v6600_v56 = vpop.f32.mrb[80].mxu0 }
0x12b8   : > { %v6601_v8 = vadd.f32 %v13210_v47, %v6600_v56  ;;  %v9923_v27 = vpop.f32.mrb[81].mxu0 }
0x12b9   : > { %v6603_v39 = vpop.f32.mrb[82].mxu0 }
0x12ba   : > { %6607 = vst [vmem:[#allocation26 + $0x16] sm:$0x3] %v6601_v8  ;;  %v9924_v40 = vpop.f32.mrb[83].mxu0 }
0x12d7   : > { %v6643_v7 = vpop.f32.mrb[84].mxu0 }
0x12d8   : > { %v6644_v41 = vadd.f32 %v13625_v31, %v6643_v7  ;;  %v9943_v22 = vpop.f32.mrb[85].mxu0  ;;  %v6872_v7 = vpack.c.bf16 %v13128_v1, %v13128_v1 }
0x12d9   : > { %v6646_v24 = vpop.f32.mrb[86].mxu0 }
0x12da   : > { %v6649_v28 = vmax.f32 %v6644_v41, 0.0  ;;  %v9944_v32 = vpop.f32.mrb[87].mxu0 }
0x12dc   : > { %v6650_v43 = vpack.c.bf16 %v6649_v28, %v6649_v28 }
0x12de   : > { %9954 = vmatmul.mubr.msk.bf16.vlgmr.msra.gmra.mrb[84].mxu1 %vm5595_vm1, %v6650_v43 }
0x12df   : > { %9958 = vmatpush3.bf16.msra.mxu1 %v13416_v63  ;;  %9973 = vmatprep.mubr.msk.bf16.mxu1 %vm12049_vm0, %v12048_v29 }
0x12e0   : > { %9959 = vmatprep.subr.bf16.mxu1 %v12048_v29 }
0x12e3   : > { %9960 = vmatpush3.bf16.msra.mxu1 %v13459_v20 }
0x12e4   : > { %9961 = vmatprep.subr.bf16.mxu1 %v12048_v29 }
0x12e7   : > { %9962 = vmatpush3.bf16.msra.mxu1 %v13466_v2 }
0x12e8   : > { %9963 = vmatprep.subr.bf16.mxu1 %v12048_v29 }
0x12eb   : > { %9964 = vmatpush3.bf16.msra.mxu1 %v13473_v3 }
0x12ec   : > { %9965 = vmatprep.subr.bf16.mxu1 %v12048_v29 }
0x12ef   : > { %9966 = vmatpush3.bf16.msra.mxu1 %v13480_v9 }
0x12f0   : > { %9967 = vmatprep.subr.bf16.mxu1 %v12048_v29 }
0x12f3   : > { %9968 = vmatpush3.bf16.msra.mxu1 %v13487_v17 }
0x12f4   : > { %9969 = vmatprep.subr.bf16.mxu1 %v12048_v29 }
0x12f7   : > { %9970 = vmatpush3.bf16.msra.mxu1 %v13527_v6 }
0x12f8   : > { %9971 = vmatprep.subr.bf16.mxu1 %v12048_v29 }
0x12fb   : > { %9972 = vmatpush3.bf16.msra.mxu1 %v13534_v61 }
0x12fc   : > { %10009 = vmatprep.subr.bf16.mxu1 %v12048_v29 }
0x12fe   : > { %9974 = vmatmul.mubr.bf16.vlgmr.msra.gmra.mrb[88].mxu1 %v6696_v38 }
0x12ff   : > { %10010 = vmatpush3.bf16.msra.mxu1 %v13573_v50  ;;  %10017 = vmatprep.mubr.msk.bf16.mxu1 %vm12049_vm0, %v12048_v29 }
0x1300   : > { %10011 = vmatprep.subr.bf16.mxu1 %v12048_v29 }
0x1303   : > { %10012 = vmatpush3.bf16.msra.mxu1 %v13579_v52 }
0x1304   : > { %10013 = vmatprep.subr.bf16.mxu1 %v12048_v29 }
0x1307   : > { %10014 = vmatpush3.bf16.msra.mxu1 %v13583_v53 }
0x1308   : > { %10015 = vmatprep.subr.bf16.mxu1 %v12048_v29 }
0x130b   : > { %10016 = vmatpush3.bf16.msra.mxu1 %v13587_v36 }
0x130c   : > { %10021 = vmatprep.subr.bf16.mxu1 %v12048_v29 }
0x13b1   : > { %v6688_v55 = vpop.f32.mrb[84].mxu1 }
0x13b2   : > { %v6689_v21 = vadd.f32 %v13210_v47, %v6688_v55  ;;  %v9955_v45 = vpop.f32.mrb[85].mxu1  ;;  %v6784_v47 = vpack.c.bf16 %v13124_v57, %v13124_v57 }
0x13b3   : > { %v6691_v46 = vpop.f32.mrb[86].mxu1 }
0x13b4   : > { %6695 = vst [vmem:[#allocation26 + $0x18] sm:$0x3] %v6689_v21  ;;  %v9956_v23 = vpop.f32.mrb[87].mxu1 }
0x13b5   : > { %v11512_v23 = vld [vmem:[#allocation20 + $0x10] sm:$0xff] }
0x13d1   : > { %v6731_v4 = vpop.f32.mrb[88].mxu1 }
0x13d2   : > { %v6732_v54 = vadd.f32 %v13625_v31, %v6731_v4  ;;  %v9975_v18 = vpop.f32.mrb[89].mxu1  ;;  %v3544_v4 = vrot.slane %v11512_v23, %v12911_v14 }
0x13d3   : > { %v6734_v26 = vpop.f32.mrb[90].mxu1 }
0x13d4   : > { %v6737_v11 = vmax.f32 %v6732_v54, 0.0  ;;  %v9976_v51 = vpop.f32.mrb[91].mxu1  ;;  %v5190_v54 = vadd.f32 %v13139_v19, %v3544_v4 }
0x13d6   : > { %v6738_v58 = vpack.c.bf16 %v6737_v11, %v6737_v11  ;;  %v6960_v18 = vpack.c.bf16 %v5190_v54, %v5190_v54 }
0x13d8   : > { %9986 = vmatmul.mubr.msk.bf16.vlgmr.msra.gmra.mrb[88].mxu0 %vm5595_vm1, %v6738_v58 }
0x13d9   : > { %9990 = vmatpush3.bf16.msra.mxu0 %v13416_v63  ;;  %10005 = vmatprep.mubr.msk.bf16.mxu0 %vm12049_vm0, %v12048_v29 }
0x13da   : > { %9991 = vmatprep.subr.bf16.mxu0 %v12048_v29 }
0x13dd   : > { %9992 = vmatpush3.bf16.msra.mxu0 %v13459_v20 }
0x13de   : > { %9993 = vmatprep.subr.bf16.mxu0 %v12048_v29 }
0x13e1   : > { %9994 = vmatpush3.bf16.msra.mxu0 %v13466_v2 }
0x13e2   : > { %9995 = vmatprep.subr.bf16.mxu0 %v12048_v29 }
0x13e5   : > { %9996 = vmatpush3.bf16.msra.mxu0 %v13473_v3 }
0x13e6   : > { %9997 = vmatprep.subr.bf16.mxu0 %v12048_v29 }
0x13e9   : > { %9998 = vmatpush3.bf16.msra.mxu0 %v13480_v9 }
0x13ea   : > { %9999 = vmatprep.subr.bf16.mxu0 %v12048_v29 }
0x13ed   : > { %10000 = vmatpush3.bf16.msra.mxu0 %v13487_v17 }
0x13ee   : > { %10001 = vmatprep.subr.bf16.mxu0 %v12048_v29 }
0x13f1   : > { %10002 = vmatpush3.bf16.msra.mxu0 %v13527_v6 }
0x13f2   : > { %10003 = vmatprep.subr.bf16.mxu0 %v12048_v29 }
0x13f5   : > { %10004 = vmatpush3.bf16.msra.mxu0 %v13534_v61 }
0x13f6   : > { %10041 = vmatprep.subr.bf16.mxu0 %v12048_v29 }
0x13f8   : > { %10006 = vmatmul.mubr.bf16.vlgmr.msra.gmra.mrb[92].mxu0 %v6784_v47 }
0x13f9   : > { %10042 = vmatpush3.bf16.msra.mxu0 %v13573_v50  ;;  %10049 = vmatprep.mubr.msk.bf16.mxu0 %vm12049_vm0, %v12048_v29 }
0x13fa   : > { %10043 = vmatprep.subr.bf16.mxu0 %v12048_v29 }
0x13fd   : > { %10044 = vmatpush3.bf16.msra.mxu0 %v13579_v52 }
0x13fe   : > { %10045 = vmatprep.subr.bf16.mxu0 %v12048_v29 }
0x1401   : > { %10046 = vmatpush3.bf16.msra.mxu0 %v13583_v53 }
0x1402   : > { %10047 = vmatprep.subr.bf16.mxu0 %v12048_v29 }
0x1405   : > { %10048 = vmatpush3.bf16.msra.mxu0 %v13587_v36 }
0x1406   : > { %10053 = vmatprep.subr.bf16.mxu0 %v12048_v29 }
0x14ab   : > { %v6776_v57 = vpop.f32.mrb[88].mxu0 }
0x14ac   : > { %v6777_v13 = vadd.f32 %v13692_v35, %v6776_v57  ;;  %v9987_v15 = vpop.f32.mrb[89].mxu0 }
0x14ad   : > { %v6779_v62 = vpop.f32.mrb[90].mxu0 }
0x14ae   : > { %6783 = vst [vmem:[#allocation26 + $0x1a] sm:$0x3] %v6777_v13  ;;  %v9988_v0 = vpop.f32.mrb[91].mxu0 }
0x14cb   : > { %v6819_v42 = vpop.f32.mrb[92].mxu0 }
0x14cc   : > { %v6820_v16 = vadd.f32 %v13625_v31, %v6819_v42  ;;  %v10007_v56 = vpop.f32.mrb[93].mxu0 }
0x14cd   : > { %v6822_v8 = vpop.f32.mrb[94].mxu0 }
0x14ce   : > { %v6825_v27 = vmax.f32 %v6820_v16, 0.0  ;;  %v10008_v39 = vpop.f32.mrb[95].mxu0  ;;  %v7048_v16 = vpack.c.bf16 %v13143_v33, %v13143_v33 }
0x14d0   : > { %v6826_v40 = vpack.c.bf16 %v6825_v27, %v6825_v27 }
0x14d2   : > { %10018 = vmatmul.mubr.msk.bf16.vlgmr.msra.gmra.mrb[92].mxu1 %vm5595_vm1, %v6826_v40 }
0x14d3   : > { %10022 = vmatpush3.bf16.msra.mxu1 %v13416_v63  ;;  %10037 = vmatprep.mubr.msk.bf16.mxu1 %vm12049_vm0, %v12048_v29 }
0x14d4   : > { %10023 = vmatprep.subr.bf16.mxu1 %v12048_v29 }
0x14d7   : > { %10024 = vmatpush3.bf16.msra.mxu1 %v13459_v20 }
0x14d8   : > { %10025 = vmatprep.subr.bf16.mxu1 %v12048_v29 }
0x14db   : > { %10026 = vmatpush3.bf16.msra.mxu1 %v13466_v2 }
0x14dc   : > { %10027 = vmatprep.subr.bf16.mxu1 %v12048_v29 }
0x14df   : > { %10028 = vmatpush3.bf16.msra.mxu1 %v13473_v3 }
0x14e0   : > { %10029 = vmatprep.subr.bf16.mxu1 %v12048_v29 }
0x14e3   : > { %10030 = vmatpush3.bf16.msra.mxu1 %v13480_v9 }
0x14e4   : > { %10031 = vmatprep.subr.bf16.mxu1 %v12048_v29 }
0x14e7   : > { %10032 = vmatpush3.bf16.msra.mxu1 %v13487_v17 }
0x14e8   : > { %10033 = vmatprep.subr.bf16.mxu1 %v12048_v29 }
0x14eb   : > { %10034 = vmatpush3.bf16.msra.mxu1 %v13527_v6 }
0x14ec   : > { %10035 = vmatprep.subr.bf16.mxu1 %v12048_v29 }
0x14ef   : > { %10036 = vmatpush3.bf16.msra.mxu1 %v13534_v61 }
0x14f0   : > { %10073 = vmatprep.subr.bf16.mxu1 %v12048_v29 }
0x14f2   : > { %10038 = vmatmul.mubr.bf16.vlgmr.msra.gmra.mrb[96].mxu1 %v6872_v7 }
0x14f3   : > { %10074 = vmatpush3.bf16.msra.mxu1 %v13573_v50  ;;  %10081 = vmatprep.mubr.msk.bf16.mxu1 %vm12049_vm0, %v12048_v29 }
0x14f4   : > { %10075 = vmatprep.subr.bf16.mxu1 %v12048_v29 }
0x14f7   : > { %10076 = vmatpush3.bf16.msra.mxu1 %v13579_v52 }
0x14f8   : > { %10077 = vmatprep.subr.bf16.mxu1 %v12048_v29 }
0x14fb   : > { %10078 = vmatpush3.bf16.msra.mxu1 %v13583_v53 }
0x14fc   : > { %10079 = vmatprep.subr.bf16.mxu1 %v12048_v29 }
0x14ff   : > { %10080 = vmatpush3.bf16.msra.mxu1 %v13587_v36 }
0x1500   : > { %10085 = vmatprep.subr.bf16.mxu1 %v12048_v29 }
0x15a5   : > { %v6864_v1 = vpop.f32.mrb[92].mxu1 }
0x15a6   : > { %v6865_v41 = vadd.f32 %v13692_v35, %v6864_v1  ;;  %v10019_v22 = vpop.f32.mrb[93].mxu1 }
0x15a7   : > { %v6867_v24 = vpop.f32.mrb[94].mxu1 }
0x15a8   : > { %6871 = vst [vmem:[#allocation26 + $0x1c] sm:$0x3] %v6865_v41  ;;  %v10020_v28 = vpop.f32.mrb[95].mxu1 }
0x15c5   : > { %v6907_v32 = vpop.f32.mrb[96].mxu1 }
0x15c6   : > { %v6908_v43 = vadd.f32 %v13625_v31, %v6907_v32  ;;  %v10039_v38 = vpop.f32.mrb[97].mxu1  ;;  %v7136_v32 = vpack.c.bf16 %v13141_v25, %v13141_v25 }
0x15c7   : > { %v6910_v55 = vpop.f32.mrb[98].mxu1 }
0x15c8   : > { %v6913_v21 = vmax.f32 %v6908_v43, 0.0  ;;  %v10040_v45 = vpop.f32.mrb[99].mxu1 }
0x15ca   : > { %v6914_v46 = vpack.c.bf16 %v6913_v21, %v6913_v21 }
0x15cc   : > { %10050 = vmatmul.mubr.msk.bf16.vlgmr.msra.gmra.mrb[96].mxu0 %vm5595_vm1, %v6914_v46 }
0x15cd   : > { %10054 = vmatpush3.bf16.msra.mxu0 %v13416_v63  ;;  %10069 = vmatprep.mubr.msk.bf16.mxu0 %vm12049_vm0, %v12048_v29 }
0x15ce   : > { %10055 = vmatprep.subr.bf16.mxu0 %v12048_v29 }
0x15d1   : > { %10056 = vmatpush3.bf16.msra.mxu0 %v13459_v20 }
0x15d2   : > { %10057 = vmatprep.subr.bf16.mxu0 %v12048_v29 }
0x15d5   : > { %10058 = vmatpush3.bf16.msra.mxu0 %v13466_v2 }
0x15d6   : > { %10059 = vmatprep.subr.bf16.mxu0 %v12048_v29 }
0x15d9   : > { %10060 = vmatpush3.bf16.msra.mxu0 %v13473_v3 }
0x15da   : > { %10061 = vmatprep.subr.bf16.mxu0 %v12048_v29 }
0x15dd   : > { %10062 = vmatpush3.bf16.msra.mxu0 %v13480_v9 }
0x15de   : > { %10063 = vmatprep.subr.bf16.mxu0 %v12048_v29 }
0x15e1   : > { %10064 = vmatpush3.bf16.msra.mxu0 %v13487_v17 }
0x15e2   : > { %10065 = vmatprep.subr.bf16.mxu0 %v12048_v29 }
0x15e5   : > { %10066 = vmatpush3.bf16.msra.mxu0 %v13527_v6 }
0x15e6   : > { %10067 = vmatprep.subr.bf16.mxu0 %v12048_v29 }
0x15e9   : > { %10068 = vmatpush3.bf16.msra.mxu0 %v13534_v61 }
0x15ea   : > { %10105 = vmatprep.subr.bf16.mxu0 %v12048_v29 }
0x15ec   : > { %10070 = vmatmul.mubr.bf16.vlgmr.msra.gmra.mrb[100].mxu0 %v6960_v18 }
0x15ed   : > { %10106 = vmatpush3.bf16.msra.mxu0 %v13573_v50  ;;  %10113 = vmatprep.mubr.msk.bf16.mxu0 %vm12049_vm0, %v12048_v29 }
0x15ee   : > { %10107 = vmatprep.subr.bf16.mxu0 %v12048_v29 }
0x15f1   : > { %10108 = vmatpush3.bf16.msra.mxu0 %v13579_v52 }
0x15f2   : > { %10109 = vmatprep.subr.bf16.mxu0 %v12048_v29 }
0x15f5   : > { %10110 = vmatpush3.bf16.msra.mxu0 %v13583_v53 }
0x15f6   : > { %10111 = vmatprep.subr.bf16.mxu0 %v12048_v29 }
0x15f9   : > { %10112 = vmatpush3.bf16.msra.mxu0 %v13587_v36 }
0x15fa   : > { %10117 = vmatprep.subr.bf16.mxu0 %v12048_v29 }
0x169f   : > { %v6952_v19 = vpop.f32.mrb[96].mxu0 }
0x16a0   : > { %v6953_v26 = vadd.f32 %v13692_v35, %v6952_v19  ;;  %v10051_v11 = vpop.f32.mrb[97].mxu0 }
0x16a1   : > { %v6955_v51 = vpop.f32.mrb[98].mxu0 }
0x16a2   : > { %6959 = vst [vmem:[#allocation26 + $0x1e] sm:$0x3] %v6953_v26  ;;  %v10052_v58 = vpop.f32.mrb[99].mxu0  ;;  %v7224_v26 = vpack.c.bf16 %v13145_v34, %v13145_v34 }
0x16bf   : > { %v6995_v47 = vpop.f32.mrb[100].mxu0 }
0x16c0   : > { %v6996_v57 = vadd.f32 %v13625_v31, %v6995_v47  ;;  %v10071_v13 = vpop.f32.mrb[101].mxu0 }
0x16c1   : > { %v6998_v15 = vpop.f32.mrb[102].mxu0 }
0x16c2   : > { %v7001_v62 = vmax.f32 %v6996_v57, 0.0  ;;  %v10072_v0 = vpop.f32.mrb[103].mxu0 }
0x16c4   : > { %v7002_v42 = vpack.c.bf16 %v7001_v62, %v7001_v62 }
0x16c6   : > { %10082 = vmatmul.mubr.msk.bf16.vlgmr.msra.gmra.mrb[100].mxu1 %vm5595_vm1, %v7002_v42 }
0x16c7   : > { %10086 = vmatpush3.bf16.msra.mxu1 %v13416_v63  ;;  %10101 = vmatprep.mubr.msk.bf16.mxu1 %vm12049_vm0, %v12048_v29 }
0x16c8   : > { %10087 = vmatprep.subr.bf16.mxu1 %v12048_v29 }
0x16cb   : > { %10088 = vmatpush3.bf16.msra.mxu1 %v13459_v20 }
0x16cc   : > { %10089 = vmatprep.subr.bf16.mxu1 %v12048_v29 }
0x16cf   : > { %10090 = vmatpush3.bf16.msra.mxu1 %v13466_v2 }
0x16d0   : > { %10091 = vmatprep.subr.bf16.mxu1 %v12048_v29 }
0x16d3   : > { %10092 = vmatpush3.bf16.msra.mxu1 %v13473_v3 }
0x16d4   : > { %10093 = vmatprep.subr.bf16.mxu1 %v12048_v29 }
0x16d7   : > { %10094 = vmatpush3.bf16.msra.mxu1 %v13480_v9 }
0x16d8   : > { %10095 = vmatprep.subr.bf16.mxu1 %v12048_v29 }
0x16db   : > { %10096 = vmatpush3.bf16.msra.mxu1 %v13487_v17 }
0x16dc   : > { %10097 = vmatprep.subr.bf16.mxu1 %v12048_v29 }
0x16df   : > { %10098 = vmatpush3.bf16.msra.mxu1 %v13527_v6 }
0x16e0   : > { %10099 = vmatprep.subr.bf16.mxu1 %v12048_v29 }
0x16e3   : > { %10100 = vmatpush3.bf16.msra.mxu1 %v13534_v61 }
0x16e4   : > { %10137 = vmatprep.subr.bf16.mxu1 %v12048_v29 }
0x16e6   : > { %10102 = vmatmul.mubr.bf16.vlgmr.msra.gmra.mrb[104].mxu1 %v7048_v16 }
0x16e7   : > { %10138 = vmatpush3.bf16.msra.mxu1 %v13573_v50  ;;  %10145 = vmatprep.mubr.msk.bf16.mxu1 %vm12049_vm0, %v12048_v29 }
0x16e8   : > { %10139 = vmatprep.subr.bf16.mxu1 %v12048_v29 }
0x16eb   : > { %10140 = vmatpush3.bf16.msra.mxu1 %v13579_v52 }
0x16ec   : > { %10141 = vmatprep.subr.bf16.mxu1 %v12048_v29 }
0x16ef   : > { %10142 = vmatpush3.bf16.msra.mxu1 %v13583_v53 }
0x16f0   : > { %10143 = vmatprep.subr.bf16.mxu1 %v12048_v29 }
0x16f3   : > { %10144 = vmatpush3.bf16.msra.mxu1 %v13587_v36 }
0x16f4   : > { %10149 = vmatprep.subr.bf16.mxu1 %v12048_v29 }
0x1799   : > { %v7040_v33 = vpop.f32.mrb[100].mxu1 }
0x179a   : > { %v7041_v56 = vadd.f32 %v13692_v35, %v7040_v33  ;;  %v10083_v8 = vpop.f32.mrb[101].mxu1 }
0x179b   : > { %v7043_v27 = vpop.f32.mrb[102].mxu1 }
0x179c   : > { %7047 = vst [vmem:[#allocation26 + $0x20] sm:$0x3] %v7041_v56  ;;  %v10084_v39 = vpop.f32.mrb[103].mxu1 }
0x17b9   : > { %v7083_v40 = vpop.f32.mrb[104].mxu1 }
0x17ba   : > { %v7084_v7 = vadd.f32 %v13625_v31, %v7083_v40  ;;  %v10103_v1 = vpop.f32.mrb[105].mxu1 }
0x17bb   : > { %v7086_v41 = vpop.f32.mrb[106].mxu1 }
0x17bc   : > { %v7089_v22 = vmax.f32 %v7084_v7, 0.0  ;;  %v10104_v24 = vpop.f32.mrb[107].mxu1 }
0x17be   : > { %v7090_v28 = vpack.c.bf16 %v7089_v22, %v7089_v22 }
0x17c0   : > { %10114 = vmatmul.mubr.msk.bf16.vlgmr.msra.gmra.mrb[104].mxu0 %vm5595_vm1, %v7090_v28  ;;  %v13898_v28 = vld [vmem:[%s14365_s11] sm:$0xff]  }
0x17c1   : > { %10118 = vmatpush3.bf16.msra.mxu0 %v13416_v63  ;;  %10133 = vmatprep.mubr.msk.bf16.mxu0 %vm12049_vm0, %v12048_v29 }
0x17c2   : > { %10119 = vmatprep.subr.bf16.mxu0 %v12048_v29 }
0x17c5   : > { %10120 = vmatpush3.bf16.msra.mxu0 %v13459_v20 }
0x17c6   : > { %10121 = vmatprep.subr.bf16.mxu0 %v12048_v29 }
0x17c9   : > { %10122 = vmatpush3.bf16.msra.mxu0 %v13466_v2 }
0x17ca   : > { %10123 = vmatprep.subr.bf16.mxu0 %v12048_v29 }
0x17cd   : > { %10124 = vmatpush3.bf16.msra.mxu0 %v13473_v3 }
0x17ce   : > { %10125 = vmatprep.subr.bf16.mxu0 %v12048_v29 }
0x17d1   : > { %10126 = vmatpush3.bf16.msra.mxu0 %v13480_v9 }
0x17d2   : > { %10127 = vmatprep.subr.bf16.mxu0 %v12048_v29 }
0x17d5   : > { %10128 = vmatpush3.bf16.msra.mxu0 %v13487_v17 }
0x17d6   : > { %10129 = vmatprep.subr.bf16.mxu0 %v12048_v29 }
0x17d9   : > { %10130 = vmatpush3.bf16.msra.mxu0 %v13527_v6 }
0x17da   : > { %10131 = vmatprep.subr.bf16.mxu0 %v12048_v29 }
0x17dd   : > { %10132 = vmatpush3.bf16.msra.mxu0 %v13534_v61 }
0x17de   : > { %10169 = vmatprep.subr.bf16.mxu0 %v12048_v29 }
0x17e0   : > { %10134 = vmatmul.mubr.bf16.vlgmr.msra.gmra.mrb[108].mxu0 %v7136_v32 }
0x17e1   : > { %10170 = vmatpush3.bf16.msra.mxu0 %v13573_v50  ;;  %10177 = vmatprep.mubr.msk.bf16.mxu0 %vm12049_vm0, %v12048_v29 }
0x17e2   : > { %10171 = vmatprep.subr.bf16.mxu0 %v12048_v29 }
0x17e5   : > { %10172 = vmatpush3.bf16.msra.mxu0 %v13579_v52 }
0x17e6   : > { %10173 = vmatprep.subr.bf16.mxu0 %v12048_v29 }
0x17e9   : > { %10174 = vmatpush3.bf16.msra.mxu0 %v13583_v53 }
0x17ea   : > { %10175 = vmatprep.subr.bf16.mxu0 %v12048_v29 }
0x17ed   : > { %10176 = vmatpush3.bf16.msra.mxu0 %v13587_v36 }
0x17ee   : > { %10181 = vmatprep.subr.bf16.mxu0 %v12048_v29 }
0x1893   : > { %v7128_v25 = vpop.f32.mrb[104].mxu0 }
0x1894   : > { %v7129_v43 = vadd.f32 %v13692_v35, %v7128_v25  ;;  %v10115_v38 = vpop.f32.mrb[105].mxu0 }
0x1895   : > { %v7131_v55 = vpop.f32.mrb[106].mxu0 }
0x1896   : > { %7135 = vst [vmem:[#allocation26 + $0x22] sm:$0x3] %v7129_v43  ;;  %v10116_v21 = vpop.f32.mrb[107].mxu0 }
0x18b3   : > { %v7171_v45 = vpop.f32.mrb[108].mxu0 }
0x18b4   : > { %v7172_v46 = vadd.f32 %v13625_v31, %v7171_v45  ;;  %v10135_v23 = vpop.f32.mrb[109].mxu0 }
0x18b5   : > { %v7174_v4 = vpop.f32.mrb[110].mxu0  ;;  %v13947_v23 = vld [vmem:[%s14365_s11 + $0x10] sm:$0xff]  }
0x18b6   : > { %v7177_v54 = vmax.f32 %v7172_v46, 0.0  ;;  %v10136_v18 = vpop.f32.mrb[111].mxu0  ;;  %v13940_v46 = vld [vmem:[%s14365_s11 + $0x8] sm:$0xff]   ;;  %v13954_v4 = vld [vmem:[%s14365_s11 + $0x18] sm:$0xff]  }
0x18b7   : > { %v13968_v18 = vld [vmem:[%s14365_s11 + $0x28] sm:$0xff]  }
0x18b8   : > { %v7178_v19 = vpack.c.bf16 %v7177_v54, %v7177_v54  ;;  %v13961_v54 = vld [vmem:[%s14365_s11 + $0x20] sm:$0xff]  }
0x18ba   : > { %10146 = vmatmul.mubr.msk.bf16.vlgmr.msra.gmra.mrb[108].mxu1 %vm5595_vm1, %v7178_v19  ;;  %v7488_v19 = vpack.c.bf16 %v13153_v60, %v13153_v60 }
0x18bb   : > { %10150 = vmatpush3.bf16.msra.mxu1 %v13416_v63  ;;  %10165 = vmatprep.mubr.msk.bf16.mxu1 %vm12049_vm0, %v12048_v29 }
0x18bc   : > { %10151 = vmatprep.subr.bf16.mxu1 %v12048_v29 }
0x18bf   : > { %10152 = vmatpush3.bf16.msra.mxu1 %v13459_v20 }
0x18c0   : > { %10153 = vmatprep.subr.bf16.mxu1 %v12048_v29 }
0x18c3   : > { %10154 = vmatpush3.bf16.msra.mxu1 %v13466_v2 }
0x18c4   : > { %10155 = vmatprep.subr.bf16.mxu1 %v12048_v29 }
0x18c7   : > { %10156 = vmatpush3.bf16.msra.mxu1 %v13473_v3 }
0x18c8   : > { %10157 = vmatprep.subr.bf16.mxu1 %v12048_v29 }
0x18cb   : > { %10158 = vmatpush3.bf16.msra.mxu1 %v13480_v9 }
0x18cc   : > { %10159 = vmatprep.subr.bf16.mxu1 %v12048_v29 }
0x18cf   : > { %10160 = vmatpush3.bf16.msra.mxu1 %v13487_v17 }
0x18d0   : > { %10161 = vmatprep.subr.bf16.mxu1 %v12048_v29 }
0x18d3   : > { %10162 = vmatpush3.bf16.msra.mxu1 %v13527_v6 }
0x18d4   : > { %10163 = vmatprep.subr.bf16.mxu1 %v12048_v29 }
0x18d7   : > { %10164 = vmatpush3.bf16.msra.mxu1 %v13534_v61 }
0x18d8   : > { %10201 = vmatprep.subr.bf16.mxu1 %v12048_v29 }
0x18da   : > { %10166 = vmatmul.mubr.bf16.vlgmr.msra.gmra.mrb[112].mxu1 %v7224_v26 }
0x18db   : > { %10202 = vmatpush3.bf16.msra.mxu1 %v13573_v50  ;;  %10209 = vmatprep.mubr.msk.bf16.mxu1 %vm12049_vm0, %v12048_v29 }
0x18dc   : > { %10203 = vmatprep.subr.bf16.mxu1 %v12048_v29 }
0x18df   : > { %10204 = vmatpush3.bf16.msra.mxu1 %v13579_v52 }
0x18e0   : > { %10205 = vmatprep.subr.bf16.mxu1 %v12048_v29 }
0x18e3   : > { %10206 = vmatpush3.bf16.msra.mxu1 %v13583_v53 }
0x18e4   : > { %10207 = vmatprep.subr.bf16.mxu1 %v12048_v29 }
0x18e7   : > { %10208 = vmatpush3.bf16.msra.mxu1 %v13587_v36 }
0x18e8   : > { %10213 = vmatprep.subr.bf16.mxu1 %v12048_v29 }
0x198d   : > { %v7216_v34 = vpop.f32.mrb[108].mxu1 }
0x198e   : > { %v7217_v11 = vadd.f32 %v13692_v35, %v7216_v34  ;;  %v10147_v51 = vpop.f32.mrb[109].mxu1 }
0x198f   : > { %v7219_v58 = vpop.f32.mrb[110].mxu1 }
0x1990   : > { %7223 = vst [vmem:[#allocation26 + $0x24] sm:$0x3] %v7217_v11  ;;  %v10148_v47 = vpop.f32.mrb[111].mxu1 }
0x19ad   : > { %v7259_v57 = vpop.f32.mrb[112].mxu1 }
0x19ae   : > { %v7260_v13 = vadd.f32 %v13625_v31, %v7259_v57  ;;  %v10167_v15 = vpop.f32.mrb[113].mxu1 }
0x19af   : > { %v7262_v62 = vpop.f32.mrb[114].mxu1 }
0x19b0   : > { %v7265_v0 = vmax.f32 %v7260_v13, 0.0  ;;  %v10168_v42 = vpop.f32.mrb[115].mxu1  ;;  %v14008_v62 = vld [vmem:[%s14365_s11 + $0x30] sm:$0xff]  }
0x19b1   : > { %v7576_v42 = vpack.c.bf16 %v13157_v44, %v13157_v44 }
0x19b2   : > { %v7266_v16 = vpack.c.bf16 %v7265_v0, %v7265_v0  ;;  %v14015_v0 = vld [vmem:[%s14365_s11 + $0x38] sm:$0xff]  }
0x19b4   : > { %10178 = vmatmul.mubr.msk.bf16.vlgmr.msra.gmra.mrb[112].mxu0 %vm5595_vm1, %v7266_v16 }
0x19b5   : > { %10182 = vmatpush3.bf16.msra.mxu0 %v13416_v63  ;;  %10197 = vmatprep.mubr.msk.bf16.mxu0 %vm12049_vm0, %v12048_v29  ;;  %v7312_v63 = vpack.c.bf16 %v13151_v59, %v13151_v59 }
0x19b6   : > { %10183 = vmatprep.subr.bf16.mxu0 %v12048_v29 }
0x19b9   : > { %10184 = vmatpush3.bf16.msra.mxu0 %v13459_v20 }
0x19ba   : > { %10185 = vmatprep.subr.bf16.mxu0 %v12048_v29 }
0x19bd   : > { %10186 = vmatpush3.bf16.msra.mxu0 %v13466_v2 }
0x19be   : > { %10187 = vmatprep.subr.bf16.mxu0 %v12048_v29 }
0x19c1   : > { %10188 = vmatpush3.bf16.msra.mxu0 %v13473_v3 }
0x19c2   : > { %10189 = vmatprep.subr.bf16.mxu0 %v12048_v29 }
0x19c5   : > { %10190 = vmatpush3.bf16.msra.mxu0 %v13480_v9 }
0x19c6   : > { %10191 = vmatprep.subr.bf16.mxu0 %v12048_v29 }
0x19c9   : > { %10192 = vmatpush3.bf16.msra.mxu0 %v13487_v17 }
0x19ca   : > { %10193 = vmatprep.subr.bf16.mxu0 %v12048_v29 }
0x19cd   : > { %10194 = vmatpush3.bf16.msra.mxu0 %v13527_v6 }
0x19ce   : > { %10195 = vmatprep.subr.bf16.mxu0 %v12048_v29 }
0x19d1   : > { %10196 = vmatpush3.bf16.msra.mxu0 %v13534_v61 }
0x19d2   : > { %10233 = vmatprep.subr.bf16.mxu0 %v12048_v29 }
0x19d4   : > { %10198 = vmatmul.mubr.bf16.vlgmr.msra.gmra.mrb[116].mxu0 %v7312_v63 }
0x19d5   : > { %10234 = vmatpush3.bf16.msra.mxu0 %v13573_v50  ;;  %10241 = vmatprep.mubr.msk.bf16.mxu0 %vm12049_vm0, %v12048_v29 }
0x19d6   : > { %10235 = vmatprep.subr.bf16.mxu0 %v12048_v29 }
0x19d9   : > { %10236 = vmatpush3.bf16.msra.mxu0 %v13579_v52 }
0x19da   : > { %10237 = vmatprep.subr.bf16.mxu0 %v12048_v29 }
0x19dd   : > { %10238 = vmatpush3.bf16.msra.mxu0 %v13583_v53 }
0x19de   : > { %10239 = vmatprep.subr.bf16.mxu0 %v12048_v29 }
0x19e1   : > { %10240 = vmatpush3.bf16.msra.mxu0 %v13587_v36 }
0x19e2   : > { %10245 = vmatprep.subr.bf16.mxu0 %v12048_v29 }
0x1a87   : > { %v7304_v59 = vpop.f32.mrb[112].mxu0 }
0x1a88   : > { %v7305_v33 = vadd.f32 %v13692_v35, %v7304_v59  ;;  %v10179_v56 = vpop.f32.mrb[113].mxu0 }
0x1a89   : > { %v7307_v8 = vpop.f32.mrb[114].mxu0 }
0x1a8a   : > { %7311 = vst [vmem:[#allocation26 + $0x26] sm:$0x3] %v7305_v33  ;;  %v10180_v27 = vpop.f32.mrb[115].mxu0 }
0x1aa7   : > { %v7347_v39 = vpop.f32.mrb[116].mxu0 }
0x1aa8   : > { %v7348_v40 = vadd.f32 %v13625_v31, %v7347_v39  ;;  %v10199_v7 = vpop.f32.mrb[117].mxu0 }
0x1aa9   : > { %v7350_v1 = vpop.f32.mrb[118].mxu0 }
0x1aaa   : > { %v7353_v41 = vmax.f32 %v7348_v40, 0.0  ;;  %v10200_v22 = vpop.f32.mrb[119].mxu0 }
0x1aab   : > { %v14068_v22 = vld [vmem:[#allocation23 + $0x18] sm:$0xff]  }
0x1aac   : > { %v7354_v24 = vpack.c.bf16 %v7353_v41, %v7353_v41  ;;  %v14054_v41 = vld [vmem:[#allocation23] sm:$0xff]  }
0x1aae   : > { %10210 = vmatmul.mubr.msk.bf16.vlgmr.msra.gmra.mrb[116].mxu1 %vm5595_vm1, %v7354_v24 }
0x1aaf   : > { %10214 = vmatpush3.bf16.msra.mxu1 %v13898_v28  ;;  %10229 = vmatprep.mubr.msk.bf16.mxu1 %vm12049_vm0, %v12048_v29 }
0x1ab0   : > { %10215 = vmatprep.subr.bf16.mxu1 %v12048_v29 }
0x1ab3   : > { %10216 = vmatpush3.bf16.msra.mxu1 %v13459_v20  ;;  %v7400_v20 = vpack.c.bf16 %v13155_v5, %v13155_v5 }
0x1ab4   : > { %10217 = vmatprep.subr.bf16.mxu1 %v12048_v29 }
0x1ab7   : > { %10218 = vmatpush3.bf16.msra.mxu1 %v13466_v2 }
0x1ab8   : > { %10219 = vmatprep.subr.bf16.mxu1 %v12048_v29 }
0x1abb   : > { %10220 = vmatpush3.bf16.msra.mxu1 %v13473_v3 }
0x1abc   : > { %10221 = vmatprep.subr.bf16.mxu1 %v12048_v29 }
0x1abf   : > { %10222 = vmatpush3.bf16.msra.mxu1 %v13480_v9 }
0x1ac0   : > { %10223 = vmatprep.subr.bf16.mxu1 %v12048_v29 }
0x1ac3   : > { %10224 = vmatpush3.bf16.msra.mxu1 %v13487_v17 }
0x1ac4   : > { %10225 = vmatprep.subr.bf16.mxu1 %v12048_v29 }
0x1ac7   : > { %10226 = vmatpush3.bf16.msra.mxu1 %v13527_v6 }
0x1ac8   : > { %10227 = vmatprep.subr.bf16.mxu1 %v12048_v29 }
0x1acb   : > { %10228 = vmatpush3.bf16.msra.mxu1 %v13534_v61 }
0x1acc   : > { %10265 = vmatprep.subr.bf16.mxu1 %v12048_v29 }
0x1ace   : > { %10230 = vmatmul.mubr.bf16.vlgmr.msra.gmra.mrb[120].mxu1 %v7400_v20 }
0x1acf   : > { %10266 = vmatpush3.bf16.msra.mxu1 %v13573_v50  ;;  %10273 = vmatprep.mubr.msk.bf16.mxu1 %vm12049_vm0, %v12048_v29 }
0x1ad0   : > { %10267 = vmatprep.subr.bf16.mxu1 %v12048_v29 }
0x1ad3   : > { %10268 = vmatpush3.bf16.msra.mxu1 %v13579_v52 }
0x1ad4   : > { %10269 = vmatprep.subr.bf16.mxu1 %v12048_v29 }
0x1ad7   : > { %10270 = vmatpush3.bf16.msra.mxu1 %v13583_v53 }
0x1ad8   : > { %10271 = vmatprep.subr.bf16.mxu1 %v12048_v29 }
0x1adb   : > { %10272 = vmatpush3.bf16.msra.mxu1 %v13587_v36 }
0x1adc   : > { %10277 = vmatprep.subr.bf16.mxu1 %v12048_v29 }
0x1b81   : > { %v7392_v5 = vpop.f32.mrb[116].mxu1 }
0x1b82   : > { %v7393_v2 = vadd.f32 %v13692_v35, %v7392_v5  ;;  %v10211_v3 = vpop.f32.mrb[117].mxu1 }
0x1b83   : > { %v7395_v9 = vpop.f32.mrb[118].mxu1 }
0x1b84   : > { %7399 = vst [vmem:[#allocation26 + $0x28] sm:$0x3] %v7393_v2  ;;  %v10212_v17 = vpop.f32.mrb[119].mxu1 }
0x1ba1   : > { %v7435_v32 = vpop.f32.mrb[120].mxu1 }
0x1ba2   : > { %v7436_v25 = vadd.f32 %v13625_v31, %v7435_v32  ;;  %v10231_v43 = vpop.f32.mrb[121].mxu1 }
0x1ba3   : > { %v7438_v38 = vpop.f32.mrb[122].mxu1 }
0x1ba4   : > { %v7441_v55 = vmax.f32 %v7436_v25, 0.0  ;;  %v10232_v21 = vpop.f32.mrb[123].mxu1 }
0x1ba6   : > { %v7442_v45 = vpack.c.bf16 %v7441_v55, %v7441_v55 }
0x1ba8   : > { %10242 = vmatmul.mubr.msk.bf16.vlgmr.msra.gmra.mrb[120].mxu0 %vm5595_vm1, %v7442_v45 }
0x1ba9   : > { %10246 = vmatpush3.bf16.msra.mxu0 %v13898_v28  ;;  %10261 = vmatprep.mubr.msk.bf16.mxu0 %vm12049_vm0, %v12048_v29 }
0x1baa   : > { %10247 = vmatprep.subr.bf16.mxu0 %v12048_v29 }
0x1bad   : > { %10248 = vmatpush3.bf16.msra.mxu0 %v13940_v46 }
0x1bae   : > { %10249 = vmatprep.subr.bf16.mxu0 %v12048_v29 }
0x1bb1   : > { %10250 = vmatpush3.bf16.msra.mxu0 %v13947_v23 }
0x1bb2   : > { %10251 = vmatprep.subr.bf16.mxu0 %v12048_v29 }
0x1bb5   : > { %10252 = vmatpush3.bf16.msra.mxu0 %v13954_v4 }
0x1bb6   : > { %10253 = vmatprep.subr.bf16.mxu0 %v12048_v29 }
0x1bb9   : > { %10254 = vmatpush3.bf16.msra.mxu0 %v13961_v54 }
0x1bba   : > { %10255 = vmatprep.subr.bf16.mxu0 %v12048_v29 }
0x1bbd   : > { %10256 = vmatpush3.bf16.msra.mxu0 %v13968_v18 }
0x1bbe   : > { %10257 = vmatprep.subr.bf16.mxu0 %v12048_v29 }
0x1bc1   : > { %10258 = vmatpush3.bf16.msra.mxu0 %v13527_v6 }
0x1bc2   : > { %10259 = vmatprep.subr.bf16.mxu0 %v12048_v29 }
0x1bc5   : > { %10260 = vmatpush3.bf16.msra.mxu0 %v13534_v61 }
0x1bc6   : > { %10297 = vmatprep.subr.bf16.mxu0 %v12048_v29 }
0x1bc8   : > { %10262 = vmatmul.mubr.bf16.vlgmr.msra.gmra.mrb[124].mxu0 %v7488_v19 }
0x1bc9   : > { %10298 = vmatpush3.bf16.msra.mxu0 %v13573_v50  ;;  %10305 = vmatprep.mubr.msk.bf16.mxu0 %vm12049_vm0, %v12048_v29 }
0x1bca   : > { %10299 = vmatprep.subr.bf16.mxu0 %v12048_v29 }
0x1bcd   : > { %10300 = vmatpush3.bf16.msra.mxu0 %v13579_v52 }
0x1bce   : > { %10301 = vmatprep.subr.bf16.mxu0 %v12048_v29 }
0x1bd1   : > { %10302 = vmatpush3.bf16.msra.mxu0 %v13583_v53 }
0x1bd2   : > { %10303 = vmatprep.subr.bf16.mxu0 %v12048_v29 }
0x1bd5   : > { %10304 = vmatpush3.bf16.msra.mxu0 %v13587_v36 }
0x1bd6   : > { %10309 = vmatprep.subr.bf16.mxu0 %v12048_v29 }
0x1c7b   : > { %v7480_v60 = vpop.f32.mrb[120].mxu0 }
0x1c7c   : > { %v7481_v6 = vadd.f32 %v13692_v35, %v7480_v60  ;;  %v10243_v61 = vpop.f32.mrb[121].mxu0 }
0x1c7d   : > { %v7483_v26 = vpop.f32.mrb[122].mxu0  ;;  %v14106_v61 = vld [vmem:[#allocation21] ss:$0 sm:$0xff] }
0x1c7e   : > { %7487 = vst [vmem:[#allocation26 + $0x2a] sm:$0x3] %v7481_v6  ;;  %v10244_v34 = vpop.f32.mrb[123].mxu0 }
0x1c9b   : > { %v7523_v11 = vpop.f32.mrb[124].mxu0 }
0x1c9c   : > { %v7524_v51 = vadd.f32 %v13625_v31, %v7523_v11  ;;  %v10263_v58 = vpop.f32.mrb[125].mxu0 }
0x1c9d   : > { %v7526_v47 = vpop.f32.mrb[126].mxu0 }
0x1c9e   : > { %v7529_v57 = vmax.f32 %v7524_v51, 0.0  ;;  %v10264_v13 = vpop.f32.mrb[127].mxu0 }
0x1ca0   : > { %v7530_v15 = vpack.c.bf16 %v7529_v57, %v7529_v57  ;;  %v7840_v57 = vpack.c.bf16 %v13164_v37, %v13164_v37 }
0x1ca2   : > { %10274 = vmatmul.mubr.msk.bf16.vlgmr.msra.gmra.mrb[124].mxu1 %vm5595_vm1, %v7530_v15 }
0x1ca3   : > { %10278 = vmatpush3.bf16.msra.mxu1 %v13898_v28  ;;  %10293 = vmatprep.mubr.msk.bf16.mxu1 %vm12049_vm0, %v12048_v29 }
0x1ca4   : > { %10279 = vmatprep.subr.bf16.mxu1 %v12048_v29 }
0x1ca7   : > { %10280 = vmatpush3.bf16.msra.mxu1 %v13940_v46 }
0x1ca8   : > { %10281 = vmatprep.subr.bf16.mxu1 %v12048_v29 }
0x1cab   : > { %10282 = vmatpush3.bf16.msra.mxu1 %v13947_v23 }
0x1cac   : > { %10283 = vmatprep.subr.bf16.mxu1 %v12048_v29 }
0x1caf   : > { %10284 = vmatpush3.bf16.msra.mxu1 %v13954_v4 }
0x1cb0   : > { %10285 = vmatprep.subr.bf16.mxu1 %v12048_v29 }
0x1cb3   : > { %10286 = vmatpush3.bf16.msra.mxu1 %v13961_v54 }
0x1cb4   : > { %10287 = vmatprep.subr.bf16.mxu1 %v12048_v29 }
0x1cb7   : > { %10288 = vmatpush3.bf16.msra.mxu1 %v13968_v18 }
0x1cb8   : > { %10289 = vmatprep.subr.bf16.mxu1 %v12048_v29 }
0x1cbb   : > { %10290 = vmatpush3.bf16.msra.mxu1 %v14008_v62 }
0x1cbc   : > { %10291 = vmatprep.subr.bf16.mxu1 %v12048_v29 }
0x1cbf   : > { %10292 = vmatpush3.bf16.msra.mxu1 %v14015_v0 }
0x1cc0   : > { %10329 = vmatprep.subr.bf16.mxu1 %v12048_v29 }
0x1cc2   : > { %10294 = vmatmul.mubr.bf16.vlgmr.msra.gmra.mrb[128].mxu1 %v7576_v42 }
0x1cc3   : > { %10330 = vmatpush3.bf16.msra.mxu1 %v13573_v50  ;;  %10337 = vmatprep.mubr.msk.bf16.mxu1 %vm12049_vm0, %v12048_v29 }
0x1cc4   : > { %10331 = vmatprep.subr.bf16.mxu1 %v12048_v29 }
0x1cc7   : > { %10332 = vmatpush3.bf16.msra.mxu1 %v13579_v52 }
0x1cc8   : > { %10333 = vmatprep.subr.bf16.mxu1 %v12048_v29 }
0x1ccb   : > { %10334 = vmatpush3.bf16.msra.mxu1 %v13583_v53 }
0x1ccc   : > { %10335 = vmatprep.subr.bf16.mxu1 %v12048_v29 }
0x1ccf   : > { %10336 = vmatpush3.bf16.msra.mxu1 %v13587_v36  ;;  %v11521_v36 = vld [vmem:[#allocation20 + $0x18] sm:$0x3f] }
0x1cd0   : > { %10341 = vmatprep.subr.bf16.mxu1 %v12048_v29  ;;  %v3576_v40 = vrot.slane %v11521_v36, %v12911_v14  ;;  %v14060_v14 = vld [vmem:[#allocation23 + $0x8] sm:$0xff]  }
0x1cd2   : > { %v5354_v7 = vadd.f32 %v13162_v30, %v3576_v40  ;;  %v14064_v30 = vld [vmem:[#allocation23 + $0x10] sm:$0xff]  }
0x1cd4   : > { %v7664_v1 = vpack.c.bf16 %v5354_v7, %v5354_v7 }
0x1d75   : > { %v7568_v44 = vpop.f32.mrb[124].mxu1 }
0x1d76   : > { %v7569_v50 = vadd.f32 %v13692_v35, %v7568_v44  ;;  %v10275_v16 = vpop.f32.mrb[125].mxu1 }
0x1d77   : > { %v7571_v63 = vpop.f32.mrb[126].mxu1 }
0x1d78   : > { %7575 = vst [vmem:[#allocation26 + $0x2c] sm:$0x3] %v7569_v50  ;;  %v10276_v59 = vpop.f32.mrb[127].mxu1 }
0x1d95   : > { %v7611_v33 = vpop.f32.mrb[128].mxu1 }
0x1d96   : > { %v7612_v52 = vadd.f32 %v13625_v31, %v7611_v33  ;;  %v10295_v56 = vpop.f32.mrb[129].mxu1 }
0x1d97   : > { %v7614_v8 = vpop.f32.mrb[130].mxu1 }
0x1d98   : > { %v7617_v27 = vmax.f32 %v7612_v52, 0.0  ;;  %v10296_v53 = vpop.f32.mrb[131].mxu1  ;;  %v14173_v8 = vld [vmem:[#allocation24] ss:$0 sm:$0xff] }
0x1d9a   : > { %v7618_v39 = vpack.c.bf16 %v7617_v27, %v7617_v27 }
0x1d9c   : > { %10306 = vmatmul.mubr.msk.bf16.vlgmr.msra.gmra.mrb[128].mxu0 %vm5595_vm1, %v7618_v39 }
0x1d9d   : > { %10310 = vmatpush3.bf16.msra.mxu0 %v13898_v28  ;;  %10325 = vmatprep.mubr.msk.bf16.mxu0 %vm12049_vm0, %v12048_v29 }
0x1d9e   : > { %10311 = vmatprep.subr.bf16.mxu0 %v12048_v29 }
0x1da1   : > { %10312 = vmatpush3.bf16.msra.mxu0 %v13940_v46 }
0x1da2   : > { %10313 = vmatprep.subr.bf16.mxu0 %v12048_v29 }
0x1da5   : > { %10314 = vmatpush3.bf16.msra.mxu0 %v13947_v23 }
0x1da6   : > { %10315 = vmatprep.subr.bf16.mxu0 %v12048_v29 }
0x1da9   : > { %10316 = vmatpush3.bf16.msra.mxu0 %v13954_v4 }
0x1daa   : > { %10317 = vmatprep.subr.bf16.mxu0 %v12048_v29 }
0x1dad   : > { %10318 = vmatpush3.bf16.msra.mxu0 %v13961_v54 }
0x1dae   : > { %10319 = vmatprep.subr.bf16.mxu0 %v12048_v29 }
0x1db1   : > { %10320 = vmatpush3.bf16.msra.mxu0 %v13968_v18 }
0x1db2   : > { %10321 = vmatprep.subr.bf16.mxu0 %v12048_v29 }
0x1db5   : > { %10322 = vmatpush3.bf16.msra.mxu0 %v14008_v62 }
0x1db6   : > { %10323 = vmatprep.subr.bf16.mxu0 %v12048_v29 }
0x1db9   : > { %10324 = vmatpush3.bf16.msra.mxu0 %v14015_v0 }
0x1dba   : > { %10361 = vmatprep.subr.bf16.mxu0 %v12048_v29 }
0x1dbc   : > { %10326 = vmatmul.mubr.bf16.vlgmr.msra.gmra.mrb[132].mxu0 %v7664_v1 }
0x1dbd   : > { %10362 = vmatpush3.bf16.msra.mxu0 %v14054_v41  ;;  %10369 = vmatprep.mubr.msk.bf16.mxu0 %vm12049_vm0, %v12048_v29 }
0x1dbe   : > { %10363 = vmatprep.subr.bf16.mxu0 %v12048_v29 }
0x1dc1   : > { %10364 = vmatpush3.bf16.msra.mxu0 %v14060_v14 }
0x1dc2   : > { %10365 = vmatprep.subr.bf16.mxu0 %v12048_v29 }
0x1dc5   : > { %10366 = vmatpush3.bf16.msra.mxu0 %v14064_v30 }
0x1dc6   : > { %10367 = vmatprep.subr.bf16.mxu0 %v12048_v29 }
0x1dc9   : > { %10368 = vmatpush3.bf16.msra.mxu0 %v14068_v22 }
0x1dca   : > { %10373 = vmatprep.subr.bf16.mxu0 %v12048_v29 }
0x1e6f   : > { %v7656_v24 = vpop.f32.mrb[128].mxu0 }
0x1e70   : > { %v7657_v20 = vadd.f32 %v13692_v35, %v7656_v24  ;;  %v10307_v5 = vpop.f32.mrb[129].mxu0 }
0x1e71   : > { %v7659_v2 = vpop.f32.mrb[130].mxu0 }
0x1e72   : > { %7663 = vst [vmem:[#allocation26 + $0x2e] sm:$0x3] %v7657_v20  ;;  %v10308_v3 = vpop.f32.mrb[131].mxu0 }
0x1e73   : > { %v8016_v3 = vpack.c.bf16 %v13174_v12, %v13174_v12 }
0x1e8f   : > { %v7699_v9 = vpop.f32.mrb[132].mxu0 }
0x1e90   : > { %v7700_v17 = vadd.f32 %v13625_v31, %v7699_v9  ;;  %v10327_v32 = vpop.f32.mrb[133].mxu0  ;;  %v7752_v31 = vpack.c.bf16 %v13166_v48, %v13166_v48 }
0x1e91   : > { %v7702_v25 = vpop.f32.mrb[134].mxu0 }
0x1e92   : > { %v7705_v43 = vmax.f32 %v7700_v17, 0.0  ;;  %v10328_v38 = vpop.f32.mrb[135].mxu0 }
0x1e94   : > { %v7706_v55 = vpack.c.bf16 %v7705_v43, %v7705_v43 }
0x1e96   : > { %10338 = vmatmul.mubr.msk.bf16.vlgmr.msra.gmra.mrb[132].mxu1 %vm5595_vm1, %v7706_v55 }
0x1e97   : > { %10342 = vmatpush3.bf16.msra.mxu1 %v13898_v28  ;;  %10357 = vmatprep.mubr.msk.bf16.mxu1 %vm12049_vm0, %v12048_v29 }
0x1e98   : > { %10343 = vmatprep.subr.bf16.mxu1 %v12048_v29 }
0x1e9b   : > { %10344 = vmatpush3.bf16.msra.mxu1 %v13940_v46 }
0x1e9c   : > { %10345 = vmatprep.subr.bf16.mxu1 %v12048_v29 }
0x1e9f   : > { %10346 = vmatpush3.bf16.msra.mxu1 %v13947_v23 }
0x1ea0   : > { %10347 = vmatprep.subr.bf16.mxu1 %v12048_v29 }
0x1ea3   : > { %10348 = vmatpush3.bf16.msra.mxu1 %v13954_v4 }
0x1ea4   : > { %10349 = vmatprep.subr.bf16.mxu1 %v12048_v29 }
0x1ea7   : > { %10350 = vmatpush3.bf16.msra.mxu1 %v13961_v54 }
0x1ea8   : > { %10351 = vmatprep.subr.bf16.mxu1 %v12048_v29 }
0x1eab   : > { %10352 = vmatpush3.bf16.msra.mxu1 %v13968_v18 }
0x1eac   : > { %10353 = vmatprep.subr.bf16.mxu1 %v12048_v29 }
0x1eaf   : > { %10354 = vmatpush3.bf16.msra.mxu1 %v14008_v62 }
0x1eb0   : > { %10355 = vmatprep.subr.bf16.mxu1 %v12048_v29 }
0x1eb3   : > { %10356 = vmatpush3.bf16.msra.mxu1 %v14015_v0 }
0x1eb4   : > { %10393 = vmatprep.subr.bf16.mxu1 %v12048_v29 }
0x1eb6   : > { %10358 = vmatmul.mubr.bf16.vlgmr.msra.gmra.mrb[136].mxu1 %v7752_v31 }
0x1eb7   : > { %10394 = vmatpush3.bf16.msra.mxu1 %v14054_v41  ;;  %10401 = vmatprep.mubr.msk.bf16.mxu1 %vm12049_vm0, %v12048_v29 }
0x1eb8   : > { %10395 = vmatprep.subr.bf16.mxu1 %v12048_v29 }
0x1ebb   : > { %10396 = vmatpush3.bf16.msra.mxu1 %v14060_v14 }
0x1ebc   : > { %10397 = vmatprep.subr.bf16.mxu1 %v12048_v29 }
0x1ebf   : > { %10398 = vmatpush3.bf16.msra.mxu1 %v14064_v30 }
0x1ec0   : > { %10399 = vmatprep.subr.bf16.mxu1 %v12048_v29 }
0x1ec3   : > { %10400 = vmatpush3.bf16.msra.mxu1 %v14068_v22 }
0x1ec4   : > { %10405 = vmatprep.subr.bf16.mxu1 %v12048_v29 }
0x1f69   : > { %v7744_v48 = vpop.f32.mrb[132].mxu1 }
0x1f6a   : > { %v7745_v21 = vadd.f32 %v13692_v35, %v7744_v48  ;;  %v10339_v45 = vpop.f32.mrb[133].mxu1 }
0x1f6b   : > { %v7747_v19 = vpop.f32.mrb[134].mxu1 }
0x1f6c   : > { %7751 = vst [vmem:[#allocation26 + $0x30] sm:$0x3] %v7745_v21  ;;  %v10340_v60 = vpop.f32.mrb[135].mxu1 }
0x1f89   : > { %v7787_v6 = vpop.f32.mrb[136].mxu1 }
0x1f8a   : > { %v7788_v26 = vadd.f32 %v14106_v61, %v7787_v6  ;;  %v10359_v34 = vpop.f32.mrb[137].mxu1 }
0x1f8b   : > { %v7790_v11 = vpop.f32.mrb[138].mxu1 }
0x1f8c   : > { %v7793_v51 = vmax.f32 %v7788_v26, 0.0  ;;  %v10360_v58 = vpop.f32.mrb[139].mxu1 }
0x1f8e   : > { %v7794_v47 = vpack.c.bf16 %v7793_v51, %v7793_v51 }
0x1f90   : > { %10370 = vmatmul.mubr.msk.bf16.vlgmr.msra.gmra.mrb[136].mxu0 %vm5595_vm1, %v7794_v47 }
0x1f91   : > { %10374 = vmatpush3.bf16.msra.mxu0 %v13898_v28  ;;  %10389 = vmatprep.mubr.msk.bf16.mxu0 %vm12049_vm0, %v12048_v29 }
0x1f92   : > { %10375 = vmatprep.subr.bf16.mxu0 %v12048_v29 }
0x1f95   : > { %10376 = vmatpush3.bf16.msra.mxu0 %v13940_v46 }
0x1f96   : > { %10377 = vmatprep.subr.bf16.mxu0 %v12048_v29 }
0x1f99   : > { %10378 = vmatpush3.bf16.msra.mxu0 %v13947_v23 }
0x1f9a   : > { %10379 = vmatprep.subr.bf16.mxu0 %v12048_v29 }
0x1f9d   : > { %10380 = vmatpush3.bf16.msra.mxu0 %v13954_v4 }
0x1f9e   : > { %10381 = vmatprep.subr.bf16.mxu0 %v12048_v29 }
0x1fa1   : > { %10382 = vmatpush3.bf16.msra.mxu0 %v13961_v54 }
0x1fa2   : > { %10383 = vmatprep.subr.bf16.mxu0 %v12048_v29 }
0x1fa5   : > { %10384 = vmatpush3.bf16.msra.mxu0 %v13968_v18 }
0x1fa6   : > { %10385 = vmatprep.subr.bf16.mxu0 %v12048_v29 }
0x1fa9   : > { %10386 = vmatpush3.bf16.msra.mxu0 %v14008_v62 }
0x1faa   : > { %10387 = vmatprep.subr.bf16.mxu0 %v12048_v29 }
0x1fad   : > { %10388 = vmatpush3.bf16.msra.mxu0 %v14015_v0 }
0x1fae   : > { %10425 = vmatprep.subr.bf16.mxu0 %v12048_v29 }
0x1fb0   : > { %10390 = vmatmul.mubr.bf16.vlgmr.msra.gmra.mrb[140].mxu0 %v7840_v57 }
0x1fb1   : > { %10426 = vmatpush3.bf16.msra.mxu0 %v14054_v41  ;;  %10433 = vmatprep.mubr.msk.bf16.mxu0 %vm12049_vm0, %v12048_v29 }
0x1fb2   : > { %10427 = vmatprep.subr.bf16.mxu0 %v12048_v29 }
0x1fb5   : > { %10428 = vmatpush3.bf16.msra.mxu0 %v14060_v14 }
0x1fb6   : > { %10429 = vmatprep.subr.bf16.mxu0 %v12048_v29 }
0x1fb9   : > { %10430 = vmatpush3.bf16.msra.mxu0 %v14064_v30 }
0x1fba   : > { %10431 = vmatprep.subr.bf16.mxu0 %v12048_v29 }
0x1fbd   : > { %10432 = vmatpush3.bf16.msra.mxu0 %v14068_v22 }
0x1fbe   : > { %10437 = vmatprep.subr.bf16.mxu0 %v12048_v29 }
0x2063   : > { %v7832_v37 = vpop.f32.mrb[136].mxu0 }
0x2064   : > { %v7833_v13 = vadd.f32 %v13692_v35, %v7832_v37  ;;  %v10371_v15 = vpop.f32.mrb[137].mxu0  ;;  %v7928_v35 = vpack.c.bf16 %v13168_v49, %v13168_v49 }
0x2065   : > { %v7835_v42 = vpop.f32.mrb[138].mxu0 }
0x2066   : > { %7839 = vst [vmem:[#allocation26 + $0x32] sm:$0x3] %v7833_v13  ;;  %v10372_v44 = vpop.f32.mrb[139].mxu0 }
0x2083   : > { %v7875_v50 = vpop.f32.mrb[140].mxu0 }
0x2084   : > { %v7876_v16 = vadd.f32 %v14106_v61, %v7875_v50  ;;  %v10391_v63 = vpop.f32.mrb[141].mxu0 }
0x2085   : > { %v7878_v59 = vpop.f32.mrb[142].mxu0 }
0x2086   : > { %v7881_v33 = vmax.f32 %v7876_v16, 0.0  ;;  %v10392_v52 = vpop.f32.mrb[143].mxu0 }
0x2088   : > { %v7882_v56 = vpack.c.bf16 %v7881_v33, %v7881_v33 }
0x208a   : > { %10402 = vmatmul.mubr.msk.bf16.vlgmr.msra.gmra.mrb[140].mxu1 %vm5595_vm1, %v7882_v56 }
0x208b   : > { %10406 = vmatpush3.bf16.msra.mxu1 %v13898_v28  ;;  %10421 = vmatprep.mubr.msk.bf16.mxu1 %vm12049_vm0, %v12048_v29 }
0x208c   : > { %10407 = vmatprep.subr.bf16.mxu1 %v12048_v29 }
0x208f   : > { %10408 = vmatpush3.bf16.msra.mxu1 %v13940_v46 }
0x2090   : > { %10409 = vmatprep.subr.bf16.mxu1 %v12048_v29 }
0x2093   : > { %10410 = vmatpush3.bf16.msra.mxu1 %v13947_v23 }
0x2094   : > { %10411 = vmatprep.subr.bf16.mxu1 %v12048_v29 }
0x2097   : > { %10412 = vmatpush3.bf16.msra.mxu1 %v13954_v4 }
0x2098   : > { %10413 = vmatprep.subr.bf16.mxu1 %v12048_v29 }
0x209b   : > { %10414 = vmatpush3.bf16.msra.mxu1 %v13961_v54 }
0x209c   : > { %10415 = vmatprep.subr.bf16.mxu1 %v12048_v29 }
0x209f   : > { %10416 = vmatpush3.bf16.msra.mxu1 %v13968_v18 }
0x20a0   : > { %10417 = vmatprep.subr.bf16.mxu1 %v12048_v29 }
0x20a3   : > { %10418 = vmatpush3.bf16.msra.mxu1 %v14008_v62 }
0x20a4   : > { %10419 = vmatprep.subr.bf16.mxu1 %v12048_v29 }
0x20a7   : > { %10420 = vmatpush3.bf16.msra.mxu1 %v14015_v0 }
0x20a8   : > { %10457 = vmatprep.subr.bf16.mxu1 %v12048_v29 }
0x20aa   : > { %10422 = vmatmul.mubr.bf16.vlgmr.msra.gmra.mrb[144].mxu1 %v7928_v35 }
0x20ab   : > { %10458 = vmatpush3.bf16.msra.mxu1 %v14054_v41  ;;  %10465 = vmatprep.mubr.msk.bf16.mxu1 %vm12049_vm0, %v12048_v29 }
0x20ac   : > { %10459 = vmatprep.subr.bf16.mxu1 %v12048_v29 }
0x20af   : > { %10460 = vmatpush3.bf16.msra.mxu1 %v14060_v14 }
0x20b0   : > { %10461 = vmatprep.subr.bf16.mxu1 %v12048_v29 }
0x20b3   : > { %10462 = vmatpush3.bf16.msra.mxu1 %v14064_v30 }
0x20b4   : > { %10463 = vmatprep.subr.bf16.mxu1 %v12048_v29 }
0x20b7   : > { %10464 = vmatpush3.bf16.msra.mxu1 %v14068_v22 }
0x20b8   : > { %10469 = vmatprep.subr.bf16.mxu1 %v12048_v29 }
0x215d   : > { %v7920_v49 = vpop.f32.mrb[140].mxu1 }
0x215e   : > { %v7921_v27 = vadd.f32 %v14173_v8, %v7920_v49  ;;  %v10403_v53 = vpop.f32.mrb[141].mxu1 }
0x215f   : > { %v7923_v39 = vpop.f32.mrb[142].mxu1 }
0x2160   : > { %7927 = vst [vmem:[#allocation26 + $0x34] sm:$0x3] %v7921_v27  ;;  %v10404_v36 = vpop.f32.mrb[143].mxu1 }
0x217d   : > { %v7963_v40 = vpop.f32.mrb[144].mxu1 }
0x217e   : > { %v7964_v7 = vadd.f32 %v14106_v61, %v7963_v40  ;;  %v10423_v1 = vpop.f32.mrb[145].mxu1 }
0x217f   : > { %v7966_v24 = vpop.f32.mrb[146].mxu1 }
0x2180   : > { %v7969_v20 = vmax.f32 %v7964_v7, 0.0  ;;  %v10424_v5 = vpop.f32.mrb[147].mxu1 }
0x2182   : > { %v7970_v2 = vpack.c.bf16 %v7969_v20, %v7969_v20 }
0x2184   : > { %10434 = vmatmul.mubr.msk.bf16.vlgmr.msra.gmra.mrb[144].mxu0 %vm5595_vm1, %v7970_v2 }
0x2185   : > { %10438 = vmatpush3.bf16.msra.mxu0 %v13898_v28  ;;  %10453 = vmatprep.mubr.msk.bf16.mxu0 %vm12049_vm0, %v12048_v29 }
0x2186   : > { %10439 = vmatprep.subr.bf16.mxu0 %v12048_v29 }
0x2189   : > { %10440 = vmatpush3.bf16.msra.mxu0 %v13940_v46 }
0x218a   : > { %10441 = vmatprep.subr.bf16.mxu0 %v12048_v29 }
0x218d   : > { %10442 = vmatpush3.bf16.msra.mxu0 %v13947_v23 }
0x218e   : > { %10443 = vmatprep.subr.bf16.mxu0 %v12048_v29 }
0x2191   : > { %10444 = vmatpush3.bf16.msra.mxu0 %v13954_v4 }
0x2192   : > { %10445 = vmatprep.subr.bf16.mxu0 %v12048_v29 }
0x2195   : > { %10446 = vmatpush3.bf16.msra.mxu0 %v13961_v54 }
0x2196   : > { %10447 = vmatprep.subr.bf16.mxu0 %v12048_v29 }
0x2199   : > { %10448 = vmatpush3.bf16.msra.mxu0 %v13968_v18 }
0x219a   : > { %10449 = vmatprep.subr.bf16.mxu0 %v12048_v29 }
0x219d   : > { %10450 = vmatpush3.bf16.msra.mxu0 %v14008_v62 }
0x219e   : > { %10451 = vmatprep.subr.bf16.mxu0 %v12048_v29 }
0x21a1   : > { %10452 = vmatpush3.bf16.msra.mxu0 %v14015_v0 }
0x21a2   : > { %10489 = vmatprep.subr.bf16.mxu0 %v12048_v29 }
0x21a4   : > { %10454 = vmatmul.mubr.bf16.vlgmr.msra.gmra.mrb[148].mxu0 %v8016_v3 }
0x21a5   : > { %10490 = vmatpush3.bf16.msra.mxu0 %v14054_v41  ;;  %10497 = vmatprep.mubr.msk.bf16.mxu0 %vm12049_vm0, %v12048_v29 }
0x21a6   : > { %10491 = vmatprep.subr.bf16.mxu0 %v12048_v29 }
0x21a9   : > { %10492 = vmatpush3.bf16.msra.mxu0 %v14060_v14 }
0x21aa   : > { %10493 = vmatprep.subr.bf16.mxu0 %v12048_v29 }
0x21ad   : > { %10494 = vmatpush3.bf16.msra.mxu0 %v14064_v30 }
0x21ae   : > { %10495 = vmatprep.subr.bf16.mxu0 %v12048_v29 }
0x21b1   : > { %10496 = vmatpush3.bf16.msra.mxu0 %v14068_v22 }
0x2257   : > { %v8008_v12 = vpop.f32.mrb[144].mxu0 }
0x2258   : > { %v8009_v9 = vadd.f32 %v14173_v8, %v8008_v12  ;;  %v10435_v17 = vpop.f32.mrb[145].mxu0 }
0x2259   : > { %v8011_v41 = vpop.f32.mrb[146].mxu0 }
0x225a   : > { %8015 = vst [vmem:[#allocation26 + $0x36] sm:$0x3] %v8009_v9  ;;  %v10436_v32 = vpop.f32.mrb[147].mxu0 }
0x2277   : > { %v8051_v25 = vpop.f32.mrb[148].mxu0 }
0x2278   : > { %v8052_v43 = vadd.f32 %v14106_v61, %v8051_v25  ;;  %v10455_v38 = vpop.f32.mrb[149].mxu0 }
0x2279   : > { %v8054_v14 = vpop.f32.mrb[150].mxu0 }
0x227a   : > { %v8057_v55 = vmax.f32 %v8052_v43, 0.0  ;;  %v10456_v31 = vpop.f32.mrb[151].mxu0 }
0x227c   : > { %v8058_v48 = vpack.c.bf16 %v8057_v55, %v8057_v55 }
0x227e   : > { %10466 = vmatmul.mubr.msk.bf16.vlgmr.msra.gmra.mrb[148].mxu1 %vm5595_vm1, %v8058_v48 }
0x227f   : > { %10470 = vmatpush3.bf16.msra.mxu1 %v13898_v28  ;;  %10485 = vmatprep.mubr.msk.bf16.mxu1 %vm12049_vm0, %v12048_v29  ;;  %v8104_v28 = vpack.c.bf16 %v13177_v10, %v13177_v10 }
0x2280   : > { %10471 = vmatprep.subr.bf16.mxu1 %v12048_v29 }
0x2283   : > { %10472 = vmatpush3.bf16.msra.mxu1 %v13940_v46 }
0x2284   : > { %10473 = vmatprep.subr.bf16.mxu1 %v12048_v29 }
0x2287   : > { %10474 = vmatpush3.bf16.msra.mxu1 %v13947_v23 }
0x2288   : > { %10475 = vmatprep.subr.bf16.mxu1 %v12048_v29 }
0x228b   : > { %10476 = vmatpush3.bf16.msra.mxu1 %v13954_v4 }
0x228c   : > { %10477 = vmatprep.subr.bf16.mxu1 %v12048_v29 }
0x228f   : > { %10478 = vmatpush3.bf16.msra.mxu1 %v13961_v54 }
0x2290   : > { %10479 = vmatprep.subr.bf16.mxu1 %v12048_v29 }
0x2293   : > { %10480 = vmatpush3.bf16.msra.mxu1 %v13968_v18 }
0x2294   : > { %10481 = vmatprep.subr.bf16.mxu1 %v12048_v29 }
0x2297   : > { %10482 = vmatpush3.bf16.msra.mxu1 %v14008_v62 }
0x2298   : > { %10483 = vmatprep.subr.bf16.mxu1 %v12048_v29 }
0x229b   : > { %10484 = vmatpush3.bf16.msra.mxu1 %v14015_v0 }
0x229e   : > { %10486 = vmatmul.mubr.bf16.vlgmr.msra.gmra.mrb[152].mxu1 %v8104_v28 }
0x2351   : > { %v8096_v46 = vpop.f32.mrb[148].mxu1 }
0x2352   : > { %v8097_v23 = vadd.f32 %v14173_v8, %v8096_v46  ;;  %v10467_v4 = vpop.f32.mrb[149].mxu1 }
0x2353   : > { %v8099_v54 = vpop.f32.mrb[150].mxu1 }
0x2354   : > { %8103 = vst [vmem:[#allocation26 + $0x38] sm:$0x3] %v8097_v23  ;;  %v10468_v30 = vpop.f32.mrb[151].mxu1 }
0x2371   : > { %v8139_v18 = vpop.f32.mrb[152].mxu1 }
0x2372   : > { %v8140_v22 = vadd.f32 %v14106_v61, %v8139_v18  ;;  %v10487_v21 = vpop.f32.mrb[153].mxu1 }
0x2373   : > { %v8142_v62 = vpop.f32.mrb[154].mxu1 }
0x2374   : > { %v8145_v45 = vmax.f32 %v8140_v22, 0.0  ;;  %v10488_v29 = vpop.f32.mrb[155].mxu1 }
0x2376   : > { %v8146_v19 = vpack.c.bf16 %v8145_v45, %v8145_v45 }
0x2378   : > { %10498 = vmatmul.mubr.msk.bf16.vlgmr.msra.gmra.mrb[152].mxu0 %vm5595_vm1, %v8146_v19 }
0x244b   : > { %v8184_v0 = vpop.f32.mrb[152].mxu0 }
0x244c   : > { %v8185_v10 = vadd.f32 %v14173_v8, %v8184_v0  ;;  %v10499_v60 = vpop.f32.mrb[153].mxu0 }
0x244d   : > { %v8187_v6 = vpop.f32.mrb[154].mxu0 }
0x244e   : > { %8191 = vst [vmem:[#allocation26 + $0x3a] sm:$0x3] %v8185_v10  ;;  %v10500_v26 = vpop.f32.mrb[155].mxu0 }
0x244f PF: > { %p10642_p11 = scmp.eq.s32.totalorder %s12155_s24, 2  ;;  %s12051_s30 = smov [#allocation26]  }
0x2450   : > { %s8198_s16 = sshll.u32 %s12051_s30, 4  ;;  %s8199_s16 = int_to_ptr.vmem [resolvable:$true] %s8198_s16 }
0x2451   : > { %s11928_s20 = scalar_lea.vmem %s8199_s16, 960  ;;  %p11935_p2 = scmp.lt.s32.totalorder %s8199_s16, %s8199_s16 }
0x2452   : > { %p11929_p8 = scmp.ne.s32.totalorder %s8199_s16, %s11928_s20  ;;  %p11936_p1 = scmp.lt.s32.totalorder %s11928_s20, %s11928_s20 }
0x2454   : > { %p11930_p13 = pnand %p11929_p8, %p10642_p11  ;;  %p11937_p10 = por %p11936_p1, %p11935_p2 }
0x2456   : > { %p11931_p7 = pneg %p11930_p13 }
0x2458   : > { %p11938_p12 = pnand %p11937_p10, %p11931_p7 }
0x245a   : > { %11941 = shalt.err (!%p11938_p12)
}
0x245b   : > { %s14366_s27 = sld [smem:[#allocation50_spill]] }
0x2461   : > { %s11942_s7 = scalar_lea.hbm %s14366_s27, 960 }
0x2462   : > { %p11943_p4 = scmp.ne.s32.totalorder %s14366_s27, %s11942_s7  ;;  %p11948_p3 = scmp.lt.u32.totalorder %s11942_s7, %s14366_s27 }
0x2464   : > { %p11944_p0 = pnand %p11943_p4, %p10642_p11 }
0x2466   : > { %p11945_p9 = pneg %p11944_p0 }
0x2468   : > { %p11950_p6 = pnand %p11948_p3, %p11945_p9 }
0x246a   : > { %11953 = shalt.err (!%p11950_p6)
}
0x246b   : > { %s12052_s5 = smov 32   ;;  %s12053_s29 = smov 2  }
0x246c   : > { %10574 = dma.vmem_to_hbm [thread:$0]  (%p10642_p11), %s8199_s16, 960, %s14366_s27, [#allocation5], %s12052_s5, %s12052_s5, %s12053_s29  }
0x246d   : > { %12007 = dma.done.wait (%p10642_p11), [#allocation5], 960  }
0x246e   : > { %12009 = vsyncadd (%p10642_p11), [#allocation5], 4294966336 }
0x246f PF: > { %s14367_s21 = sld [smem:[#allocation39_spill]]  ;;  %s14368_s12 = sld [smem:[#allocation37_spill]] }
0x2470   : > { %s14369_s20 = sld [smem:[#allocation40_spill]]  ;;  %s14370_s18 = smov %s12016_s19 }
0x2475   : > { %p37_p5 = scmp.ge.s32.totalorder %s14367_s21, 5   ;;  %s14371_s19 = smov %s14368_s12 }
0x2477   :  { %39 = sbr.rel (!%p37_p5) target bundleno = 24 (0x18), region = 231 }
0x247e   :  { %8214 = vsyncpa [#allocation4], 1 }
0x247f   :  { %8216 = vsyncpa [#allocation4 + $0x1], 1 }
0x2480   :  { %8217 = vsyncpa [#allocation7], 1 }
0x2481   :  { %8219 = vsyncpa [#allocation7 + $0x1], 1 }
0x2482   :  { %8220 = vsyncpa [#allocation10], 1 }
0x2483   :  { %8222 = vsyncpa [#allocation10 + $0x1], 1 }
0x2484   :  { %8223 = vsyncpa [#allocation13], 1 }
0x2485   :  { %8224 = vsyncpa [#allocation16], 1 }
0x2486   :  { %8225 = vsyncpa [#allocation19], 1 }
0x2487   :  { %8226 = vsyncpa [#allocation22], 1 }
0x2488   :  { %8227 = vsyncpa [#allocation25], 1 }
0x2489   :  { %8228 = vsyncpa [#allocation5], 1 }
0x248a   :  { %8230 = vsyncpa [#allocation5 + $0x1], 1 }

</bundles_post_ra>
